<compile_context>
chip_gen: v7x
topology: tpu7x:2x2x1
jax: 0.10.0
libtpu: 0.0.40
codegen_flags: <defaults>
</compile_context>

<pallas_src>
import functools

import jax
import jax.numpy as jnp
from jax.experimental import pallas as pl
from jax.experimental.pallas import tpu as pltpu


C_PAD = 128  # conv channel padding (lane-dense outputs, pre-padded weights)


def _round_up(x, m):
    return (x + m - 1) // m * m


def _m_tiling(M, max_tm=256):
    """Pick (tm, Mp): tm multiple of 8, Mp multiple of tm, minimal padding."""
    mp8 = _round_up(M, 8)
    if mp8 <= max_tm:
        return mp8, mp8
    # Prefer a multiple-of-8 divisor of M -> no row padding / output slicing.
    for d in range(max_tm, 63, -8):
        if M % d == 0:
            return d, M
    return max_tm, _round_up(M, max_tm)


# ----------------------------------------------------------------------------
# Pallas kernels
# ----------------------------------------------------------------------------
def _matmul_bias_relu_kernel(a_ref, w_ref, b_ref, o_ref):
    # a, w are bf16; accumulate in f32 on the MXU; bias/ReLU in f32.
    acc = jnp.dot(a_ref[...], w_ref[...], preferred_element_type=jnp.float32)
    acc = jnp.maximum(acc + b_ref[...], 0.0)
    o_ref[...] = acc.astype(o_ref.dtype)


def _mlp_head_kernel(a_ref, w4_ref, b4_ref, w5_ref, b5_ref, o_ref, *, n_valid):
    # Fused Linear(3136,512)+ReLU -> Linear(512,out)+Softmax.
    h = jnp.dot(a_ref[...], w4_ref[...], preferred_element_type=jnp.float32)
    h = jnp.maximum(h + b4_ref[...], 0.0)                  # hidden stays in VMEM
    logits = jnp.dot(h.astype(w5_ref.dtype), w5_ref[...],
                     preferred_element_type=jnp.float32) + b5_ref[...]
    col = jax.lax.broadcasted_iota(jnp.int32, logits.shape, 1)
    valid = col < n_valid                                  # mask padded columns
    logits = jnp.where(valid, logits, -jnp.inf)
    m = jnp.max(logits, axis=-1, keepdims=True)
    e = jnp.where(valid, jnp.exp(logits - m), 0.0)
    o_ref[...] = (e / jnp.sum(e, axis=-1, keepdims=True)).astype(o_ref.dtype)


# ----------------------------------------------------------------------------
# Pallas wrappers
# ----------------------------------------------------------------------------
def pallas_matmul_bias_relu(a, w, b, *, out_dtype=jnp.bfloat16):
    """a: [M, K], w: [K, N] bf16 (N % 128 == 0), b: [1, N] f32 -> [M, N]."""
    M, K = a.shape
    Kw, N = w.shape
    assert K == Kw and N % 128 == 0
    a = a.astype(jnp.bfloat16)
    tm, Mp = _m_tiling(M)
    if Mp != M:
        a = jnp.zeros((Mp, K), jnp.bfloat16).at[:M].set(a)
    out = pl.pallas_call(
        _matmul_bias_relu_kernel,
        out_shape=jax.ShapeDtypeStruct((Mp, N), out_dtype),
        grid=(Mp // tm,),
        in_specs=[
            pl.BlockSpec((tm, K), lambda i: (i, 0)),
            pl.BlockSpec((K, N), lambda i: (0, 0)),
            pl.BlockSpec((1, N), lambda i: (0, 0)),
        ],
        out_specs=pl.BlockSpec((tm, N), lambda i: (i, 0)),
        compiler_params=pltpu.CompilerParams(
            dimension_semantics=("parallel",)),
    )(a, w, b)
    return out[:M] if Mp != M else out


def pallas_mlp_head(a, w4, b4, w5, b5, *, n_out):
    """Fused FC head: softmax(relu(a@w4+b4)@w5+b5). Returns [M, n_out] f32."""
    M, K = a.shape
    N1 = w4.shape[1]
    N2 = w5.shape[1]
    a = a.astype(jnp.bfloat16)
    tm, Mp = _m_tiling(M)
    if Mp != M:
        a = jnp.zeros((Mp, K), jnp.bfloat16).at[:M].set(a)
    kernel = functools.partial(_mlp_head_kernel, n_valid=n_out)
    out = pl.pallas_call(
        kernel,
        out_shape=jax.ShapeDtypeStruct((Mp, N2), jnp.float32),
        grid=(Mp // tm,),
        in_specs=[
            pl.BlockSpec((tm, K), lambda i: (i, 0)),
            pl.BlockSpec((K, N1), lambda i: (0, 0)),
            pl.BlockSpec((1, N1), lambda i: (0, 0)),
            pl.BlockSpec((N1, N2), lambda i: (0, 0)),
            pl.BlockSpec((1, N2), lambda i: (0, 0)),
        ],
        out_specs=pl.BlockSpec((tm, N2), lambda i: (i, 0)),
        compiler_params=pltpu.CompilerParams(
            dimension_semantics=("parallel",)),
    )(a, w4, b4, w5, b5)
    return out[:M, :n_out]


# ----------------------------------------------------------------------------
# Glue: im2col (valid conv, no padding) and conv-as-matmul wrapper.
# ----------------------------------------------------------------------------
def _im2col_nhwc(x, kh, kw, stride):
    B, H, W, C = x.shape
    OH = (H - kh) // stride + 1
    OW = (W - kw) // stride + 1
    cols = []
    for i in range(kh):
        for j in range(kw):
            cols.append(x[:, i:i + stride * OH:stride,
                          j:j + stride * OW:stride, :])
    patches = jnp.stack(cols, axis=3)                    # [B, OH, OW, kh*kw, C]
    return patches.reshape(B, OH, OW, kh * kw * C), OH, OW


def conv2d_relu(x_nhwc, w_mat, b_row, kh, kw, stride):
    """x_nhwc bf16 [B,H,W,C]; w_mat bf16 [(kh*kw*C), C_PAD]; b_row f32 [1,C_PAD]."""
    B = x_nhwc.shape[0]
    patches, OH, OW = _im2col_nhwc(x_nhwc, kh, kw, stride)
    a = patches.reshape(B * OH * OW, patches.shape[-1])
    y = pallas_matmul_bias_relu(a, w_mat, b_row, out_dtype=jnp.bfloat16)
    return y.reshape(B, OH, OW, w_mat.shape[1])


# ----------------------------------------------------------------------------
# Parameters (deterministic, PyTorch-default-style uniform init) + one-time prep
# ----------------------------------------------------------------------------
def _uniform(key, shape, fan_in):
    bound = 1.0 / float(fan_in) ** 0.5
    return jax.random.uniform(key, shape, jnp.float32, -bound, bound)


def init_params(key, frames, outputs):
    ks = jax.random.split(key, 10)
    p = {}
    p["w1"] = _uniform(ks[0], (32, frames, 8, 8), frames * 8 * 8)
    p["b1"] = _uniform(ks[1], (32,), frames * 8 * 8)
    p["w2"] = _uniform(ks[2], (64, 32, 4, 4), 32 * 4 * 4)
    p["b2"] = _uniform(ks[3], (64,), 32 * 4 * 4)
    p["w3"] = _uniform(ks[4], (64, 64, 3, 3), 64 * 3 * 3)
    p["b3"] = _uniform(ks[5], (64,), 64 * 3 * 3)
    p["w4"] = _uniform(ks[6], (64 * 7 * 7, 512), 64 * 7 * 7)   # [in, out] = torch weight.T
    p["b4"] = _uniform(ks[7], (512,), 64 * 7 * 7)
    p["w5"] = _uniform(ks[8], (512, outputs), 512)
    p["b5"] = _uniform(ks[9], (outputs,), 512)
    return p


def prepare_params(p):
    """One-time prep: fold /255 into conv1, reorder/pad/cast all weights."""
    frames = p["w1"].shape[1]

    def conv_mat(w_oihw, scale, cin_pad):
        cout, cin, kh, kw = w_oihw.shape
        # PyTorch [Cout,Cin,KH,KW] -> [(KH,KW,Cin_pad), Cout_pad] matching im2col order
        wt = jnp.transpose(w_oihw.astype(jnp.float32) * scale, (2, 3, 1, 0))
        full = jnp.zeros((kh, kw, cin_pad, C_PAD), jnp.float32)
        full = full.at[:, :, :cin, :cout].set(wt)
        return full.reshape(kh * kw * cin_pad, C_PAD).astype(jnp.bfloat16)

    def bias_row(b, n_pad):
        return jnp.zeros((1, n_pad), jnp.float32).at[0, :b.shape[0]].set(
            b.astype(jnp.float32))

    out_pad = _round_up(p["w5"].shape[1], 128)
    pp = {
        "w1m": conv_mat(p["w1"], 1.0 / 255.0, frames),   # x/255 folded into weights
        "b1r": bias_row(p["b1"], C_PAD),
        "w2m": conv_mat(p["w2"], 1.0, C_PAD),            # accepts padded 128-ch input
        "b2r": bias_row(p["b2"], C_PAD),
        "w3m": conv_mat(p["w3"], 1.0, C_PAD),
        "b3r": bias_row(p["b3"], C_PAD),
        "w4m": p["w4"].astype(jnp.bfloat16),             # (3136, 512)
        "b4r": p["b4"].reshape(1, -1).astype(jnp.float32),
        "w5m": jnp.zeros((p["w5"].shape[0], out_pad), jnp.bfloat16)
                  .at[:, :p["w5"].shape[1]].set(p["w5"].astype(jnp.bfloat16)),
        "b5r": bias_row(p["b5"], out_pad),
    }
    return jax.tree_util.tree_map(jax.block_until_ready, pp)


# ----------------------------------------------------------------------------
# Forward pass: Conv(8,4) ReLU -> Conv(4,2) ReLU -> Conv(3,1) ReLU
#               -> Flatten -> Linear(3136,512) ReLU -> Linear(512,out) Softmax
# ----------------------------------------------------------------------------
def cnn_forward(pp, x_nchw, *, n_out):
    # uint8 pixels are exactly representable in bf16; /255 lives in the weights.
    x = jnp.transpose(x_nchw, (0, 2, 3, 1)).astype(jnp.bfloat16)   # NCHW -> NHWC
    h = conv2d_relu(x, pp["w1m"], pp["b1r"], 8, 8, 4)   # [B,20,20,128] (32 real ch)
    h = conv2d_relu(h, pp["w2m"], pp["b2r"], 4, 4, 2)   # [B, 9, 9,128] (64 real ch)
    h = conv2d_relu(h, pp["w3m"], pp["b3r"], 3, 3, 1)   # [B, 7, 7,128] (64 real ch)
    B = h.shape[0]
    # PyTorch Flatten on NCHW => (C, H, W) order; drop padded channels first.
    h = jnp.transpose(h[..., :64], (0, 3, 1, 2)).reshape(B, -1)    # [B, 3136]
    return pallas_mlp_head(h, pp["w4m"], pp["b4r"], pp["w5m"], pp["b5r"],
                           n_out=n_out)


if __name__ == "__main__":
    key = jax.random.PRNGKey(0)
    kp, kx = jax.random.split(key)

    batch, frames, outputs = 2, 4, 6      # spatial 84x84 is fixed by the module
    params = init_params(kp, frames, outputs)
    prepped = prepare_params(params)      # one-time weight prep (not in forward)

    x = jax.random.randint(kx, (batch, frames, 84, 84), 0, 256,
                           dtype=jnp.int32).astype(jnp.uint8)

    fwd = jax.jit(functools.partial(cnn_forward, n_out=outputs))
    y = jax.block_until_ready(fwd(prepped, x))

    assert y.shape == (batch, outputs), y.shape
    assert y.dtype == jnp.float32
    assert bool(jnp.all(jnp.isfinite(y)))
    assert bool(jnp.allclose(jnp.sum(y, axis=1), 1.0, atol=1e-5))
    print("KERNEL_OK")
</pallas_src>

<mosaic_0001>
module attributes {stable_mosaic.version = 11 : i64} {
  func.func @_matmul_bias_relu_kernel(%arg0: i32, %arg1: memref<200x256xbf16, #tpu.memory_space<vmem>>, %arg2: memref<256x128xbf16, #tpu.memory_space<vmem>>, %arg3: memref<1x128xf32, #tpu.memory_space<vmem>>, %arg4: memref<200x128xbf16, #tpu.memory_space<vmem>>) attributes {dimension_semantics = [#tpu.dimension_semantics<parallel>], iteration_bounds = array<i64: 4>, scalar_prefetch = 0 : i64, scratch_operands = 0 : i64, tpu.core_type = #tpu.core_type<tc>, window_params = [{transform_indices = @transform_0, window_bounds = array<i64: 200, 256>}, {pipeline_mode = #tpu.pipeline_mode<synchronous>, transform_indices = @transform_1, window_bounds = array<i64: 256, 128>}, {pipeline_mode = #tpu.pipeline_mode<synchronous>, transform_indices = @transform_2, window_bounds = array<i64: 1, 128>}, {transform_indices = @transform_3, window_bounds = array<i64: 200, 128>}]} {
    %c0 = arith.constant 0 : index
    %c0_0 = arith.constant 0 : index
    %0 = vector.load %arg1[%c0, %c0_0] : memref<200x256xbf16, #tpu.memory_space<vmem>>, vector<200x256xbf16>
    %c0_1 = arith.constant 0 : index
    %c0_2 = arith.constant 0 : index
    %1 = vector.load %arg2[%c0_1, %c0_2] : memref<256x128xbf16, #tpu.memory_space<vmem>>, vector<256x128xbf16>
    %cst = arith.constant dense<0.000000e+00> : vector<200x128xf32>
    %2 = tpu.matmul %0, %1, %cst {dimension_numbers = #tpu.dot_dimension_numbers<[1], [0], [0], [1], [0, 0, 1, 1], [], []>} : vector<200x256xbf16>, vector<256x128xbf16>, vector<200x128xf32> -> vector<200x128xf32>
    %c0_3 = arith.constant 0 : index
    %c0_4 = arith.constant 0 : index
    %3 = vector.load %arg3[%c0_3, %c0_4] : memref<1x128xf32, #tpu.memory_space<vmem>>, vector<1x128xf32>
    %4 = vector.broadcast %3 : vector<1x128xf32> to vector<200x128xf32>
    %5 = arith.addf %2, %4 : vector<200x128xf32>
    %cst_5 = arith.constant 0.000000e+00 : f32
    %6 = vector.broadcast %cst_5 : f32 to vector<200x128xf32>
    %7 = arith.maximumf %5, %6 : vector<200x128xf32>
    %8 = arith.truncf %7 : vector<200x128xf32> to vector<200x128xbf16>
    %c0_6 = arith.constant 0 : index
    %c0_7 = arith.constant 0 : index
    %9 = vector.load %arg4[%c0_6, %c0_7] : memref<200x128xbf16, #tpu.memory_space<vmem>>, vector<200x128xbf16>
    tpu.vector_store %arg4[%c0_6, %c0_7], %8 {strides = array<i32>} : memref<200x128xbf16, #tpu.memory_space<vmem>>, vector<200x128xbf16>,
    return
  }
  func.func @transform_0(%arg0: i32) -> (i32, i32) {
    %c0_i32 = arith.constant 0 : i32
    %c0_i32_0 = arith.constant 0 : i32
    return %arg0, %c0_i32 : i32, i32
  }
  func.func @transform_1(%arg0: i32) -> (i32, i32) {
    %c0_i32 = arith.constant 0 : i32
    %c0_i32_0 = arith.constant 0 : i32
    %c0_i32_1 = arith.constant 0 : i32
    return %c0_i32, %c0_i32_0 : i32, i32
  }
  func.func @transform_2(%arg0: i32) -> (i32, i32) {
    %c0_i32 = arith.constant 0 : i32
    %c0_i32_0 = arith.constant 0 : i32
    %c0_i32_1 = arith.constant 0 : i32
    return %c0_i32, %c0_i32_0 : i32, i32
  }
  func.func @transform_3(%arg0: i32) -> (i32, i32) {
    %c0_i32 = arith.constant 0 : i32
    %c0_i32_0 = arith.constant 0 : i32
    return %arg0, %c0_i32 : i32, i32
  }
}

module attributes {stable_mosaic.version = 11 : i64} {
  func.func @_matmul_bias_relu_kernel(%arg0: i32, %arg1: memref<168x2048xbf16, #tpu.memory_space<vmem>>, %arg2: memref<2048x128xbf16, #tpu.memory_space<vmem>>, %arg3: memref<1x128xf32, #tpu.memory_space<vmem>>, %arg4: memref<168x128xbf16, #tpu.memory_space<vmem>>) attributes {dimension_semantics = [#tpu.dimension_semantics<parallel>], iteration_bounds = array<i64: 1>, scalar_prefetch = 0 : i64, scratch_operands = 0 : i64, tpu.core_type = #tpu.core_type<tc>, window_params = [{transform_indices = @transform_0, window_bounds = array<i64: 168, 2048>}, {pipeline_mode = #tpu.pipeline_mode<synchronous>, transform_indices = @transform_1, window_bounds = array<i64: 2048, 128>}, {pipeline_mode = #tpu.pipeline_mode<synchronous>, transform_indices = @transform_2, window_bounds = array<i64: 1, 128>}, {transform_indices = @transform_3, window_bounds = array<i64: 168, 128>}]} {
    %c0 = arith.constant 0 : index
    %c0_0 = arith.constant 0 : index
    %0 = vector.load %arg1[%c0, %c0_0] : memref<168x2048xbf16, #tpu.memory_space<vmem>>, vector<168x2048xbf16>
    %c0_1 = arith.constant 0 : index
    %c0_2 = arith.constant 0 : index
    %1 = vector.load %arg2[%c0_1, %c0_2] : memref<2048x128xbf16, #tpu.memory_space<vmem>>, vector<2048x128xbf16>
    %cst = arith.constant dense<0.000000e+00> : vector<168x128xf32>
    %2 = tpu.matmul %0, %1, %cst {dimension_numbers = #tpu.dot_dimension_numbers<[1], [0], [0], [1], [0, 0, 1, 1], [], []>} : vector<168x2048xbf16>, vector<2048x128xbf16>, vector<168x128xf32> -> vector<168x128xf32>
    %c0_3 = arith.constant 0 : index
    %c0_4 = arith.constant 0 : index
    %3 = vector.load %arg3[%c0_3, %c0_4] : memref<1x128xf32, #tpu.memory_space<vmem>>, vector<1x128xf32>
    %4 = vector.broadcast %3 : vector<1x128xf32> to vector<168x128xf32>
    %5 = arith.addf %2, %4 : vector<168x128xf32>
    %cst_5 = arith.constant 0.000000e+00 : f32
    %6 = vector.broadcast %cst_5 : f32 to vector<168x128xf32>
    %7 = arith.maximumf %5, %6 : vector<168x128xf32>
    %8 = arith.truncf %7 : vector<168x128xf32> to vector<168x128xbf16>
    %c0_6 = arith.constant 0 : index
    %c0_7 = arith.constant 0 : index
    %9 = vector.load %arg4[%c0_6, %c0_7] : memref<168x128xbf16, #tpu.memory_space<vmem>>, vector<168x128xbf16>
    tpu.vector_store %arg4[%c0_6, %c0_7], %8 {strides = array<i32>} : memref<168x128xbf16, #tpu.memory_space<vmem>>, vector<168x128xbf16>,
    return
  }
  func.func @transform_0(%arg0: i32) -> (i32, i32) {
    %c0_i32 = arith.constant 0 : i32
    %c0_i32_0 = arith.constant 0 : i32
    return %arg0, %c0_i32 : i32, i32
  }
  func.func @transform_1(%arg0: i32) -> (i32, i32) {
    %c0_i32 = arith.constant 0 : i32
    %c0_i32_0 = arith.constant 0 : i32
    %c0_i32_1 = arith.constant 0 : i32
    return %c0_i32, %c0_i32_0 : i32, i32
  }
  func.func @transform_2(%arg0: i32) -> (i32, i32) {
    %c0_i32 = arith.constant 0 : i32
    %c0_i32_0 = arith.constant 0 : i32
    %c0_i32_1 = arith.constant 0 : i32
    return %c0_i32, %c0_i32_0 : i32, i32
  }
  func.func @transform_3(%arg0: i32) -> (i32, i32) {
    %c0_i32 = arith.constant 0 : i32
    %c0_i32_0 = arith.constant 0 : i32
    return %arg0, %c0_i32 : i32, i32
  }
}

module attributes {stable_mosaic.version = 11 : i64} {
  func.func @_matmul_bias_relu_kernel(%arg0: i32, %arg1: memref<104x1152xbf16, #tpu.memory_space<vmem>>, %arg2: memref<1152x128xbf16, #tpu.memory_space<vmem>>, %arg3: memref<1x128xf32, #tpu.memory_space<vmem>>, %arg4: memref<104x128xbf16, #tpu.memory_space<vmem>>) attributes {dimension_semantics = [#tpu.dimension_semantics<parallel>], iteration_bounds = array<i64: 1>, scalar_prefetch = 0 : i64, scratch_operands = 0 : i64, tpu.core_type = #tpu.core_type<tc>, window_params = [{transform_indices = @transform_0, window_bounds = array<i64: 104, 1152>}, {pipeline_mode = #tpu.pipeline_mode<synchronous>, transform_indices = @transform_1, window_bounds = array<i64: 1152, 128>}, {pipeline_mode = #tpu.pipeline_mode<synchronous>, transform_indices = @transform_2, window_bounds = array<i64: 1, 128>}, {transform_indices = @transform_3, window_bounds = array<i64: 104, 128>}]} {
    %c0 = arith.constant 0 : index
    %c0_0 = arith.constant 0 : index
    %0 = vector.load %arg1[%c0, %c0_0] : memref<104x1152xbf16, #tpu.memory_space<vmem>>, vector<104x1152xbf16>
    %c0_1 = arith.constant 0 : index
    %c0_2 = arith.constant 0 : index
    %1 = vector.load %arg2[%c0_1, %c0_2] : memref<1152x128xbf16, #tpu.memory_space<vmem>>, vector<1152x128xbf16>
    %cst = arith.constant dense<0.000000e+00> : vector<104x128xf32>
    %2 = tpu.matmul %0, %1, %cst {dimension_numbers = #tpu.dot_dimension_numbers<[1], [0], [0], [1], [0, 0, 1, 1], [], []>} : vector<104x1152xbf16>, vector<1152x128xbf16>, vector<104x128xf32> -> vector<104x128xf32>
    %c0_3 = arith.constant 0 : index
    %c0_4 = arith.constant 0 : index
    %3 = vector.load %arg3[%c0_3, %c0_4] : memref<1x128xf32, #tpu.memory_space<vmem>>, vector<1x128xf32>
    %4 = vector.broadcast %3 : vector<1x128xf32> to vector<104x128xf32>
    %5 = arith.addf %2, %4 : vector<104x128xf32>
    %cst_5 = arith.constant 0.000000e+00 : f32
    %6 = vector.broadcast %cst_5 : f32 to vector<104x128xf32>
    %7 = arith.maximumf %5, %6 : vector<104x128xf32>
    %8 = arith.truncf %7 : vector<104x128xf32> to vector<104x128xbf16>
    %c0_6 = arith.constant 0 : index
    %c0_7 = arith.constant 0 : index
    %9 = vector.load %arg4[%c0_6, %c0_7] : memref<104x128xbf16, #tpu.memory_space<vmem>>, vector<104x128xbf16>
    tpu.vector_store %arg4[%c0_6, %c0_7], %8 {strides = array<i32>} : memref<104x128xbf16, #tpu.memory_space<vmem>>, vector<104x128xbf16>,
    return
  }
  func.func @transform_0(%arg0: i32) -> (i32, i32) {
    %c0_i32 = arith.constant 0 : i32
    %c0_i32_0 = arith.constant 0 : i32
    return %arg0, %c0_i32 : i32, i32
  }
  func.func @transform_1(%arg0: i32) -> (i32, i32) {
    %c0_i32 = arith.constant 0 : i32
    %c0_i32_0 = arith.constant 0 : i32
    %c0_i32_1 = arith.constant 0 : i32
    return %c0_i32, %c0_i32_0 : i32, i32
  }
  func.func @transform_2(%arg0: i32) -> (i32, i32) {
    %c0_i32 = arith.constant 0 : i32
    %c0_i32_0 = arith.constant 0 : i32
    %c0_i32_1 = arith.constant 0 : i32
    return %c0_i32, %c0_i32_0 : i32, i32
  }
  func.func @transform_3(%arg0: i32) -> (i32, i32) {
    %c0_i32 = arith.constant 0 : i32
    %c0_i32_0 = arith.constant 0 : i32
    return %arg0, %c0_i32 : i32, i32
  }
}

module attributes {stable_mosaic.version = 11 : i64} {
  func.func @_mlp_head_kernel(%arg0: i32, %arg1: memref<8x3136xbf16, #tpu.memory_space<vmem>>, %arg2: memref<3136x512xbf16, #tpu.memory_space<vmem>>, %arg3: memref<1x512xf32, #tpu.memory_space<vmem>>, %arg4: memref<512x128xbf16, #tpu.memory_space<vmem>>, %arg5: memref<1x128xf32, #tpu.memory_space<vmem>>, %arg6: memref<8x128xf32, #tpu.memory_space<vmem>>) attributes {dimension_semantics = [#tpu.dimension_semantics<parallel>], iteration_bounds = array<i64: 1>, scalar_prefetch = 0 : i64, scratch_operands = 0 : i64, tpu.core_type = #tpu.core_type<tc>, window_params = [{transform_indices = @transform_0, window_bounds = array<i64: 8, 3136>}, {pipeline_mode = #tpu.pipeline_mode<synchronous>, transform_indices = @transform_1, window_bounds = array<i64: 3136, 512>}, {pipeline_mode = #tpu.pipeline_mode<synchronous>, transform_indices = @transform_2, window_bounds = array<i64: 1, 512>}, {pipeline_mode = #tpu.pipeline_mode<synchronous>, transform_indices = @transform_3, window_bounds = array<i64: 512, 128>}, {pipeline_mode = #tpu.pipeline_mode<synchronous>, transform_indices = @transform_4, window_bounds = array<i64: 1, 128>}, {transform_indices = @transform_5, window_bounds = array<i64: 8, 128>}]} {
    %c0 = arith.constant 0 : index
    %c0_0 = arith.constant 0 : index
    %0 = vector.load %arg1[%c0, %c0_0] : memref<8x3136xbf16, #tpu.memory_space<vmem>>, vector<8x3136xbf16>
    %c0_1 = arith.constant 0 : index
    %c0_2 = arith.constant 0 : index
    %1 = vector.load %arg2[%c0_1, %c0_2] : memref<3136x512xbf16, #tpu.memory_space<vmem>>, vector<3136x512xbf16>
    %cst = arith.constant dense<0.000000e+00> : vector<8x512xf32>
    %2 = tpu.matmul %0, %1, %cst {dimension_numbers = #tpu.dot_dimension_numbers<[1], [0], [0], [1], [0, 0, 1, 1], [], []>} : vector<8x3136xbf16>, vector<3136x512xbf16>, vector<8x512xf32> -> vector<8x512xf32>
    %c0_3 = arith.constant 0 : index
    %c0_4 = arith.constant 0 : index
    %3 = vector.load %arg3[%c0_3, %c0_4] : memref<1x512xf32, #tpu.memory_space<vmem>>, vector<1x512xf32>
    %4 = vector.broadcast %3 : vector<1x512xf32> to vector<8x512xf32>
    %5 = arith.addf %2, %4 : vector<8x512xf32>
    %cst_5 = arith.constant 0.000000e+00 : f32
    %6 = vector.broadcast %cst_5 : f32 to vector<8x512xf32>
    %7 = arith.maximumf %5, %6 : vector<8x512xf32>
    %8 = arith.truncf %7 : vector<8x512xf32> to vector<8x512xbf16>
    %c0_6 = arith.constant 0 : index
    %c0_7 = arith.constant 0 : index
    %9 = vector.load %arg4[%c0_6, %c0_7] : memref<512x128xbf16, #tpu.memory_space<vmem>>, vector<512x128xbf16>
    %cst_8 = arith.constant dense<0.000000e+00> : vector<8x128xf32>
    %10 = tpu.matmul %8, %9, %cst_8 {dimension_numbers = #tpu.dot_dimension_numbers<[1], [0], [0], [1], [0, 0, 1, 1], [], []>} : vector<8x512xbf16>, vector<512x128xbf16>, vector<8x128xf32> -> vector<8x128xf32>
    %c0_9 = arith.constant 0 : index
    %c0_10 = arith.constant 0 : index
    %11 = vector.load %arg5[%c0_9, %c0_10] : memref<1x128xf32, #tpu.memory_space<vmem>>, vector<1x128xf32>
    %12 = vector.broadcast %11 : vector<1x128xf32> to vector<8x128xf32>
    %13 = arith.addf %10, %12 : vector<8x128xf32>
    %14 = tpu.iota {dimensions = array<i32: 1>} : vector<8x128xi32>
    %c6_i32 = arith.constant 6 : i32
    %15 = vector.broadcast %c6_i32 : i32 to vector<8x128xi32>
    %16 = arith.cmpi slt, %14, %15 : vector<8x128xi32>
    %cst_11 = arith.constant 0xFF800000 : f32
    %17 = vector.broadcast %cst_11 : f32 to vector<8x128xf32>
    %18 = arith.select %16, %13, %17 : vector<8x128xi1>, vector<8x128xf32>
    %cst_12 = arith.constant dense<0xFF800000> : vector<8xf32>
    %19 = vector.multi_reduction <maximumf>, %18, %cst_12 [1] : vector<8x128xf32> to vector<8xf32>
    %20 = vector.shape_cast %19 : vector<8xf32> to vector<8x1xf32>
    %21 = vector.broadcast %20 : vector<8x1xf32> to vector<8x128xf32>
    %22 = arith.subf %18, %21 : vector<8x128xf32>
    %23 = math.exp %22 : vector<8x128xf32>
    %cst_13 = arith.constant 0.000000e+00 : f32
    %24 = vector.broadcast %cst_13 : f32 to vector<8x128xf32>
    %25 = arith.select %16, %23, %24 : vector<8x128xi1>, vector<8x128xf32>
    %cst_14 = arith.constant dense<0.000000e+00> : vector<8xf32>
    %26 = vector.multi_reduction <add>, %25, %cst_14 [1] : vector<8x128xf32> to vector<8xf32>
    %27 = vector.shape_cast %26 : vector<8xf32> to vector<8x1xf32>
    %28 = vector.broadcast %27 : vector<8x1xf32> to vector<8x128xf32>
    %29 = arith.divf %25, %28 : vector<8x128xf32>
    %c0_15 = arith.constant 0 : index
    %c0_16 = arith.constant 0 : index
    %30 = vector.load %arg6[%c0_15, %c0_16] : memref<8x128xf32, #tpu.memory_space<vmem>>, vector<8x128xf32>
    tpu.vector_store %arg6[%c0_15, %c0_16], %29 {strides = array<i32>} : memref<8x128xf32, #tpu.memory_space<vmem>>, vector<8x128xf32>,
    return
  }
  func.func @transform_0(%arg0: i32) -> (i32, i32) {
    %c0_i32 = arith.constant 0 : i32
    %c0_i32_0 = arith.constant 0 : i32
    return %arg0, %c0_i32 : i32, i32
  }
  func.func @transform_1(%arg0: i32) -> (i32, i32) {
    %c0_i32 = arith.constant 0 : i32
    %c0_i32_0 = arith.constant 0 : i32
    %c0_i32_1 = arith.constant 0 : i32
    return %c0_i32, %c0_i32_0 : i32, i32
  }
  func.func @transform_2(%arg0: i32) -> (i32, i32) {
    %c0_i32 = arith.constant 0 : i32
    %c0_i32_0 = arith.constant 0 : i32
    %c0_i32_1 = arith.constant 0 : i32
    return %c0_i32, %c0_i32_0 : i32, i32
  }
  func.func @transform_3(%arg0: i32) -> (i32, i32) {
    %c0_i32 = arith.constant 0 : i32
    %c0_i32_0 = arith.constant 0 : i32
    %c0_i32_1 = arith.constant 0 : i32
    return %c0_i32, %c0_i32_0 : i32, i32
  }
  func.func @transform_4(%arg0: i32) -> (i32, i32) {
    %c0_i32 = arith.constant 0 : i32
    %c0_i32_0 = arith.constant 0 : i32
    %c0_i32_1 = arith.constant 0 : i32
    return %c0_i32, %c0_i32_0 : i32, i32
  }
  func.func @transform_5(%arg0: i32) -> (i32, i32) {
    %c0_i32 = arith.constant 0 : i32
    %c0_i32_0 = arith.constant 0 : i32
    return %arg0, %c0_i32 : i32, i32
  }
}

</mosaic_0001>

<bundles_post_ra>
// kernel: cnn_forward.4
= control target key start
LH: loop header
LB: loop body
LE: loop exit
PB: predicated region body
PF: predicated region fallthrough
CT: control target
= control target key end

     0   :  { %s1183_s12 = smov 0   ;;  %s1324_s0 = inlined_call_operand.vmem [shape: bf16[800,256], index: 0, kind: input, shape index: {}]   ;;  %s1325_s1 = inlined_call_operand.vmem [shape: bf16[256,128], index: 1, kind: input, shape index: {}]   ;;  %s1326_s2 = inlined_call_operand.vmem [shape: f32[1,128], index: 2, kind: input, shape index: {}]   ;;  %s1327_s3 = inlined_call_operand.vmem [shape: bf16[800,128], index: 3, kind: output, shape index: {}]  }
   0x1 LB: > { %s808_s13 = sadd.s32 4294967295, %s1161_s12   ;;  %p812_p0 = scmp.ge.s32.totalorder %s1161_s12, 1  ;;  %s1161_s12 = sphi %s1183_s12, %s13_s12  }
   0x2   : > { %p139_p1 = scmp.lt.s32.totalorder %s1161_s12, 5 }
   0x4   : > { %p140_p2 = pnand %p812_p0, %p139_p1 }
   0x5   : > { %v1101_v0 = vld [vmem:[%s1325_s1 + $0x40] sm:$0xff] (!%p140_p2)   ;;  %s164_s16 = smul.u32 (!%p140_p2), 25, %s808_s13  ;;  %v1103_v2 = vld [vmem:[%s1325_s1 + $0x48] sm:$0xff] (!%p140_p2)   ;;  %v1105_v4 = vld [vmem:[%s1325_s1 + $0x50] sm:$0xff] (!%p140_p2)  }
   0x6   : > { %143 = sbr.rel (%p140_p2) target bundleno = 310 (0x136), region = 32  ;;  %v1102_v1 = vld [vmem:[%s1325_s1] sm:$0xff] (!%p140_p2)   ;;  %983 = vmatprep.subr.bf16.mxu0 (!%p140_p2), %v1101_v0  ;;  %1077 = vmatprep.subr.bf16.mxu1 (!%p140_p2), %v1101_v0  ;;  %v1104_v3 = vld [vmem:[%s1325_s1 + $0x8] sm:$0xff] (!%p140_p2)   ;;  %v1106_v5 = vld [vmem:[%s1325_s1 + $0x10] sm:$0xff] (!%p140_p2)  }
   0x7   : > { %984 = vmatpush3.bf16.msra.mxu0 (!%p140_p2), %v1102_v1  ;;  %1085 = vmatpush3.bf16.msra.mxu1 (!%p140_p2), %v1102_v1  ;;  %p165_p3 = scmp.lt.s32.totalorder (!%p140_p2), %s164_s16, 99  ;;  %v1107_v6 = vld [vmem:[%s1325_s1 + $0x58] sm:$0xff] (!%p140_p2)   ;;  %v1109_v8 = vld [vmem:[%s1325_s1 + $0x60] sm:$0xff] (!%p140_p2)   ;;  %v1111_v10 = vld [vmem:[%s1325_s1 + $0x68] sm:$0xff] (!%p140_p2)  }
   0x8   : > { %985 = vmatprep.subr.bf16.mxu0 (!%p140_p2), %v1103_v2  ;;  %1078 = vmatprep.subr.bf16.mxu1 (!%p140_p2), %v1103_v2  ;;  %v1108_v7 = vld [vmem:[%s1325_s1 + $0x18] sm:$0xff] (!%p140_p2)   ;;  %v1110_v9 = vld [vmem:[%s1325_s1 + $0x20] sm:$0xff] (!%p140_p2)   ;;  %v1112_v13 = vld [vmem:[%s1325_s1 + $0x28] sm:$0xff] (!%p140_p2)  }
   0x9   : > { %v1113_v14 = vld [vmem:[%s1325_s1 + $0x70] sm:$0xff] (!%p140_p2)   ;;  %v1115_v16 = vld [vmem:[%s1325_s1 + $0x78] sm:$0xff] (!%p140_p2)   ;;  %v1275_v45 = vld [vmem:[%s1326_s2] ss:$0 sm:$0xff] (!%p140_p2) }
   0xa   : > { %v1114_v15 = vld [vmem:[%s1325_s1 + $0x30] sm:$0xff] (!%p140_p2)   ;;  %v1116_v17 = vld [vmem:[%s1325_s1 + $0x38] sm:$0xff] (!%p140_p2)  }
   0xb   : > { %986 = vmatpush3.bf16.msra.mxu0 (!%p140_p2), %v1104_v3  ;;  %1086 = vmatpush3.bf16.msra.mxu1 (!%p140_p2), %v1104_v3 }
   0xc   : > { %987 = vmatprep.subr.bf16.mxu0 (!%p140_p2), %v1105_v4  ;;  %1079 = vmatprep.subr.bf16.mxu1 (!%p140_p2), %v1105_v4 }
   0xd   : > { %s1329_s16 = smov (!%p165_p3, %s164_s16), 99 }
   0xe   : > { %s886_s4 = sshll.u32 %s1329_s16, 3  ;;  %s815_s28 = sshll.u32 %s1329_s16, 2 }
   0xf   : > { %988 = vmatpush3.bf16.msra.mxu0 %v1106_v5  ;;  %1087 = vmatpush3.bf16.msra.mxu1 %v1106_v5  ;;  %s1224_s9 = scalar_lea.vmem %s1324_s0, %s886_s4  ;;  %s1285_s4 = scalar_lea.vmem %s1327_s3, %s815_s28 }
  0x10   : > { %989 = vmatprep.subr.bf16.mxu0 %v1107_v6  ;;  %1080 = vmatprep.subr.bf16.mxu1 %v1107_v6  ;;  %v1119_v11 = vld [vmem:[%s1224_s9 + $0x4] ss:$8 sps:$4 sm:$0xff]   ;;  %v1122_v12 = vld [vmem:[%s1224_s9 + $0x74] ss:$8 sps:$4 sm:$0xff]   ;;  %v1117_v18 = vld [vmem:[%s1224_s9] ss:$8 sps:$4 sm:$0xff]  }
  0x11   : > { %497 = vmatprep.mubr.bf16.mxu0 %v1119_v11  ;;  %553 = vmatprep.mubr.bf16.mxu1 %v1122_v12  ;;  %v1120_v19 = vld [vmem:[%s1224_s9 + $0x70] ss:$8 sps:$4 sm:$0xff]   ;;  %v1123_v20 = vld [vmem:[%s1224_s9 + $0x14] ss:$8 sps:$4 sm:$0xff]   ;;  %v1126_v21 = vld [vmem:[%s1224_s9 + $0x84] ss:$8 sps:$4 sm:$0xff]  }
  0x12   : > { %v1125_v22 = vld [vmem:[%s1224_s9 + $0x10] ss:$8 sps:$4 sm:$0xff]   ;;  %v1130_v23 = vld [vmem:[%s1224_s9 + $0x80] ss:$8 sps:$4 sm:$0xff]   ;;  %v1128_v24 = vld [vmem:[%s1224_s9 + $0x24] ss:$8 sps:$4 sm:$0xff]  }
  0x13   : > { %990 = vmatpush3.bf16.msra.mxu0 %v1108_v7  ;;  %1088 = vmatpush3.bf16.msra.mxu1 %v1108_v7  ;;  %v1132_v25 = vld [vmem:[%s1224_s9 + $0x94] ss:$8 sps:$4 sm:$0xff]   ;;  %v1131_v26 = vld [vmem:[%s1224_s9 + $0x20] ss:$8 sps:$4 sm:$0xff]   ;;  %v1136_v27 = vld [vmem:[%s1224_s9 + $0x90] ss:$8 sps:$4 sm:$0xff]  }
  0x14   : > { %991 = vmatprep.subr.bf16.mxu0 %v1109_v8  ;;  %1081 = vmatprep.subr.bf16.mxu1 %v1109_v8  ;;  %v1134_v28 = vld [vmem:[%s1224_s9 + $0x34] ss:$8 sps:$4 sm:$0xff]   ;;  %v1138_v29 = vld [vmem:[%s1224_s9 + $0xa4] ss:$8 sps:$4 sm:$0xff]   ;;  %v1137_v30 = vld [vmem:[%s1224_s9 + $0x30] ss:$8 sps:$4 sm:$0xff]  }
  0x15   : > { %v1142_v31 = vld [vmem:[%s1224_s9 + $0xa0] ss:$8 sps:$4 sm:$0xff]   ;;  %v1140_v32 = vld [vmem:[%s1224_s9 + $0x44] ss:$8 sps:$4 sm:$0xff]   ;;  %v1144_v33 = vld [vmem:[%s1224_s9 + $0xb4] ss:$8 sps:$4 sm:$0xff]  }
  0x16   : > { %v202_v34 = vld [vmem:[%s1224_s9 + $0xc0] sm:$0xff]  ;;  %v1148_v36 = vld [vmem:[%s1224_s9 + $0xb0] ss:$8 sps:$4 sm:$0xff]   ;;  %v1146_v37 = vld [vmem:[%s1224_s9 + $0x54] ss:$8 sps:$4 sm:$0xff]  }
  0x17   : > { %992 = vmatpush3.bf16.msra.mxu0 %v1110_v9  ;;  %1089 = vmatpush3.bf16.msra.mxu1 %v1110_v9  ;;  %v1143_v35 = vld [vmem:[%s1224_s9 + $0x40] ss:$8 sps:$4 sm:$0xff]   ;;  %v842_v38 = vcombine.high %v202_v34, %v202_v34  ;;  %v1149_v39 = vld [vmem:[%s1224_s9 + $0x50] ss:$8 sps:$4 sm:$0xff]   ;;  %v841_v40 = vcombine.low %v202_v34, %v202_v34  ;;  %v1151_v41 = vld [vmem:[%s1224_s9 + $0x64] ss:$8 sps:$4 sm:$0xff]  }
  0x18   : > { %993 = vmatprep.subr.bf16.mxu0 %v1111_v10  ;;  %1082 = vmatprep.subr.bf16.mxu1 %v1111_v10  ;;  %v1154_v42 = vld [vmem:[%s1224_s9 + $0x60] ss:$8 sps:$4 sm:$0xff]  }
  0x1b   : > { %994 = vmatpush3.bf16.msra.mxu0 %v1112_v13  ;;  %1090 = vmatpush3.bf16.msra.mxu1 %v1112_v13 }
  0x1c   : > { %995 = vmatprep.subr.bf16.mxu0 %v1113_v14  ;;  %1083 = vmatprep.subr.bf16.mxu1 %v1113_v14 }
  0x1f   : > { %996 = vmatpush3.bf16.msra.mxu0 %v1114_v15  ;;  %1091 = vmatpush3.bf16.msra.mxu1 %v1114_v15 }
  0x20   : > { %997 = vmatprep.subr.bf16.mxu0 %v1115_v16  ;;  %1084 = vmatprep.subr.bf16.mxu1 %v1115_v16 }
  0x23   : > { %998 = vmatpush3.bf16.msra.mxu0 %v1116_v17  ;;  %1092 = vmatpush3.bf16.msra.mxu1 %v1116_v17 }
  0x26   : > { %498 = vmatmul.mubr.bf16.vlgmr.msra.gmra.mrb[0].mxu0 %v1117_v18  ;;  %554 = vmatmul.mubr.bf16.vlgmr.msra.gmra.mrb[0].mxu1 %v1120_v19 }
  0x27   : > { %505 = vmatprep.mubr.bf16.mxu0 %v1123_v20  ;;  %561 = vmatprep.mubr.bf16.mxu1 %v1126_v21 }
  0x2e   : > { %506 = vmatmul.mubr.bf16.gmra.mrb[4].mxu0 %v1125_v22  ;;  %562 = vmatmul.mubr.bf16.gmra.mrb[4].mxu1 %v1130_v23 }
  0x2f   : > { %513 = vmatprep.mubr.bf16.mxu0 %v1128_v24  ;;  %569 = vmatprep.mubr.bf16.mxu1 %v1132_v25 }
  0x36   : > { %514 = vmatmul.mubr.bf16.gmra.mrb[8].mxu0 %v1131_v26  ;;  %570 = vmatmul.mubr.bf16.gmra.mrb[8].mxu1 %v1136_v27 }
  0x37   : > { %521 = vmatprep.mubr.bf16.mxu0 %v1134_v28  ;;  %577 = vmatprep.mubr.bf16.mxu1 %v1138_v29 }
  0x3e   : > { %522 = vmatmul.mubr.bf16.gmra.mrb[12].mxu0 %v1137_v30  ;;  %578 = vmatmul.mubr.bf16.gmra.mrb[12].mxu1 %v1142_v31 }
  0x3f   : > { %529 = vmatprep.mubr.bf16.mxu0 %v1140_v32  ;;  %585 = vmatprep.mubr.bf16.mxu1 %v1144_v33 }
  0x46   : > { %530 = vmatmul.mubr.bf16.gmra.mrb[16].mxu0 %v1143_v35  ;;  %586 = vmatmul.mubr.bf16.gmra.mrb[16].mxu1 %v1148_v36 }
  0x47   : > { %537 = vmatprep.mubr.bf16.mxu0 %v1146_v37  ;;  %593 = vmatprep.mubr.bf16.mxu1 %v842_v38 }
  0x4e   : > { %538 = vmatmul.mubr.bf16.gmra.mrb[20].mxu0 %v1149_v39  ;;  %594 = vmatmul.mubr.bf16.gmra.mrb[20].mxu1 %v841_v40 }
  0x4f   : > { %545 = vmatprep.mubr.bf16.mxu0 %v1151_v41 }
  0x56   : > { %546 = vmatmul.mubr.bf16.gmra.mrb[24].mxu0 %v1154_v42 }
  0xf9   : > { %v999_v43 = vpop.f32.mrb[0].mxu0  ;;  %v1041_v44 = vpop.f32.mrb[0].mxu1 }
  0xfa   : > { %v1000_v46 = vpop.f32.mrb[1].mxu0  ;;  %v1042_v47 = vpop.f32.mrb[1].mxu1 }
  0xfb   : > { %v1001_v48 = vadd.f32 %v1000_v46, %v999_v43  ;;  %v1002_v49 = vpop.f32.mrb[2].mxu0  ;;  %v1043_v50 = vadd.f32 %v1042_v47, %v1041_v44  ;;  %v1044_v51 = vpop.f32.mrb[2].mxu1 }
  0xfc   : > { %v1003_v52 = vpop.f32.mrb[3].mxu0  ;;  %v1045_v53 = vpop.f32.mrb[3].mxu1 }
  0xfd   : > { %v500_v54 = vadd.f32 %v1001_v48, %v1275_v45  ;;  %v1004_v55 = vadd.f32 %v1003_v52, %v1002_v49  ;;  %v556_v56 = vadd.f32 %v1043_v50, %v1275_v45  ;;  %v1046_v57 = vadd.f32 %v1045_v53, %v1044_v51 }
  0xff   : > { %v503_v58 = vadd.f32 %v1004_v55, %v1275_v45  ;;  %v615_v59 = vmax.f32 %v556_v56, 0.0  ;;  %v559_v60 = vadd.f32 %v1046_v57, %v1275_v45  ;;  %v601_v61 = vmax.f32 %v500_v54, 0.0 }
 0x101   : > { %v602_v62 = vmax.f32 %v503_v58, 0.0  ;;  %v1005_v63 = vpop.f32.mrb[4].mxu0  ;;  %v616_v0 = vmax.f32 %v559_v60, 0.0  ;;  %v1047_v1 = vpop.f32.mrb[4].mxu1 }
 0x102   : > { %v1006_v2 = vpop.f32.mrb[5].mxu0  ;;  %v1048_v3 = vpop.f32.mrb[5].mxu1 }
 0x103   : > { %v915_v4 = vpack.c.bf16 %v602_v62, %v601_v61  ;;  %v1007_v5 = vadd.f32 %v1006_v2, %v1005_v63  ;;  %v1008_v6 = vpop.f32.mrb[6].mxu0  ;;  %v950_v7 = vpack.c.bf16 %v616_v0, %v615_v59  ;;  %v1049_v8 = vadd.f32 %v1048_v3, %v1047_v1  ;;  %v1050_v9 = vpop.f32.mrb[6].mxu1 }
 0x104   : > { %v1009_v10 = vpop.f32.mrb[7].mxu0  ;;  %v1051_v11 = vpop.f32.mrb[7].mxu1 }
 0x105   : > { %916 = vst [vmem:[%s1285_s4] sm:$0xff] %v915_v4   ;;  %v508_v12 = vadd.f32 %v1007_v5, %v1275_v45  ;;  %978 = vst [vmem:[%s1285_s4 + $0x38] sm:$0xff] %v950_v7   ;;  %v1010_v13 = vadd.f32 %v1009_v10, %v1008_v6  ;;  %v564_v14 = vadd.f32 %v1049_v8, %v1275_v45 }
 0x106   : > { %v1052_v15 = vadd.f32 %v1051_v11, %v1050_v9 }
 0x107   : > { %v511_v16 = vadd.f32 %v1010_v13, %v1275_v45  ;;  %v617_v17 = vmax.f32 %v564_v14, 0.0  ;;  %v603_v19 = vmax.f32 %v508_v12, 0.0 }
 0x108   : > { %v567_v18 = vadd.f32 %v1052_v15, %v1275_v45 }
 0x109   : > { %v604_v20 = vmax.f32 %v511_v16, 0.0  ;;  %v1011_v21 = vpop.f32.mrb[8].mxu0  ;;  %v1053_v23 = vpop.f32.mrb[8].mxu1 }
 0x10a   : > { %v618_v22 = vmax.f32 %v567_v18, 0.0  ;;  %v1012_v24 = vpop.f32.mrb[9].mxu0  ;;  %v1054_v25 = vpop.f32.mrb[9].mxu1 }
 0x10b   : > { %v920_v26 = vpack.c.bf16 %v604_v20, %v603_v19  ;;  %v1013_v27 = vadd.f32 %v1012_v24, %v1011_v21  ;;  %v1014_v28 = vpop.f32.mrb[10].mxu0  ;;  %v1055_v30 = vadd.f32 %v1054_v25, %v1053_v23  ;;  %v1056_v31 = vpop.f32.mrb[10].mxu1 }
 0x10c   : > { %v955_v29 = vpack.c.bf16 %v618_v22, %v617_v17  ;;  %v1015_v32 = vpop.f32.mrb[11].mxu0  ;;  %v1057_v33 = vpop.f32.mrb[11].mxu1 }
 0x10d   : > { %972 = vst [vmem:[%s1285_s4 + $0x8] sm:$0xff] %v920_v26   ;;  %v516_v34 = vadd.f32 %v1013_v27, %v1275_v45  ;;  %v1016_v35 = vadd.f32 %v1015_v32, %v1014_v28  ;;  %v572_v36 = vadd.f32 %v1055_v30, %v1275_v45  ;;  %v1058_v37 = vadd.f32 %v1057_v33, %v1056_v31 }
 0x10e   : > { %979 = vst [vmem:[%s1285_s4 + $0x40] sm:$0xff] %v955_v29  }
 0x10f   : > { %v519_v38 = vadd.f32 %v1016_v35, %v1275_v45  ;;  %v619_v39 = vmax.f32 %v572_v36, 0.0  ;;  %v575_v40 = vadd.f32 %v1058_v37, %v1275_v45  ;;  %v605_v41 = vmax.f32 %v516_v34, 0.0 }
 0x111   : > { %v606_v42 = vmax.f32 %v519_v38, 0.0  ;;  %v1017_v43 = vpop.f32.mrb[12].mxu0  ;;  %v620_v44 = vmax.f32 %v575_v40, 0.0  ;;  %v1059_v46 = vpop.f32.mrb[12].mxu1 }
 0x112   : > { %v1018_v47 = vpop.f32.mrb[13].mxu0  ;;  %v1060_v48 = vpop.f32.mrb[13].mxu1 }
 0x113   : > { %v925_v49 = vpack.c.bf16 %v606_v42, %v605_v41  ;;  %v1019_v50 = vadd.f32 %v1018_v47, %v1017_v43  ;;  %v1020_v51 = vpop.f32.mrb[14].mxu0  ;;  %v960_v52 = vpack.c.bf16 %v620_v44, %v619_v39  ;;  %v1061_v53 = vadd.f32 %v1060_v48, %v1059_v46  ;;  %v1062_v54 = vpop.f32.mrb[14].mxu1 }
 0x114   : > { %v1021_v55 = vpop.f32.mrb[15].mxu0  ;;  %v1063_v56 = vpop.f32.mrb[15].mxu1 }
 0x115   : > { %973 = vst [vmem:[%s1285_s4 + $0x10] sm:$0xff] %v925_v49   ;;  %v524_v57 = vadd.f32 %v1019_v50, %v1275_v45  ;;  %980 = vst [vmem:[%s1285_s4 + $0x48] sm:$0xff] %v960_v52   ;;  %v1022_v58 = vadd.f32 %v1021_v55, %v1020_v51  ;;  %v580_v59 = vadd.f32 %v1061_v53, %v1275_v45 }
 0x116   : > { %v1064_v60 = vadd.f32 %v1063_v56, %v1062_v54 }
 0x117   : > { %v527_v61 = vadd.f32 %v1022_v58, %v1275_v45  ;;  %v621_v62 = vmax.f32 %v580_v59, 0.0  ;;  %v607_v0 = vmax.f32 %v524_v57, 0.0 }
 0x118   : > { %v583_v63 = vadd.f32 %v1064_v60, %v1275_v45 }
 0x119   : > { %v608_v1 = vmax.f32 %v527_v61, 0.0  ;;  %v1023_v2 = vpop.f32.mrb[16].mxu0  ;;  %v1065_v4 = vpop.f32.mrb[16].mxu1 }
 0x11a   : > { %v622_v3 = vmax.f32 %v583_v63, 0.0  ;;  %v1024_v5 = vpop.f32.mrb[17].mxu0  ;;  %v1066_v6 = vpop.f32.mrb[17].mxu1 }
 0x11b   : > { %v930_v7 = vpack.c.bf16 %v608_v1, %v607_v0  ;;  %v1025_v8 = vadd.f32 %v1024_v5, %v1023_v2  ;;  %v1026_v9 = vpop.f32.mrb[18].mxu0  ;;  %v1067_v11 = vadd.f32 %v1066_v6, %v1065_v4  ;;  %v1068_v12 = vpop.f32.mrb[18].mxu1 }
 0x11c   : > { %v965_v10 = vpack.c.bf16 %v622_v3, %v621_v62  ;;  %v1027_v13 = vpop.f32.mrb[19].mxu0  ;;  %v1069_v14 = vpop.f32.mrb[19].mxu1 }
 0x11d   : > { %974 = vst [vmem:[%s1285_s4 + $0x18] sm:$0xff] %v930_v7   ;;  %v532_v15 = vadd.f32 %v1025_v8, %v1275_v45  ;;  %v1028_v16 = vadd.f32 %v1027_v13, %v1026_v9  ;;  %v588_v17 = vadd.f32 %v1067_v11, %v1275_v45  ;;  %v1070_v18 = vadd.f32 %v1069_v14, %v1068_v12 }
 0x11e   : > { %981 = vst [vmem:[%s1285_s4 + $0x50] sm:$0xff] %v965_v10  }
 0x11f   : > { %v535_v19 = vadd.f32 %v1028_v16, %v1275_v45  ;;  %v623_v20 = vmax.f32 %v588_v17, 0.0  ;;  %v591_v21 = vadd.f32 %v1070_v18, %v1275_v45  ;;  %v609_v22 = vmax.f32 %v532_v15, 0.0 }
 0x121   : > { %v610_v23 = vmax.f32 %v535_v19, 0.0  ;;  %v1029_v24 = vpop.f32.mrb[20].mxu0  ;;  %v624_v25 = vmax.f32 %v591_v21, 0.0  ;;  %v1071_v26 = vpop.f32.mrb[20].mxu1 }
 0x122   : > { %v1030_v27 = vpop.f32.mrb[21].mxu0  ;;  %v1072_v28 = vpop.f32.mrb[21].mxu1 }
 0x123   : > { %v935_v29 = vpack.c.bf16 %v610_v23, %v609_v22  ;;  %v1031_v30 = vadd.f32 %v1030_v27, %v1029_v24  ;;  %v1032_v31 = vpop.f32.mrb[22].mxu0  ;;  %v970_v32 = vpack.c.bf16 %v624_v25, %v623_v20  ;;  %v1073_v33 = vadd.f32 %v1072_v28, %v1071_v26  ;;  %v1074_v34 = vpop.f32.mrb[22].mxu1 }
 0x124   : > { %v1033_v35 = vpop.f32.mrb[23].mxu0  ;;  %v1075_v36 = vpop.f32.mrb[23].mxu1 }
 0x125   : > { %975 = vst [vmem:[%s1285_s4 + $0x20] sm:$0xff] %v935_v29   ;;  %v540_v37 = vadd.f32 %v1031_v30, %v1275_v45  ;;  %982 = vst [vmem:[%s1285_s4 + $0x58] sm:$0xff] %v970_v32   ;;  %v1034_v38 = vadd.f32 %v1033_v35, %v1032_v31  ;;  %v596_v39 = vadd.f32 %v1073_v33, %v1275_v45 }
 0x127   : > { %v543_v40 = vadd.f32 %v1034_v38, %v1275_v45  ;;  %v625_v41 = vmax.f32 %v596_v39, 0.0  ;;  %v611_v42 = vmax.f32 %v540_v37, 0.0 }
 0x129   : > { %v612_v43 = vmax.f32 %v543_v40, 0.0  ;;  %v1035_v44 = vpop.f32.mrb[24].mxu0  ;;  %v911_v46 = vpack.c.bf16 %v625_v41, %v625_v41 }
 0x12a   : > { %v1036_v47 = vpop.f32.mrb[25].mxu0 }
 0x12b   : > { %v940_v48 = vpack.c.bf16 %v612_v43, %v611_v42  ;;  %751 = vst [vmem:[%s1285_s4 + $0x60] sm:$0xf] %v911_v46  ;;  %v1037_v49 = vadd.f32 %v1036_v47, %v1035_v44  ;;  %v1038_v50 = vpop.f32.mrb[26].mxu0 }
 0x12c   : > { %v1039_v51 = vpop.f32.mrb[27].mxu0 }
 0x12d   : > { %976 = vst [vmem:[%s1285_s4 + $0x28] sm:$0xff] %v940_v48   ;;  %v548_v52 = vadd.f32 %v1037_v49, %v1275_v45  ;;  %v1040_v53 = vadd.f32 %v1039_v51, %v1038_v50 }
 0x12f   : > { %v551_v54 = vadd.f32 %v1040_v53, %v1275_v45  ;;  %v613_v55 = vmax.f32 %v548_v52, 0.0 }
 0x131   : > { %v614_v56 = vmax.f32 %v551_v54, 0.0 }
 0x133   : > { %v945_v57 = vpack.c.bf16 %v614_v56, %v613_v55 }
 0x135   : > { %977 = vst [vmem:[%s1285_s4 + $0x30] sm:$0xff] %v945_v57  }
 0x136 PF: > { %s13_s12 = sadd.s32 1, %s1161_s12  }
 0x137   : > { %p10_p4 = scmp.ge.s32.totalorder %s13_s12, 6  }
 0x139   :  { %12 = sbr.rel (!%p10_p4) target bundleno = 1 (0x1), region = 62 }

// kernel: cnn_forward.5
= control target key start
LH: loop header
LB: loop body
LE: loop exit
PB: predicated region body
PF: predicated region fallthrough
CT: control target
= control target key end

     0   :  { %s5523_s1 = inlined_call_operand.vmem [shape: bf16[2048,128], index: 1, kind: input, shape index: {}]   ;;  %s5524_s0 = inlined_call_operand.vmem [shape: bf16[168,2048], index: 0, kind: input, shape index: {}]   ;;  %s5525_s2 = inlined_call_operand.vmem [shape: f32[1,128], index: 2, kind: input, shape index: {}]   ;;  %s5526_s3 = inlined_call_operand.vmem [shape: bf16[168,128], index: 3, kind: output, shape index: {}]  }
   0x1   :  { %v4223_v0 = vld [vmem:[%s5523_s1 + $0x40] sm:$0xff]   ;;  %v4227_v4 = vld [vmem:[%s5523_s1 + $0x48] sm:$0xff]   ;;  %v4231_v8 = vld [vmem:[%s5523_s1 + $0x50] sm:$0xff]  }
   0x2   :  { %v4224_v1 = vld [vmem:[%s5523_s1 + $0xc0] sm:$0xff]   ;;  %3567 = vmatprep.subr.bf16.mxu0 %v4223_v0  ;;  %v4228_v5 = vld [vmem:[%s5523_s1 + $0xc8] sm:$0xff]   ;;  %v4232_v9 = vld [vmem:[%s5523_s1 + $0xd0] sm:$0xff]  }
   0x3   :  { %v4225_v2 = vld [vmem:[%s5523_s1] sm:$0xff]   ;;  %3649 = vmatprep.subr.bf16.mxu1 %v4224_v1  ;;  %v4229_v6 = vld [vmem:[%s5523_s1 + $0x8] sm:$0xff]   ;;  %v4233_v10 = vld [vmem:[%s5523_s1 + $0x10] sm:$0xff]  }
   0x4   :  { %v4226_v3 = vld [vmem:[%s5523_s1 + $0x80] sm:$0xff]   ;;  %3568 = vmatpush3.bf16.msra.mxu0 %v4225_v2  ;;  %v4230_v7 = vld [vmem:[%s5523_s1 + $0x88] sm:$0xff]   ;;  %v4234_v11 = vld [vmem:[%s5523_s1 + $0x90] sm:$0xff]  }
   0x5   :  { %3650 = vmatpush3.bf16.msra.mxu1 %v4226_v3  ;;  %3569 = vmatprep.subr.bf16.mxu0 %v4227_v4  ;;  %v4235_v12 = vld [vmem:[%s5523_s1 + $0x58] sm:$0xff]   ;;  %v4239_v16 = vld [vmem:[%s5523_s1 + $0x60] sm:$0xff]   ;;  %v4243_v20 = vld [vmem:[%s5523_s1 + $0x68] sm:$0xff]  }
   0x6   :  { %3651 = vmatprep.subr.bf16.mxu1 %v4228_v5  ;;  %v4236_v13 = vld [vmem:[%s5523_s1 + $0xd8] sm:$0xff]   ;;  %v4240_v17 = vld [vmem:[%s5523_s1 + $0xe0] sm:$0xff]   ;;  %v4244_v21 = vld [vmem:[%s5523_s1 + $0xe8] sm:$0xff]  }
   0x7   :  { %v4237_v14 = vld [vmem:[%s5523_s1 + $0x18] sm:$0xff]   ;;  %v4241_v18 = vld [vmem:[%s5523_s1 + $0x20] sm:$0xff]   ;;  %v4245_v22 = vld [vmem:[%s5523_s1 + $0x28] sm:$0xff]  }
   0x8   :  { %3570 = vmatpush3.bf16.msra.mxu0 %v4229_v6  ;;  %v4238_v15 = vld [vmem:[%s5523_s1 + $0x98] sm:$0xff]   ;;  %v4242_v19 = vld [vmem:[%s5523_s1 + $0xa0] sm:$0xff]   ;;  %v4246_v23 = vld [vmem:[%s5523_s1 + $0xa8] sm:$0xff]  }
   0x9   :  { %3652 = vmatpush3.bf16.msra.mxu1 %v4230_v7  ;;  %3571 = vmatprep.subr.bf16.mxu0 %v4231_v8  ;;  %v4247_v24 = vld [vmem:[%s5523_s1 + $0x70] sm:$0xff]   ;;  %v4251_v28 = vld [vmem:[%s5523_s1 + $0x78] sm:$0xff]   ;;  %v15_v32 = vld [vmem:[%s5524_s0] sm:$0xff] }
   0xa   :  { %3653 = vmatprep.subr.bf16.mxu1 %v4232_v9  ;;  %v4248_v25 = vld [vmem:[%s5523_s1 + $0xf0] sm:$0xff]   ;;  %v4252_v29 = vld [vmem:[%s5523_s1 + $0xf8] sm:$0xff]   ;;  %v23_v33 = vld [vmem:[%s5524_s0 + $0x40] sm:$0xff] }
   0xb   :  { %v4249_v26 = vld [vmem:[%s5523_s1 + $0x30] sm:$0xff]   ;;  %v4253_v30 = vld [vmem:[%s5523_s1 + $0x38] sm:$0xff]   ;;  %v16_v34 = vld [vmem:[%s5524_s0 + $0x8] sm:$0xff]  ;;  %v3162_v35 = vcombine.low %v15_v32, %v23_v33  ;;  %v3163_v36 = vcombine.high %v15_v32, %v23_v33 }
   0xc   :  { %3572 = vmatpush3.bf16.msra.mxu0 %v4233_v10  ;;  %v4250_v27 = vld [vmem:[%s5523_s1 + $0xb0] sm:$0xff]   ;;  %v4254_v31 = vld [vmem:[%s5523_s1 + $0xb8] sm:$0xff]   ;;  %v24_v37 = vld [vmem:[%s5524_s0 + $0x48] sm:$0xff] }
   0xd   :  { %3654 = vmatpush3.bf16.msra.mxu1 %v4234_v11  ;;  %3573 = vmatprep.subr.bf16.mxu0 %v4235_v12  ;;  %v3164_v38 = vcombine.low %v16_v34, %v24_v37  ;;  %v3165_v39 = vcombine.high %v16_v34, %v24_v37  ;;  %v4255_v40 = vld [vmem:[%s5523_s1 + $0x140] sm:$0xff]   ;;  %v32_v47 = vld [vmem:[%s5524_s0 + $0x88] sm:$0xff]  ;;  %v4263_v62 = vld [vmem:[%s5523_s1 + $0x150] sm:$0xff]  }
   0xe   :  { %3655 = vmatprep.subr.bf16.mxu1 %v4236_v13  ;;  %2102 = vmatprep.mubr.bf16.mxu0 %v3163_v36  ;;  %v4256_v41 = vld [vmem:[%s5523_s1 + $0x100] sm:$0xff]   ;;  %v40_v48 = vld [vmem:[%s5524_s0 + $0xc8] sm:$0xff]  ;;  %v4264_v3 = vld [vmem:[%s5523_s1 + $0x110] sm:$0xff]  }
   0xf   :  { %2222 = vmatprep.mubr.bf16.mxu1 %v3165_v39  ;;  %v4257_v42 = vld [vmem:[%s5523_s1 + $0x1c0] sm:$0xff]   ;;  %v3181_v49 = vcombine.high %v32_v47, %v40_v48  ;;  %v4259_v50 = vld [vmem:[%s5523_s1 + $0x148] sm:$0xff]   ;;  %v3180_v53 = vcombine.low %v32_v47, %v40_v48  ;;  %v4265_v5 = vld [vmem:[%s5523_s1 + $0x1d0] sm:$0xff]  }
  0x10   :  { %3574 = vmatpush3.bf16.msra.mxu0 %v4237_v14  ;;  %v4258_v43 = vld [vmem:[%s5523_s1 + $0x180] sm:$0xff]   ;;  %v4260_v52 = vld [vmem:[%s5523_s1 + $0x108] sm:$0xff]   ;;  %v4266_v8 = vld [vmem:[%s5523_s1 + $0x190] sm:$0xff]  }
  0x11   :  { %3656 = vmatpush3.bf16.msra.mxu1 %v4238_v15  ;;  %3575 = vmatprep.subr.bf16.mxu0 %v4239_v16  ;;  %v31_v44 = vld [vmem:[%s5524_s0 + $0x80] sm:$0xff]  ;;  %v4261_v54 = vld [vmem:[%s5523_s1 + $0x1c8] sm:$0xff]   ;;  %v4267_v10 = vld [vmem:[%s5523_s1 + $0x158] sm:$0xff]  }
  0x12   :  { %3657 = vmatprep.subr.bf16.mxu1 %v4240_v17  ;;  %v39_v45 = vld [vmem:[%s5524_s0 + $0xc0] sm:$0xff]  ;;  %v4262_v55 = vld [vmem:[%s5523_s1 + $0x188] sm:$0xff]   ;;  %v4268_v12 = vld [vmem:[%s5523_s1 + $0x118] sm:$0xff]  }
  0x13   :  { %v3179_v46 = vcombine.high %v31_v44, %v39_v45  ;;  %v3178_v51 = vcombine.low %v31_v44, %v39_v45  ;;  %v47_v56 = vld [vmem:[%s5524_s0 + $0x100] sm:$0xff]  ;;  %v48_v58 = vld [vmem:[%s5524_s0 + $0x108] sm:$0xff]  ;;  %v4269_v13 = vld [vmem:[%s5523_s1 + $0x1d8] sm:$0xff]  }
  0x14   :  { %3576 = vmatpush3.bf16.msra.mxu0 %v4241_v18  ;;  %v55_v57 = vld [vmem:[%s5524_s0 + $0x140] sm:$0xff]  ;;  %v56_v59 = vld [vmem:[%s5524_s0 + $0x148] sm:$0xff]  ;;  %v4270_v15 = vld [vmem:[%s5523_s1 + $0x198] sm:$0xff]  }
  0x15   :  { %3658 = vmatpush3.bf16.msra.mxu1 %v4242_v19  ;;  %3577 = vmatprep.subr.bf16.mxu0 %v4243_v20  ;;  %v3195_v60 = vcombine.high %v47_v56, %v55_v57  ;;  %v3197_v61 = vcombine.high %v48_v58, %v56_v59  ;;  %v63_v63 = vld [vmem:[%s5524_s0 + $0x180] sm:$0xff]  ;;  %v64_v1 = vld [vmem:[%s5524_s0 + $0x188] sm:$0xff]  ;;  %v3194_v4 = vcombine.low %v47_v56, %v55_v57  ;;  %v4281_v44 = vld [vmem:[%s5523_s1 + $0x1f0] sm:$0xff]  }
  0x16   :  { %3659 = vmatprep.subr.bf16.mxu1 %v4244_v21  ;;  %v71_v0 = vld [vmem:[%s5524_s0 + $0x1c0] sm:$0xff]  ;;  %v72_v2 = vld [vmem:[%s5524_s0 + $0x1c8] sm:$0xff]  ;;  %v3196_v6 = vcombine.low %v48_v58, %v56_v59  ;;  %v4282_v45 = vld [vmem:[%s5523_s1 + $0x1b0] sm:$0xff]  }
  0x17   :  { %v3211_v7 = vcombine.high %v63_v63, %v71_v0  ;;  %v3213_v9 = vcombine.high %v64_v1, %v72_v2  ;;  %v79_v11 = vld [vmem:[%s5524_s0 + $0x200] sm:$0xff]  ;;  %v80_v16 = vld [vmem:[%s5524_s0 + $0x208] sm:$0xff]  ;;  %v3210_v18 = vcombine.low %v63_v63, %v71_v0  ;;  %v3212_v20 = vcombine.low %v64_v1, %v72_v2 }
  0x18   :  { %3578 = vmatpush3.bf16.msra.mxu0 %v4245_v22  ;;  %v87_v14 = vld [vmem:[%s5524_s0 + $0x240] sm:$0xff]  ;;  %v88_v17 = vld [vmem:[%s5524_s0 + $0x248] sm:$0xff] }
  0x19   :  { %3660 = vmatpush3.bf16.msra.mxu1 %v4246_v23  ;;  %3579 = vmatprep.subr.bf16.mxu0 %v4247_v24  ;;  %v4271_v19 = vld [vmem:[%s5523_s1 + $0x160] sm:$0xff]   ;;  %v3227_v21 = vcombine.high %v79_v11, %v87_v14  ;;  %v3229_v23 = vcombine.high %v80_v16, %v88_v17  ;;  %v4276_v32 = vld [vmem:[%s5523_s1 + $0x128] sm:$0xff]   ;;  %v3228_v33 = vcombine.low %v80_v16, %v88_v17 }
  0x1a   :  { %3661 = vmatprep.subr.bf16.mxu1 %v4248_v25  ;;  %v4272_v22 = vld [vmem:[%s5523_s1 + $0x120] sm:$0xff]   ;;  %v4278_v37 = vld [vmem:[%s5523_s1 + $0x1a8] sm:$0xff]  }
  0x1b   :  { %v4273_v24 = vld [vmem:[%s5523_s1 + $0x1e0] sm:$0xff]   ;;  %v128_v56 = vld [vmem:[%s5524_s0 + $0x388] sm:$0xff] }
  0x1c   :  { %3580 = vmatpush3.bf16.msra.mxu0 %v4249_v26  ;;  %v95_v25 = vld [vmem:[%s5524_s0 + $0x280] sm:$0xff]  ;;  %v136_v57 = vld [vmem:[%s5524_s0 + $0x3c8] sm:$0xff] }
  0x1d   :  { %3662 = vmatpush3.bf16.msra.mxu1 %v4250_v27  ;;  %3581 = vmatprep.subr.bf16.mxu0 %v4251_v28  ;;  %v103_v26 = vld [vmem:[%s5524_s0 + $0x2c0] sm:$0xff]  ;;  %v96_v28 = vld [vmem:[%s5524_s0 + $0x288] sm:$0xff] }
  0x1e   :  { %3663 = vmatprep.subr.bf16.mxu1 %v4252_v29  ;;  %v4274_v27 = vld [vmem:[%s5523_s1 + $0x1a0] sm:$0xff]   ;;  %v104_v29 = vld [vmem:[%s5524_s0 + $0x2c8] sm:$0xff]  ;;  %v3243_v34 = vcombine.high %v95_v25, %v103_v26 }
  0x1f   :  { %v3245_v36 = vcombine.high %v96_v28, %v104_v29  ;;  %v119_v39 = vld [vmem:[%s5524_s0 + $0x340] sm:$0xff]  ;;  %v3244_v47 = vcombine.low %v96_v28, %v104_v29  ;;  %v144_v2 = vld [vmem:[%s5524_s0 + $0x408] sm:$0xff] }
  0x20   :  { %3582 = vmatpush3.bf16.msra.mxu0 %v4253_v30  ;;  %v4275_v30 = vld [vmem:[%s5523_s1 + $0x168] sm:$0xff]   ;;  %v4291_v59 = vld [vmem:[%s5523_s1 + $0x240] sm:$0xff]  }
  0x21   :  { %3664 = vmatpush3.bf16.msra.mxu1 %v4254_v31  ;;  %3731 = vmatprep.subr.bf16.mxu0 %v4255_v40  ;;  %v3226_v31 = vcombine.low %v79_v11, %v87_v14  ;;  %v4279_v40 = vld [vmem:[%s5523_s1 + $0x170] sm:$0xff]   ;;  %v4293_v63 = vld [vmem:[%s5523_s1 + $0x2c0] sm:$0xff]   ;;  %v168_v11 = vld [vmem:[%s5524_s0 + $0x4c8] sm:$0xff] }
  0x22   :  { %3813 = vmatprep.subr.bf16.mxu1 %v4257_v42  ;;  %v120_v42 = vld [vmem:[%s5524_s0 + $0x348] sm:$0xff]  ;;  %v143_v0 = vld [vmem:[%s5524_s0 + $0x400] sm:$0xff] }
  0x23   :  { %2103 = vmatmul.mubr.bf16.vlgmr.msra.gmra.mrb[0].mxu0 %v3162_v35  ;;  %v4277_v35 = vld [vmem:[%s5523_s1 + $0x1e8] sm:$0xff]   ;;  %v151_v1 = vld [vmem:[%s5524_s0 + $0x440] sm:$0xff] }
  0x24   :  { %2223 = vmatmul.mubr.bf16.vlgmr.msra.gmra.mrb[0].mxu1 %v3164_v38  ;;  %3732 = vmatpush3.bf16.msra.mxu0 %v4256_v41  ;;  %v111_v38 = vld [vmem:[%s5524_s0 + $0x300] sm:$0xff]  ;;  %v112_v41 = vld [vmem:[%s5524_s0 + $0x308] sm:$0xff] }
  0x25   :  { %3814 = vmatpush3.bf16.msra.mxu1 %v4258_v43  ;;  %2110 = vmatprep.mubr.bf16.mxu0 %v3179_v46  ;;  %v4280_v43 = vld [vmem:[%s5523_s1 + $0x130] sm:$0xff]   ;;  %v3242_v46 = vcombine.low %v95_v25, %v103_v26  ;;  %v3259_v48 = vcombine.high %v111_v38, %v119_v39  ;;  %v3258_v58 = vcombine.low %v111_v38, %v119_v39  ;;  %v175_v16 = vld [vmem:[%s5524_s0 + $0x500] sm:$0xff]  ;;  %v176_v17 = vld [vmem:[%s5524_s0 + $0x508] sm:$0xff] }
  0x26   :  { %2230 = vmatprep.mubr.bf16.mxu1 %v3181_v49  ;;  %3733 = vmatprep.subr.bf16.mxu0 %v4259_v50  ;;  %v3261_v49 = vcombine.high %v112_v41, %v120_v42  ;;  %v4283_v50 = vld [vmem:[%s5523_s1 + $0x178] sm:$0xff]   ;;  %v3322_v26 = vcombine.low %v175_v16, %v175_v16  ;;  %v4295_v39 = vld [vmem:[%s5523_s1 + $0x248] sm:$0xff]  }
  0x27   :  { %3815 = vmatprep.subr.bf16.mxu1 %v4261_v54  ;;  %v127_v54 = vld [vmem:[%s5524_s0 + $0x380] sm:$0xff]  ;;  %v26_v25 = vld [vmem:[%s5524_s0 + $0x58] sm:$0xff] }
  0x28   :  { %3734 = vmatpush3.bf16.msra.mxu0 %v4260_v52  ;;  %v4287_v52 = vld [vmem:[%s5523_s1 + $0x1f8] sm:$0xff]  }
  0x29   :  { %3816 = vmatpush3.bf16.msra.mxu1 %v4262_v55  ;;  %3735 = vmatprep.subr.bf16.mxu0 %v4263_v62  ;;  %v135_v55 = vld [vmem:[%s5524_s0 + $0x3c0] sm:$0xff]  ;;  %v3277_v62 = vcombine.high %v128_v56, %v136_v57 }
  0x2a   :  { %3817 = vmatprep.subr.bf16.mxu1 %v4265_v5  ;;  %v3276_v5 = vcombine.low %v128_v56, %v136_v57  ;;  %v4303_v56 = vld [vmem:[%s5523_s1 + $0x258] sm:$0xff]   ;;  %v65_v57 = vld [vmem:[%s5524_s0 + $0x190] sm:$0xff] }
  0x2b   :  { %2111 = vmatmul.mubr.bf16.gmra.mrb[4].mxu0 %v3178_v51  ;;  %v4284_v51 = vld [vmem:[%s5523_s1 + $0x138] sm:$0xff]  }
  0x2c   :  { %2231 = vmatmul.mubr.bf16.gmra.mrb[4].mxu1 %v3180_v53  ;;  %2118 = vmatprep.mubr.bf16.mxu0 %v3195_v60  ;;  %v4290_v53 = vld [vmem:[%s5523_s1 + $0x1b8] sm:$0xff]   ;;  %v3260_v60 = vcombine.low %v112_v41, %v120_v42  ;;  %v4296_v41 = vld [vmem:[%s5523_s1 + $0x208] sm:$0xff]  }
  0x2d   :  { %2238 = vmatprep.mubr.bf16.mxu1 %v3197_v61  ;;  %3736 = vmatpush3.bf16.msra.mxu0 %v4264_v3  ;;  %v3275_v61 = vcombine.high %v127_v54, %v135_v55  ;;  %v152_v3 = vld [vmem:[%s5524_s0 + $0x448] sm:$0xff] }
  0x2e   :  { %3818 = vmatpush3.bf16.msra.mxu1 %v4266_v8  ;;  %3737 = vmatprep.subr.bf16.mxu0 %v4267_v10  ;;  %v159_v8 = vld [vmem:[%s5524_s0 + $0x480] sm:$0xff]  ;;  %v160_v10 = vld [vmem:[%s5524_s0 + $0x488] sm:$0xff] }
  0x2f   :  { %3819 = vmatprep.subr.bf16.mxu1 %v4269_v13  ;;  %v3292_v13 = vcombine.low %v144_v2, %v152_v3  ;;  %v4297_v42 = vld [vmem:[%s5523_s1 + $0x2c8] sm:$0xff]  }
  0x31   :  { %3738 = vmatpush3.bf16.msra.mxu0 %v4268_v12  ;;  %v3290_v12 = vcombine.low %v143_v0, %v151_v1 }
  0x32   :  { %3820 = vmatpush3.bf16.msra.mxu1 %v4270_v15  ;;  %3739 = vmatprep.subr.bf16.mxu0 %v4271_v19  ;;  %v3309_v15 = vcombine.high %v160_v10, %v168_v11  ;;  %v3308_v19 = vcombine.low %v160_v10, %v168_v11  ;;  %v4313_v10 = vld [vmem:[%s5523_s1 + $0x2e8] sm:$0xff]   ;;  %v89_v11 = vld [vmem:[%s5524_s0 + $0x250] sm:$0xff] }
  0x33   :  { %2119 = vmatmul.mubr.bf16.gmra.mrb[8].mxu0 %v3194_v4  ;;  %3821 = vmatprep.subr.bf16.mxu1 %v4273_v24  ;;  %v3274_v4 = vcombine.low %v127_v54, %v135_v55  ;;  %v18_v24 = vld [vmem:[%s5524_s0 + $0x18] sm:$0xff]  ;;  %v4300_v54 = vld [vmem:[%s5523_s1 + $0x210] sm:$0xff]  }
  0x34   :  { %2239 = vmatmul.mubr.bf16.gmra.mrb[8].mxu1 %v3196_v6  ;;  %2126 = vmatprep.mubr.bf16.mxu0 %v3211_v7  ;;  %v3291_v6 = vcombine.high %v143_v0, %v151_v1  ;;  %v3293_v7 = vcombine.high %v144_v2, %v152_v3  ;;  %v3169_v29 = vcombine.high %v18_v24, %v26_v25  ;;  %v4302_v55 = vld [vmem:[%s5523_s1 + $0x290] sm:$0xff]   ;;  %v4307_v0 = vld [vmem:[%s5523_s1 + $0x260] sm:$0xff]  }
  0x35   :  { %2246 = vmatprep.mubr.bf16.mxu1 %v3213_v9  ;;  %3740 = vmatpush3.bf16.msra.mxu0 %v4272_v22  ;;  %v167_v9 = vld [vmem:[%s5524_s0 + $0x4c0] sm:$0xff]  ;;  %v17_v22 = vld [vmem:[%s5524_s0 + $0x10] sm:$0xff] }
  0x36   :  { %3822 = vmatpush3.bf16.msra.mxu1 %v4274_v27  ;;  %3741 = vmatprep.subr.bf16.mxu0 %v4275_v30  ;;  %v3307_v14 = vcombine.high %v159_v8, %v167_v9  ;;  %v3324_v27 = vcombine.low %v176_v17, %v176_v17  ;;  %v33_v30 = vld [vmem:[%s5524_s0 + $0x90] sm:$0xff]  ;;  %v4309_v2 = vld [vmem:[%s5523_s1 + $0x2e0] sm:$0xff]  }
  0x37   :  { %3823 = vmatprep.subr.bf16.mxu1 %v4277_v35  ;;  %v3168_v35 = vcombine.low %v18_v24, %v26_v25  ;;  %v4319_v24 = vld [vmem:[%s5523_s1 + $0x278] sm:$0xff]   ;;  %v97_v25 = vld [vmem:[%s5524_s0 + $0x290] sm:$0xff] }
  0x39   :  { %3742 = vmatpush3.bf16.msra.mxu0 %v4276_v32  ;;  %v34_v32 = vld [vmem:[%s5524_s0 + $0x98] sm:$0xff] }
  0x3a   :  { %3824 = vmatpush3.bf16.msra.mxu1 %v4278_v37  ;;  %3743 = vmatprep.subr.bf16.mxu0 %v4279_v40  ;;  %v4294_v37 = vld [vmem:[%s5523_s1 + $0x280] sm:$0xff]  }
  0x3b   :  { %2127 = vmatmul.mubr.bf16.gmra.mrb[12].mxu0 %v3210_v18  ;;  %3825 = vmatprep.subr.bf16.mxu1 %v4281_v44  ;;  %v3306_v18 = vcombine.low %v159_v8, %v167_v9  ;;  %v49_v44 = vld [vmem:[%s5524_s0 + $0x110] sm:$0xff]  ;;  %v4311_v8 = vld [vmem:[%s5523_s1 + $0x268] sm:$0xff]  }
  0x3c   :  { %2247 = vmatmul.mubr.bf16.gmra.mrb[12].mxu1 %v3212_v20  ;;  %2134 = vmatprep.mubr.bf16.mxu0 %v3227_v21  ;;  %v3323_v20 = vcombine.high %v175_v16, %v175_v16  ;;  %v3325_v21 = vcombine.high %v176_v17, %v176_v17  ;;  %v81_v9 = vld [vmem:[%s5524_s0 + $0x210] sm:$0xff] }
  0x3d   :  { %2254 = vmatprep.mubr.bf16.mxu1 %v3229_v23  ;;  %3744 = vmatpush3.bf16.msra.mxu0 %v4280_v43  ;;  %v25_v23 = vld [vmem:[%s5524_s0 + $0x50] sm:$0xff]  ;;  %v4298_v43 = vld [vmem:[%s5523_s1 + $0x288] sm:$0xff]  }
  0x3e   :  { %3826 = vmatpush3.bf16.msra.mxu1 %v4282_v45  ;;  %3745 = vmatprep.subr.bf16.mxu0 %v4283_v50  ;;  %v3167_v28 = vcombine.high %v17_v22, %v25_v23  ;;  %v57_v45 = vld [vmem:[%s5524_s0 + $0x150] sm:$0xff] }
  0x3f   :  { %3827 = vmatprep.subr.bf16.mxu1 %v4287_v52  ;;  %v3199_v52 = vcombine.high %v49_v44, %v57_v45  ;;  %v3198_v1 = vcombine.low %v49_v44, %v57_v45  ;;  %v4315_v16 = vld [vmem:[%s5523_s1 + $0x270] sm:$0xff]  }
  0x41   :  { %3746 = vmatpush3.bf16.msra.mxu0 %v4284_v51 }
  0x42   :  { %3828 = vmatpush3.bf16.msra.mxu1 %v4290_v53  ;;  %3895 = vmatprep.subr.bf16.mxu0 %v4291_v59  ;;  %v73_v59 = vld [vmem:[%s5524_s0 + $0x1d0] sm:$0xff] }
  0x43   :  { %2135 = vmatmul.mubr.bf16.gmra.mrb[16].mxu0 %v3226_v31  ;;  %3977 = vmatprep.subr.bf16.mxu1 %v4293_v63  ;;  %v41_v31 = vld [vmem:[%s5524_s0 + $0xd0] sm:$0xff]  ;;  %v4306_v63 = vld [vmem:[%s5523_s1 + $0x298] sm:$0xff]   ;;  %v3214_v17 = vcombine.low %v65_v57, %v73_v59 }
  0x44   :  { %2255 = vmatmul.mubr.bf16.gmra.mrb[16].mxu1 %v3228_v33  ;;  %2142 = vmatprep.mubr.bf16.mxu0 %v3243_v34  ;;  %v3166_v33 = vcombine.low %v17_v22, %v25_v23  ;;  %v42_v34 = vld [vmem:[%s5524_s0 + $0xd8] sm:$0xff]  ;;  %v3183_v38 = vcombine.high %v33_v30, %v41_v31  ;;  %v3182_v50 = vcombine.low %v33_v30, %v41_v31  ;;  %v4316_v22 = vld [vmem:[%s5523_s1 + $0x230] sm:$0xff]  }
  0x45   :  { %2262 = vmatprep.mubr.bf16.mxu1 %v3245_v36  ;;  %v4292_v36 = vld [vmem:[%s5523_s1 + $0x200] sm:$0xff]   ;;  %v3185_v40 = vcombine.high %v34_v32, %v42_v34  ;;  %v3184_v51 = vcombine.low %v34_v32, %v42_v34  ;;  %v4318_v23 = vld [vmem:[%s5523_s1 + $0x2b0] sm:$0xff]   ;;  %v106_v30 = vld [vmem:[%s5524_s0 + $0x2d8] sm:$0xff] }
  0x46   :  { %v4326_v31 = vld [vmem:[%s5523_s1 + $0x2b8] sm:$0xff]   ;;  %v4327_v32 = vld [vmem:[%s5523_s1 + $0x340] sm:$0xff]  }
  0x47   :  { %v4329_v34 = vld [vmem:[%s5523_s1 + $0x3c0] sm:$0xff]  }
  0x4b   :  { %2143 = vmatmul.mubr.bf16.gmra.mrb[20].mxu0 %v3242_v46  ;;  %v50_v46 = vld [vmem:[%s5524_s0 + $0x118] sm:$0xff] }
  0x4c   :  { %2263 = vmatmul.mubr.bf16.gmra.mrb[20].mxu1 %v3244_v47  ;;  %2150 = vmatprep.mubr.bf16.mxu0 %v3259_v48  ;;  %v58_v47 = vld [vmem:[%s5524_s0 + $0x158] sm:$0xff]  ;;  %v4299_v48 = vld [vmem:[%s5523_s1 + $0x250] sm:$0xff]  }
  0x4d   :  { %2270 = vmatprep.mubr.bf16.mxu1 %v3261_v49  ;;  %v4301_v49 = vld [vmem:[%s5523_s1 + $0x2d0] sm:$0xff]   ;;  %v3201_v53 = vcombine.high %v50_v46, %v58_v47  ;;  %v3200_v3 = vcombine.low %v50_v46, %v58_v47 }
  0x4e   :  { %v129_v46 = vld [vmem:[%s5524_s0 + $0x390] sm:$0xff] }
  0x4f   :  { %v137_v47 = vld [vmem:[%s5524_s0 + $0x3d0] sm:$0xff] }
  0x53   :  { %2151 = vmatmul.mubr.bf16.gmra.mrb[24].mxu0 %v3258_v58  ;;  %v4305_v58 = vld [vmem:[%s5523_s1 + $0x2d8] sm:$0xff]  }
  0x54   :  { %2271 = vmatmul.mubr.bf16.gmra.mrb[24].mxu1 %v3260_v60  ;;  %2158 = vmatprep.mubr.bf16.mxu0 %v3275_v61  ;;  %v66_v60 = vld [vmem:[%s5524_s0 + $0x198] sm:$0xff] }
  0x55   :  { %2278 = vmatprep.mubr.bf16.mxu1 %v3277_v62  ;;  %v4304_v61 = vld [vmem:[%s5523_s1 + $0x218] sm:$0xff]  }
  0x56   :  { %v74_v62 = vld [vmem:[%s5524_s0 + $0x1d8] sm:$0xff] }
  0x5b   :  { %2159 = vmatmul.mubr.bf16.gmra.mrb[28].mxu0 %v3274_v4  ;;  %v3215_v4 = vcombine.high %v65_v57, %v73_v59  ;;  %v154_v57 = vld [vmem:[%s5524_s0 + $0x458] sm:$0xff] }
  0x5c   :  { %2279 = vmatmul.mubr.bf16.gmra.mrb[28].mxu1 %v3276_v5  ;;  %2166 = vmatprep.mubr.bf16.mxu0 %v3291_v6  ;;  %v4308_v5 = vld [vmem:[%s5523_s1 + $0x220] sm:$0xff]   ;;  %v3217_v6 = vcombine.high %v66_v60, %v74_v62 }
  0x5d   :  { %2286 = vmatprep.mubr.bf16.mxu1 %v3293_v7  ;;  %v4310_v7 = vld [vmem:[%s5523_s1 + $0x2a0] sm:$0xff]  }
  0x63   :  { %2167 = vmatmul.mubr.bf16.gmra.mrb[32].mxu0 %v3290_v12  ;;  %v82_v12 = vld [vmem:[%s5524_s0 + $0x218] sm:$0xff] }
  0x64   :  { %2287 = vmatmul.mubr.bf16.gmra.mrb[32].mxu1 %v3292_v13  ;;  %2174 = vmatprep.mubr.bf16.mxu0 %v3307_v14  ;;  %v90_v13 = vld [vmem:[%s5524_s0 + $0x258] sm:$0xff]  ;;  %v4312_v14 = vld [vmem:[%s5523_s1 + $0x228] sm:$0xff]  }
  0x65   :  { %2294 = vmatprep.mubr.bf16.mxu1 %v3309_v15  ;;  %v4314_v15 = vld [vmem:[%s5523_s1 + $0x2a8] sm:$0xff]  }
  0x6b   :  { %2175 = vmatmul.mubr.bf16.gmra.mrb[36].mxu0 %v3306_v18  ;;  %v4317_v18 = vld [vmem:[%s5523_s1 + $0x2f0] sm:$0xff]  }
  0x6c   :  { %2295 = vmatmul.mubr.bf16.gmra.mrb[36].mxu1 %v3308_v19  ;;  %2182 = vmatprep.mubr.bf16.mxu0 %v3323_v20  ;;  %v3216_v19 = vcombine.low %v66_v60, %v74_v62  ;;  %v3231_v20 = vcombine.high %v81_v9, %v89_v11  ;;  %v161_v62 = vld [vmem:[%s5524_s0 + $0x490] sm:$0xff] }
  0x6d   :  { %2302 = vmatprep.mubr.bf16.mxu1 %v3325_v21  ;;  %v3233_v21 = vcombine.high %v82_v12, %v90_v13 }
  0x73   :  { %2183 = vmatmul.mubr.bf16.gmra.mrb[40].mxu0 %v3322_v26  ;;  %v105_v26 = vld [vmem:[%s5524_s0 + $0x2d0] sm:$0xff] }
  0x74   :  { %2303 = vmatmul.mubr.bf16.gmra.mrb[40].mxu1 %v3324_v27  ;;  %2342 = vmatprep.mubr.bf16.mxu0 %v3167_v28  ;;  %v4323_v27 = vld [vmem:[%s5523_s1 + $0x2f8] sm:$0xff]  }
  0x75   :  { %2462 = vmatprep.mubr.bf16.mxu1 %v3169_v29  ;;  %v98_v28 = vld [vmem:[%s5524_s0 + $0x298] sm:$0xff] }
  0x76   :  { %v4320_v29 = vld [vmem:[%s5523_s1 + $0x238] sm:$0xff]  }
  0x7b   :  { %2343 = vmatmul.mubr.bf16.vlgmr.msra.gmra.mrb[44].mxu0 %v3166_v33  ;;  %v3230_v33 = vcombine.low %v81_v9, %v89_v11 }
  0x7c   :  { %2463 = vmatmul.mubr.bf16.vlgmr.msra.gmra.mrb[44].mxu1 %v3168_v35  ;;  %3896 = vmatpush3.bf16.msra.mxu0 %v4292_v36  ;;  %v3232_v35 = vcombine.low %v82_v12, %v90_v13  ;;  %v3247_v36 = vcombine.high %v97_v25, %v105_v26  ;;  %v19_v12 = vld [vmem:[%s5524_s0 + $0x20] sm:$0xff] }
  0x7d   :  { %3978 = vmatpush3.bf16.msra.mxu1 %v4294_v37  ;;  %2350 = vmatprep.mubr.bf16.mxu0 %v3183_v38  ;;  %v3249_v37 = vcombine.high %v98_v28, %v106_v30  ;;  %v113_v38 = vld [vmem:[%s5524_s0 + $0x310] sm:$0xff]  ;;  %v27_v13 = vld [vmem:[%s5524_s0 + $0x60] sm:$0xff] }
  0x7e   :  { %2470 = vmatprep.mubr.bf16.mxu1 %v3185_v40  ;;  %3897 = vmatprep.subr.bf16.mxu0 %v4295_v39  ;;  %v121_v39 = vld [vmem:[%s5524_s0 + $0x350] sm:$0xff]  ;;  %v114_v40 = vld [vmem:[%s5524_s0 + $0x318] sm:$0xff] }
  0x7f   :  { %3979 = vmatprep.subr.bf16.mxu1 %v4297_v42  ;;  %v3246_v42 = vcombine.low %v97_v25, %v105_v26  ;;  %v3263_v44 = vcombine.high %v113_v38, %v121_v39  ;;  %v4328_v26 = vld [vmem:[%s5523_s1 + $0x300] sm:$0xff]  }
  0x80   :  { %3898 = vmatpush3.bf16.msra.mxu0 %v4296_v41  ;;  %v122_v41 = vld [vmem:[%s5524_s0 + $0x358] sm:$0xff] }
  0x81   :  { %3980 = vmatpush3.bf16.msra.mxu1 %v4298_v43  ;;  %3899 = vmatprep.subr.bf16.mxu0 %v4299_v48  ;;  %v3248_v43 = vcombine.low %v98_v28, %v106_v30  ;;  %v3265_v45 = vcombine.high %v114_v40, %v122_v41  ;;  %v130_v48 = vld [vmem:[%s5524_s0 + $0x398] sm:$0xff]  ;;  %v4331_v30 = vld [vmem:[%s5523_s1 + $0x348] sm:$0xff]  }
  0x82   :  { %3981 = vmatprep.subr.bf16.mxu1 %v4301_v49  ;;  %v138_v49 = vld [vmem:[%s5524_s0 + $0x3d8] sm:$0xff] }
  0x83   :  { %2351 = vmatmul.mubr.bf16.gmra.mrb[48].mxu0 %v3182_v50  ;;  %v3262_v50 = vcombine.low %v113_v38, %v121_v39  ;;  %v3280_v59 = vcombine.low %v130_v48, %v138_v49  ;;  %v60_v38 = vld [vmem:[%s5524_s0 + $0x168] sm:$0xff]  ;;  %v4337_v39 = vld [vmem:[%s5523_s1 + $0x3d0] sm:$0xff]  }
  0x84   :  { %2471 = vmatmul.mubr.bf16.gmra.mrb[48].mxu1 %v3184_v51  ;;  %2358 = vmatprep.mubr.bf16.mxu0 %v3199_v52  ;;  %v3264_v51 = vcombine.low %v114_v40, %v122_v41  ;;  %v3279_v52 = vcombine.high %v129_v46, %v137_v47 }
  0x85   :  { %2478 = vmatprep.mubr.bf16.mxu1 %v3201_v53  ;;  %3900 = vmatpush3.bf16.msra.mxu0 %v4300_v54  ;;  %v3281_v53 = vcombine.high %v130_v48, %v138_v49  ;;  %v145_v54 = vld [vmem:[%s5524_s0 + $0x410] sm:$0xff]  ;;  %v67_v48 = vld [vmem:[%s5524_s0 + $0x1a0] sm:$0xff] }
  0x86   :  { %3982 = vmatpush3.bf16.msra.mxu1 %v4302_v55  ;;  %3901 = vmatprep.subr.bf16.mxu0 %v4303_v56  ;;  %v153_v55 = vld [vmem:[%s5524_s0 + $0x450] sm:$0xff]  ;;  %v146_v56 = vld [vmem:[%s5524_s0 + $0x418] sm:$0xff]  ;;  %v75_v49 = vld [vmem:[%s5524_s0 + $0x1e0] sm:$0xff] }
  0x87   :  { %3983 = vmatprep.subr.bf16.mxu1 %v4305_v58  ;;  %v3278_v58 = vcombine.low %v129_v46, %v137_v47  ;;  %v3295_v60 = vcombine.high %v145_v54, %v153_v55  ;;  %v4339_v46 = vld [vmem:[%s5523_s1 + $0x358] sm:$0xff]  }
  0x88   :  { %v4341_v47 = vld [vmem:[%s5523_s1 + $0x3d8] sm:$0xff]  }
  0x89   :  { %3902 = vmatpush3.bf16.msra.mxu0 %v4304_v61  ;;  %v3297_v61 = vcombine.high %v146_v56, %v154_v57 }
  0x8a   :  { %3984 = vmatpush3.bf16.msra.mxu1 %v4306_v63  ;;  %3903 = vmatprep.subr.bf16.mxu0 %v4307_v0  ;;  %v169_v63 = vld [vmem:[%s5524_s0 + $0x4d0] sm:$0xff]  ;;  %v162_v0 = vld [vmem:[%s5524_s0 + $0x498] sm:$0xff] }
  0x8b   :  { %2359 = vmatmul.mubr.bf16.gmra.mrb[52].mxu0 %v3198_v1  ;;  %3985 = vmatprep.subr.bf16.mxu1 %v4309_v2  ;;  %v170_v1 = vld [vmem:[%s5524_s0 + $0x4d8] sm:$0xff]  ;;  %v3294_v2 = vcombine.low %v145_v54, %v153_v55  ;;  %v4343_v54 = vld [vmem:[%s5523_s1 + $0x360] sm:$0xff]  }
  0x8c   :  { %2479 = vmatmul.mubr.bf16.gmra.mrb[52].mxu1 %v3200_v3  ;;  %2366 = vmatprep.mubr.bf16.mxu0 %v3215_v4  ;;  %v3296_v3 = vcombine.low %v146_v56, %v154_v57  ;;  %v3311_v4 = vcombine.high %v161_v62, %v169_v63  ;;  %v3312_v9 = vcombine.low %v162_v0, %v170_v1  ;;  %v4345_v56 = vld [vmem:[%s5523_s1 + $0x3e0] sm:$0xff]  }
  0x8d   :  { %2486 = vmatprep.mubr.bf16.mxu1 %v3217_v6  ;;  %3904 = vmatpush3.bf16.msra.mxu0 %v4308_v5  ;;  %v3313_v5 = vcombine.high %v162_v0, %v170_v1  ;;  %v177_v6 = vld [vmem:[%s5524_s0 + $0x510] sm:$0xff]  ;;  %v83_v0 = vld [vmem:[%s5524_s0 + $0x220] sm:$0xff] }
  0x8e   :  { %3986 = vmatpush3.bf16.msra.mxu1 %v4310_v7  ;;  %3905 = vmatprep.subr.bf16.mxu0 %v4311_v8  ;;  %v178_v7 = vld [vmem:[%s5524_s0 + $0x518] sm:$0xff]  ;;  %v3310_v8 = vcombine.low %v161_v62, %v169_v63  ;;  %v4347_v62 = vld [vmem:[%s5523_s1 + $0x368] sm:$0xff]   ;;  %v91_v1 = vld [vmem:[%s5524_s0 + $0x260] sm:$0xff] }
  0x8f   :  { %3987 = vmatprep.subr.bf16.mxu1 %v4313_v10  ;;  %v3327_v10 = vcombine.high %v177_v6, %v177_v6  ;;  %v3329_v11 = vcombine.high %v178_v7, %v178_v7  ;;  %v4349_v63 = vld [vmem:[%s5523_s1 + $0x3e8] sm:$0xff]  }
  0x91   :  { %3906 = vmatpush3.bf16.msra.mxu0 %v4312_v14  ;;  %v20_v14 = vld [vmem:[%s5524_s0 + $0x28] sm:$0xff] }
  0x92   :  { %3988 = vmatpush3.bf16.msra.mxu1 %v4314_v15  ;;  %3907 = vmatprep.subr.bf16.mxu0 %v4315_v16  ;;  %v28_v15 = vld [vmem:[%s5524_s0 + $0x68] sm:$0xff]  ;;  %v3326_v16 = vcombine.low %v177_v6, %v177_v6  ;;  %v4351_v6 = vld [vmem:[%s5523_s1 + $0x370] sm:$0xff]  }
  0x93   :  { %2367 = vmatmul.mubr.bf16.gmra.mrb[56].mxu0 %v3214_v17  ;;  %3989 = vmatprep.subr.bf16.mxu1 %v4317_v18  ;;  %v3328_v17 = vcombine.low %v178_v7, %v178_v7  ;;  %v3171_v18 = vcombine.high %v19_v12, %v27_v13  ;;  %v3172_v25 = vcombine.low %v20_v14, %v28_v15 }
  0x94   :  { %2487 = vmatmul.mubr.bf16.gmra.mrb[56].mxu1 %v3216_v19  ;;  %2374 = vmatprep.mubr.bf16.mxu0 %v3231_v20  ;;  %v3173_v19 = vcombine.high %v20_v14, %v28_v15  ;;  %v35_v20 = vld [vmem:[%s5524_s0 + $0xa0] sm:$0xff]  ;;  %v3218_v7 = vcombine.low %v67_v48, %v75_v49  ;;  %v4355_v14 = vld [vmem:[%s5523_s1 + $0x378] sm:$0xff]  }
  0x95   :  { %2494 = vmatprep.mubr.bf16.mxu1 %v3233_v21  ;;  %3908 = vmatpush3.bf16.msra.mxu0 %v4316_v22  ;;  %v43_v21 = vld [vmem:[%s5524_s0 + $0xe0] sm:$0xff]  ;;  %v3170_v22 = vcombine.low %v19_v12, %v27_v13  ;;  %v4352_v12 = vld [vmem:[%s5523_s1 + $0x330] sm:$0xff]   ;;  %v4359_v15 = vld [vmem:[%s5523_s1 + $0x3f8] sm:$0xff]  }
  0x96   :  { %3990 = vmatpush3.bf16.msra.mxu1 %v4318_v23  ;;  %3909 = vmatprep.subr.bf16.mxu0 %v4319_v24  ;;  %v36_v23 = vld [vmem:[%s5524_s0 + $0xa8] sm:$0xff]  ;;  %v3187_v28 = vcombine.high %v35_v20, %v43_v21  ;;  %v3186_v40 = vcombine.low %v35_v20, %v43_v21  ;;  %v4354_v13 = vld [vmem:[%s5523_s1 + $0x3b0] sm:$0xff]   ;;  %v4362_v21 = vld [vmem:[%s5523_s1 + $0x3b8] sm:$0xff]  }
  0x97   :  { %3991 = vmatprep.subr.bf16.mxu1 %v4323_v27  ;;  %v44_v24 = vld [vmem:[%s5524_s0 + $0xe8] sm:$0xff]  ;;  %v4330_v27 = vld [vmem:[%s5523_s1 + $0x380] sm:$0xff]  }
  0x98   :  { %v3188_v41 = vcombine.low %v36_v23, %v44_v24  ;;  %v108_v20 = vld [vmem:[%s5524_s0 + $0x2e8] sm:$0xff] }
  0x99   :  { %3910 = vmatpush3.bf16.msra.mxu0 %v4320_v29  ;;  %v3189_v29 = vcombine.high %v36_v23, %v44_v24 }
  0x9a   :  { %3992 = vmatpush3.bf16.msra.mxu1 %v4326_v31  ;;  %4059 = vmatprep.subr.bf16.mxu0 %v4327_v32  ;;  %v4333_v31 = vld [vmem:[%s5523_s1 + $0x3c8] sm:$0xff]  }
  0x9b   :  { %2375 = vmatmul.mubr.bf16.gmra.mrb[60].mxu0 %v3230_v33  ;;  %4141 = vmatprep.subr.bf16.mxu1 %v4329_v34  ;;  %v4332_v32 = vld [vmem:[%s5523_s1 + $0x308] sm:$0xff]   ;;  %v51_v34 = vld [vmem:[%s5524_s0 + $0x120] sm:$0xff] }
  0x9c   :  { %2495 = vmatmul.mubr.bf16.gmra.mrb[60].mxu1 %v3232_v35  ;;  %2382 = vmatprep.mubr.bf16.mxu0 %v3247_v36  ;;  %v4334_v33 = vld [vmem:[%s5523_s1 + $0x388] sm:$0xff]   ;;  %v59_v35 = vld [vmem:[%s5524_s0 + $0x160] sm:$0xff]  ;;  %v4335_v36 = vld [vmem:[%s5523_s1 + $0x350] sm:$0xff]  }
  0x9d   :  { %2502 = vmatprep.mubr.bf16.mxu1 %v3249_v37  ;;  %v52_v37 = vld [vmem:[%s5524_s0 + $0x128] sm:$0xff]  ;;  %v3202_v55 = vcombine.low %v51_v34, %v59_v35 }
  0x9e   :  { %v3204_v57 = vcombine.low %v52_v37, %v60_v38 }
  0xa3   :  { %2383 = vmatmul.mubr.bf16.gmra.mrb[64].mxu0 %v3246_v42  ;;  %v3203_v42 = vcombine.high %v51_v34, %v59_v35 }
  0xa4   :  { %2503 = vmatmul.mubr.bf16.gmra.mrb[64].mxu1 %v3248_v43  ;;  %2390 = vmatprep.mubr.bf16.mxu0 %v3263_v44  ;;  %v3205_v43 = vcombine.high %v52_v37, %v60_v38  ;;  %v4336_v44 = vld [vmem:[%s5523_s1 + $0x310] sm:$0xff]  }
  0xa5   :  { %2510 = vmatprep.mubr.bf16.mxu1 %v3265_v45  ;;  %v4338_v45 = vld [vmem:[%s5523_s1 + $0x390] sm:$0xff]  }
  0xab   :  { %2391 = vmatmul.mubr.bf16.gmra.mrb[68].mxu0 %v3262_v50  ;;  %v68_v50 = vld [vmem:[%s5524_s0 + $0x1a8] sm:$0xff] }
  0xac   :  { %2511 = vmatmul.mubr.bf16.gmra.mrb[68].mxu1 %v3264_v51  ;;  %2398 = vmatprep.mubr.bf16.mxu0 %v3279_v52  ;;  %v4340_v51 = vld [vmem:[%s5523_s1 + $0x318] sm:$0xff]   ;;  %v76_v52 = vld [vmem:[%s5524_s0 + $0x1e8] sm:$0xff] }
  0xad   :  { %2518 = vmatprep.mubr.bf16.mxu1 %v3281_v53  ;;  %v4342_v53 = vld [vmem:[%s5523_s1 + $0x398] sm:$0xff]  }
  0xb3   :  { %2399 = vmatmul.mubr.bf16.gmra.mrb[72].mxu0 %v3278_v58  ;;  %v3219_v58 = vcombine.high %v67_v48, %v75_v49 }
  0xb4   :  { %2519 = vmatmul.mubr.bf16.gmra.mrb[72].mxu1 %v3280_v59  ;;  %2406 = vmatprep.mubr.bf16.mxu0 %v3295_v60  ;;  %v3221_v59 = vcombine.high %v68_v50, %v76_v52  ;;  %v4344_v60 = vld [vmem:[%s5523_s1 + $0x320] sm:$0xff]  }
  0xb5   :  { %2526 = vmatprep.mubr.bf16.mxu1 %v3297_v61  ;;  %v4346_v61 = vld [vmem:[%s5523_s1 + $0x3a0] sm:$0xff]  }
  0xbb   :  { %2407 = vmatmul.mubr.bf16.gmra.mrb[76].mxu0 %v3294_v2  ;;  %v84_v2 = vld [vmem:[%s5524_s0 + $0x228] sm:$0xff] }
  0xbc   :  { %2527 = vmatmul.mubr.bf16.gmra.mrb[76].mxu1 %v3296_v3  ;;  %2414 = vmatprep.mubr.bf16.mxu0 %v3311_v4  ;;  %v4348_v3 = vld [vmem:[%s5523_s1 + $0x328] sm:$0xff]  }
  0xbd   :  { %2534 = vmatprep.mubr.bf16.mxu1 %v3313_v5  ;;  %v92_v4 = vld [vmem:[%s5524_s0 + $0x268] sm:$0xff] }
  0xbe   :  { %v4350_v5 = vld [vmem:[%s5523_s1 + $0x3a8] sm:$0xff]   ;;  %v3236_v23 = vcombine.low %v84_v2, %v92_v4 }
  0xc3   :  { %2415 = vmatmul.mubr.bf16.gmra.mrb[80].mxu0 %v3310_v8  ;;  %v4353_v8 = vld [vmem:[%s5523_s1 + $0x3f0] sm:$0xff]  }
  0xc4   :  { %2535 = vmatmul.mubr.bf16.gmra.mrb[80].mxu1 %v3312_v9  ;;  %2422 = vmatprep.mubr.bf16.mxu0 %v3327_v10  ;;  %v3220_v9 = vcombine.low %v68_v50, %v76_v52  ;;  %v3235_v10 = vcombine.high %v83_v0, %v91_v1  ;;  %v131_v50 = vld [vmem:[%s5524_s0 + $0x3a0] sm:$0xff] }
  0xc5   :  { %2542 = vmatprep.mubr.bf16.mxu1 %v3329_v11  ;;  %v3237_v11 = vcombine.high %v84_v2, %v92_v4 }
  0xcb   :  { %2423 = vmatmul.mubr.bf16.gmra.mrb[84].mxu0 %v3326_v16  ;;  %v99_v16 = vld [vmem:[%s5524_s0 + $0x2a0] sm:$0xff] }
  0xcc   :  { %2543 = vmatmul.mubr.bf16.gmra.mrb[84].mxu1 %v3328_v17  ;;  %2582 = vmatprep.mubr.bf16.mxu0 %v3171_v18  ;;  %v107_v17 = vld [vmem:[%s5524_s0 + $0x2e0] sm:$0xff]  ;;  %v4356_v18 = vld [vmem:[%s5523_s1 + $0x338] sm:$0xff]  }
  0xcd   :  { %2702 = vmatprep.mubr.bf16.mxu1 %v3173_v19  ;;  %v100_v19 = vld [vmem:[%s5524_s0 + $0x2a8] sm:$0xff]  ;;  %v3251_v24 = vcombine.high %v99_v16, %v107_v17  ;;  %v3250_v34 = vcombine.low %v99_v16, %v107_v17 }
  0xce   :  { %v3252_v38 = vcombine.low %v100_v19, %v108_v20 }
  0xd3   :  { %2583 = vmatmul.mubr.bf16.vlgmr.msra.gmra.mrb[88].mxu0 %v3170_v22  ;;  %v3234_v22 = vcombine.low %v83_v0, %v91_v1 }
  0xd4   :  { %2703 = vmatmul.mubr.bf16.vlgmr.msra.gmra.mrb[88].mxu1 %v3172_v25  ;;  %4060 = vmatpush3.bf16.msra.mxu0 %v4328_v26  ;;  %v3253_v25 = vcombine.high %v100_v19, %v108_v20  ;;  %v115_v26 = vld [vmem:[%s5524_s0 + $0x320] sm:$0xff] }
  0xd5   :  { %4142 = vmatpush3.bf16.msra.mxu1 %v4330_v27  ;;  %2590 = vmatprep.mubr.bf16.mxu0 %v3187_v28  ;;  %v123_v27 = vld [vmem:[%s5524_s0 + $0x360] sm:$0xff] }
  0xd6   :  { %2710 = vmatprep.mubr.bf16.mxu1 %v3189_v29  ;;  %4061 = vmatprep.subr.bf16.mxu0 %v4331_v30  ;;  %v116_v29 = vld [vmem:[%s5524_s0 + $0x328] sm:$0xff] }
  0xd7   :  { %4143 = vmatprep.subr.bf16.mxu1 %v4333_v31  ;;  %v124_v30 = vld [vmem:[%s5524_s0 + $0x368] sm:$0xff] }
  0xd8   :  { %4062 = vmatpush3.bf16.msra.mxu0 %v4332_v32  ;;  %v5110_v32 = vld [vmem:[%s5525_s2] ss:$0 sm:$0xff] }
  0xd9   :  { %4144 = vmatpush3.bf16.msra.mxu1 %v4334_v33  ;;  %4063 = vmatprep.subr.bf16.mxu0 %v4335_v36 }
  0xda   :  { %4145 = vmatprep.subr.bf16.mxu1 %v4337_v39  ;;  %v3267_v39 = vcombine.high %v115_v26, %v123_v27 }
  0xdb   :  { %2591 = vmatmul.mubr.bf16.gmra.mrb[92].mxu0 %v3186_v40 }
  0xdc   :  { %2711 = vmatmul.mubr.bf16.gmra.mrb[92].mxu1 %v3188_v41  ;;  %2598 = vmatprep.mubr.bf16.mxu0 %v3203_v42 }
  0xdd   :  { %2718 = vmatprep.mubr.bf16.mxu1 %v3205_v43  ;;  %4064 = vmatpush3.bf16.msra.mxu0 %v4336_v44  ;;  %v3269_v43 = vcombine.high %v116_v29, %v124_v30 }
  0xde   :  { %4146 = vmatpush3.bf16.msra.mxu1 %v4338_v45  ;;  %4065 = vmatprep.subr.bf16.mxu0 %v4339_v46 }
  0xdf   :  { %4147 = vmatprep.subr.bf16.mxu1 %v4341_v47 }
  0xe1   :  { %4066 = vmatpush3.bf16.msra.mxu0 %v4340_v51  ;;  %v139_v51 = vld [vmem:[%s5524_s0 + $0x3e0] sm:$0xff] }
  0xe2   :  { %4148 = vmatpush3.bf16.msra.mxu1 %v4342_v53  ;;  %4067 = vmatprep.subr.bf16.mxu0 %v4343_v54  ;;  %v132_v54 = vld [vmem:[%s5524_s0 + $0x3a8] sm:$0xff] }
  0xe3   :  { %2599 = vmatmul.mubr.bf16.gmra.mrb[96].mxu0 %v3202_v55  ;;  %4149 = vmatprep.subr.bf16.mxu1 %v4345_v56  ;;  %v140_v55 = vld [vmem:[%s5524_s0 + $0x3e8] sm:$0xff] }
  0xe4   :  { %2719 = vmatmul.mubr.bf16.gmra.mrb[96].mxu1 %v3204_v57  ;;  %2606 = vmatprep.mubr.bf16.mxu0 %v3219_v58  ;;  %v3266_v58 = vcombine.low %v115_v26, %v123_v27 }
  0xe5   :  { %2726 = vmatprep.mubr.bf16.mxu1 %v3221_v59  ;;  %4068 = vmatpush3.bf16.msra.mxu0 %v4344_v60 }
  0xe6   :  { %4150 = vmatpush3.bf16.msra.mxu1 %v4346_v61  ;;  %4069 = vmatprep.subr.bf16.mxu0 %v4347_v62  ;;  %v3268_v62 = vcombine.low %v116_v29, %v124_v30 }
  0xe7   :  { %4151 = vmatprep.subr.bf16.mxu1 %v4349_v63  ;;  %v3283_v63 = vcombine.high %v131_v50, %v139_v51 }
  0xe9   :  { %4070 = vmatpush3.bf16.msra.mxu0 %v4348_v3  ;;  %v3285_v3 = vcombine.high %v132_v54, %v140_v55 }
  0xea   :  { %4152 = vmatpush3.bf16.msra.mxu1 %v4350_v5  ;;  %4071 = vmatprep.subr.bf16.mxu0 %v4351_v6 }
  0xeb   :  { %2607 = vmatmul.mubr.bf16.gmra.mrb[100].mxu0 %v3218_v7  ;;  %4153 = vmatprep.subr.bf16.mxu1 %v4353_v8 }
  0xec   :  { %2727 = vmatmul.mubr.bf16.gmra.mrb[100].mxu1 %v3220_v9  ;;  %2614 = vmatprep.mubr.bf16.mxu0 %v3235_v10  ;;  %v147_v10 = vld [vmem:[%s5524_s0 + $0x420] sm:$0xff] }
  0xed   :  { %2734 = vmatprep.mubr.bf16.mxu1 %v3237_v11  ;;  %4072 = vmatpush3.bf16.msra.mxu0 %v4352_v12  ;;  %v155_v11 = vld [vmem:[%s5524_s0 + $0x460] sm:$0xff] }
  0xee   :  { %4154 = vmatpush3.bf16.msra.mxu1 %v4354_v13  ;;  %4073 = vmatprep.subr.bf16.mxu0 %v4355_v14  ;;  %v148_v14 = vld [vmem:[%s5524_s0 + $0x428] sm:$0xff] }
  0xef   :  { %4155 = vmatprep.subr.bf16.mxu1 %v4359_v15  ;;  %v156_v15 = vld [vmem:[%s5524_s0 + $0x468] sm:$0xff] }
  0xf0   :  { %v3301_v27 = vcombine.high %v148_v14, %v156_v15 }
  0xf1   :  { %4074 = vmatpush3.bf16.msra.mxu0 %v4356_v18  ;;  %v3282_v18 = vcombine.low %v131_v50, %v139_v51 }
  0xf2   :  { %4156 = vmatpush3.bf16.msra.mxu1 %v4362_v21 }
  0xf3   :  { %2615 = vmatmul.mubr.bf16.gmra.mrb[104].mxu0 %v3234_v22  ;;  %v3284_v22 = vcombine.low %v132_v54, %v140_v55 }
  0xf4   :  { %2735 = vmatmul.mubr.bf16.gmra.mrb[104].mxu1 %v3236_v23  ;;  %2622 = vmatprep.mubr.bf16.mxu0 %v3251_v24  ;;  %v3299_v23 = vcombine.high %v147_v10, %v155_v11 }
  0xf5   :  { %2742 = vmatprep.mubr.bf16.mxu1 %v3253_v25 }
  0xf6   :  { %v3583_v28 = vpop.f32.mrb[0].mxu0 }
  0xf7   :  { %v3665_v31 = vpop.f32.mrb[0].mxu1  ;;  %v3584_v33 = vpop.f32.mrb[1].mxu0 }
  0xf8   :  { %v3585_v35 = vadd.f32 %v3584_v33, %v3583_v28  ;;  %v3666_v36 = vpop.f32.mrb[1].mxu1  ;;  %v3586_v37 = vpop.f32.mrb[2].mxu0 }
  0xf9   :  { %v3667_v40 = vadd.f32 %v3666_v36, %v3665_v31  ;;  %v3668_v41 = vpop.f32.mrb[2].mxu1  ;;  %v3587_v42 = vpop.f32.mrb[3].mxu0  ;;  %v171_v36 = vld [vmem:[%s5524_s0 + $0x4e0] sm:$0xff] }
  0xfa   :  { %v2105_v44 = vadd.f32 %v3585_v35, %v5110_v32  ;;  %v3588_v45 = vadd.f32 %v3587_v42, %v3586_v37  ;;  %v3669_v46 = vpop.f32.mrb[3].mxu1  ;;  %v163_v35 = vld [vmem:[%s5524_s0 + $0x4a0] sm:$0xff] }
  0xfb   :  { %v3670_v47 = vadd.f32 %v3669_v46, %v3668_v41  ;;  %2623 = vmatmul.mubr.bf16.gmra.mrb[108].mxu0 %v3250_v34 }
  0xfc   :  { %v5113_v48 = vadd.f32 %v3667_v40, %v2105_v44  ;;  %v2108_v49 = vadd.f32 %v3588_v45, %v5110_v32  ;;  %2743 = vmatmul.mubr.bf16.gmra.mrb[108].mxu1 %v3252_v38  ;;  %2630 = vmatprep.mubr.bf16.mxu0 %v3267_v39  ;;  %v164_v39 = vld [vmem:[%s5524_s0 + $0x4a8] sm:$0xff] }
  0xfd   :  { %2750 = vmatprep.mubr.bf16.mxu1 %v3269_v43  ;;  %v172_v40 = vld [vmem:[%s5524_s0 + $0x4e8] sm:$0xff]  ;;  %v3298_v43 = vcombine.low %v147_v10, %v155_v11 }
  0xfe   :  { %v5122_v52 = vadd.f32 %v3670_v47, %v2108_v49  ;;  %v3589_v53 = vpop.f32.mrb[4].mxu0  ;;  %v3300_v47 = vcombine.low %v148_v14, %v156_v15  ;;  %v3315_v49 = vcombine.high %v163_v35, %v171_v36  ;;  %v3317_v54 = vcombine.high %v164_v39, %v172_v40 }
  0xff   :  { %v3671_v56 = vpop.f32.mrb[4].mxu1  ;;  %v3590_v57 = vpop.f32.mrb[5].mxu0 }
 0x100   :  { %v3591_v59 = vadd.f32 %v3590_v57, %v3589_v53  ;;  %v3672_v60 = vpop.f32.mrb[5].mxu1  ;;  %v3592_v61 = vpop.f32.mrb[6].mxu0 }
 0x101   :  { %v3673_v0 = vadd.f32 %v3672_v60, %v3671_v56  ;;  %v3674_v1 = vpop.f32.mrb[6].mxu1  ;;  %v3593_v2 = vpop.f32.mrb[7].mxu0 }
 0x102   :  { %v2113_v4 = vadd.f32 %v3591_v59, %v5110_v32  ;;  %v3594_v5 = vadd.f32 %v3593_v2, %v3592_v61  ;;  %v3675_v6 = vpop.f32.mrb[7].mxu1  ;;  %v179_v61 = vld [vmem:[%s5524_s0 + $0x520] sm:$0xff] }
 0x103   :  { %v3676_v7 = vadd.f32 %v3675_v6, %v3674_v1  ;;  %2631 = vmatmul.mubr.bf16.gmra.mrb[112].mxu0 %v3266_v58 }
 0x104   :  { %v5131_v8 = vadd.f32 %v3673_v0, %v2113_v4  ;;  %v2116_v9 = vadd.f32 %v3594_v5, %v5110_v32  ;;  %2751 = vmatmul.mubr.bf16.gmra.mrb[112].mxu1 %v3268_v62  ;;  %2638 = vmatprep.mubr.bf16.mxu0 %v3283_v63  ;;  %v180_v0 = vld [vmem:[%s5524_s0 + $0x528] sm:$0xff] }
 0x105   :  { %2758 = vmatprep.mubr.bf16.mxu1 %v3285_v3  ;;  %v3314_v3 = vcombine.low %v163_v35, %v171_v36  ;;  %v3333_v14 = vcombine.high %v180_v0, %v180_v0  ;;  %v3332_v35 = vcombine.low %v180_v0, %v180_v0 }
 0x106   :  { %v5140_v12 = vadd.f32 %v3676_v7, %v2116_v9  ;;  %v3595_v13 = vpop.f32.mrb[8].mxu0  ;;  %v3316_v7 = vcombine.low %v164_v39, %v172_v40  ;;  %v3331_v9 = vcombine.high %v179_v61, %v179_v61 }
 0x107   :  { %v3677_v16 = vpop.f32.mrb[8].mxu1  ;;  %v3596_v17 = vpop.f32.mrb[9].mxu0 }
 0x108   :  { %v3597_v19 = vadd.f32 %v3596_v17, %v3595_v13  ;;  %v3678_v20 = vpop.f32.mrb[9].mxu1  ;;  %v3598_v21 = vpop.f32.mrb[10].mxu0 }
 0x109   :  { %v3679_v24 = vadd.f32 %v3678_v20, %v3677_v16  ;;  %v3680_v25 = vpop.f32.mrb[10].mxu1  ;;  %v3599_v26 = vpop.f32.mrb[11].mxu0 }
 0x10a   :  { %v2121_v28 = vadd.f32 %v3597_v19, %v5110_v32  ;;  %v3600_v29 = vadd.f32 %v3599_v26, %v3598_v21  ;;  %v3681_v30 = vpop.f32.mrb[11].mxu1  ;;  %v21_v21 = vld [vmem:[%s5524_s0 + $0x30] sm:$0xff]  ;;  %v30_v26 = vld [vmem:[%s5524_s0 + $0x78] sm:$0xff] }
 0x10b   :  { %v3682_v31 = vadd.f32 %v3681_v30, %v3680_v25  ;;  %2639 = vmatmul.mubr.bf16.gmra.mrb[116].mxu0 %v3282_v18  ;;  %v22_v25 = vld [vmem:[%s5524_s0 + $0x38] sm:$0xff] }
 0x10c   :  { %v5149_v33 = vadd.f32 %v3679_v24, %v2121_v28  ;;  %v2124_v34 = vadd.f32 %v3600_v29, %v5110_v32  ;;  %2759 = vmatmul.mubr.bf16.gmra.mrb[116].mxu1 %v3284_v22  ;;  %2646 = vmatprep.mubr.bf16.mxu0 %v3299_v23  ;;  %v29_v22 = vld [vmem:[%s5524_s0 + $0x70] sm:$0xff]  ;;  %v3330_v29 = vcombine.low %v179_v61, %v179_v61 }
 0x10d   :  { %2766 = vmatprep.mubr.bf16.mxu1 %v3301_v27  ;;  %v3175_v36 = vcombine.high %v21_v21, %v29_v22  ;;  %v3176_v0 = vcombine.low %v22_v25, %v30_v26 }
 0x10e   :  { %v5158_v37 = vadd.f32 %v3682_v31, %v2124_v34  ;;  %v3601_v38 = vpop.f32.mrb[12].mxu0 }
 0x10f   :  { %v3683_v41 = vpop.f32.mrb[12].mxu1  ;;  %v3602_v42 = vpop.f32.mrb[13].mxu0 }
 0x110   :  { %v3603_v44 = vadd.f32 %v3602_v42, %v3601_v38  ;;  %v3684_v45 = vpop.f32.mrb[13].mxu1  ;;  %v3604_v46 = vpop.f32.mrb[14].mxu0 }
 0x111   :  { %v3685_v50 = vadd.f32 %v3684_v45, %v3683_v41  ;;  %v3686_v51 = vpop.f32.mrb[14].mxu1  ;;  %v3605_v53 = vpop.f32.mrb[15].mxu0  ;;  %v3177_v41 = vcombine.high %v22_v25, %v30_v26 }
 0x112   :  { %v2129_v55 = vadd.f32 %v3603_v44, %v5110_v32  ;;  %v3606_v56 = vadd.f32 %v3605_v53, %v3604_v46  ;;  %v3687_v57 = vpop.f32.mrb[15].mxu1 }
 0x113   :  { %v3688_v58 = vadd.f32 %v3687_v57, %v3686_v51  ;;  %2647 = vmatmul.mubr.bf16.gmra.mrb[120].mxu0 %v3298_v43 }
 0x114   :  { %v5167_v59 = vadd.f32 %v3685_v50, %v2129_v55  ;;  %v2132_v60 = vadd.f32 %v3606_v56, %v5110_v32  ;;  %2767 = vmatmul.mubr.bf16.gmra.mrb[120].mxu1 %v3300_v47  ;;  %2654 = vmatprep.mubr.bf16.mxu0 %v3315_v49  ;;  %v37_v49 = vld [vmem:[%s5524_s0 + $0xb0] sm:$0xff]  ;;  %v46_v55 = vld [vmem:[%s5524_s0 + $0xf8] sm:$0xff] }
 0x115   :  { %2774 = vmatprep.mubr.bf16.mxu1 %v3317_v54  ;;  %v45_v50 = vld [vmem:[%s5524_s0 + $0xf0] sm:$0xff]  ;;  %v38_v54 = vld [vmem:[%s5524_s0 + $0xb8] sm:$0xff] }
 0x116   :  { %v5173_v62 = vadd.f32 %v3688_v58, %v2132_v60  ;;  %v3607_v63 = vpop.f32.mrb[16].mxu0  ;;  %v3174_v58 = vcombine.low %v21_v21, %v29_v22 }
 0x117   :  { %v3689_v1 = vpop.f32.mrb[16].mxu1  ;;  %v3608_v2 = vpop.f32.mrb[17].mxu0 }
 0x118   :  { %v3609_v4 = vadd.f32 %v3608_v2, %v3607_v63  ;;  %v3690_v5 = vpop.f32.mrb[17].mxu1  ;;  %v3610_v6 = vpop.f32.mrb[18].mxu0 }
 0x119   :  { %v3691_v10 = vadd.f32 %v3690_v5, %v3689_v1  ;;  %v3692_v11 = vpop.f32.mrb[18].mxu1  ;;  %v3611_v13 = vpop.f32.mrb[19].mxu0  ;;  %v3191_v1 = vcombine.high %v37_v49, %v45_v50  ;;  %v3193_v5 = vcombine.high %v38_v54, %v46_v55 }
 0x11a   :  { %v2137_v15 = vadd.f32 %v3609_v4, %v5110_v32  ;;  %v3612_v16 = vadd.f32 %v3611_v13, %v3610_v6  ;;  %v3693_v17 = vpop.f32.mrb[19].mxu1 }
 0x11b   :  { %v3694_v18 = vadd.f32 %v3693_v17, %v3692_v11  ;;  %2655 = vmatmul.mubr.bf16.gmra.mrb[124].mxu0 %v3314_v3 }
 0x11c   :  { %v5179_v19 = vadd.f32 %v3691_v10, %v2137_v15  ;;  %v2140_v20 = vadd.f32 %v3612_v16, %v5110_v32  ;;  %2775 = vmatmul.mubr.bf16.gmra.mrb[124].mxu1 %v3316_v7  ;;  %2662 = vmatprep.mubr.bf16.mxu0 %v3331_v9  ;;  %v61_v15 = vld [vmem:[%s5524_s0 + $0x170] sm:$0xff] }
 0x11d   :  { %2782 = vmatprep.mubr.bf16.mxu1 %v3333_v14  ;;  %v53_v14 = vld [vmem:[%s5524_s0 + $0x130] sm:$0xff] }
 0x11e   :  { %v5188_v23 = vadd.f32 %v3694_v18, %v2140_v20  ;;  %v3613_v24 = vpop.f32.mrb[20].mxu0  ;;  %v54_v18 = vld [vmem:[%s5524_s0 + $0x138] sm:$0xff] }
 0x11f   :  { %v3695_v27 = vpop.f32.mrb[20].mxu1  ;;  %v3614_v28 = vpop.f32.mrb[21].mxu0  ;;  %v62_v20 = vld [vmem:[%s5524_s0 + $0x178] sm:$0xff] }
 0x120   :  { %v3615_v30 = vadd.f32 %v3614_v28, %v3613_v24  ;;  %v3696_v31 = vpop.f32.mrb[21].mxu1  ;;  %v3616_v34 = vpop.f32.mrb[22].mxu0  ;;  %v3190_v24 = vcombine.low %v37_v49, %v45_v50  ;;  %v3192_v28 = vcombine.low %v38_v54, %v46_v55  ;;  %v70_v49 = vld [vmem:[%s5524_s0 + $0x1b8] sm:$0xff]  ;;  %v3206_v55 = vcombine.low %v53_v14, %v61_v15 }
 0x121   :  { %v3697_v38 = vadd.f32 %v3696_v31, %v3695_v27  ;;  %v3698_v39 = vpop.f32.mrb[22].mxu1  ;;  %v3617_v40 = vpop.f32.mrb[23].mxu0  ;;  %v78_v50 = vld [vmem:[%s5524_s0 + $0x1f8] sm:$0xff] }
 0x122   :  { %v2145_v42 = vadd.f32 %v3615_v30, %v5110_v32  ;;  %v3618_v43 = vadd.f32 %v3617_v40, %v3616_v34  ;;  %v3699_v44 = vpop.f32.mrb[23].mxu1 }
 0x123   :  { %v3700_v45 = vadd.f32 %v3699_v44, %v3698_v39  ;;  %2663 = vmatmul.mubr.bf16.gmra.mrb[128].mxu0 %v3330_v29  ;;  %v3207_v29 = vcombine.high %v53_v14, %v61_v15  ;;  %v77_v44 = vld [vmem:[%s5524_s0 + $0x1f0] sm:$0xff] }
 0x124   :  { %v5197_v46 = vadd.f32 %v3697_v38, %v2145_v42  ;;  %v2148_v47 = vadd.f32 %v3618_v43, %v5110_v32  ;;  %2783 = vmatmul.mubr.bf16.gmra.mrb[128].mxu1 %v3332_v35  ;;  %2822 = vmatprep.mubr.bf16.mxu0 %v3175_v36  ;;  %v3209_v35 = vcombine.high %v54_v18, %v62_v20  ;;  %v69_v43 = vld [vmem:[%s5524_s0 + $0x1b0] sm:$0xff] }
 0x125   :  { %2942 = vmatprep.mubr.bf16.mxu1 %v3177_v41 }
 0x126   :  { %v5206_v51 = vadd.f32 %v3700_v45, %v2148_v47  ;;  %v3619_v53 = vpop.f32.mrb[24].mxu0 }
 0x127   :  { %v3701_v56 = vpop.f32.mrb[24].mxu1  ;;  %v3620_v57 = vpop.f32.mrb[25].mxu0 }
 0x128   :  { %v3621_v60 = vadd.f32 %v3620_v57, %v3619_v53  ;;  %v3702_v61 = vpop.f32.mrb[25].mxu1  ;;  %v3622_v63 = vpop.f32.mrb[26].mxu0 }
 0x129   :  { %v3703_v2 = vadd.f32 %v3702_v61, %v3701_v56  ;;  %v3704_v3 = vpop.f32.mrb[26].mxu1  ;;  %v3623_v4 = vpop.f32.mrb[27].mxu0  ;;  %v3223_v61 = vcombine.high %v69_v43, %v77_v44 }
 0x12a   :  { %v2153_v6 = vadd.f32 %v3621_v60, %v5110_v32  ;;  %v3624_v7 = vadd.f32 %v3623_v4, %v3622_v63  ;;  %v3705_v9 = vpop.f32.mrb[27].mxu1  ;;  %v3208_v60 = vcombine.low %v54_v18, %v62_v20  ;;  %v94_v18 = vld [vmem:[%s5524_s0 + $0x278] sm:$0xff] }
 0x12b   :  { %v3706_v10 = vadd.f32 %v3705_v9, %v3704_v3  ;;  %2823 = vmatmul.mubr.bf16.vlgmr.msra.gmra.mrb[132].mxu0 %v3174_v58 }
 0x12c   :  { %v5215_v11 = vadd.f32 %v3703_v2, %v2153_v6  ;;  %v2156_v13 = vadd.f32 %v3624_v7, %v5110_v32  ;;  %2943 = vmatmul.mubr.bf16.vlgmr.msra.gmra.mrb[132].mxu1 %v3176_v0  ;;  %2830 = vmatprep.mubr.bf16.mxu0 %v3191_v1  ;;  %v3225_v2 = vcombine.high %v70_v49, %v78_v50 }
 0x12d   :  { %2950 = vmatprep.mubr.bf16.mxu1 %v3193_v5 }
 0x12e   :  { %v5224_v16 = vadd.f32 %v3706_v10, %v2156_v13  ;;  %v3625_v17 = vpop.f32.mrb[28].mxu0  ;;  %v85_v10 = vld [vmem:[%s5524_s0 + $0x230] sm:$0xff] }
 0x12f   :  { %v3707_v21 = vpop.f32.mrb[28].mxu1  ;;  %v3626_v22 = vpop.f32.mrb[29].mxu0  ;;  %v93_v13 = vld [vmem:[%s5524_s0 + $0x270] sm:$0xff] }
 0x130   :  { %v3627_v25 = vadd.f32 %v3626_v22, %v3625_v17  ;;  %v3708_v26 = vpop.f32.mrb[29].mxu1  ;;  %v3628_v27 = vpop.f32.mrb[30].mxu0  ;;  %v86_v17 = vld [vmem:[%s5524_s0 + $0x238] sm:$0xff]  ;;  %v3222_v22 = vcombine.low %v69_v43, %v77_v44  ;;  %v101_v43 = vld [vmem:[%s5524_s0 + $0x2b0] sm:$0xff] }
 0x131   :  { %v3709_v30 = vadd.f32 %v3708_v26, %v3707_v21  ;;  %v3710_v31 = vpop.f32.mrb[30].mxu1  ;;  %v3629_v34 = vpop.f32.mrb[31].mxu0  ;;  %v109_v44 = vld [vmem:[%s5524_s0 + $0x2f0] sm:$0xff] }
 0x132   :  { %v2161_v36 = vadd.f32 %v3627_v25, %v5110_v32  ;;  %v3630_v38 = vadd.f32 %v3629_v34, %v3628_v27  ;;  %v3711_v39 = vpop.f32.mrb[31].mxu1  ;;  %v3224_v27 = vcombine.low %v70_v49, %v78_v50  ;;  %v3241_v34 = vcombine.high %v86_v17, %v94_v18  ;;  %v102_v50 = vld [vmem:[%s5524_s0 + $0x2b8] sm:$0xff] }
 0x133   :  { %v3712_v40 = vadd.f32 %v3711_v39, %v3710_v31  ;;  %2831 = vmatmul.mubr.bf16.gmra.mrb[136].mxu0 %v3190_v24 }
 0x134   :  { %v5233_v41 = vadd.f32 %v3709_v30, %v2161_v36  ;;  %v2164_v42 = vadd.f32 %v3630_v38, %v5110_v32  ;;  %2951 = vmatmul.mubr.bf16.gmra.mrb[136].mxu1 %v3192_v28  ;;  %2838 = vmatprep.mubr.bf16.mxu0 %v3207_v29  ;;  %v3239_v28 = vcombine.high %v85_v10, %v93_v13 }
 0x135   :  { %2958 = vmatprep.mubr.bf16.mxu1 %v3209_v35 }
 0x136   :  { %v5242_v45 = vadd.f32 %v3712_v40, %v2164_v42  ;;  %v3631_v47 = vpop.f32.mrb[32].mxu0 }
 0x137   :  { %v3713_v53 = vpop.f32.mrb[32].mxu1  ;;  %v3632_v54 = vpop.f32.mrb[33].mxu0 }
 0x138   :  { %v3633_v56 = vadd.f32 %v3632_v54, %v3631_v47  ;;  %v3714_v57 = vpop.f32.mrb[33].mxu1  ;;  %v3634_v58 = vpop.f32.mrb[34].mxu0 }
 0x139   :  { %v3715_v63 = vadd.f32 %v3714_v57, %v3713_v53  ;;  %v3716_v0 = vpop.f32.mrb[34].mxu1  ;;  %v3635_v1 = vpop.f32.mrb[35].mxu0  ;;  %v110_v53 = vld [vmem:[%s5524_s0 + $0x2f8] sm:$0xff] }
 0x13a   :  { %v2169_v3 = vadd.f32 %v3633_v56, %v5110_v32  ;;  %v3636_v4 = vadd.f32 %v3635_v1, %v3634_v58  ;;  %v3717_v5 = vpop.f32.mrb[35].mxu1  ;;  %v3238_v56 = vcombine.low %v85_v10, %v93_v13  ;;  %v125_v10 = vld [vmem:[%s5524_s0 + $0x370] sm:$0xff] }
 0x13b   :  { %v3718_v6 = vadd.f32 %v3717_v5, %v3716_v0  ;;  %2839 = vmatmul.mubr.bf16.gmra.mrb[140].mxu0 %v3206_v55 }
 0x13c   :  { %v5251_v7 = vadd.f32 %v3715_v63, %v2169_v3  ;;  %v2172_v9 = vadd.f32 %v3636_v4, %v5110_v32  ;;  %2959 = vmatmul.mubr.bf16.gmra.mrb[140].mxu1 %v3208_v60  ;;  %2846 = vmatprep.mubr.bf16.mxu0 %v3223_v61  ;;  %v3240_v61 = vcombine.low %v86_v17, %v94_v18 }
 0x13d   :  { %2966 = vmatprep.mubr.bf16.mxu1 %v3225_v2  ;;  %v3255_v63 = vcombine.high %v101_v43, %v109_v44  ;;  %v3257_v3 = vcombine.high %v102_v50, %v110_v53 }
 0x13e   :  { %v5260_v14 = vadd.f32 %v3718_v6, %v2172_v9  ;;  %v3637_v15 = vpop.f32.mrb[36].mxu0  ;;  %v117_v9 = vld [vmem:[%s5524_s0 + $0x330] sm:$0xff] }
 0x13f   :  { %v3719_v20 = vpop.f32.mrb[36].mxu1  ;;  %v3638_v21 = vpop.f32.mrb[37].mxu0 }
 0x140   :  { %v3639_v24 = vadd.f32 %v3638_v21, %v3637_v15  ;;  %v3720_v25 = vpop.f32.mrb[37].mxu1  ;;  %v3640_v26 = vpop.f32.mrb[38].mxu0  ;;  %v126_v15 = vld [vmem:[%s5524_s0 + $0x378] sm:$0xff] }
 0x141   :  { %v3721_v29 = vadd.f32 %v3720_v25, %v3719_v20  ;;  %v3722_v30 = vpop.f32.mrb[38].mxu1  ;;  %v3641_v31 = vpop.f32.mrb[39].mxu0  ;;  %v3254_v20 = vcombine.low %v101_v43, %v109_v44  ;;  %v3256_v25 = vcombine.low %v102_v50, %v110_v53  ;;  %v141_v43 = vld [vmem:[%s5524_s0 + $0x3f0] sm:$0xff] }
 0x142   :  { %v2177_v35 = vadd.f32 %v3639_v24, %v5110_v32  ;;  %v3642_v36 = vadd.f32 %v3641_v31, %v3640_v26  ;;  %v3723_v38 = vpop.f32.mrb[39].mxu1  ;;  %v3271_v26 = vcombine.high %v117_v9, %v125_v10 }
 0x143   :  { %v3724_v39 = vadd.f32 %v3723_v38, %v3722_v30  ;;  %2847 = vmatmul.mubr.bf16.gmra.mrb[144].mxu0 %v3222_v22 }
 0x144   :  { %v5269_v40 = vadd.f32 %v3721_v29, %v2177_v35  ;;  %v2180_v42 = vadd.f32 %v3642_v36, %v5110_v32  ;;  %2967 = vmatmul.mubr.bf16.gmra.mrb[144].mxu1 %v3224_v27  ;;  %2854 = vmatprep.mubr.bf16.mxu0 %v3239_v28 }
 0x145   :  { %2974 = vmatprep.mubr.bf16.mxu1 %v3241_v34 }
 0x146   :  { %v5278_v47 = vadd.f32 %v3724_v39, %v2180_v42  ;;  %v3643_v49 = vpop.f32.mrb[40].mxu0  ;;  %v133_v42 = vld [vmem:[%s5524_s0 + $0x3b0] sm:$0xff] }
 0x147   :  { %v3725_v54 = vpop.f32.mrb[40].mxu1  ;;  %v3644_v55 = vpop.f32.mrb[41].mxu0 }
 0x148   :  { %v3645_v57 = vadd.f32 %v3644_v55, %v3643_v49  ;;  %v3726_v58 = vpop.f32.mrb[41].mxu1  ;;  %v3646_v60 = vpop.f32.mrb[42].mxu0  ;;  %v134_v49 = vld [vmem:[%s5524_s0 + $0x3b8] sm:$0xff] }
 0x149   :  { %v3727_v0 = vadd.f32 %v3726_v58, %v3725_v54  ;;  %v3728_v1 = vpop.f32.mrb[42].mxu1  ;;  %v3647_v2 = vpop.f32.mrb[43].mxu0  ;;  %v3270_v54 = vcombine.low %v117_v9, %v125_v10  ;;  %v3287_v60 = vcombine.high %v133_v42, %v141_v43  ;;  %v149_v9 = vld [vmem:[%s5524_s0 + $0x430] sm:$0xff] }
 0x14a   :  { %v2185_v4 = vadd.f32 %v3645_v57, %v5110_v32  ;;  %v3729_v5 = vpop.f32.mrb[43].mxu1  ;;  %v118_v32 = vld [vmem:[%s5524_s0 + $0x338] sm:$0xff]  ;;  %v157_v10 = vld [vmem:[%s5524_s0 + $0x470] sm:$0xff] }
 0x14b   :  { %2855 = vmatmul.mubr.bf16.gmra.mrb[148].mxu0 %v3238_v56  ;;  %v3273_v30 = vcombine.high %v118_v32, %v126_v15  ;;  %v3272_v58 = vcombine.low %v118_v32, %v126_v15  ;;  %v150_v15 = vld [vmem:[%s5524_s0 + $0x438] sm:$0xff] }
 0x14c   :  { %v5287_v6 = vadd.f32 %v3727_v0, %v2185_v4  ;;  %2975 = vmatmul.mubr.bf16.gmra.mrb[148].mxu1 %v3240_v61  ;;  %2862 = vmatprep.mubr.bf16.mxu0 %v3255_v63 }
 0x14d   :  { %2982 = vmatprep.mubr.bf16.mxu1 %v3257_v3 }
 0x14e   :  { %v3747_v13 = vpop.f32.mrb[44].mxu0 }
 0x14f   :  { %v3829_v17 = vpop.f32.mrb[44].mxu1  ;;  %v3748_v18 = vpop.f32.mrb[45].mxu0 }
 0x150   :  { %v3749_v21 = vadd.f32 %v3748_v18, %v3747_v13  ;;  %v3830_v22 = vpop.f32.mrb[45].mxu1  ;;  %v3750_v24 = vpop.f32.mrb[46].mxu0 }
 0x151   :  { %v3831_v27 = vadd.f32 %v3830_v22, %v3829_v17  ;;  %v3832_v28 = vpop.f32.mrb[46].mxu1  ;;  %v3751_v29 = vpop.f32.mrb[47].mxu0 }
 0x152   :  { %v2345_v31 = vadd.f32 %v3749_v21, %v5113_v48  ;;  %v3752_v34 = vadd.f32 %v3751_v29, %v3750_v24  ;;  %v3833_v35 = vpop.f32.mrb[47].mxu1  ;;  %v3286_v21 = vcombine.low %v133_v42, %v141_v43  ;;  %v165_v42 = vld [vmem:[%s5524_s0 + $0x4b0] sm:$0xff] }
 0x153   :  { %v3834_v36 = vadd.f32 %v3833_v35, %v3832_v28  ;;  %2863 = vmatmul.mubr.bf16.gmra.mrb[152].mxu0 %v3254_v20  ;;  %v173_v43 = vld [vmem:[%s5524_s0 + $0x4f0] sm:$0xff] }
 0x154   :  { %v5302_v38 = vadd.f32 %v3831_v27, %v2345_v31  ;;  %v2348_v39 = vadd.f32 %v3752_v34, %v5122_v52  ;;  %2983 = vmatmul.mubr.bf16.gmra.mrb[152].mxu1 %v3256_v25  ;;  %2870 = vmatprep.mubr.bf16.mxu0 %v3271_v26  ;;  %v142_v52 = vld [vmem:[%s5524_s0 + $0x3f8] sm:$0xff]  ;;  %v3303_v27 = vcombine.high %v149_v9, %v157_v10 }
 0x155   :  { %2990 = vmatprep.mubr.bf16.mxu1 %v3273_v30  ;;  %v3289_v1 = vcombine.high %v134_v49, %v142_v52  ;;  %v3288_v26 = vcombine.low %v134_v49, %v142_v52  ;;  %v166_v52 = vld [vmem:[%s5524_s0 + $0x4b8] sm:$0xff] }
 0x156   :  { %v5311_v48 = vadd.f32 %v3834_v36, %v2348_v39  ;;  %v3753_v44 = vpop.f32.mrb[48].mxu0 }
 0x157   :  { %v3835_v50 = vpop.f32.mrb[48].mxu1  ;;  %v3754_v53 = vpop.f32.mrb[49].mxu0 }
 0x158   :  { %v3755_v55 = vadd.f32 %v3754_v53, %v3753_v44  ;;  %v3836_v56 = vpop.f32.mrb[49].mxu1  ;;  %v3756_v57 = vpop.f32.mrb[50].mxu0 }
 0x159   :  { %v3837_v61 = vadd.f32 %v3836_v56, %v3835_v50  ;;  %v3838_v63 = vpop.f32.mrb[50].mxu1  ;;  %v3757_v0 = vpop.f32.mrb[51].mxu0 }
 0x15a   :  { %v2353_v2 = vadd.f32 %v3755_v55, %v5131_v8  ;;  %v3758_v3 = vadd.f32 %v3757_v0, %v3756_v57  ;;  %v3839_v4 = vpop.f32.mrb[51].mxu1  ;;  %v3302_v55 = vcombine.low %v149_v9, %v157_v10  ;;  %v181_v9 = vld [vmem:[%s5524_s0 + $0x530] sm:$0xff] }
 0x15b   :  { %v3840_v5 = vadd.f32 %v3839_v4, %v3838_v63  ;;  %2871 = vmatmul.mubr.bf16.gmra.mrb[156].mxu0 %v3270_v54 }
 0x15c   :  { %v5320_v13 = vadd.f32 %v3837_v61, %v2353_v2  ;;  %v2356_v17 = vadd.f32 %v3758_v3, %v5140_v12  ;;  %2991 = vmatmul.mubr.bf16.gmra.mrb[156].mxu1 %v3272_v58  ;;  %2878 = vmatprep.mubr.bf16.mxu0 %v3287_v60  ;;  %v158_v12 = vld [vmem:[%s5524_s0 + $0x478] sm:$0xff]  ;;  %v3319_v61 = vcombine.high %v165_v42, %v173_v43 }
 0x15d   :  { %2998 = vmatprep.mubr.bf16.mxu1 %v3289_v1  ;;  %v3305_v31 = vcombine.high %v150_v15, %v158_v12  ;;  %v3304_v60 = vcombine.low %v150_v15, %v158_v12 }
 0x15e   :  { %v5329_v8 = vadd.f32 %v3840_v5, %v2356_v17  ;;  %v3759_v32 = vpop.f32.mrb[52].mxu0 }
 0x15f   :  { %v3841_v18 = vpop.f32.mrb[52].mxu1  ;;  %v3760_v20 = vpop.f32.mrb[53].mxu0 }
 0x160   :  { %v3761_v22 = vadd.f32 %v3760_v20, %v3759_v32  ;;  %v3842_v24 = vpop.f32.mrb[53].mxu1  ;;  %v3762_v25 = vpop.f32.mrb[54].mxu0 }
 0x161   :  { %v3843_v28 = vadd.f32 %v3842_v24, %v3841_v18  ;;  %v3844_v29 = vpop.f32.mrb[54].mxu1  ;;  %v3763_v30 = vpop.f32.mrb[55].mxu0 }
 0x162   :  { %v2361_v34 = vadd.f32 %v3761_v22, %v5149_v33  ;;  %v3764_v35 = vadd.f32 %v3763_v30, %v3762_v25  ;;  %v3845_v36 = vpop.f32.mrb[55].mxu1 }
 0x163   :  { %v3846_v39 = vadd.f32 %v3845_v36, %v3844_v29  ;;  %2879 = vmatmul.mubr.bf16.gmra.mrb[160].mxu0 %v3286_v21  ;;  %v3318_v21 = vcombine.low %v165_v42, %v173_v43 }
 0x164   :  { %v5338_v44 = vadd.f32 %v3843_v28, %v2361_v34  ;;  %v2364_v50 = vadd.f32 %v3764_v35, %v5158_v37  ;;  %2999 = vmatmul.mubr.bf16.gmra.mrb[160].mxu1 %v3288_v26  ;;  %2886 = vmatprep.mubr.bf16.mxu0 %v3303_v27  ;;  %v174_v37 = vld [vmem:[%s5524_s0 + $0x4f8] sm:$0xff]  ;;  %v3335_v26 = vcombine.high %v181_v9, %v181_v9 }
 0x165   :  { %3006 = vmatprep.mubr.bf16.mxu1 %v3305_v31  ;;  %v3321_v2 = vcombine.high %v166_v52, %v174_v37  ;;  %v3320_v25 = vcombine.low %v166_v52, %v174_v37  ;;  %v3334_v37 = vcombine.low %v181_v9, %v181_v9 }
 0x166   :  { %v5347_v33 = vadd.f32 %v3846_v39, %v2364_v50  ;;  %v3765_v49 = vpop.f32.mrb[56].mxu0 }
 0x167   :  { %v3847_v53 = vpop.f32.mrb[56].mxu1  ;;  %v3766_v54 = vpop.f32.mrb[57].mxu0 }
 0x168   :  { %v3767_v56 = vadd.f32 %v3766_v54, %v3765_v49  ;;  %v3848_v57 = vpop.f32.mrb[57].mxu1  ;;  %v3768_v58 = vpop.f32.mrb[58].mxu0 }
 0x169   :  { %v3849_v63 = vadd.f32 %v3848_v57, %v3847_v53  ;;  %v3850_v0 = vpop.f32.mrb[58].mxu1  ;;  %v3769_v1 = vpop.f32.mrb[59].mxu0 }
 0x16a   :  { %v2369_v3 = vadd.f32 %v3767_v56, %v5167_v59  ;;  %v3770_v4 = vadd.f32 %v3769_v1, %v3768_v58  ;;  %v3851_v5 = vpop.f32.mrb[59].mxu1  ;;  %v182_v59 = vld [vmem:[%s5524_s0 + $0x538] sm:$0xff] }
 0x16b   :  { %v3852_v17 = vadd.f32 %v3851_v5, %v3850_v0  ;;  %2887 = vmatmul.mubr.bf16.gmra.mrb[164].mxu0 %v3302_v55  ;;  %v3337_v30 = vcombine.high %v182_v59, %v182_v59  ;;  %v3336_v55 = vcombine.low %v182_v59, %v182_v59 }
 0x16c   :  { %v5356_v32 = vadd.f32 %v3849_v63, %v2369_v3  ;;  %v2372_v18 = vadd.f32 %v3770_v4, %v5173_v62  ;;  %3007 = vmatmul.mubr.bf16.gmra.mrb[164].mxu1 %v3304_v60  ;;  %2894 = vmatprep.mubr.bf16.mxu0 %v3319_v61 }
 0x16d   :  { %3014 = vmatprep.mubr.bf16.mxu1 %v3321_v2 }
 0x16e   :  { %v5362_v10 = vadd.f32 %v3852_v17, %v2372_v18  ;;  %v3771_v15 = vpop.f32.mrb[60].mxu0 }
 0x16f   :  { %v3853_v12 = vpop.f32.mrb[60].mxu1  ;;  %v3772_v20 = vpop.f32.mrb[61].mxu0 }
 0x170   :  { %v3773_v22 = vadd.f32 %v3772_v20, %v3771_v15  ;;  %v3854_v24 = vpop.f32.mrb[61].mxu1  ;;  %v3774_v62 = vpop.f32.mrb[62].mxu0 }
 0x171   :  { %v3855_v27 = vadd.f32 %v3854_v24, %v3853_v12  ;;  %v3856_v28 = vpop.f32.mrb[62].mxu1  ;;  %v3775_v29 = vpop.f32.mrb[63].mxu0 }
 0x172   :  { %v2377_v31 = vadd.f32 %v3773_v22, %v5179_v19  ;;  %v3776_v34 = vadd.f32 %v3775_v29, %v3774_v62  ;;  %v3857_v35 = vpop.f32.mrb[63].mxu1 }
 0x173   :  { %v3858_v36 = vadd.f32 %v3857_v35, %v3856_v28  ;;  %2895 = vmatmul.mubr.bf16.gmra.mrb[168].mxu0 %v3318_v21 }
 0x174   :  { %v5368_v39 = vadd.f32 %v3855_v27, %v2377_v31  ;;  %v2380_v50 = vadd.f32 %v3776_v34, %v5188_v23  ;;  %3015 = vmatmul.mubr.bf16.gmra.mrb[168].mxu1 %v3320_v25  ;;  %2902 = vmatprep.mubr.bf16.mxu0 %v3335_v26 }
 0x175   :  { %3022 = vmatprep.mubr.bf16.mxu1 %v3337_v30 }
 0x176   :  { %v5371_v42 = vadd.f32 %v3858_v36, %v2380_v50  ;;  %v3777_v43 = vpop.f32.mrb[64].mxu0 }
 0x177   :  { %v3859_v49 = vpop.f32.mrb[64].mxu1  ;;  %v3778_v52 = vpop.f32.mrb[65].mxu0 }
 0x178   :  { %v3779_v53 = vadd.f32 %v3778_v52, %v3777_v43  ;;  %v3860_v54 = vpop.f32.mrb[65].mxu1  ;;  %v3780_v19 = vpop.f32.mrb[66].mxu0 }
 0x179   :  { %v3861_v56 = vadd.f32 %v3860_v54, %v3859_v49  ;;  %v3862_v57 = vpop.f32.mrb[66].mxu1  ;;  %v3781_v58 = vpop.f32.mrb[67].mxu0 }
 0x17a   :  { %v2385_v60 = vadd.f32 %v3779_v53, %v5197_v46  ;;  %v3782_v61 = vadd.f32 %v3781_v58, %v3780_v19  ;;  %v3863_v23 = vpop.f32.mrb[67].mxu1 }
 0x17b   :  { %v3864_v63 = vadd.f32 %v3863_v23, %v3862_v57  ;;  %2903 = vmatmul.mubr.bf16.gmra.mrb[172].mxu0 %v3334_v37 }
 0x17c   :  { %v5374_v0 = vadd.f32 %v3861_v56, %v2385_v60  ;;  %v2388_v1 = vadd.f32 %v3782_v61, %v5206_v51  ;;  %3023 = vmatmul.mubr.bf16.gmra.mrb[172].mxu1 %v3336_v55 }
 0x17e   :  { %v5377_v2 = vadd.f32 %v3864_v63, %v2388_v1  ;;  %v3783_v3 = vpop.f32.mrb[68].mxu0 }
 0x17f   :  { %v3865_v4 = vpop.f32.mrb[68].mxu1  ;;  %v3784_v5 = vpop.f32.mrb[69].mxu0 }
 0x180   :  { %v3785_v17 = vadd.f32 %v3784_v5, %v3783_v3  ;;  %v3866_v18 = vpop.f32.mrb[69].mxu1  ;;  %v3786_v9 = vpop.f32.mrb[70].mxu0 }
 0x181   :  { %v3867_v15 = vadd.f32 %v3866_v18, %v3865_v4  ;;  %v3868_v59 = vpop.f32.mrb[70].mxu1  ;;  %v3787_v46 = vpop.f32.mrb[71].mxu0 }
 0x182   :  { %v2393_v12 = vadd.f32 %v3785_v17, %v5215_v11  ;;  %v3788_v20 = vadd.f32 %v3787_v46, %v3786_v9  ;;  %v3869_v21 = vpop.f32.mrb[71].mxu1 }
 0x183   :  { %v3870_v22 = vadd.f32 %v3869_v21, %v3868_v59 }
 0x184   :  { %v5380_v24 = vadd.f32 %v3867_v15, %v2393_v12  ;;  %v2396_v51 = vadd.f32 %v3788_v20, %v5224_v16 }
 0x186   :  { %v5383_v62 = vadd.f32 %v3870_v22, %v2396_v51  ;;  %v3789_v25 = vpop.f32.mrb[72].mxu0 }
 0x187   :  { %v3871_v26 = vpop.f32.mrb[72].mxu1  ;;  %v3790_v27 = vpop.f32.mrb[73].mxu0 }
 0x188   :  { %v3791_v28 = vadd.f32 %v3790_v27, %v3789_v25  ;;  %v3872_v29 = vpop.f32.mrb[73].mxu1  ;;  %v3792_v30 = vpop.f32.mrb[74].mxu0 }
 0x189   :  { %v3873_v31 = vadd.f32 %v3872_v29, %v3871_v26  ;;  %v3874_v34 = vpop.f32.mrb[74].mxu1  ;;  %v3793_v35 = vpop.f32.mrb[75].mxu0 }
 0x18a   :  { %v2401_v11 = vadd.f32 %v3791_v28, %v5233_v41  ;;  %v3794_v36 = vadd.f32 %v3793_v35, %v3792_v30  ;;  %v3875_v50 = vpop.f32.mrb[75].mxu1 }
 0x18b   :  { %v3876_v43 = vadd.f32 %v3875_v50, %v3874_v34 }
 0x18c   :  { %v5386_v49 = vadd.f32 %v3873_v31, %v2401_v11  ;;  %v2404_v16 = vadd.f32 %v3794_v36, %v5242_v45 }
 0x18e   :  { %v5389_v52 = vadd.f32 %v3876_v43, %v2404_v16  ;;  %v3795_v37 = vpop.f32.mrb[76].mxu0 }
 0x18f   :  { %v3877_v53 = vpop.f32.mrb[76].mxu1  ;;  %v3796_v54 = vpop.f32.mrb[77].mxu0 }
 0x190   :  { %v3797_v19 = vadd.f32 %v3796_v54, %v3795_v37  ;;  %v3878_v55 = vpop.f32.mrb[77].mxu1  ;;  %v3798_v56 = vpop.f32.mrb[78].mxu0 }
 0x191   :  { %v3879_v57 = vadd.f32 %v3878_v55, %v3877_v53  ;;  %v3880_v58 = vpop.f32.mrb[78].mxu1  ;;  %v3799_v60 = vpop.f32.mrb[79].mxu0 }
 0x192   :  { %v2409_v41 = vadd.f32 %v3797_v19, %v5251_v7  ;;  %v3800_v61 = vadd.f32 %v3799_v60, %v3798_v56  ;;  %v3881_v23 = vpop.f32.mrb[79].mxu1 }
 0x193   :  { %v3882_v63 = vadd.f32 %v3881_v23, %v3880_v58 }
 0x194   :  { %v5392_v1 = vadd.f32 %v3879_v57, %v2409_v41  ;;  %v2412_v45 = vadd.f32 %v3800_v61, %v5260_v14 }
 0x196   :  { %v5395_v3 = vadd.f32 %v3882_v63, %v2412_v45  ;;  %v3801_v4 = vpop.f32.mrb[80].mxu0 }
 0x197   :  { %v3883_v5 = vpop.f32.mrb[80].mxu1  ;;  %v3802_v17 = vpop.f32.mrb[81].mxu0 }
 0x198   :  { %v3803_v18 = vadd.f32 %v3802_v17, %v3801_v4  ;;  %v3884_v9 = vpop.f32.mrb[81].mxu1  ;;  %v3804_v15 = vpop.f32.mrb[82].mxu0 }
 0x199   :  { %v3885_v59 = vadd.f32 %v3884_v9, %v3883_v5  ;;  %v3886_v46 = vpop.f32.mrb[82].mxu1  ;;  %v3805_v12 = vpop.f32.mrb[83].mxu0 }
 0x19a   :  { %v2417_v7 = vadd.f32 %v3803_v18, %v5269_v40  ;;  %v3806_v20 = vadd.f32 %v3805_v12, %v3804_v15  ;;  %v3887_v21 = vpop.f32.mrb[83].mxu1 }
 0x19b   :  { %v3888_v22 = vadd.f32 %v3887_v21, %v3886_v46 }
 0x19c   :  { %v5398_v51 = vadd.f32 %v3885_v59, %v2417_v7  ;;  %v2420_v14 = vadd.f32 %v3806_v20, %v5278_v47 }
 0x19e   :  { %v5401_v25 = vadd.f32 %v3888_v22, %v2420_v14  ;;  %v3807_v26 = vpop.f32.mrb[84].mxu0 }
 0x19f   :  { %v3889_v27 = vpop.f32.mrb[84].mxu1  ;;  %v3808_v28 = vpop.f32.mrb[85].mxu0 }
 0x1a0   :  { %v3809_v29 = vadd.f32 %v3808_v28, %v3807_v26  ;;  %v3890_v30 = vpop.f32.mrb[85].mxu1  ;;  %v3810_v31 = vpop.f32.mrb[86].mxu0 }
 0x1a1   :  { %v3891_v34 = vadd.f32 %v3890_v30, %v3889_v27  ;;  %v3892_v35 = vpop.f32.mrb[86].mxu1  ;;  %v3811_v11 = vpop.f32.mrb[87].mxu0 }
 0x1a2   :  { %v2425_v40 = vadd.f32 %v3809_v29, %v5287_v6  ;;  %v3893_v36 = vpop.f32.mrb[87].mxu1 }
 0x1a4   :  { %v5404_v50 = vadd.f32 %v3891_v34, %v2425_v40 }
 0x1a6   :  { %v3911_v43 = vpop.f32.mrb[88].mxu0 }
 0x1a7   :  { %v3993_v16 = vpop.f32.mrb[88].mxu1  ;;  %v3912_v37 = vpop.f32.mrb[89].mxu0 }
 0x1a8   :  { %v3913_v47 = vadd.f32 %v3912_v37, %v3911_v43  ;;  %v3994_v53 = vpop.f32.mrb[89].mxu1  ;;  %v3914_v54 = vpop.f32.mrb[90].mxu0 }
 0x1a9   :  { %v3995_v19 = vadd.f32 %v3994_v53, %v3993_v16  ;;  %v3996_v55 = vpop.f32.mrb[90].mxu1  ;;  %v3915_v56 = vpop.f32.mrb[91].mxu0 }
 0x1aa   :  { %v2585_v57 = vadd.f32 %v3913_v47, %v5302_v38  ;;  %v3916_v58 = vadd.f32 %v3915_v56, %v3914_v54  ;;  %v3997_v60 = vpop.f32.mrb[91].mxu1 }
 0x1ab   :  { %v3998_v41 = vadd.f32 %v3997_v60, %v3996_v55 }
 0x1ac   :  { %v5407_v61 = vadd.f32 %v3995_v19, %v2585_v57  ;;  %v2588_v6 = vadd.f32 %v3916_v58, %v5311_v48 }
 0x1ae   :  { %v5410_v23 = vadd.f32 %v3998_v41, %v2588_v6  ;;  %v3917_v63 = vpop.f32.mrb[92].mxu0 }
 0x1af   :  { %v3999_v45 = vpop.f32.mrb[92].mxu1  ;;  %v3918_v4 = vpop.f32.mrb[93].mxu0 }
 0x1b0   :  { %v3919_v5 = vadd.f32 %v3918_v4, %v3917_v63  ;;  %v4000_v17 = vpop.f32.mrb[93].mxu1  ;;  %v3920_v18 = vpop.f32.mrb[94].mxu0 }
 0x1b1   :  { %v4001_v9 = vadd.f32 %v4000_v17, %v3999_v45  ;;  %v4002_v15 = vpop.f32.mrb[94].mxu1  ;;  %v3921_v59 = vpop.f32.mrb[95].mxu0 }
 0x1b2   :  { %v2593_v38 = vadd.f32 %v3919_v5, %v5320_v13  ;;  %v3922_v46 = vadd.f32 %v3921_v59, %v3920_v18  ;;  %v4003_v12 = vpop.f32.mrb[95].mxu1 }
 0x1b3   :  { %v4004_v7 = vadd.f32 %v4003_v12, %v4002_v15 }
 0x1b4   :  { %v5413_v20 = vadd.f32 %v4001_v9, %v2593_v38  ;;  %v2596_v48 = vadd.f32 %v3922_v46, %v5329_v8 }
 0x1b6   :  { %v5416_v21 = vadd.f32 %v4004_v7, %v2596_v48  ;;  %v3923_v22 = vpop.f32.mrb[96].mxu0 }
 0x1b7   :  { %v4005_v14 = vpop.f32.mrb[96].mxu1  ;;  %v3924_v26 = vpop.f32.mrb[97].mxu0 }
 0x1b8   :  { %v3925_v27 = vadd.f32 %v3924_v26, %v3923_v22  ;;  %v4006_v28 = vpop.f32.mrb[97].mxu1  ;;  %v3926_v29 = vpop.f32.mrb[98].mxu0 }
 0x1b9   :  { %v4007_v30 = vadd.f32 %v4006_v28, %v4005_v14  ;;  %v4008_v31 = vpop.f32.mrb[98].mxu1  ;;  %v3927_v34 = vpop.f32.mrb[99].mxu0 }
 0x1ba   :  { %v2601_v13 = vadd.f32 %v3925_v27, %v5338_v44  ;;  %v3928_v35 = vadd.f32 %v3927_v34, %v3926_v29  ;;  %v4009_v11 = vpop.f32.mrb[99].mxu1 }
 0x1bb   :  { %v4010_v40 = vadd.f32 %v4009_v11, %v4008_v31 }
 0x1bc   :  { %v5419_v36 = vadd.f32 %v4007_v30, %v2601_v13  ;;  %v2604_v8 = vadd.f32 %v3928_v35, %v5347_v33 }
 0x1be   :  { %v5422_v43 = vadd.f32 %v4010_v40, %v2604_v8  ;;  %v3929_v16 = vpop.f32.mrb[100].mxu0 }
 0x1bf   :  { %v4011_v37 = vpop.f32.mrb[100].mxu1  ;;  %v3930_v47 = vpop.f32.mrb[101].mxu0 }
 0x1c0   :  { %v3931_v53 = vadd.f32 %v3930_v47, %v3929_v16  ;;  %v4012_v54 = vpop.f32.mrb[101].mxu1  ;;  %v3932_v19 = vpop.f32.mrb[102].mxu0 }
 0x1c1   :  { %v4013_v55 = vadd.f32 %v4012_v54, %v4011_v37  ;;  %v4014_v56 = vpop.f32.mrb[102].mxu1  ;;  %v3933_v57 = vpop.f32.mrb[103].mxu0 }
 0x1c2   :  { %v2609_v44 = vadd.f32 %v3931_v53, %v5356_v32  ;;  %v3934_v58 = vadd.f32 %v3933_v57, %v3932_v19  ;;  %v4015_v60 = vpop.f32.mrb[103].mxu1 }
 0x1c3   :  { %v4016_v41 = vadd.f32 %v4015_v60, %v4014_v56 }
 0x1c4   :  { %v5425_v6 = vadd.f32 %v4013_v55, %v2609_v44  ;;  %v2612_v33 = vadd.f32 %v3934_v58, %v5362_v10 }
 0x1c6   :  { %v5428_v63 = vadd.f32 %v4016_v41, %v2612_v33  ;;  %v3935_v45 = vpop.f32.mrb[104].mxu0 }
 0x1c7   :  { %v4017_v4 = vpop.f32.mrb[104].mxu1  ;;  %v3936_v5 = vpop.f32.mrb[105].mxu0 }
 0x1c8   :  { %v3937_v17 = vadd.f32 %v3936_v5, %v3935_v45  ;;  %v4018_v18 = vpop.f32.mrb[105].mxu1  ;;  %v3938_v9 = vpop.f32.mrb[106].mxu0 }
 0x1c9   :  { %v4019_v15 = vadd.f32 %v4018_v18, %v4017_v4  ;;  %v4020_v59 = vpop.f32.mrb[106].mxu1  ;;  %v3939_v38 = vpop.f32.mrb[107].mxu0 }
 0x1ca   :  { %v2617_v32 = vadd.f32 %v3937_v17, %v5368_v39  ;;  %v3940_v46 = vadd.f32 %v3939_v38, %v3938_v9  ;;  %v4021_v12 = vpop.f32.mrb[107].mxu1 }
 0x1cb   :  { %v4022_v7 = vadd.f32 %v4021_v12, %v4020_v59 }
 0x1cc   :  { %v5431_v48 = vadd.f32 %v4019_v15, %v2617_v32  ;;  %v2620_v10 = vadd.f32 %v3940_v46, %v5371_v42 }
 0x1ce   :  { %v5434_v22 = vadd.f32 %v4022_v7, %v2620_v10  ;;  %v3941_v14 = vpop.f32.mrb[108].mxu0 }
 0x1cf   :  { %v4023_v26 = vpop.f32.mrb[108].mxu1  ;;  %v3942_v27 = vpop.f32.mrb[109].mxu0 }
 0x1d0   :  { %v3943_v28 = vadd.f32 %v3942_v27, %v3941_v14  ;;  %v4024_v29 = vpop.f32.mrb[109].mxu1  ;;  %v3944_v30 = vpop.f32.mrb[110].mxu0 }
 0x1d1   :  { %v4025_v31 = vadd.f32 %v4024_v29, %v4023_v26  ;;  %v4026_v34 = vpop.f32.mrb[110].mxu1  ;;  %v3945_v13 = vpop.f32.mrb[111].mxu0 }
 0x1d2   :  { %v2625_v39 = vadd.f32 %v3943_v28, %v5374_v0  ;;  %v3946_v35 = vadd.f32 %v3945_v13, %v3944_v30  ;;  %v4027_v11 = vpop.f32.mrb[111].mxu1 }
 0x1d3   :  { %v4028_v40 = vadd.f32 %v4027_v11, %v4026_v34 }
 0x1d4   :  { %v5437_v8 = vadd.f32 %v4025_v31, %v2625_v39  ;;  %v2628_v42 = vadd.f32 %v3946_v35, %v5377_v2 }
 0x1d6   :  { %v5440_v16 = vadd.f32 %v4028_v40, %v2628_v42  ;;  %v3947_v37 = vpop.f32.mrb[112].mxu0 }
 0x1d7   :  { %v4029_v47 = vpop.f32.mrb[112].mxu1  ;;  %v3948_v53 = vpop.f32.mrb[113].mxu0 }
 0x1d8   :  { %v3949_v54 = vadd.f32 %v3948_v53, %v3947_v37  ;;  %v4030_v19 = vpop.f32.mrb[113].mxu1  ;;  %v3950_v55 = vpop.f32.mrb[114].mxu0 }
 0x1d9   :  { %v4031_v56 = vadd.f32 %v4030_v19, %v4029_v47  ;;  %v4032_v57 = vpop.f32.mrb[114].mxu1  ;;  %v3951_v44 = vpop.f32.mrb[115].mxu0 }
 0x1da   :  { %v2633_v0 = vadd.f32 %v3949_v54, %v5380_v24  ;;  %v3952_v58 = vadd.f32 %v3951_v44, %v3950_v55  ;;  %v4033_v60 = vpop.f32.mrb[115].mxu1 }
 0x1db   :  { %v4034_v41 = vadd.f32 %v4033_v60, %v4032_v57 }
 0x1dc   :  { %v5443_v33 = vadd.f32 %v4031_v56, %v2633_v0  ;;  %v2636_v2 = vadd.f32 %v3952_v58, %v5383_v62 }
 0x1de   :  { %v5446_v45 = vadd.f32 %v4034_v41, %v2636_v2  ;;  %v3953_v4 = vpop.f32.mrb[116].mxu0 }
 0x1df   :  { %v4035_v5 = vpop.f32.mrb[116].mxu1  ;;  %v3954_v17 = vpop.f32.mrb[117].mxu0 }
 0x1e0   :  { %v3955_v18 = vadd.f32 %v3954_v17, %v3953_v4  ;;  %v4036_v9 = vpop.f32.mrb[117].mxu1  ;;  %v3956_v15 = vpop.f32.mrb[118].mxu0 }
 0x1e1   :  { %v4037_v59 = vadd.f32 %v4036_v9, %v4035_v5  ;;  %v4038_v38 = vpop.f32.mrb[118].mxu1  ;;  %v3957_v32 = vpop.f32.mrb[119].mxu0 }
 0x1e2   :  { %v2641_v24 = vadd.f32 %v3955_v18, %v5386_v49  ;;  %v3958_v46 = vadd.f32 %v3957_v32, %v3956_v15  ;;  %v4039_v12 = vpop.f32.mrb[119].mxu1 }
 0x1e3   :  { %v4040_v7 = vadd.f32 %v4039_v12, %v4038_v38 }
 0x1e4   :  { %v5449_v10 = vadd.f32 %v4037_v59, %v2641_v24  ;;  %v2644_v62 = vadd.f32 %v3958_v46, %v5389_v52 }
 0x1e6   :  { %v5452_v14 = vadd.f32 %v4040_v7, %v2644_v62  ;;  %v3959_v26 = vpop.f32.mrb[120].mxu0 }
 0x1e7   :  { %v4041_v27 = vpop.f32.mrb[120].mxu1  ;;  %v3960_v28 = vpop.f32.mrb[121].mxu0 }
 0x1e8   :  { %v3961_v29 = vadd.f32 %v3960_v28, %v3959_v26  ;;  %v4042_v30 = vpop.f32.mrb[121].mxu1  ;;  %v3962_v31 = vpop.f32.mrb[122].mxu0 }
 0x1e9   :  { %v4043_v34 = vadd.f32 %v4042_v30, %v4041_v27  ;;  %v4044_v13 = vpop.f32.mrb[122].mxu1  ;;  %v3963_v39 = vpop.f32.mrb[123].mxu0 }
 0x1ea   :  { %v2649_v49 = vadd.f32 %v3961_v29, %v5392_v1  ;;  %v3964_v35 = vadd.f32 %v3963_v39, %v3962_v31  ;;  %v4045_v11 = vpop.f32.mrb[123].mxu1 }
 0x1eb   :  { %v4046_v40 = vadd.f32 %v4045_v11, %v4044_v13 }
 0x1ec   :  { %v5455_v42 = vadd.f32 %v4043_v34, %v2649_v49  ;;  %v2652_v52 = vadd.f32 %v3964_v35, %v5395_v3 }
 0x1ee   :  { %v5458_v37 = vadd.f32 %v4046_v40, %v2652_v52  ;;  %v3965_v47 = vpop.f32.mrb[124].mxu0 }
 0x1ef   :  { %v4047_v53 = vpop.f32.mrb[124].mxu1  ;;  %v3966_v54 = vpop.f32.mrb[125].mxu0 }
 0x1f0   :  { %v3967_v19 = vadd.f32 %v3966_v54, %v3965_v47  ;;  %v4048_v55 = vpop.f32.mrb[125].mxu1  ;;  %v3968_v56 = vpop.f32.mrb[126].mxu0 }
 0x1f1   :  { %v4049_v57 = vadd.f32 %v4048_v55, %v4047_v53  ;;  %v4050_v44 = vpop.f32.mrb[126].mxu1  ;;  %v3969_v0 = vpop.f32.mrb[127].mxu0 }
 0x1f2   :  { %v2657_v1 = vadd.f32 %v3967_v19, %v5398_v51  ;;  %v3970_v58 = vadd.f32 %v3969_v0, %v3968_v56  ;;  %v4051_v60 = vpop.f32.mrb[127].mxu1 }
 0x1f3   :  { %v4052_v41 = vadd.f32 %v4051_v60, %v4050_v44 }
 0x1f4   :  { %v5461_v2 = vadd.f32 %v4049_v57, %v2657_v1  ;;  %v2660_v3 = vadd.f32 %v3970_v58, %v5401_v25 }
 0x1f6   :  { %v5464_v4 = vadd.f32 %v4052_v41, %v2660_v3  ;;  %v3971_v5 = vpop.f32.mrb[128].mxu0 }
 0x1f7   :  { %v4053_v17 = vpop.f32.mrb[128].mxu1  ;;  %v3972_v18 = vpop.f32.mrb[129].mxu0 }
 0x1f8   :  { %v3973_v9 = vadd.f32 %v3972_v18, %v3971_v5  ;;  %v4054_v15 = vpop.f32.mrb[129].mxu1  ;;  %v3974_v59 = vpop.f32.mrb[130].mxu0 }
 0x1f9   :  { %v4055_v38 = vadd.f32 %v4054_v15, %v4053_v17  ;;  %v4056_v32 = vpop.f32.mrb[130].mxu1  ;;  %v3975_v24 = vpop.f32.mrb[131].mxu0 }
 0x1fa   :  { %v2665_v51 = vadd.f32 %v3973_v9, %v5404_v50  ;;  %v4057_v46 = vpop.f32.mrb[131].mxu1 }
 0x1fc   :  { %v5467_v12 = vadd.f32 %v4055_v38, %v2665_v51 }
 0x1fe   :  { %v4075_v7 = vpop.f32.mrb[132].mxu0 }
 0x1ff   :  { %v4157_v62 = vpop.f32.mrb[132].mxu1  ;;  %v4076_v26 = vpop.f32.mrb[133].mxu0 }
 0x200   :  { %v4077_v25 = vadd.f32 %v4076_v26, %v4075_v7  ;;  %v4158_v27 = vpop.f32.mrb[133].mxu1  ;;  %v4078_v28 = vpop.f32.mrb[134].mxu0 }
 0x201   :  { %v4159_v29 = vadd.f32 %v4158_v27, %v4157_v62  ;;  %v4160_v30 = vpop.f32.mrb[134].mxu1  ;;  %v4079_v31 = vpop.f32.mrb[135].mxu0 }
 0x202   :  { %v2825_v34 = vadd.f32 %v4077_v25, %v5407_v61  ;;  %v4080_v13 = vadd.f32 %v4079_v31, %v4078_v28  ;;  %v4161_v39 = vpop.f32.mrb[135].mxu1 }
 0x203   :  { %v4162_v49 = vadd.f32 %v4161_v39, %v4160_v30 }
 0x204   :  { %v2945_v35 = vadd.f32 %v4159_v29, %v2825_v34  ;;  %v2828_v50 = vadd.f32 %v4080_v13, %v5410_v23 }
 0x206   :  { %v2948_v11 = vadd.f32 %v4162_v49, %v2828_v50  ;;  %v4081_v40 = vpop.f32.mrb[136].mxu0  ;;  %v3030_v53 = vmax.f32 %v2945_v35, 0.0 }
 0x207   :  { %v4163_v52 = vpop.f32.mrb[136].mxu1  ;;  %v4082_v47 = vpop.f32.mrb[137].mxu0 }
 0x208   :  { %v3031_v54 = vmax.f32 %v2948_v11, 0.0  ;;  %v4083_v19 = vadd.f32 %v4082_v47, %v4081_v40  ;;  %v4164_v55 = vpop.f32.mrb[137].mxu1  ;;  %v4084_v56 = vpop.f32.mrb[138].mxu0 }
 0x209   :  { %v4165_v57 = vadd.f32 %v4164_v55, %v4163_v52  ;;  %v4166_v44 = vpop.f32.mrb[138].mxu1  ;;  %v4085_v0 = vpop.f32.mrb[139].mxu0 }
 0x20a   :  { %v3511_v1 = vpack.c.bf16 %v3031_v54, %v3030_v53  ;;  %v2833_v61 = vadd.f32 %v4083_v19, %v5413_v20  ;;  %v4086_v58 = vadd.f32 %v4085_v0, %v4084_v56  ;;  %v4167_v60 = vpop.f32.mrb[139].mxu1 }
 0x20b   :  { %v4168_v41 = vadd.f32 %v4167_v60, %v4166_v44 }
 0x20c   :  { %3512 = vst [vmem:[%s5526_s3] sm:$0xff] %v3511_v1   ;;  %v2953_v23 = vadd.f32 %v4165_v57, %v2833_v61  ;;  %v2836_v3 = vadd.f32 %v4086_v58, %v5416_v21 }
 0x20e   :  { %v2956_v5 = vadd.f32 %v4168_v41, %v2836_v3  ;;  %v4087_v17 = vpop.f32.mrb[140].mxu0  ;;  %v3032_v15 = vmax.f32 %v2953_v23, 0.0 }
 0x20f   :  { %v4169_v18 = vpop.f32.mrb[140].mxu1  ;;  %v4088_v9 = vpop.f32.mrb[141].mxu0 }
 0x210   :  { %v3033_v59 = vmax.f32 %v2956_v5, 0.0  ;;  %v4089_v38 = vadd.f32 %v4088_v9, %v4087_v17  ;;  %v4170_v32 = vpop.f32.mrb[141].mxu1  ;;  %v4090_v24 = vpop.f32.mrb[142].mxu0 }
 0x211   :  { %v4171_v20 = vadd.f32 %v4170_v32, %v4169_v18  ;;  %v4172_v51 = vpop.f32.mrb[142].mxu1  ;;  %v4091_v46 = vpop.f32.mrb[143].mxu0 }
 0x212   :  { %v3516_v7 = vpack.c.bf16 %v3033_v59, %v3032_v15  ;;  %v2841_v62 = vadd.f32 %v4089_v38, %v5419_v36  ;;  %v4092_v26 = vadd.f32 %v4091_v46, %v4090_v24  ;;  %v4173_v25 = vpop.f32.mrb[143].mxu1 }
 0x213   :  { %v4174_v27 = vadd.f32 %v4173_v25, %v4172_v51 }
 0x214   :  { %3558 = vst [vmem:[%s5526_s3 + $0x8] sm:$0xff] %v3516_v7   ;;  %v2961_v21 = vadd.f32 %v4171_v20, %v2841_v62  ;;  %v2844_v28 = vadd.f32 %v4092_v26, %v5422_v43 }
 0x216   :  { %v2964_v29 = vadd.f32 %v4174_v27, %v2844_v28  ;;  %v4093_v30 = vpop.f32.mrb[144].mxu0  ;;  %v3034_v13 = vmax.f32 %v2961_v21, 0.0 }
 0x217   :  { %v4175_v31 = vpop.f32.mrb[144].mxu1  ;;  %v4094_v34 = vpop.f32.mrb[145].mxu0 }
 0x218   :  { %v3035_v39 = vmax.f32 %v2964_v29, 0.0  ;;  %v4095_v49 = vadd.f32 %v4094_v34, %v4093_v30  ;;  %v4176_v35 = vpop.f32.mrb[145].mxu1  ;;  %v4096_v50 = vpop.f32.mrb[146].mxu0 }
 0x219   :  { %v4177_v36 = vadd.f32 %v4176_v35, %v4175_v31  ;;  %v4178_v11 = vpop.f32.mrb[146].mxu1  ;;  %v4097_v40 = vpop.f32.mrb[147].mxu0 }
 0x21a   :  { %v3521_v52 = vpack.c.bf16 %v3035_v39, %v3034_v13  ;;  %v2849_v47 = vadd.f32 %v4095_v49, %v5425_v6  ;;  %v4098_v53 = vadd.f32 %v4097_v40, %v4096_v50  ;;  %v4179_v54 = vpop.f32.mrb[147].mxu1 }
 0x21b   :  { %v4180_v19 = vadd.f32 %v4179_v54, %v4178_v11 }
 0x21c   :  { %3559 = vst [vmem:[%s5526_s3 + $0x10] sm:$0xff] %v3521_v52   ;;  %v2969_v43 = vadd.f32 %v4177_v36, %v2849_v47  ;;  %v2852_v55 = vadd.f32 %v4098_v53, %v5428_v63 }
 0x21e   :  { %v2972_v56 = vadd.f32 %v4180_v19, %v2852_v55  ;;  %v4099_v57 = vpop.f32.mrb[148].mxu0  ;;  %v3036_v1 = vmax.f32 %v2969_v43, 0.0 }
 0x21f   :  { %v4181_v44 = vpop.f32.mrb[148].mxu1  ;;  %v4100_v0 = vpop.f32.mrb[149].mxu0 }
 0x220   :  { %v3037_v61 = vmax.f32 %v2972_v56, 0.0  ;;  %v4101_v58 = vadd.f32 %v4100_v0, %v4099_v57  ;;  %v4182_v60 = vpop.f32.mrb[149].mxu1  ;;  %v4102_v41 = vpop.f32.mrb[150].mxu0 }
 0x221   :  { %v4183_v6 = vadd.f32 %v4182_v60, %v4181_v44  ;;  %v4184_v23 = vpop.f32.mrb[150].mxu1  ;;  %v4103_v3 = vpop.f32.mrb[151].mxu0 }
 0x222   :  { %v3526_v5 = vpack.c.bf16 %v3037_v61, %v3036_v1  ;;  %v2857_v17 = vadd.f32 %v4101_v58, %v5431_v48  ;;  %v4104_v18 = vadd.f32 %v4103_v3, %v4102_v41  ;;  %v4185_v9 = vpop.f32.mrb[151].mxu1 }
 0x223   :  { %v4186_v15 = vadd.f32 %v4185_v9, %v4184_v23 }
 0x224   :  { %3560 = vst [vmem:[%s5526_s3 + $0x18] sm:$0xff] %v3526_v5   ;;  %v2977_v63 = vadd.f32 %v4183_v6, %v2857_v17  ;;  %v2860_v59 = vadd.f32 %v4104_v18, %v5434_v22 }
 0x226   :  { %v2980_v38 = vadd.f32 %v4186_v15, %v2860_v59  ;;  %v4105_v32 = vpop.f32.mrb[152].mxu0  ;;  %v3038_v51 = vmax.f32 %v2977_v63, 0.0 }
 0x227   :  { %v4187_v24 = vpop.f32.mrb[152].mxu1  ;;  %v4106_v20 = vpop.f32.mrb[153].mxu0 }
 0x228   :  { %v3039_v46 = vmax.f32 %v2980_v38, 0.0  ;;  %v4107_v7 = vadd.f32 %v4106_v20, %v4105_v32  ;;  %v4188_v62 = vpop.f32.mrb[153].mxu1  ;;  %v4108_v26 = vpop.f32.mrb[154].mxu0 }
 0x229   :  { %v4189_v48 = vadd.f32 %v4188_v62, %v4187_v24  ;;  %v4190_v25 = vpop.f32.mrb[154].mxu1  ;;  %v4109_v27 = vpop.f32.mrb[155].mxu0 }
 0x22a   :  { %v3531_v21 = vpack.c.bf16 %v3039_v46, %v3038_v51  ;;  %v2865_v28 = vadd.f32 %v4107_v7, %v5437_v8  ;;  %v4110_v29 = vadd.f32 %v4109_v27, %v4108_v26  ;;  %v4191_v30 = vpop.f32.mrb[155].mxu1 }
 0x22b   :  { %v4192_v31 = vadd.f32 %v4191_v30, %v4190_v25 }
 0x22c   :  { %3561 = vst [vmem:[%s5526_s3 + $0x20] sm:$0xff] %v3531_v21   ;;  %v2985_v22 = vadd.f32 %v4189_v48, %v2865_v28  ;;  %v2868_v34 = vadd.f32 %v4110_v29, %v5440_v16 }
 0x22e   :  { %v2988_v13 = vadd.f32 %v4192_v31, %v2868_v34  ;;  %v4111_v39 = vpop.f32.mrb[156].mxu0  ;;  %v3040_v50 = vmax.f32 %v2985_v22, 0.0 }
 0x22f   :  { %v4193_v49 = vpop.f32.mrb[156].mxu1  ;;  %v4112_v35 = vpop.f32.mrb[157].mxu0 }
 0x230   :  { %v3041_v36 = vmax.f32 %v2988_v13, 0.0  ;;  %v4113_v11 = vadd.f32 %v4112_v35, %v4111_v39  ;;  %v4194_v40 = vpop.f32.mrb[157].mxu1  ;;  %v4114_v52 = vpop.f32.mrb[158].mxu0 }
 0x231   :  { %v4195_v8 = vadd.f32 %v4194_v40, %v4193_v49  ;;  %v4196_v47 = vpop.f32.mrb[158].mxu1  ;;  %v4115_v53 = vpop.f32.mrb[159].mxu0 }
 0x232   :  { %v3536_v54 = vpack.c.bf16 %v3041_v36, %v3040_v50  ;;  %v2873_v19 = vadd.f32 %v4113_v11, %v5443_v33  ;;  %v4116_v43 = vadd.f32 %v4115_v53, %v4114_v52  ;;  %v4197_v55 = vpop.f32.mrb[159].mxu1 }
 0x233   :  { %v4198_v56 = vadd.f32 %v4197_v55, %v4196_v47 }
 0x234   :  { %3562 = vst [vmem:[%s5526_s3 + $0x28] sm:$0xff] %v3536_v54   ;;  %v2993_v16 = vadd.f32 %v4195_v8, %v2873_v19  ;;  %v2876_v57 = vadd.f32 %v4116_v43, %v5446_v45 }
 0x236   :  { %v2996_v44 = vadd.f32 %v4198_v56, %v2876_v57  ;;  %v4117_v0 = vpop.f32.mrb[160].mxu0  ;;  %v3042_v58 = vmax.f32 %v2993_v16, 0.0 }
 0x237   :  { %v4199_v1 = vpop.f32.mrb[160].mxu1  ;;  %v4118_v61 = vpop.f32.mrb[161].mxu0 }
 0x238   :  { %v3043_v60 = vmax.f32 %v2996_v44, 0.0  ;;  %v4119_v41 = vadd.f32 %v4118_v61, %v4117_v0  ;;  %v4200_v6 = vpop.f32.mrb[161].mxu1  ;;  %v4120_v23 = vpop.f32.mrb[162].mxu0 }
 0x239   :  { %v4201_v33 = vadd.f32 %v4200_v6, %v4199_v1  ;;  %v4202_v3 = vpop.f32.mrb[162].mxu1  ;;  %v4121_v5 = vpop.f32.mrb[163].mxu0 }
 0x23a   :  { %v3541_v17 = vpack.c.bf16 %v3043_v60, %v3042_v58  ;;  %v2881_v18 = vadd.f32 %v4119_v41, %v5449_v10  ;;  %v4122_v9 = vadd.f32 %v4121_v5, %v4120_v23  ;;  %v4203_v15 = vpop.f32.mrb[163].mxu1 }
 0x23b   :  { %v4204_v63 = vadd.f32 %v4203_v15, %v4202_v3 }
 0x23c   :  { %3563 = vst [vmem:[%s5526_s3 + $0x30] sm:$0xff] %v3541_v17   ;;  %v3001_v45 = vadd.f32 %v4201_v33, %v2881_v18  ;;  %v2884_v59 = vadd.f32 %v4122_v9, %v5452_v14 }
 0x23e   :  { %v3004_v38 = vadd.f32 %v4204_v63, %v2884_v59  ;;  %v4123_v32 = vpop.f32.mrb[164].mxu0  ;;  %v3044_v51 = vmax.f32 %v3001_v45, 0.0 }
 0x23f   :  { %v4205_v24 = vpop.f32.mrb[164].mxu1  ;;  %v4124_v20 = vpop.f32.mrb[165].mxu0 }
 0x240   :  { %v3045_v46 = vmax.f32 %v3004_v38, 0.0  ;;  %v4125_v7 = vadd.f32 %v4124_v20, %v4123_v32  ;;  %v4206_v62 = vpop.f32.mrb[165].mxu1  ;;  %v4126_v26 = vpop.f32.mrb[166].mxu0 }
 0x241   :  { %v4207_v10 = vadd.f32 %v4206_v62, %v4205_v24  ;;  %v4208_v48 = vpop.f32.mrb[166].mxu1  ;;  %v4127_v25 = vpop.f32.mrb[167].mxu0 }
 0x242   :  { %v3546_v27 = vpack.c.bf16 %v3045_v46, %v3044_v51  ;;  %v2889_v21 = vadd.f32 %v4125_v7, %v5455_v42  ;;  %v4128_v28 = vadd.f32 %v4127_v25, %v4126_v26  ;;  %v4209_v29 = vpop.f32.mrb[167].mxu1 }
 0x243   :  { %v4210_v30 = vadd.f32 %v4209_v29, %v4208_v48 }
 0x244   :  { %3564 = vst [vmem:[%s5526_s3 + $0x38] sm:$0xff] %v3546_v27   ;;  %v3009_v14 = vadd.f32 %v4207_v10, %v2889_v21  ;;  %v2892_v31 = vadd.f32 %v4128_v28, %v5458_v37 }
 0x246   :  { %v3012_v22 = vadd.f32 %v4210_v30, %v2892_v31  ;;  %v4129_v34 = vpop.f32.mrb[168].mxu0  ;;  %v3046_v49 = vmax.f32 %v3009_v14, 0.0 }
 0x247   :  { %v4211_v13 = vpop.f32.mrb[168].mxu1  ;;  %v4130_v39 = vpop.f32.mrb[169].mxu0 }
 0x248   :  { %v3047_v35 = vmax.f32 %v3012_v22, 0.0  ;;  %v4131_v50 = vadd.f32 %v4130_v39, %v4129_v34  ;;  %v4212_v36 = vpop.f32.mrb[169].mxu1  ;;  %v4132_v11 = vpop.f32.mrb[170].mxu0 }
 0x249   :  { %v4213_v42 = vadd.f32 %v4212_v36, %v4211_v13  ;;  %v4214_v40 = vpop.f32.mrb[170].mxu1  ;;  %v4133_v52 = vpop.f32.mrb[171].mxu0 }
 0x24a   :  { %v3551_v8 = vpack.c.bf16 %v3047_v35, %v3046_v49  ;;  %v2897_v47 = vadd.f32 %v4131_v50, %v5461_v2  ;;  %v4134_v53 = vadd.f32 %v4133_v52, %v4132_v11  ;;  %v4215_v54 = vpop.f32.mrb[171].mxu1 }
 0x24b   :  { %v4216_v19 = vadd.f32 %v4215_v54, %v4214_v40 }
 0x24c   :  { %3565 = vst [vmem:[%s5526_s3 + $0x40] sm:$0xff] %v3551_v8   ;;  %v3017_v37 = vadd.f32 %v4213_v42, %v2897_v47  ;;  %v2900_v43 = vadd.f32 %v4134_v53, %v5464_v4 }
 0x24e   :  { %v3020_v55 = vadd.f32 %v4216_v19, %v2900_v43  ;;  %v4135_v56 = vpop.f32.mrb[172].mxu0  ;;  %v3048_v44 = vmax.f32 %v3017_v37, 0.0 }
 0x24f   :  { %v4217_v16 = vpop.f32.mrb[172].mxu1  ;;  %v4136_v57 = vpop.f32.mrb[173].mxu0 }
 0x250   :  { %v3049_v0 = vmax.f32 %v3020_v55, 0.0  ;;  %v4137_v1 = vadd.f32 %v4136_v57, %v4135_v56  ;;  %v4218_v61 = vpop.f32.mrb[173].mxu1  ;;  %v4138_v58 = vpop.f32.mrb[174].mxu0 }
 0x251   :  { %v4219_v2 = vadd.f32 %v4218_v61, %v4217_v16  ;;  %v4220_v60 = vpop.f32.mrb[174].mxu1  ;;  %v4139_v41 = vpop.f32.mrb[175].mxu0 }
 0x252   :  { %v3556_v6 = vpack.c.bf16 %v3049_v0, %v3048_v44  ;;  %v2905_v23 = vadd.f32 %v4137_v1, %v5467_v12  ;;  %v4221_v33 = vpop.f32.mrb[175].mxu1 }
 0x254   :  { %3566 = vst [vmem:[%s5526_s3 + $0x48] sm:$0xff] %v3556_v6   ;;  %v3025_v4 = vadd.f32 %v4219_v2, %v2905_v23 }
 0x256   :  { %v3050_v3 = vmax.f32 %v3025_v4, 0.0 }
 0x258   :  { %v3507_v5 = vpack.c.bf16 %v3050_v3, %v3050_v3 }
 0x25a   :  { %3156 = vst [vmem:[%s5526_s3 + $0x50] sm:$0xf] %v3507_v5 }

// kernel: cnn_forward.6
= control target key start
LH: loop header
LB: loop body
LE: loop exit
PB: predicated region body
PF: predicated region fallthrough
CT: control target
= control target key end

     0   :  { %vm2160_vm0 = vmmov 0   ;;  %s2695_s1 = inlined_call_operand.vmem [shape: bf16[1152,128], index: 1, kind: input, shape index: {}]   ;;  %s2696_s0 = inlined_call_operand.vmem [shape: bf16[104,1152], index: 0, kind: input, shape index: {}]   ;;  %s2697_s2 = inlined_call_operand.vmem [shape: f32[1,128], index: 2, kind: input, shape index: {}]   ;;  %s2698_s3 = inlined_call_operand.vmem [shape: bf16[104,128], index: 3, kind: output, shape index: {}]  }
   0x1   :  { %v2000_v0 = vld [vmem:[%s2695_s1 + $0x40] sm:$0xff]   ;;  %v2002_v2 = vld [vmem:[%s2695_s1 + $0x48] sm:$0xff]   ;;  %v2004_v4 = vld [vmem:[%s2695_s1 + $0x50] sm:$0xff]  }
   0x2   :  { %v2001_v1 = vld [vmem:[%s2695_s1] sm:$0xff]   ;;  %1982 = vmatprep.subr.bf16.mxu1 %v2000_v0  ;;  %1691 = vmatprep.subr.bf16.mxu0 %v2000_v0  ;;  %v2003_v3 = vld [vmem:[%s2695_s1 + $0x8] sm:$0xff]   ;;  %v2005_v5 = vld [vmem:[%s2695_s1 + $0x10] sm:$0xff]  }
   0x3   :  { %1990 = vmatpush3.bf16.msra.mxu1 %v2001_v1  ;;  %1692 = vmatpush3.bf16.msra.mxu0 %v2001_v1  ;;  %v2006_v6 = vld [vmem:[%s2695_s1 + $0x58] sm:$0xff]   ;;  %v2008_v8 = vld [vmem:[%s2695_s1 + $0x60] sm:$0xff]   ;;  %v2010_v10 = vld [vmem:[%s2695_s1 + $0x68] sm:$0xff]  }
   0x4   :  { %1983 = vmatprep.subr.bf16.mxu1 %v2002_v2  ;;  %1693 = vmatprep.subr.bf16.mxu0 %v2002_v2  ;;  %v2007_v7 = vld [vmem:[%s2695_s1 + $0x18] sm:$0xff]   ;;  %v2009_v9 = vld [vmem:[%s2695_s1 + $0x20] sm:$0xff]   ;;  %v2011_v12 = vld [vmem:[%s2695_s1 + $0x28] sm:$0xff]  }
   0x5   :  { %v2018_v11 = vld [vmem:[%s2696_s0 + $0x124] ss:$36 sps:$4 sm:$0xff]   ;;  %v2012_v14 = vld [vmem:[%s2695_s1 + $0x70] sm:$0xff]   ;;  %v2014_v16 = vld [vmem:[%s2695_s1 + $0x78] sm:$0xff]  }
   0x6   :  { %v2022_v13 = vld [vmem:[%s2696_s0 + $0x4] ss:$36 sps:$4 sm:$0xff]   ;;  %1035 = vmatprep.mubr.bf16.mxu1 %v2018_v11  ;;  %v2013_v15 = vld [vmem:[%s2695_s1 + $0x30] sm:$0xff]   ;;  %v2015_v17 = vld [vmem:[%s2695_s1 + $0x38] sm:$0xff]  }
   0x7   :  { %1991 = vmatpush3.bf16.msra.mxu1 %v2003_v3  ;;  %1694 = vmatpush3.bf16.msra.mxu0 %v2003_v3  ;;  %v2019_v18 = vld [vmem:[%s2695_s1 + $0xc0] sm:$0xff]   ;;  %v2026_v24 = vld [vmem:[%s2695_s1 + $0xc8] sm:$0xff]   ;;  %v2030_v30 = vld [vmem:[%s2695_s1 + $0xd0] sm:$0xff]  }
   0x8   :  { %1984 = vmatprep.subr.bf16.mxu1 %v2004_v4  ;;  %1695 = vmatprep.subr.bf16.mxu0 %v2004_v4  ;;  %v2016_v19 = vld [vmem:[%s2696_s0 + $0x120] ss:$36 sps:$4 sm:$0xff]   ;;  %v2028_v25 = vld [vmem:[%s2695_s1 + $0x148] sm:$0xff]   ;;  %v2035_v31 = vld [vmem:[%s2695_s1 + $0x150] sm:$0xff]  }
   0x9   :  { %1003 = vmatprep.mubr.bf16.mxu0 %v2022_v13  ;;  %v2020_v20 = vld [vmem:[%s2696_s0] ss:$36 sps:$4 sm:$0xff]   ;;  %v2031_v26 = vld [vmem:[%s2696_s0 + $0x4c] ss:$36 sps:$4 sm:$0xff]   ;;  %v2037_v36 = vld [vmem:[%s2695_s1 + $0xd8] sm:$0xff]  }
   0xa   :  { %v2024_v21 = vld [vmem:[%s2695_s1 + $0x140] sm:$0xff]   ;;  %v2027_v27 = vld [vmem:[%s2695_s1 + $0x88] sm:$0xff]   ;;  %v2033_v32 = vld [vmem:[%s2695_s1 + $0x90] sm:$0xff]  }
   0xb   :  { %1992 = vmatpush3.bf16.msra.mxu1 %v2005_v5  ;;  %1696 = vmatpush3.bf16.msra.mxu0 %v2005_v5  ;;  %v2023_v22 = vld [vmem:[%s2695_s1 + $0x80] sm:$0xff]   ;;  %v2038_v28 = vld [vmem:[%s2696_s0 + $0x16c] ss:$36 sps:$4 sm:$0xff]   ;;  %v2042_v37 = vld [vmem:[%s2695_s1 + $0x158] sm:$0xff]  }
   0xc   :  { %1985 = vmatprep.subr.bf16.mxu1 %v2006_v6  ;;  %1697 = vmatprep.subr.bf16.mxu0 %v2006_v6  ;;  %v2025_v23 = vld [vmem:[%s2695_s1 + $0x100] sm:$0xff]   ;;  %v2029_v29 = vld [vmem:[%s2695_s1 + $0x108] sm:$0xff]   ;;  %v2036_v35 = vld [vmem:[%s2695_s1 + $0x110] sm:$0xff]  }
   0xd   :  { %v2034_v33 = vld [vmem:[%s2696_s0 + $0x48] ss:$36 sps:$4 sm:$0xff]   ;;  %v2040_v38 = vld [vmem:[%s2695_s1 + $0x98] sm:$0xff]   ;;  %v2044_v41 = vld [vmem:[%s2695_s1 + $0xe0] sm:$0xff]  }
   0xe   :  { %v2041_v34 = vld [vmem:[%s2696_s0 + $0x168] ss:$36 sps:$4 sm:$0xff]   ;;  %v2045_v39 = vld [vmem:[%s2696_s0 + $0x94] ss:$36 sps:$4 sm:$0xff]   ;;  %v2049_v43 = vld [vmem:[%s2695_s1 + $0x160] sm:$0xff]  }
   0xf   :  { %1993 = vmatpush3.bf16.msra.mxu1 %v2007_v7  ;;  %1698 = vmatpush3.bf16.msra.mxu0 %v2007_v7  ;;  %v2043_v40 = vld [vmem:[%s2695_s1 + $0x118] sm:$0xff]   ;;  %v75_v42 = vld [vmem:[%s2696_s0 + $0x1b0] sm:$0xff]  ;;  %v2047_v45 = vld [vmem:[%s2695_s1 + $0xa0] sm:$0xff]   ;;  %v2159_v7 = vmov 0.0  }
  0x10   :  { %1986 = vmatprep.subr.bf16.mxu1 %v2008_v8  ;;  %1699 = vmatprep.subr.bf16.mxu0 %v2008_v8  ;;  %v1550_v44 = vcombine.high %v75_v42, %v75_v42  ;;  %v2048_v46 = vld [vmem:[%s2696_s0 + $0x90] ss:$36 sps:$4 sm:$0xff]   ;;  %v2050_v47 = vld [vmem:[%s2695_s1 + $0x120] sm:$0xff]   ;;  %v1549_v48 = vcombine.low %v75_v42, %v75_v42  ;;  %v2051_v49 = vld [vmem:[%s2695_s1 + $0xe8] sm:$0xff]  }
  0x11   :  { %v2055_v50 = vld [vmem:[%s2695_s1 + $0x168] sm:$0xff]   ;;  %v2058_v52 = vld [vmem:[%s2696_s0 + $0xdc] ss:$36 sps:$4 sm:$0xff]   ;;  %v2057_v54 = vld [vmem:[%s2695_s1 + $0xf0] sm:$0xff]  }
  0x12   :  { %v2053_v51 = vld [vmem:[%s2695_s1 + $0xa8] sm:$0xff]   ;;  %v2062_v55 = vld [vmem:[%s2695_s1 + $0x170] sm:$0xff]   ;;  %v2061_v57 = vld [vmem:[%s2696_s0 + $0xd8] ss:$36 sps:$4 sm:$0xff]  }
  0x13   :  { %1994 = vmatpush3.bf16.msra.mxu1 %v2009_v9  ;;  %1700 = vmatpush3.bf16.msra.mxu0 %v2009_v9  ;;  %v2056_v53 = vld [vmem:[%s2695_s1 + $0x128] sm:$0xff]   ;;  %v2060_v56 = vld [vmem:[%s2695_s1 + $0xb0] sm:$0xff]   ;;  %v2064_v59 = vld [vmem:[%s2695_s1 + $0xf8] sm:$0xff]  }
  0x14   :  { %1987 = vmatprep.subr.bf16.mxu1 %v2010_v10  ;;  %1701 = vmatprep.subr.bf16.mxu0 %v2010_v10  ;;  %v2063_v58 = vld [vmem:[%s2695_s1 + $0x130] sm:$0xff]   ;;  %v2066_v60 = vld [vmem:[%s2695_s1 + $0x178] sm:$0xff]   ;;  %v2071_v0 = vld [vmem:[%s2695_s1 + $0x1c0] sm:$0xff]  }
  0x15   :  { %v2069_v61 = vld [vmem:[%s2696_s0 + $0xc] ss:$36 sps:$4 sm:$0xff]   ;;  %v2065_v62 = vld [vmem:[%s2695_s1 + $0xb8] sm:$0xff]   ;;  %v2075_v4 = vld [vmem:[%s2695_s1 + $0x180] sm:$0xff]  }
  0x16   :  { %v2070_v63 = vld [vmem:[%s2695_s1 + $0x138] sm:$0xff]   ;;  %v2067_v2 = vld [vmem:[%s2696_s0 + $0x8] ss:$36 sps:$4 sm:$0xff]   ;;  %v2072_v3 = vld [vmem:[%s2696_s0 + $0x10] ss:$36 sps:$4 sm:$0xff]  }
  0x17   :  { %1995 = vmatpush3.bf16.msra.mxu1 %v2011_v12  ;;  %1702 = vmatpush3.bf16.msra.mxu0 %v2011_v12  ;;  %v2074_v1 = vld [vmem:[%s2696_s0 + $0x14] ss:$36 sps:$4 sm:$0xff]   ;;  %v2076_v5 = vld [vmem:[%s2695_s1 + $0x200] sm:$0xff]   ;;  %v2079_v8 = vld [vmem:[%s2695_s1 + $0x1c8] sm:$0xff]  }
  0x18   :  { %1988 = vmatprep.subr.bf16.mxu1 %v2012_v14  ;;  %1703 = vmatprep.subr.bf16.mxu0 %v2012_v14  ;;  %v2077_v6 = vld [vmem:[%s2696_s0 + $0x54] ss:$36 sps:$4 sm:$0xff]   ;;  %v2081_v9 = vld [vmem:[%s2695_s1 + $0x188] sm:$0xff]   ;;  %v2082_v10 = vld [vmem:[%s2696_s0 + $0x5c] ss:$36 sps:$4 sm:$0xff]  }
  0x19   :  { %v2085_v11 = vld [vmem:[%s2695_s1 + $0x208] sm:$0xff]   ;;  %v2086_v12 = vld [vmem:[%s2695_s1 + $0x1d0] sm:$0xff]   ;;  %v2084_v14 = vld [vmem:[%s2696_s0 + $0x58] ss:$36 sps:$4 sm:$0xff]  }
  0x1a   :  { %v2080_v13 = vld [vmem:[%s2696_s0 + $0x50] ss:$36 sps:$4 sm:$0xff]   ;;  %v2128_v42 = vld [vmem:[%s2695_s1 + $0x1f8] sm:$0xff]  }
  0x1b   :  { %1996 = vmatpush3.bf16.msra.mxu1 %v2013_v15  ;;  %1704 = vmatpush3.bf16.msra.mxu0 %v2013_v15  ;;  %v2087_v15 = vld [vmem:[%s2696_s0 + $0x9c] ss:$36 sps:$4 sm:$0xff]  }
  0x1c   :  { %1989 = vmatprep.subr.bf16.mxu1 %v2014_v16  ;;  %1705 = vmatprep.subr.bf16.mxu0 %v2014_v16  ;;  %v2089_v16 = vld [vmem:[%s2695_s1 + $0x190] sm:$0xff]  }
  0x1f   :  { %1997 = vmatpush3.bf16.msra.mxu1 %v2015_v17  ;;  %1706 = vmatpush3.bf16.msra.mxu0 %v2015_v17  ;;  %v2091_v17 = vld [vmem:[%s2696_s0 + $0xa4] ss:$36 sps:$4 sm:$0xff]  }
  0x20   :  { %1749 = vmatprep.subr.bf16.mxu1 %v2019_v18  ;;  %1807 = vmatprep.subr.bf16.mxu0 %v2024_v21  ;;  %v2094_v18 = vld [vmem:[%s2695_s1 + $0x210] sm:$0xff]   ;;  %v2090_v21 = vld [vmem:[%s2696_s0 + $0x98] ss:$36 sps:$4 sm:$0xff]  }
  0x22   :  { %1036 = vmatmul.mubr.bf16.vlgmr.msra.gmra.mrb[0].mxu1 %v2016_v19  ;;  %1004 = vmatmul.mubr.bf16.vlgmr.msra.gmra.mrb[0].mxu0 %v2020_v20  ;;  %v2095_v19 = vld [vmem:[%s2695_s1 + $0x1d8] sm:$0xff]  }
  0x23   :  { %1750 = vmatpush3.bf16.msra.mxu1 %v2023_v22  ;;  %1808 = vmatpush3.bf16.msra.mxu0 %v2025_v23  ;;  %v2096_v20 = vld [vmem:[%s2695_s1 + $0x198] sm:$0xff]   ;;  %v2093_v22 = vld [vmem:[%s2696_s0 + $0xa0] ss:$36 sps:$4 sm:$0xff]  }
  0x24   :  { %1751 = vmatprep.subr.bf16.mxu1 %v2026_v24  ;;  %1809 = vmatprep.subr.bf16.mxu0 %v2028_v25  ;;  %v2097_v23 = vld [vmem:[%s2696_s0 + $0xe4] ss:$36 sps:$4 sm:$0xff]   ;;  %v2100_v24 = vld [vmem:[%s2696_s0 + $0xec] ss:$36 sps:$4 sm:$0xff]   ;;  %v2103_v25 = vld [vmem:[%s2695_s1 + $0x218] sm:$0xff]  }
  0x25   :  { %1011 = vmatprep.mubr.bf16.mxu0 %v2031_v26  ;;  %1043 = vmatprep.mubr.bf16.mxu1 %v2038_v28  ;;  %v2104_v26 = vld [vmem:[%s2695_s1 + $0x1e0] sm:$0xff]  }
  0x26   :  { %v2099_v28 = vld [vmem:[%s2696_s0 + $0xe0] ss:$36 sps:$4 sm:$0xff]  }
  0x27   :  { %1752 = vmatpush3.bf16.msra.mxu1 %v2027_v27  ;;  %1810 = vmatpush3.bf16.msra.mxu0 %v2029_v29  ;;  %v2105_v27 = vld [vmem:[%s2695_s1 + $0x1a0] sm:$0xff]   ;;  %v2102_v29 = vld [vmem:[%s2696_s0 + $0xe8] ss:$36 sps:$4 sm:$0xff]  }
  0x28   :  { %1753 = vmatprep.subr.bf16.mxu1 %v2030_v30  ;;  %1811 = vmatprep.subr.bf16.mxu0 %v2035_v31  ;;  %v2112_v30 = vld [vmem:[%s2695_s1 + $0x220] sm:$0xff]   ;;  %v2113_v31 = vld [vmem:[%s2695_s1 + $0x1e8] sm:$0xff]  }
  0x2a   :  { %1012 = vmatmul.mubr.bf16.gmra.mrb[4].mxu0 %v2034_v33  ;;  %1044 = vmatmul.mubr.bf16.gmra.mrb[4].mxu1 %v2041_v34  ;;  %v2106_v33 = vld [vmem:[%s2696_s0 + $0x12c] ss:$36 sps:$4 sm:$0xff]   ;;  %v2109_v34 = vld [vmem:[%s2696_s0 + $0x134] ss:$36 sps:$4 sm:$0xff]  }
  0x2b   :  { %1754 = vmatpush3.bf16.msra.mxu1 %v2033_v32  ;;  %1812 = vmatpush3.bf16.msra.mxu0 %v2036_v35  ;;  %v2114_v32 = vld [vmem:[%s2695_s1 + $0x1a8] sm:$0xff]  }
  0x2c   :  { %1755 = vmatprep.subr.bf16.mxu1 %v2037_v36  ;;  %1813 = vmatprep.subr.bf16.mxu0 %v2042_v37  ;;  %v2120_v35 = vld [vmem:[%s2695_s1 + $0x228] sm:$0xff]   ;;  %v2122_v36 = vld [vmem:[%s2695_s1 + $0x1f0] sm:$0xff]  }
  0x2d   :  { %1019 = vmatprep.mubr.bf16.mxu0 %v2045_v39  ;;  %1051 = vmatprep.mubr.bf16.mxu1 %v1550_v44  ;;  %v2108_v37 = vld [vmem:[%s2696_s0 + $0x128] ss:$36 sps:$4 sm:$0xff]   ;;  %v2123_v39 = vld [vmem:[%s2695_s1 + $0x1b0] sm:$0xff]   ;;  %v2130_v44 = vld [vmem:[%s2695_s1 + $0x1b8] sm:$0xff]  }
  0x2f   :  { %1756 = vmatpush3.bf16.msra.mxu1 %v2040_v38  ;;  %1814 = vmatpush3.bf16.msra.mxu0 %v2043_v40  ;;  %v2111_v38 = vld [vmem:[%s2696_s0 + $0x130] ss:$36 sps:$4 sm:$0xff]  }
  0x30   :  { %1757 = vmatprep.subr.bf16.mxu1 %v2044_v41  ;;  %1815 = vmatprep.subr.bf16.mxu0 %v2049_v43  ;;  %v2115_v40 = vld [vmem:[%s2696_s0 + $0x174] ss:$36 sps:$4 sm:$0xff]   ;;  %v2118_v43 = vld [vmem:[%s2696_s0 + $0x17c] ss:$36 sps:$4 sm:$0xff]  }
  0x31   :  { %v2126_v41 = vld [vmem:[%s2695_s1 + $0x230] sm:$0xff]  }
  0x32   :  { %1020 = vmatmul.mubr.bf16.gmra.mrb[8].mxu0 %v2048_v46  ;;  %1052 = vmatmul.mubr.bf16.gmra.mrb[8].mxu1 %v1549_v48  ;;  %v76_v46 = vld [vmem:[%s2696_s0 + $0x1b8] sm:$0xff]  ;;  %v2117_v48 = vld [vmem:[%s2696_s0 + $0x170] ss:$36 sps:$4 sm:$0xff]  }
  0x33   :  { %1758 = vmatpush3.bf16.msra.mxu1 %v2047_v45  ;;  %1816 = vmatpush3.bf16.msra.mxu0 %v2050_v47  ;;  %v2134_v45 = vld [vmem:[%s2695_s1 + $0x238] sm:$0xff]   ;;  %v77_v47 = vld [vmem:[%s2696_s0 + $0x1c0] sm:$0xff] }
  0x34   :  { %1759 = vmatprep.subr.bf16.mxu1 %v2051_v49  ;;  %1817 = vmatprep.subr.bf16.mxu0 %v2055_v50  ;;  %v2121_v49 = vld [vmem:[%s2696_s0 + $0x178] ss:$36 sps:$4 sm:$0xff]   ;;  %v1552_v50 = vcombine.high %v76_v46, %v76_v46 }
  0x35   :  { %1027 = vmatprep.mubr.bf16.mxu0 %v2058_v52  ;;  %1091 = vmatprep.mubr.bf16.mxu1 %v2069_v61  ;;  %v1551_v52 = vcombine.low %v76_v46, %v76_v46  ;;  %v2142_v61 = vld [vmem:[%s2696_s0 + $0xa8] ss:$36 sps:$4 sm:$0xff]  }
  0x37   :  { %1760 = vmatpush3.bf16.msra.mxu1 %v2053_v51  ;;  %1818 = vmatpush3.bf16.msra.mxu0 %v2056_v53  ;;  %v1554_v51 = vcombine.high %v77_v47, %v77_v47  ;;  %v1553_v53 = vcombine.low %v77_v47, %v77_v47 }
  0x38   :  { %1761 = vmatprep.subr.bf16.mxu1 %v2057_v54  ;;  %1819 = vmatprep.subr.bf16.mxu0 %v2062_v55  ;;  %v2133_v54 = vld [vmem:[%s2696_s0 + $0x1c] ss:$36 sps:$4 sm:$0xff]  }
  0x39   :  { %v2131_v55 = vld [vmem:[%s2696_s0 + $0x18] ss:$36 sps:$4 sm:$0xff]  }
  0x3a   :  { %1028 = vmatmul.mubr.bf16.gmra.mrb[12].mxu0 %v2061_v57  ;;  %v2136_v57 = vld [vmem:[%s2696_s0 + $0x64] ss:$36 sps:$4 sm:$0xff]  }
  0x3b   :  { %1762 = vmatpush3.bf16.msra.mxu1 %v2060_v56  ;;  %1820 = vmatpush3.bf16.msra.mxu0 %v2063_v58  ;;  %v2135_v56 = vld [vmem:[%s2696_s0 + $0x20] ss:$36 sps:$4 sm:$0xff]  }
  0x3c   :  { %1763 = vmatprep.subr.bf16.mxu1 %v2064_v59  ;;  %1821 = vmatprep.subr.bf16.mxu0 %v2066_v60  ;;  %v2138_v58 = vld [vmem:[%s2696_s0 + $0x60] ss:$36 sps:$4 sm:$0xff]   ;;  %v2139_v59 = vld [vmem:[%s2696_s0 + $0x68] ss:$36 sps:$4 sm:$0xff]  }
  0x3d   :  { %1179 = vmatprep.mubr.bf16.mxu0 %v2074_v1  ;;  %v2140_v60 = vld [vmem:[%s2696_s0 + $0xac] ss:$36 sps:$4 sm:$0xff]   ;;  %v2147_v1 = vld [vmem:[%s2696_s0 + $0xf8] ss:$36 sps:$4 sm:$0xff]  }
  0x3f   :  { %1764 = vmatpush3.bf16.msra.mxu1 %v2065_v62  ;;  %1822 = vmatpush3.bf16.msra.mxu0 %v2070_v63  ;;  %v2143_v62 = vld [vmem:[%s2696_s0 + $0xb0] ss:$36 sps:$4 sm:$0xff]  }
  0x40   :  { %1865 = vmatprep.subr.bf16.mxu1 %v2071_v0  ;;  %1938 = vmatprep.subr.bf16.mxu0 %v2159_v7  ;;  %v2144_v63 = vld [vmem:[%s2696_s0 + $0xf4] ss:$36 sps:$4 sm:$0xff]  }
  0x41   :  { %v2146_v0 = vld [vmem:[%s2696_s0 + $0xf0] ss:$36 sps:$4 sm:$0xff]  }
  0x42   :  { %1092 = vmatmul.mubr.bf16.vlgmr.msra.gmra.mrb[12].mxu1 %v2067_v2  ;;  %1180 = vmatmul.mubr.bf16.vlgmr.msra.gmra.mrb[16].mxu0 %v2072_v3  ;;  %v2148_v2 = vld [vmem:[%s2696_s0 + $0x13c] ss:$36 sps:$4 sm:$0xff]  }
  0x43   :  { %1866 = vmatpush3.bf16.msra.mxu1 %v2075_v4  ;;  %1939 = vmatpush3.bf16.msra.mxu0 %v2076_v5  ;;  %v2150_v3 = vld [vmem:[%s2696_s0 + $0x138] ss:$36 sps:$4 sm:$0xff]   ;;  %v2151_v4 = vld [vmem:[%s2696_s0 + $0x140] ss:$36 sps:$4 sm:$0xff]  }
  0x44   :  { %1099 = vmatprep.mubr.bf16.mxu1 %v2077_v6  ;;  %1867 = vmatprep.subr.bf16.mxu1 %v2079_v8  ;;  %v2152_v5 = vld [vmem:[%s2696_s0 + $0x184] ss:$36 sps:$4 sm:$0xff]  }
  0x45   :  { %1187 = vmatprep.mubr.bf16.mxu0 %v2082_v10  ;;  %1940 = vmatprep.subr.bf16.mxu0 %v2159_v7  ;;  %v78_v6 = vld [vmem:[%s2696_s0 + $0x1c8] sm:$0xff]  ;;  %v2154_v8 = vld [vmem:[%s2696_s0 + $0x180] ss:$36 sps:$4 sm:$0xff]  }
  0x46   :  { %v1556_v10 = vcombine.high %v78_v6, %v78_v6 }
  0x47   :  { %1868 = vmatpush3.bf16.msra.mxu1 %v2081_v9  ;;  %1941 = vmatpush3.bf16.msra.mxu0 %v2085_v11  ;;  %v2155_v9 = vld [vmem:[%s2696_s0 + $0x188] ss:$36 sps:$4 sm:$0xff]   ;;  %v1555_v11 = vcombine.low %v78_v6, %v78_v6 }
  0x48   :  { %1869 = vmatprep.subr.bf16.mxu1 %v2086_v12  ;;  %1942 = vmatprep.subr.bf16.mxu0 %v2159_v7  ;;  %v2158_v12 = vld [vmem:[%s2696_s0 + $0x1d0] ss:$0 sps:$4 sm:$0xff]  }
  0x4a   :  { %1100 = vmatmul.mubr.bf16.gmra.mrb[16].mxu1 %v2080_v13  ;;  %1188 = vmatmul.mubr.bf16.gmra.mrb[20].mxu0 %v2084_v14 }
  0x4b   :  { %1107 = vmatprep.mubr.bf16.mxu1 %v2087_v15  ;;  %1870 = vmatpush3.bf16.msra.mxu1 %v2089_v16 }
  0x4c   :  { %1195 = vmatprep.mubr.bf16.mxu0 %v2091_v17  ;;  %1943 = vmatpush3.bf16.msra.mxu0 %v2094_v18 }
  0x4d   :  { %1871 = vmatprep.subr.bf16.mxu1 %v2095_v19  ;;  %1944 = vmatprep.subr.bf16.mxu0 %v2159_v7 }
  0x4f   :  { %1872 = vmatpush3.bf16.msra.mxu1 %v2096_v20 }
  0x50   :  { %1945 = vmatpush3.bf16.msra.mxu0 %v2103_v25  ;;  %1873 = vmatprep.subr.bf16.mxu1 %v2104_v26 }
  0x51   :  { %1946 = vmatprep.subr.bf16.mxu0 %v2159_v7 }
  0x52   :  { %1108 = vmatmul.mubr.bf16.gmra.mrb[20].mxu1 %v2090_v21  ;;  %1196 = vmatmul.mubr.bf16.gmra.mrb[24].mxu0 %v2093_v22 }
  0x53   :  { %1115 = vmatprep.mubr.bf16.mxu1 %v2097_v23  ;;  %1203 = vmatprep.mubr.bf16.mxu0 %v2100_v24 }
  0x54   :  { %1874 = vmatpush3.bf16.msra.mxu1 %v2105_v27  ;;  %1947 = vmatpush3.bf16.msra.mxu0 %v2112_v30 }
  0x55   :  { %1875 = vmatprep.subr.bf16.mxu1 %v2113_v31  ;;  %1948 = vmatprep.subr.bf16.mxu0 %v2159_v7 }
  0x58   :  { %1876 = vmatpush3.bf16.msra.mxu1 %v2114_v32  ;;  %1949 = vmatpush3.bf16.msra.mxu0 %v2120_v35 }
  0x59   :  { %1877 = vmatprep.subr.bf16.mxu1 %v2122_v36  ;;  %1950 = vmatprep.subr.bf16.mxu0 %v2159_v7 }
  0x5a   :  { %1116 = vmatmul.mubr.bf16.gmra.mrb[24].mxu1 %v2099_v28  ;;  %1204 = vmatmul.mubr.bf16.gmra.mrb[28].mxu0 %v2102_v29 }
  0x5b   :  { %1123 = vmatprep.mubr.bf16.mxu1 %v2106_v33  ;;  %1211 = vmatprep.mubr.bf16.mxu0 %v2109_v34 }
  0x5c   :  { %1878 = vmatpush3.bf16.msra.mxu1 %v2123_v39  ;;  %1951 = vmatpush3.bf16.msra.mxu0 %v2126_v41 }
  0x5d   :  { %1879 = vmatprep.subr.bf16.mxu1 %v2128_v42  ;;  %1952 = vmatprep.subr.bf16.mxu0 %v2159_v7 }
  0x60   :  { %1880 = vmatpush3.bf16.msra.mxu1 %v2130_v44  ;;  %1953 = vmatpush3.bf16.msra.mxu0 %v2134_v45 }
  0x62   :  { %1124 = vmatmul.mubr.bf16.gmra.mrb[28].mxu1 %v2108_v37  ;;  %1212 = vmatmul.mubr.bf16.gmra.mrb[32].mxu0 %v2111_v38 }
  0x63   :  { %1131 = vmatprep.mubr.bf16.mxu1 %v2115_v40  ;;  %1219 = vmatprep.mubr.bf16.mxu0 %v2118_v43 }
  0x6a   :  { %1132 = vmatmul.mubr.bf16.gmra.mrb[32].mxu1 %v2117_v48  ;;  %1220 = vmatmul.mubr.bf16.gmra.mrb[36].mxu0 %v2121_v49 }
  0x6b   :  { %1139 = vmatprep.mubr.bf16.mxu1 %v1552_v50  ;;  %1227 = vmatprep.mubr.bf16.mxu0 %v1554_v51 }
  0x72   :  { %1140 = vmatmul.mubr.bf16.gmra.mrb[36].mxu1 %v1551_v52  ;;  %1228 = vmatmul.mubr.bf16.gmra.mrb[40].mxu0 %v1553_v53 }
  0x73   :  { %1267 = vmatprep.mubr.bf16.mxu1 %v2133_v54  ;;  %1954 = vmatprep.mubr.msk.bf16.mxu0 %vm2160_vm0, %v2159_v7 }
  0x7a   :  { %1268 = vmatmul.mubr.bf16.vlgmr.msra.gmra.mrb[40].mxu1 %v2131_v55  ;;  %1955 = vmatmul.mubr.bf16.vlgmr.msra.gmra.mrb[44].mxu0 %v2135_v56  ;;  %v2613_v55 = vld [vmem:[%s2697_s2] ss:$0 sm:$0xff] }
  0x7b   :  { %1275 = vmatprep.mubr.bf16.mxu1 %v2136_v57  ;;  %1958 = vmatprep.mubr.msk.bf16.mxu0 %vm2160_vm0, %v2159_v7 }
  0x82   :  { %1276 = vmatmul.mubr.bf16.gmra.mrb[44].mxu1 %v2138_v58  ;;  %1959 = vmatmul.mubr.bf16.gmra.mrb[48].mxu0 %v2139_v59 }
  0x83   :  { %1283 = vmatprep.mubr.bf16.mxu1 %v2140_v60  ;;  %1962 = vmatprep.mubr.msk.bf16.mxu0 %vm2160_vm0, %v2159_v7 }
  0x8a   :  { %1284 = vmatmul.mubr.bf16.gmra.mrb[48].mxu1 %v2142_v61  ;;  %1963 = vmatmul.mubr.bf16.gmra.mrb[52].mxu0 %v2143_v62 }
  0x8b   :  { %1291 = vmatprep.mubr.bf16.mxu1 %v2144_v63  ;;  %1966 = vmatprep.mubr.msk.bf16.mxu0 %vm2160_vm0, %v2159_v7 }
  0x92   :  { %1292 = vmatmul.mubr.bf16.gmra.mrb[52].mxu1 %v2146_v0  ;;  %1967 = vmatmul.mubr.bf16.gmra.mrb[56].mxu0 %v2147_v1 }
  0x93   :  { %1299 = vmatprep.mubr.bf16.mxu1 %v2148_v2  ;;  %1970 = vmatprep.mubr.msk.bf16.mxu0 %vm2160_vm0, %v2159_v7 }
  0x9a   :  { %1300 = vmatmul.mubr.bf16.gmra.mrb[56].mxu1 %v2150_v3  ;;  %1971 = vmatmul.mubr.bf16.gmra.mrb[60].mxu0 %v2151_v4 }
  0x9b   :  { %1307 = vmatprep.mubr.bf16.mxu1 %v2152_v5  ;;  %1974 = vmatprep.mubr.msk.bf16.mxu0 %vm2160_vm0, %v2159_v7 }
  0xa2   :  { %1308 = vmatmul.mubr.bf16.gmra.mrb[60].mxu1 %v2154_v8  ;;  %1975 = vmatmul.mubr.bf16.gmra.mrb[64].mxu0 %v2155_v9 }
  0xa3   :  { %1315 = vmatprep.mubr.bf16.mxu1 %v1556_v10  ;;  %1978 = vmatprep.mubr.msk.bf16.mxu0 %vm2160_vm0, %v2159_v7 }
  0xaa   :  { %1316 = vmatmul.mubr.bf16.gmra.mrb[64].mxu1 %v1555_v11  ;;  %1979 = vmatmul.mubr.bf16.gmra.mrb[68].mxu0 %v2158_v12 }
  0xf5   :  { %v1731_v13 = vpop.f32.mrb[0].mxu1  ;;  %v1707_v14 = vpop.f32.mrb[0].mxu0 }
  0xf6   :  { %v1732_v15 = vpop.f32.mrb[1].mxu1  ;;  %v1708_v16 = vpop.f32.mrb[1].mxu0 }
  0xf7   :  { %v2596_v17 = vadd.f32 %v1732_v15, %v1731_v13  ;;  %v1734_v18 = vpop.f32.mrb[2].mxu1  ;;  %v1709_v19 = vadd.f32 %v1708_v16, %v1707_v14  ;;  %v1710_v20 = vpop.f32.mrb[2].mxu0 }
  0xf8   :  { %v1735_v21 = vpop.f32.mrb[3].mxu1  ;;  %v1711_v22 = vpop.f32.mrb[3].mxu0 }
  0xf9   :  { %v2598_v23 = vadd.f32 %v1735_v21, %v1734_v18  ;;  %v1712_v7 = vadd.f32 %v1711_v22, %v1710_v20  ;;  %v1006_v58 = vadd.f32 %v1709_v19, %v2613_v55 }
  0xfb   :  { %v1009_v1 = vadd.f32 %v1712_v7, %v2613_v55 }
  0xfd   :  { %v1713_v24 = vpop.f32.mrb[4].mxu0  ;;  %v1737_v25 = vpop.f32.mrb[4].mxu1 }
  0xfe   :  { %v1714_v26 = vpop.f32.mrb[5].mxu0  ;;  %v1738_v27 = vpop.f32.mrb[5].mxu1 }
  0xff   :  { %v1715_v28 = vadd.f32 %v1714_v26, %v1713_v24  ;;  %v1716_v29 = vpop.f32.mrb[6].mxu0  ;;  %v2600_v30 = vadd.f32 %v1738_v27, %v1737_v25  ;;  %v1740_v31 = vpop.f32.mrb[6].mxu1 }
 0x100   :  { %v1717_v32 = vpop.f32.mrb[7].mxu0  ;;  %v1741_v33 = vpop.f32.mrb[7].mxu1 }
 0x101   :  { %v1718_v34 = vadd.f32 %v1717_v32, %v1716_v29  ;;  %v2602_v35 = vadd.f32 %v1741_v33, %v1740_v31  ;;  %v1014_v13 = vadd.f32 %v1715_v28, %v2613_v55 }
 0x103   :  { %v1017_v21 = vadd.f32 %v1718_v34, %v2613_v55 }
 0x105   :  { %v1719_v36 = vpop.f32.mrb[8].mxu0  ;;  %v1743_v37 = vpop.f32.mrb[8].mxu1 }
 0x106   :  { %v1720_v38 = vpop.f32.mrb[9].mxu0  ;;  %v1744_v39 = vpop.f32.mrb[9].mxu1 }
 0x107   :  { %v1721_v40 = vadd.f32 %v1720_v38, %v1719_v36  ;;  %v1722_v41 = vpop.f32.mrb[10].mxu0  ;;  %v2604_v42 = vadd.f32 %v1744_v39, %v1743_v37  ;;  %v1746_v43 = vpop.f32.mrb[10].mxu1 }
 0x108   :  { %v1723_v44 = vpop.f32.mrb[11].mxu0  ;;  %v1747_v45 = vpop.f32.mrb[11].mxu1 }
 0x109   :  { %v1724_v46 = vadd.f32 %v1723_v44, %v1722_v41  ;;  %v1022_v33 = vadd.f32 %v1721_v40, %v2613_v55 }
 0x10b   :  { %v1025_v43 = vadd.f32 %v1724_v46, %v2613_v55 }
 0x10d   :  { %v1725_v47 = vpop.f32.mrb[12].mxu0 }
 0x10e   :  { %v1726_v48 = vpop.f32.mrb[13].mxu0 }
 0x10f   :  { %v2606_v49 = vadd.f32 %v1726_v48, %v1725_v47  ;;  %v1728_v50 = vpop.f32.mrb[14].mxu0 }
 0x110   :  { %v1729_v51 = vpop.f32.mrb[15].mxu0 }
 0x111   :  { %v2608_v52 = vadd.f32 %v1729_v51, %v1728_v50 }
 0x115   :  { %v1765_v53 = vpop.f32.mrb[12].mxu1  ;;  %v1823_v54 = vpop.f32.mrb[16].mxu0 }
 0x116   :  { %v1766_v56 = vpop.f32.mrb[13].mxu1  ;;  %v1824_v57 = vpop.f32.mrb[17].mxu0 }
 0x117   :  { %v1767_v59 = vadd.f32 %v1766_v56, %v1765_v53  ;;  %v1768_v60 = vpop.f32.mrb[14].mxu1  ;;  %v1825_v61 = vadd.f32 %v1824_v57, %v1823_v54  ;;  %v1826_v62 = vpop.f32.mrb[18].mxu0  ;;  %v1030_v57 = vadd.f32 %v2606_v49, %v2613_v55 }
 0x118   :  { %v1769_v63 = vpop.f32.mrb[15].mxu1  ;;  %v1827_v0 = vpop.f32.mrb[19].mxu0 }
 0x119   :  { %v1094_v2 = vadd.f32 %v1767_v59, %v1006_v58  ;;  %v1770_v3 = vadd.f32 %v1769_v63, %v1768_v60  ;;  %v1828_v4 = vadd.f32 %v1827_v0, %v1826_v62  ;;  %v1033_v63 = vadd.f32 %v2608_v52, %v2613_v55 }
 0x11b   :  { %v1097_v5 = vadd.f32 %v1770_v3, %v1009_v1  ;;  %v2617_v6 = vadd.f32 %v1825_v61, %v1094_v2 }
 0x11d   :  { %v2619_v8 = vadd.f32 %v1828_v4, %v1097_v5  ;;  %v1771_v9 = vpop.f32.mrb[16].mxu1  ;;  %v1829_v10 = vpop.f32.mrb[20].mxu0 }
 0x11e   :  { %v1772_v11 = vpop.f32.mrb[17].mxu1  ;;  %v1830_v12 = vpop.f32.mrb[21].mxu0 }
 0x11f   :  { %v1773_v14 = vadd.f32 %v1772_v11, %v1771_v9  ;;  %v1774_v15 = vpop.f32.mrb[18].mxu1  ;;  %v1831_v16 = vadd.f32 %v1830_v12, %v1829_v10  ;;  %v1832_v18 = vpop.f32.mrb[22].mxu0  ;;  %v1038_v12 = vadd.f32 %v2596_v17, %v2613_v55 }
 0x120   :  { %v1775_v19 = vpop.f32.mrb[19].mxu1  ;;  %v1833_v20 = vpop.f32.mrb[23].mxu0 }
 0x121   :  { %v1102_v22 = vadd.f32 %v1773_v14, %v1014_v13  ;;  %v1776_v7 = vadd.f32 %v1775_v19, %v1774_v15  ;;  %v1834_v24 = vadd.f32 %v1833_v20, %v1832_v18  ;;  %v1041_v19 = vadd.f32 %v2598_v23, %v2613_v55 }
 0x123   :  { %v1105_v25 = vadd.f32 %v1776_v7, %v1017_v21  ;;  %v2623_v26 = vadd.f32 %v1831_v16, %v1102_v22 }
 0x125   :  { %v2625_v27 = vadd.f32 %v1834_v24, %v1105_v25  ;;  %v1777_v29 = vpop.f32.mrb[20].mxu1  ;;  %v1835_v31 = vpop.f32.mrb[24].mxu0 }
 0x126   :  { %v1778_v32 = vpop.f32.mrb[21].mxu1  ;;  %v1836_v28 = vpop.f32.mrb[25].mxu0 }
 0x127   :  { %v1779_v36 = vadd.f32 %v1778_v32, %v1777_v29  ;;  %v1780_v37 = vpop.f32.mrb[22].mxu1  ;;  %v1837_v38 = vadd.f32 %v1836_v28, %v1835_v31  ;;  %v1838_v39 = vpop.f32.mrb[26].mxu0  ;;  %v1046_v28 = vadd.f32 %v2600_v30, %v2613_v55 }
 0x128   :  { %v1781_v41 = vpop.f32.mrb[23].mxu1  ;;  %v1839_v34 = vpop.f32.mrb[27].mxu0 }
 0x129   :  { %v1110_v44 = vadd.f32 %v1779_v36, %v1022_v33  ;;  %v1782_v45 = vadd.f32 %v1781_v41, %v1780_v37  ;;  %v1840_v47 = vadd.f32 %v1839_v34, %v1838_v39  ;;  %v1049_v41 = vadd.f32 %v2602_v35, %v2613_v55 }
 0x12b   :  { %v1113_v48 = vadd.f32 %v1782_v45, %v1025_v43  ;;  %v2629_v50 = vadd.f32 %v1837_v38, %v1110_v44 }
 0x12d   :  { %v2631_v51 = vadd.f32 %v1840_v47, %v1113_v48  ;;  %v1783_v53 = vpop.f32.mrb[24].mxu1  ;;  %v1841_v54 = vpop.f32.mrb[28].mxu0 }
 0x12e   :  { %v1784_v56 = vpop.f32.mrb[25].mxu1  ;;  %v1842_v40 = vpop.f32.mrb[29].mxu0 }
 0x12f   :  { %v1785_v58 = vadd.f32 %v1784_v56, %v1783_v53  ;;  %v1786_v59 = vpop.f32.mrb[26].mxu1  ;;  %v1843_v60 = vadd.f32 %v1842_v40, %v1841_v54  ;;  %v1844_v61 = vpop.f32.mrb[30].mxu0  ;;  %v1054_v40 = vadd.f32 %v2604_v42, %v2613_v55 }
 0x130   :  { %v1787_v46 = vpop.f32.mrb[27].mxu1  ;;  %v1845_v62 = vpop.f32.mrb[31].mxu0 }
 0x131   :  { %v1118_v0 = vadd.f32 %v1785_v58, %v1030_v57  ;;  %v1788_v1 = vadd.f32 %v1787_v46, %v1786_v59  ;;  %v1846_v2 = vadd.f32 %v1845_v62, %v1844_v61 }
 0x133   :  { %v1121_v3 = vadd.f32 %v1788_v1, %v1033_v63  ;;  %v2637_v4 = vadd.f32 %v1843_v60, %v1118_v0 }
 0x135   :  { %v2639_v5 = vadd.f32 %v1846_v2, %v1121_v3  ;;  %v1789_v9 = vpop.f32.mrb[28].mxu1  ;;  %v1847_v10 = vpop.f32.mrb[32].mxu0 }
 0x136   :  { %v1790_v49 = vpop.f32.mrb[29].mxu1  ;;  %v1848_v11 = vpop.f32.mrb[33].mxu0 }
 0x137   :  { %v1791_v13 = vadd.f32 %v1790_v49, %v1789_v9  ;;  %v1792_v14 = vpop.f32.mrb[30].mxu1  ;;  %v1849_v15 = vadd.f32 %v1848_v11, %v1847_v10  ;;  %v1850_v16 = vpop.f32.mrb[34].mxu0 }
 0x138   :  { %v1793_v52 = vpop.f32.mrb[31].mxu1  ;;  %v1851_v18 = vpop.f32.mrb[35].mxu0 }
 0x139   :  { %v1126_v20 = vadd.f32 %v1791_v13, %v1038_v12  ;;  %v1794_v21 = vadd.f32 %v1793_v52, %v1792_v14  ;;  %v1852_v22 = vadd.f32 %v1851_v18, %v1850_v16 }
 0x13b   :  { %v1129_v7 = vadd.f32 %v1794_v21, %v1041_v19  ;;  %v2645_v24 = vadd.f32 %v1849_v15, %v1126_v20 }
 0x13d   :  { %v2647_v25 = vadd.f32 %v1852_v22, %v1129_v7  ;;  %v1795_v29 = vpop.f32.mrb[32].mxu1  ;;  %v1853_v31 = vpop.f32.mrb[36].mxu0 }
 0x13e   :  { %v1796_v17 = vpop.f32.mrb[33].mxu1  ;;  %v1854_v32 = vpop.f32.mrb[37].mxu0 }
 0x13f   :  { %v1797_v33 = vadd.f32 %v1796_v17, %v1795_v29  ;;  %v1798_v36 = vpop.f32.mrb[34].mxu1  ;;  %v1855_v37 = vadd.f32 %v1854_v32, %v1853_v31  ;;  %v1856_v38 = vpop.f32.mrb[38].mxu0 }
 0x140   :  { %v1799_v23 = vpop.f32.mrb[35].mxu1  ;;  %v1857_v39 = vpop.f32.mrb[39].mxu0 }
 0x141   :  { %v1134_v34 = vadd.f32 %v1797_v33, %v1046_v28  ;;  %v1800_v43 = vadd.f32 %v1799_v23, %v1798_v36  ;;  %v1858_v44 = vadd.f32 %v1857_v39, %v1856_v38 }
 0x143   :  { %v1137_v45 = vadd.f32 %v1800_v43, %v1049_v41  ;;  %v2653_v47 = vadd.f32 %v1855_v37, %v1134_v34 }
 0x145   :  { %v2655_v48 = vadd.f32 %v1858_v44, %v1137_v45  ;;  %v1801_v53 = vpop.f32.mrb[36].mxu1  ;;  %v1859_v54 = vpop.f32.mrb[40].mxu0 }
 0x146   :  { %v1802_v30 = vpop.f32.mrb[37].mxu1  ;;  %v1860_v56 = vpop.f32.mrb[41].mxu0 }
 0x147   :  { %v1803_v57 = vadd.f32 %v1802_v30, %v1801_v53  ;;  %v1804_v58 = vpop.f32.mrb[38].mxu1  ;;  %v1861_v59 = vadd.f32 %v1860_v56, %v1859_v54  ;;  %v1862_v60 = vpop.f32.mrb[42].mxu0 }
 0x148   :  { %v1805_v35 = vpop.f32.mrb[39].mxu1  ;;  %v1863_v61 = vpop.f32.mrb[43].mxu0 }
 0x149   :  { %v1142_v46 = vadd.f32 %v1803_v57, %v1054_v40 }
 0x14b   :  { %v2659_v62 = vadd.f32 %v1861_v59, %v1142_v46 }
 0x14d   :  { %v1881_v63 = vpop.f32.mrb[40].mxu1  ;;  %v1357_v0 = vpop.f32.mrb[44].mxu0 }
 0x14e   :  { %v1882_v1 = vpop.f32.mrb[41].mxu1  ;;  %v1956_v2 = vpop.f32.mrb[45].mxu0 }
 0x14f   :  { %v1883_v3 = vadd.f32 %v1882_v1, %v1881_v63  ;;  %v1884_v9 = vpop.f32.mrb[42].mxu1  ;;  %v1360_v10 = vpop.f32.mrb[46].mxu0 }
 0x150   :  { %v1885_v49 = vpop.f32.mrb[43].mxu1  ;;  %v1957_v11 = vpop.f32.mrb[47].mxu0 }
 0x151   :  { %v1886_v12 = vadd.f32 %v1885_v49, %v1884_v9  ;;  %v1270_v42 = vadd.f32 %v1883_v3, %v2617_v6 }
 0x153   :  { %v1358_v55 = vadd.f32 %v1357_v0, %v1270_v42  ;;  %v1273_v13 = vadd.f32 %v1886_v12, %v2619_v8 }
 0x155   :  { %v1361_v14 = vadd.f32 %v1360_v10, %v1273_v13  ;;  %v1887_v15 = vpop.f32.mrb[44].mxu1  ;;  %v1365_v16 = vpop.f32.mrb[48].mxu0  ;;  %v1411_v19 = vmax.f32 %v1358_v55, 0.0 }
 0x156   :  { %v1888_v52 = vpop.f32.mrb[45].mxu1  ;;  %v1960_v18 = vpop.f32.mrb[49].mxu0 }
 0x157   :  { %v1412_v20 = vmax.f32 %v1361_v14, 0.0  ;;  %v1889_v21 = vadd.f32 %v1888_v52, %v1887_v15  ;;  %v1890_v22 = vpop.f32.mrb[46].mxu1  ;;  %v1368_v7 = vpop.f32.mrb[50].mxu0 }
 0x158   :  { %v1891_v29 = vpop.f32.mrb[47].mxu1  ;;  %v1961_v31 = vpop.f32.mrb[51].mxu0 }
 0x159   :  { %v1659_v17 = vpack.c.bf16 %v1412_v20, %v1411_v19  ;;  %v1892_v32 = vadd.f32 %v1891_v29, %v1890_v22  ;;  %v1278_v28 = vadd.f32 %v1889_v21, %v2623_v26 }
 0x15b   :  { %1660 = vst [vmem:[%s2698_s3] sm:$0xff] %v1659_v17   ;;  %v1366_v6 = vadd.f32 %v1365_v16, %v1278_v28  ;;  %v1281_v8 = vadd.f32 %v1892_v32, %v2625_v27 }
 0x15d   :  { %v1369_v33 = vadd.f32 %v1368_v7, %v1281_v8  ;;  %v1893_v36 = vpop.f32.mrb[48].mxu1  ;;  %v1373_v37 = vpop.f32.mrb[52].mxu0  ;;  %v1413_v39 = vmax.f32 %v1366_v6, 0.0 }
 0x15e   :  { %v1894_v38 = vpop.f32.mrb[49].mxu1  ;;  %v1964_v23 = vpop.f32.mrb[53].mxu0 }
 0x15f   :  { %v1414_v41 = vmax.f32 %v1369_v33, 0.0  ;;  %v1895_v34 = vadd.f32 %v1894_v38, %v1893_v36  ;;  %v1896_v43 = vpop.f32.mrb[50].mxu1  ;;  %v1376_v44 = vpop.f32.mrb[54].mxu0 }
 0x160   :  { %v1897_v45 = vpop.f32.mrb[51].mxu1  ;;  %v1965_v53 = vpop.f32.mrb[55].mxu0 }
 0x161   :  { %v1664_v26 = vpack.c.bf16 %v1414_v41, %v1413_v39  ;;  %v1898_v54 = vadd.f32 %v1897_v45, %v1896_v43  ;;  %v1286_v30 = vadd.f32 %v1895_v34, %v2629_v50 }
 0x163   :  { %1686 = vst [vmem:[%s2698_s3 + $0x8] sm:$0xff] %v1664_v26   ;;  %v1374_v27 = vadd.f32 %v1373_v37, %v1286_v30  ;;  %v1289_v56 = vadd.f32 %v1898_v54, %v2631_v51 }
 0x165   :  { %v1377_v40 = vadd.f32 %v1376_v44, %v1289_v56  ;;  %v1899_v57 = vpop.f32.mrb[52].mxu1  ;;  %v1381_v58 = vpop.f32.mrb[56].mxu0  ;;  %v1415_v35 = vmax.f32 %v1374_v27, 0.0 }
 0x166   :  { %v1900_v59 = vpop.f32.mrb[53].mxu1  ;;  %v1968_v60 = vpop.f32.mrb[57].mxu0 }
 0x167   :  { %v1416_v61 = vmax.f32 %v1377_v40, 0.0  ;;  %v1901_v46 = vadd.f32 %v1900_v59, %v1899_v57  ;;  %v1902_v63 = vpop.f32.mrb[54].mxu1  ;;  %v1384_v0 = vpop.f32.mrb[58].mxu0 }
 0x168   :  { %v1903_v1 = vpop.f32.mrb[55].mxu1  ;;  %v1969_v2 = vpop.f32.mrb[59].mxu0 }
 0x169   :  { %v1669_v50 = vpack.c.bf16 %v1416_v61, %v1415_v35  ;;  %v1904_v3 = vadd.f32 %v1903_v1, %v1902_v63  ;;  %v1294_v9 = vadd.f32 %v1901_v46, %v2637_v4 }
 0x16b   :  { %1687 = vst [vmem:[%s2698_s3 + $0x10] sm:$0xff] %v1669_v50   ;;  %v1382_v51 = vadd.f32 %v1381_v58, %v1294_v9  ;;  %v1297_v10 = vadd.f32 %v1904_v3, %v2639_v5 }
 0x16d   :  { %v1385_v49 = vadd.f32 %v1384_v0, %v1297_v10  ;;  %v1905_v11 = vpop.f32.mrb[56].mxu1  ;;  %v1389_v12 = vpop.f32.mrb[60].mxu0  ;;  %v1417_v13 = vmax.f32 %v1382_v51, 0.0 }
 0x16e   :  { %v1906_v42 = vpop.f32.mrb[57].mxu1  ;;  %v1972_v55 = vpop.f32.mrb[61].mxu0 }
 0x16f   :  { %v1418_v14 = vmax.f32 %v1385_v49, 0.0  ;;  %v1907_v15 = vadd.f32 %v1906_v42, %v1905_v11  ;;  %v1908_v16 = vpop.f32.mrb[58].mxu1  ;;  %v1392_v52 = vpop.f32.mrb[62].mxu0 }
 0x170   :  { %v1909_v18 = vpop.f32.mrb[59].mxu1  ;;  %v1973_v19 = vpop.f32.mrb[63].mxu0 }
 0x171   :  { %v1674_v4 = vpack.c.bf16 %v1418_v14, %v1417_v13  ;;  %v1910_v20 = vadd.f32 %v1909_v18, %v1908_v16  ;;  %v1302_v21 = vadd.f32 %v1907_v15, %v2645_v24 }
 0x173   :  { %1688 = vst [vmem:[%s2698_s3 + $0x18] sm:$0xff] %v1674_v4   ;;  %v1390_v5 = vadd.f32 %v1389_v12, %v1302_v21  ;;  %v1305_v22 = vadd.f32 %v1910_v20, %v2647_v25 }
 0x175   :  { %v1393_v7 = vadd.f32 %v1392_v52, %v1305_v22  ;;  %v1911_v29 = vpop.f32.mrb[60].mxu1  ;;  %v1397_v31 = vpop.f32.mrb[64].mxu0  ;;  %v1419_v28 = vmax.f32 %v1390_v5, 0.0 }
 0x176   :  { %v1912_v17 = vpop.f32.mrb[61].mxu1  ;;  %v1976_v32 = vpop.f32.mrb[65].mxu0 }
 0x177   :  { %v1420_v6 = vmax.f32 %v1393_v7, 0.0  ;;  %v1913_v8 = vadd.f32 %v1912_v17, %v1911_v29  ;;  %v1914_v33 = vpop.f32.mrb[62].mxu1  ;;  %v1400_v36 = vpop.f32.mrb[66].mxu0 }
 0x178   :  { %v1915_v37 = vpop.f32.mrb[63].mxu1  ;;  %v1977_v38 = vpop.f32.mrb[67].mxu0 }
 0x179   :  { %v1679_v24 = vpack.c.bf16 %v1420_v6, %v1419_v28  ;;  %v1916_v23 = vadd.f32 %v1915_v37, %v1914_v33  ;;  %v1310_v39 = vadd.f32 %v1913_v8, %v2653_v47 }
 0x17b   :  { %1689 = vst [vmem:[%s2698_s3 + $0x20] sm:$0xff] %v1679_v24   ;;  %v1398_v25 = vadd.f32 %v1397_v31, %v1310_v39  ;;  %v1313_v41 = vadd.f32 %v1916_v23, %v2655_v48 }
 0x17d   :  { %v1401_v34 = vadd.f32 %v1400_v36, %v1313_v41  ;;  %v1917_v43 = vpop.f32.mrb[64].mxu1  ;;  %v1405_v44 = vpop.f32.mrb[68].mxu0  ;;  %v1421_v26 = vmax.f32 %v1398_v25, 0.0 }
 0x17e   :  { %v1918_v45 = vpop.f32.mrb[65].mxu1  ;;  %v1980_v53 = vpop.f32.mrb[69].mxu0 }
 0x17f   :  { %v1422_v54 = vmax.f32 %v1401_v34, 0.0  ;;  %v1919_v30 = vadd.f32 %v1918_v45, %v1917_v43  ;;  %v1920_v27 = vpop.f32.mrb[66].mxu1  ;;  %v1408_v56 = vpop.f32.mrb[70].mxu0 }
 0x180   :  { %v1921_v40 = vpop.f32.mrb[67].mxu1  ;;  %v1981_v57 = vpop.f32.mrb[71].mxu0 }
 0x181   :  { %v1684_v47 = vpack.c.bf16 %v1422_v54, %v1421_v26  ;;  %v1318_v58 = vadd.f32 %v1919_v30, %v2659_v62 }
 0x183   :  { %1690 = vst [vmem:[%s2698_s3 + $0x28] sm:$0xff] %v1684_v47   ;;  %v1406_v48 = vadd.f32 %v1405_v44, %v1318_v58 }
 0x185   :  { %v1423_v59 = vmax.f32 %v1406_v48, 0.0 }
 0x187   :  { %v1655_v60 = vpack.c.bf16 %v1423_v59, %v1423_v59 }
 0x189   :  { %1489 = vst [vmem:[%s2698_s3 + $0x30] sm:$0xf] %v1655_v60 }

// kernel: cnn_forward.7
= control target key start
LH: loop header
LB: loop body
LE: loop exit
PB: predicated region body
PF: predicated region fallthrough
CT: control target
= control target key end

     0   :  { %vm4847_vm0 = vcmask 523264   ;;  %s11106_s1 = inlined_call_operand.vmem [shape: bf16[3136,512], index: 1, kind: input, shape index: {}]   ;;  %s11107_s0 = inlined_call_operand.vmem [shape: bf16[8,3136], index: 0, kind: input, shape index: {}]   ;;  %s11108_s3 = inlined_call_operand.vmem [shape: bf16[512,128], index: 3, kind: input, shape index: {}]   ;;  %s11109_s2 = inlined_call_operand.vmem [shape: f32[1,512], index: 2, kind: input, shape index: {}]   ;;  %s11110_s4 = inlined_call_operand.vmem [shape: f32[1,128], index: 4, kind: input, shape index: {}]   ;;  %s11111_s5 = inlined_call_operand.vmem [shape: f32[8,128], index: 5, kind: output, shape index: {}]  }
   0x1   :  { %v7276_v0 = vld [vmem:[%s11106_s1 + $0x4] ss:$16 sps:$4 sm:$0xff]   ;;  %v7278_v1 = vld [vmem:[%s11106_s1 + $0xc] ss:$16 sps:$4 sm:$0xff]   ;;  %v7280_v2 = vld [vmem:[%s11106_s1] ss:$16 sps:$4 sm:$0xff]  }
   0x2   :  { %4851 = vmatprep.subr.bf16.mxu0 %v7276_v0  ;;  %v7281_v3 = vld [vmem:[%s11106_s1 + $0x8] ss:$16 sps:$4 sm:$0xff]   ;;  %5384 = vmatprep.subr.bf16.mxu1 %v7278_v1  ;;  %v7282_v4 = vld [vmem:[%s11106_s1 + $0x24] ss:$16 sps:$4 sm:$0xff]   ;;  %v7284_v5 = vld [vmem:[%s11106_s1 + $0x2c] ss:$16 sps:$4 sm:$0xff]  }
   0x3   :  { %4852 = vmatpush1.bf16.msra.mxu0 %v7280_v2  ;;  %5385 = vmatpush1.bf16.msra.mxu1 %v7281_v3  ;;  %v7286_v6 = vld [vmem:[%s11106_s1 + $0x20] ss:$16 sps:$4 sm:$0xff]   ;;  %v7287_v7 = vld [vmem:[%s11106_s1 + $0x28] ss:$16 sps:$4 sm:$0xff]   ;;  %v7288_v8 = vld [vmem:[%s11106_s1 + $0x44] ss:$16 sps:$4 sm:$0xff]  }
   0x4   :  { %4853 = vmatprep.subr.bf16.mxu0 %v7282_v4  ;;  %5386 = vmatprep.subr.bf16.mxu1 %v7284_v5  ;;  %v7290_v9 = vld [vmem:[%s11106_s1 + $0x4c] ss:$16 sps:$4 sm:$0xff]   ;;  %v7292_v10 = vld [vmem:[%s11106_s1 + $0x40] ss:$16 sps:$4 sm:$0xff]   ;;  %v7293_v11 = vld [vmem:[%s11106_s1 + $0x48] ss:$16 sps:$4 sm:$0xff]  }
   0x5   :  { %v7294_v12 = vld [vmem:[%s11106_s1 + $0x64] ss:$16 sps:$4 sm:$0xff]   ;;  %v7296_v13 = vld [vmem:[%s11106_s1 + $0x6c] ss:$16 sps:$4 sm:$0xff]   ;;  %v7298_v14 = vld [vmem:[%s11106_s1 + $0x60] ss:$16 sps:$4 sm:$0xff]  }
   0x6   :  { %v7299_v15 = vld [vmem:[%s11106_s1 + $0x68] ss:$16 sps:$4 sm:$0xff]   ;;  %v7300_v16 = vld [vmem:[%s11106_s1 + $0x84] ss:$16 sps:$4 sm:$0xff]   ;;  %v7302_v17 = vld [vmem:[%s11106_s1 + $0x8c] ss:$16 sps:$4 sm:$0xff]  }
   0x7   :  { %4854 = vmatpush1.bf16.msra.mxu0 %v7286_v6  ;;  %5387 = vmatpush1.bf16.msra.mxu1 %v7287_v7  ;;  %v7304_v18 = vld [vmem:[%s11106_s1 + $0x80] ss:$16 sps:$4 sm:$0xff]   ;;  %v7305_v19 = vld [vmem:[%s11106_s1 + $0x88] ss:$16 sps:$4 sm:$0xff]   ;;  %v7306_v20 = vld [vmem:[%s11106_s1 + $0xa4] ss:$16 sps:$4 sm:$0xff]  }
   0x8   :  { %4855 = vmatprep.subr.bf16.mxu0 %v7288_v8  ;;  %5388 = vmatprep.subr.bf16.mxu1 %v7290_v9  ;;  %v7308_v21 = vld [vmem:[%s11106_s1 + $0xac] ss:$16 sps:$4 sm:$0xff]   ;;  %v7310_v22 = vld [vmem:[%s11106_s1 + $0xa0] ss:$16 sps:$4 sm:$0xff]   ;;  %v7311_v23 = vld [vmem:[%s11106_s1 + $0xa8] ss:$16 sps:$4 sm:$0xff]  }
   0x9   :  { %v7312_v24 = vld [vmem:[%s11106_s1 + $0xc4] ss:$16 sps:$4 sm:$0xff]   ;;  %v7314_v25 = vld [vmem:[%s11106_s1 + $0xcc] ss:$16 sps:$4 sm:$0xff]   ;;  %v7316_v26 = vld [vmem:[%s11106_s1 + $0xc0] ss:$16 sps:$4 sm:$0xff]  }
   0xa   :  { %v7317_v27 = vld [vmem:[%s11106_s1 + $0xc8] ss:$16 sps:$4 sm:$0xff]   ;;  %v7318_v28 = vld [vmem:[%s11106_s1 + $0xe4] ss:$16 sps:$4 sm:$0xff]   ;;  %v7320_v29 = vld [vmem:[%s11106_s1 + $0xec] ss:$16 sps:$4 sm:$0xff]  }
   0xb   :  { %4856 = vmatpush1.bf16.msra.mxu0 %v7292_v10  ;;  %5389 = vmatpush1.bf16.msra.mxu1 %v7293_v11  ;;  %v7322_v30 = vld [vmem:[%s11106_s1 + $0xe0] ss:$16 sps:$4 sm:$0xff]   ;;  %v7323_v31 = vld [vmem:[%s11106_s1 + $0xe8] ss:$16 sps:$4 sm:$0xff]   ;;  %v7324_v32 = vld [vmem:[%s11106_s1 + $0x104] ss:$16 sps:$4 sm:$0xff]  }
   0xc   :  { %4857 = vmatprep.subr.bf16.mxu0 %v7294_v12  ;;  %5390 = vmatprep.subr.bf16.mxu1 %v7296_v13  ;;  %v7326_v33 = vld [vmem:[%s11106_s1 + $0x10c] ss:$16 sps:$4 sm:$0xff]   ;;  %v7328_v34 = vld [vmem:[%s11106_s1 + $0x100] ss:$16 sps:$4 sm:$0xff]   ;;  %v7329_v35 = vld [vmem:[%s11106_s1 + $0x108] ss:$16 sps:$4 sm:$0xff]  }
   0xd   :  { %v7330_v36 = vld [vmem:[%s11106_s1 + $0x124] ss:$16 sps:$4 sm:$0xff]   ;;  %v7332_v37 = vld [vmem:[%s11106_s1 + $0x12c] ss:$16 sps:$4 sm:$0xff]   ;;  %v7334_v38 = vld [vmem:[%s11106_s1 + $0x120] ss:$16 sps:$4 sm:$0xff]  }
   0xe   :  { %v7335_v39 = vld [vmem:[%s11106_s1 + $0x128] ss:$16 sps:$4 sm:$0xff]   ;;  %v7336_v40 = vld [vmem:[%s11106_s1 + $0x144] ss:$16 sps:$4 sm:$0xff]   ;;  %v7338_v41 = vld [vmem:[%s11106_s1 + $0x14c] ss:$16 sps:$4 sm:$0xff]  }
   0xf   :  { %4858 = vmatpush1.bf16.msra.mxu0 %v7298_v14  ;;  %5391 = vmatpush1.bf16.msra.mxu1 %v7299_v15  ;;  %v7340_v42 = vld [vmem:[%s11106_s1 + $0x140] ss:$16 sps:$4 sm:$0xff]   ;;  %v7341_v43 = vld [vmem:[%s11106_s1 + $0x148] ss:$16 sps:$4 sm:$0xff]   ;;  %v7342_v44 = vld [vmem:[%s11106_s1 + $0x164] ss:$16 sps:$4 sm:$0xff]  }
  0x10   :  { %4859 = vmatprep.subr.bf16.mxu0 %v7300_v16  ;;  %5392 = vmatprep.subr.bf16.mxu1 %v7302_v17  ;;  %v7344_v45 = vld [vmem:[%s11106_s1 + $0x16c] ss:$16 sps:$4 sm:$0xff]   ;;  %v21_v46 = vld [vmem:[%s11107_s0] sm:$0xff]  ;;  %v7347_v49 = vld [vmem:[%s11106_s1 + $0x168] ss:$16 sps:$4 sm:$0xff]  }
  0x11   :  { %v7346_v47 = vld [vmem:[%s11106_s1 + $0x160] ss:$16 sps:$4 sm:$0xff]   ;;  %v6288_v48 = vcombine.high %v21_v46, %v21_v46  ;;  %v7348_v50 = vld [vmem:[%s11106_s1 + $0x184] ss:$16 sps:$4 sm:$0xff]   ;;  %v7350_v51 = vld [vmem:[%s11106_s1 + $0x18c] ss:$16 sps:$4 sm:$0xff]   ;;  %v6287_v4 = vcombine.low %v21_v46, %v21_v46 }
  0x12   :  { %v7352_v52 = vld [vmem:[%s11106_s1 + $0x180] ss:$16 sps:$4 sm:$0xff]   ;;  %v7353_v53 = vld [vmem:[%s11106_s1 + $0x188] ss:$16 sps:$4 sm:$0xff]   ;;  %v7354_v54 = vld [vmem:[%s11106_s1 + $0x1a4] ss:$16 sps:$4 sm:$0xff]  }
  0x13   :  { %4860 = vmatpush1.bf16.msra.mxu0 %v7304_v18  ;;  %5393 = vmatpush1.bf16.msra.mxu1 %v7305_v19  ;;  %v7356_v55 = vld [vmem:[%s11106_s1 + $0x1ac] ss:$16 sps:$4 sm:$0xff]   ;;  %v7358_v56 = vld [vmem:[%s11106_s1 + $0x1a0] ss:$16 sps:$4 sm:$0xff]   ;;  %v7359_v57 = vld [vmem:[%s11106_s1 + $0x1a8] ss:$16 sps:$4 sm:$0xff]  }
  0x14   :  { %4861 = vmatprep.subr.bf16.mxu0 %v7306_v20  ;;  %5394 = vmatprep.subr.bf16.mxu1 %v7308_v21  ;;  %v7360_v58 = vld [vmem:[%s11106_s1 + $0x1c4] ss:$16 sps:$4 sm:$0xff]   ;;  %v7362_v59 = vld [vmem:[%s11106_s1 + $0x1cc] ss:$16 sps:$4 sm:$0xff]   ;;  %v7364_v60 = vld [vmem:[%s11106_s1 + $0x1c0] ss:$16 sps:$4 sm:$0xff]  }
  0x15   :  { %4883 = vmatprep.mubr.bf16.mxu0 %v6288_v48  ;;  %5416 = vmatprep.mubr.bf16.mxu1 %v6288_v48  ;;  %v7365_v61 = vld [vmem:[%s11106_s1 + $0x1c8] ss:$16 sps:$4 sm:$0xff]   ;;  %v7366_v62 = vld [vmem:[%s11106_s1 + $0x1e4] ss:$16 sps:$4 sm:$0xff]   ;;  %v7368_v63 = vld [vmem:[%s11106_s1 + $0x1ec] ss:$16 sps:$4 sm:$0xff]  }
  0x16   :  { %v7370_v0 = vld [vmem:[%s11106_s1 + $0x1e0] ss:$16 sps:$4 sm:$0xff]   ;;  %v7371_v1 = vld [vmem:[%s11106_s1 + $0x1e8] ss:$16 sps:$4 sm:$0xff]   ;;  %v7376_v2 = vld [vmem:[%s11106_s1 + $0x204] ss:$16 sps:$4 sm:$0xff]  }
  0x17   :  { %4862 = vmatpush1.bf16.msra.mxu0 %v7310_v22  ;;  %5395 = vmatpush1.bf16.msra.mxu1 %v7311_v23  ;;  %v7379_v3 = vld [vmem:[%s11106_s1 + $0x20c] ss:$16 sps:$4 sm:$0xff]   ;;  %v7374_v5 = vld [vmem:[%s11106_s1 + $0x200] ss:$16 sps:$4 sm:$0xff]   ;;  %v7377_v6 = vld [vmem:[%s11106_s1 + $0x208] ss:$16 sps:$4 sm:$0xff]  }
  0x18   :  { %4863 = vmatprep.subr.bf16.mxu0 %v7312_v24  ;;  %5396 = vmatprep.subr.bf16.mxu1 %v7314_v25  ;;  %v7382_v7 = vld [vmem:[%s11106_s1 + $0x224] ss:$16 sps:$4 sm:$0xff]   ;;  %v7385_v8 = vld [vmem:[%s11106_s1 + $0x22c] ss:$16 sps:$4 sm:$0xff]   ;;  %v7380_v9 = vld [vmem:[%s11106_s1 + $0x220] ss:$16 sps:$4 sm:$0xff]  }
  0x19   :  { %v7383_v10 = vld [vmem:[%s11106_s1 + $0x228] ss:$16 sps:$4 sm:$0xff]   ;;  %v7388_v11 = vld [vmem:[%s11106_s1 + $0x244] ss:$16 sps:$4 sm:$0xff]   ;;  %v7391_v12 = vld [vmem:[%s11106_s1 + $0x24c] ss:$16 sps:$4 sm:$0xff]  }
  0x1a   :  { %v7386_v13 = vld [vmem:[%s11106_s1 + $0x240] ss:$16 sps:$4 sm:$0xff]   ;;  %v7389_v14 = vld [vmem:[%s11106_s1 + $0x248] ss:$16 sps:$4 sm:$0xff]   ;;  %v7394_v15 = vld [vmem:[%s11106_s1 + $0x264] ss:$16 sps:$4 sm:$0xff]  }
  0x1b   :  { %4864 = vmatpush1.bf16.msra.mxu0 %v7316_v26  ;;  %5397 = vmatpush1.bf16.msra.mxu1 %v7317_v27  ;;  %v7397_v16 = vld [vmem:[%s11106_s1 + $0x26c] ss:$16 sps:$4 sm:$0xff]   ;;  %v7392_v17 = vld [vmem:[%s11106_s1 + $0x260] ss:$16 sps:$4 sm:$0xff]   ;;  %v7395_v18 = vld [vmem:[%s11106_s1 + $0x268] ss:$16 sps:$4 sm:$0xff]  }
  0x1c   :  { %4865 = vmatprep.subr.bf16.mxu0 %v7318_v28  ;;  %5398 = vmatprep.subr.bf16.mxu1 %v7320_v29  ;;  %v7400_v19 = vld [vmem:[%s11106_s1 + $0x284] ss:$16 sps:$4 sm:$0xff]   ;;  %v7403_v20 = vld [vmem:[%s11106_s1 + $0x28c] ss:$16 sps:$4 sm:$0xff]   ;;  %v7398_v21 = vld [vmem:[%s11106_s1 + $0x280] ss:$16 sps:$4 sm:$0xff]  }
  0x1d   :  { %v7401_v22 = vld [vmem:[%s11106_s1 + $0x288] ss:$16 sps:$4 sm:$0xff]   ;;  %v7406_v23 = vld [vmem:[%s11106_s1 + $0x2a4] ss:$16 sps:$4 sm:$0xff]   ;;  %v7409_v24 = vld [vmem:[%s11106_s1 + $0x2ac] ss:$16 sps:$4 sm:$0xff]  }
  0x1e   :  { %v7404_v25 = vld [vmem:[%s11106_s1 + $0x2a0] ss:$16 sps:$4 sm:$0xff]   ;;  %v7407_v26 = vld [vmem:[%s11106_s1 + $0x2a8] ss:$16 sps:$4 sm:$0xff]   ;;  %v7412_v27 = vld [vmem:[%s11106_s1 + $0x2c4] ss:$16 sps:$4 sm:$0xff]  }
  0x1f   :  { %4866 = vmatpush1.bf16.msra.mxu0 %v7322_v30  ;;  %5399 = vmatpush1.bf16.msra.mxu1 %v7323_v31  ;;  %v7415_v28 = vld [vmem:[%s11106_s1 + $0x2cc] ss:$16 sps:$4 sm:$0xff]   ;;  %v7410_v31 = vld [vmem:[%s11106_s1 + $0x2c0] ss:$16 sps:$4 sm:$0xff]   ;;  %v7437_v48 = vld [vmem:[%s11106_s1 + $0x348] ss:$16 sps:$4 sm:$0xff]  }
  0x20   :  { %4867 = vmatprep.subr.bf16.mxu0 %v7324_v32  ;;  %5400 = vmatprep.subr.bf16.mxu1 %v7326_v33  ;;  %v8820_v29 = vld [vmem:[%s11107_s0 + $0x8] sm:$0xff]  ;;  %v7418_v33 = vld [vmem:[%s11106_s1 + $0x2e4] ss:$16 sps:$4 sm:$0xff]  }
  0x21   :  { %v6290_v30 = vcombine.high %v8820_v29, %v8820_v29  ;;  %v7413_v32 = vld [vmem:[%s11106_s1 + $0x2c8] ss:$16 sps:$4 sm:$0xff]   ;;  %v7439_v46 = vld [vmem:[%s11106_s1 + $0x34c] ss:$16 sps:$4 sm:$0xff]  }
  0x23   :  { %4868 = vmatpush1.bf16.msra.mxu0 %v7328_v34  ;;  %5401 = vmatpush1.bf16.msra.mxu1 %v7329_v35  ;;  %v7421_v34 = vld [vmem:[%s11106_s1 + $0x2ec] ss:$16 sps:$4 sm:$0xff]   ;;  %v7416_v35 = vld [vmem:[%s11106_s1 + $0x2e0] ss:$16 sps:$4 sm:$0xff]  }
  0x24   :  { %4869 = vmatprep.subr.bf16.mxu0 %v7330_v36  ;;  %5402 = vmatprep.subr.bf16.mxu1 %v7332_v37  ;;  %v7419_v36 = vld [vmem:[%s11106_s1 + $0x2e8] ss:$16 sps:$4 sm:$0xff]   ;;  %v7424_v37 = vld [vmem:[%s11106_s1 + $0x304] ss:$16 sps:$4 sm:$0xff]  }
  0x27   :  { %4870 = vmatpush1.bf16.msra.mxu0 %v7334_v38  ;;  %5403 = vmatpush1.bf16.msra.mxu1 %v7335_v39  ;;  %v7427_v38 = vld [vmem:[%s11106_s1 + $0x30c] ss:$16 sps:$4 sm:$0xff]   ;;  %v7422_v39 = vld [vmem:[%s11106_s1 + $0x300] ss:$16 sps:$4 sm:$0xff]  }
  0x28   :  { %4871 = vmatprep.subr.bf16.mxu0 %v7336_v40  ;;  %5404 = vmatprep.subr.bf16.mxu1 %v7338_v41  ;;  %v7425_v40 = vld [vmem:[%s11106_s1 + $0x308] ss:$16 sps:$4 sm:$0xff]   ;;  %v7430_v41 = vld [vmem:[%s11106_s1 + $0x324] ss:$16 sps:$4 sm:$0xff]  }
  0x2b   :  { %4872 = vmatpush1.bf16.msra.mxu0 %v7340_v42  ;;  %5405 = vmatpush1.bf16.msra.mxu1 %v7341_v43  ;;  %v7433_v42 = vld [vmem:[%s11106_s1 + $0x32c] ss:$16 sps:$4 sm:$0xff]   ;;  %v7428_v43 = vld [vmem:[%s11106_s1 + $0x320] ss:$16 sps:$4 sm:$0xff]  }
  0x2c   :  { %4873 = vmatprep.subr.bf16.mxu0 %v7342_v44  ;;  %5406 = vmatprep.subr.bf16.mxu1 %v7344_v45  ;;  %v7431_v44 = vld [vmem:[%s11106_s1 + $0x328] ss:$16 sps:$4 sm:$0xff]   ;;  %v7436_v45 = vld [vmem:[%s11106_s1 + $0x344] ss:$16 sps:$4 sm:$0xff]  }
  0x2f   :  { %4874 = vmatpush1.bf16.msra.mxu0 %v7346_v47  ;;  %5407 = vmatpush1.bf16.msra.mxu1 %v7347_v49  ;;  %v7434_v47 = vld [vmem:[%s11106_s1 + $0x340] ss:$16 sps:$4 sm:$0xff]   ;;  %v7442_v49 = vld [vmem:[%s11106_s1 + $0x364] ss:$16 sps:$4 sm:$0xff]  }
  0x30   :  { %4875 = vmatprep.subr.bf16.mxu0 %v7348_v50  ;;  %5408 = vmatprep.subr.bf16.mxu1 %v7350_v51  ;;  %v7445_v50 = vld [vmem:[%s11106_s1 + $0x36c] ss:$16 sps:$4 sm:$0xff]   ;;  %v7440_v51 = vld [vmem:[%s11106_s1 + $0x360] ss:$16 sps:$4 sm:$0xff]  }
  0x33   :  { %4876 = vmatpush1.bf16.msra.mxu0 %v7352_v52  ;;  %5409 = vmatpush1.bf16.msra.mxu1 %v7353_v53  ;;  %v7443_v52 = vld [vmem:[%s11106_s1 + $0x368] ss:$16 sps:$4 sm:$0xff]   ;;  %v7448_v53 = vld [vmem:[%s11106_s1 + $0x384] ss:$16 sps:$4 sm:$0xff]  }
  0x34   :  { %4877 = vmatprep.subr.bf16.mxu0 %v7354_v54  ;;  %5410 = vmatprep.subr.bf16.mxu1 %v7356_v55  ;;  %v7451_v54 = vld [vmem:[%s11106_s1 + $0x38c] ss:$16 sps:$4 sm:$0xff]   ;;  %v7446_v55 = vld [vmem:[%s11106_s1 + $0x380] ss:$16 sps:$4 sm:$0xff]  }
  0x37   :  { %4878 = vmatpush1.bf16.msra.mxu0 %v7358_v56  ;;  %5411 = vmatpush1.bf16.msra.mxu1 %v7359_v57  ;;  %v7449_v56 = vld [vmem:[%s11106_s1 + $0x388] ss:$16 sps:$4 sm:$0xff]   ;;  %v7454_v57 = vld [vmem:[%s11106_s1 + $0x3a4] ss:$16 sps:$4 sm:$0xff]  }
  0x38   :  { %4879 = vmatprep.subr.bf16.mxu0 %v7360_v58  ;;  %5412 = vmatprep.subr.bf16.mxu1 %v7362_v59  ;;  %v7457_v58 = vld [vmem:[%s11106_s1 + $0x3ac] ss:$16 sps:$4 sm:$0xff]   ;;  %v7452_v59 = vld [vmem:[%s11106_s1 + $0x3a0] ss:$16 sps:$4 sm:$0xff]  }
  0x3b   :  { %4880 = vmatpush1.bf16.msra.mxu0 %v7364_v60  ;;  %5413 = vmatpush1.bf16.msra.mxu1 %v7365_v61  ;;  %v7455_v60 = vld [vmem:[%s11106_s1 + $0x3a8] ss:$16 sps:$4 sm:$0xff]   ;;  %v7460_v61 = vld [vmem:[%s11106_s1 + $0x3c4] ss:$16 sps:$4 sm:$0xff]  }
  0x3c   :  { %4881 = vmatprep.subr.bf16.mxu0 %v7366_v62  ;;  %5414 = vmatprep.subr.bf16.mxu1 %v7368_v63  ;;  %v7463_v62 = vld [vmem:[%s11106_s1 + $0x3cc] ss:$16 sps:$4 sm:$0xff]   ;;  %v7458_v63 = vld [vmem:[%s11106_s1 + $0x3c0] ss:$16 sps:$4 sm:$0xff]  }
  0x3f   :  { %4882 = vmatpush1.bf16.msra.mxu0 %v7370_v0  ;;  %5415 = vmatpush1.bf16.msra.mxu1 %v7371_v1  ;;  %v7461_v0 = vld [vmem:[%s11106_s1 + $0x3c8] ss:$16 sps:$4 sm:$0xff]   ;;  %v7466_v1 = vld [vmem:[%s11106_s1 + $0x3e4] ss:$16 sps:$4 sm:$0xff]  }
  0x40   :  { %4892 = vmatprep.subr.bf16.mxu0 %v7376_v2  ;;  %5425 = vmatprep.subr.bf16.mxu1 %v7379_v3  ;;  %v7469_v2 = vld [vmem:[%s11106_s1 + $0x3ec] ss:$16 sps:$4 sm:$0xff]   ;;  %v7464_v3 = vld [vmem:[%s11106_s1 + $0x3e0] ss:$16 sps:$4 sm:$0xff]  }
  0x42   :  { %4884 = vmatmul.mubr.bf16.vlgmr.msra.gmra.mrb[0].mxu0 %v6287_v4  ;;  %5417 = vmatmul.mubr.bf16.vlgmr.msra.gmra.mrb[0].mxu1 %v6287_v4  ;;  %v7467_v4 = vld [vmem:[%s11106_s1 + $0x3e8] ss:$16 sps:$4 sm:$0xff]  }
  0x43   :  { %4893 = vmatpush1.bf16.msra.mxu0 %v7374_v5  ;;  %5426 = vmatpush1.bf16.msra.mxu1 %v7377_v6  ;;  %v7474_v5 = vld [vmem:[%s11106_s1 + $0x404] ss:$16 sps:$4 sm:$0xff]   ;;  %v7477_v6 = vld [vmem:[%s11106_s1 + $0x40c] ss:$16 sps:$4 sm:$0xff]  }
  0x44   :  { %4894 = vmatprep.subr.bf16.mxu0 %v7382_v7  ;;  %5427 = vmatprep.subr.bf16.mxu1 %v7385_v8  ;;  %v6289_v7 = vcombine.low %v8820_v29, %v8820_v29  ;;  %v7472_v8 = vld [vmem:[%s11106_s1 + $0x400] ss:$16 sps:$4 sm:$0xff]   ;;  %v7507_v29 = vld [vmem:[%s11106_s1 + $0x4ac] ss:$16 sps:$4 sm:$0xff]  }
  0x45   :  { %4924 = vmatprep.mubr.bf16.mxu0 %v6290_v30  ;;  %5457 = vmatprep.mubr.bf16.mxu1 %v6290_v30  ;;  %v7502_v30 = vld [vmem:[%s11106_s1 + $0x4a0] ss:$16 sps:$4 sm:$0xff]  }
  0x47   :  { %4895 = vmatpush1.bf16.msra.mxu0 %v7380_v9  ;;  %5428 = vmatpush1.bf16.msra.mxu1 %v7383_v10  ;;  %v7475_v9 = vld [vmem:[%s11106_s1 + $0x408] ss:$16 sps:$4 sm:$0xff]   ;;  %v7480_v10 = vld [vmem:[%s11106_s1 + $0x424] ss:$16 sps:$4 sm:$0xff]  }
  0x48   :  { %4896 = vmatprep.subr.bf16.mxu0 %v7388_v11  ;;  %5429 = vmatprep.subr.bf16.mxu1 %v7391_v12  ;;  %v8958_v11 = vld [vmem:[%s11107_s0 + $0x10] sm:$0xff]  ;;  %v7483_v12 = vld [vmem:[%s11106_s1 + $0x42c] ss:$16 sps:$4 sm:$0xff]  }
  0x4b   :  { %4897 = vmatpush1.bf16.msra.mxu0 %v7386_v13  ;;  %5430 = vmatpush1.bf16.msra.mxu1 %v7389_v14  ;;  %v6292_v13 = vcombine.high %v8958_v11, %v8958_v11  ;;  %v7478_v14 = vld [vmem:[%s11106_s1 + $0x420] ss:$16 sps:$4 sm:$0xff]  }
  0x4c   :  { %4898 = vmatprep.subr.bf16.mxu0 %v7394_v15  ;;  %5431 = vmatprep.subr.bf16.mxu1 %v7397_v16  ;;  %v7481_v15 = vld [vmem:[%s11106_s1 + $0x428] ss:$16 sps:$4 sm:$0xff]   ;;  %v7486_v16 = vld [vmem:[%s11106_s1 + $0x444] ss:$16 sps:$4 sm:$0xff]  }
  0x4f   :  { %4899 = vmatpush1.bf16.msra.mxu0 %v7392_v17  ;;  %5432 = vmatpush1.bf16.msra.mxu1 %v7395_v18  ;;  %v7489_v17 = vld [vmem:[%s11106_s1 + $0x44c] ss:$16 sps:$4 sm:$0xff]   ;;  %v7484_v18 = vld [vmem:[%s11106_s1 + $0x440] ss:$16 sps:$4 sm:$0xff]  }
  0x50   :  { %4900 = vmatprep.subr.bf16.mxu0 %v7400_v19  ;;  %5433 = vmatprep.subr.bf16.mxu1 %v7403_v20  ;;  %v7487_v19 = vld [vmem:[%s11106_s1 + $0x448] ss:$16 sps:$4 sm:$0xff]   ;;  %v7492_v20 = vld [vmem:[%s11106_s1 + $0x464] ss:$16 sps:$4 sm:$0xff]  }
  0x53   :  { %4901 = vmatpush1.bf16.msra.mxu0 %v7398_v21  ;;  %5434 = vmatpush1.bf16.msra.mxu1 %v7401_v22  ;;  %v7495_v21 = vld [vmem:[%s11106_s1 + $0x46c] ss:$16 sps:$4 sm:$0xff]   ;;  %v7490_v22 = vld [vmem:[%s11106_s1 + $0x460] ss:$16 sps:$4 sm:$0xff]  }
  0x54   :  { %4902 = vmatprep.subr.bf16.mxu0 %v7406_v23  ;;  %5435 = vmatprep.subr.bf16.mxu1 %v7409_v24  ;;  %v7493_v23 = vld [vmem:[%s11106_s1 + $0x468] ss:$16 sps:$4 sm:$0xff]   ;;  %v7498_v24 = vld [vmem:[%s11106_s1 + $0x484] ss:$16 sps:$4 sm:$0xff]  }
  0x57   :  { %4903 = vmatpush1.bf16.msra.mxu0 %v7404_v25  ;;  %5436 = vmatpush1.bf16.msra.mxu1 %v7407_v26  ;;  %v7501_v25 = vld [vmem:[%s11106_s1 + $0x48c] ss:$16 sps:$4 sm:$0xff]   ;;  %v7496_v26 = vld [vmem:[%s11106_s1 + $0x480] ss:$16 sps:$4 sm:$0xff]  }
  0x58   :  { %4904 = vmatprep.subr.bf16.mxu0 %v7412_v27  ;;  %5437 = vmatprep.subr.bf16.mxu1 %v7415_v28  ;;  %v7499_v27 = vld [vmem:[%s11106_s1 + $0x488] ss:$16 sps:$4 sm:$0xff]   ;;  %v7504_v28 = vld [vmem:[%s11106_s1 + $0x4a4] ss:$16 sps:$4 sm:$0xff]  }
  0x5b   :  { %4905 = vmatpush1.bf16.msra.mxu0 %v7410_v31  ;;  %5438 = vmatpush1.bf16.msra.mxu1 %v7413_v32  ;;  %v7505_v31 = vld [vmem:[%s11106_s1 + $0x4a8] ss:$16 sps:$4 sm:$0xff]   ;;  %v7510_v32 = vld [vmem:[%s11106_s1 + $0x4c4] ss:$16 sps:$4 sm:$0xff]  }
  0x5c   :  { %4906 = vmatprep.subr.bf16.mxu0 %v7418_v33  ;;  %5439 = vmatprep.subr.bf16.mxu1 %v7421_v34  ;;  %v7513_v33 = vld [vmem:[%s11106_s1 + $0x4cc] ss:$16 sps:$4 sm:$0xff]   ;;  %v7508_v34 = vld [vmem:[%s11106_s1 + $0x4c0] ss:$16 sps:$4 sm:$0xff]  }
  0x5f   :  { %4907 = vmatpush1.bf16.msra.mxu0 %v7416_v35  ;;  %5440 = vmatpush1.bf16.msra.mxu1 %v7419_v36  ;;  %v7511_v35 = vld [vmem:[%s11106_s1 + $0x4c8] ss:$16 sps:$4 sm:$0xff]   ;;  %v7516_v36 = vld [vmem:[%s11106_s1 + $0x4e4] ss:$16 sps:$4 sm:$0xff]  }
  0x60   :  { %4908 = vmatprep.subr.bf16.mxu0 %v7424_v37  ;;  %5441 = vmatprep.subr.bf16.mxu1 %v7427_v38  ;;  %v7519_v37 = vld [vmem:[%s11106_s1 + $0x4ec] ss:$16 sps:$4 sm:$0xff]   ;;  %v7514_v38 = vld [vmem:[%s11106_s1 + $0x4e0] ss:$16 sps:$4 sm:$0xff]  }
  0x63   :  { %4909 = vmatpush1.bf16.msra.mxu0 %v7422_v39  ;;  %5442 = vmatpush1.bf16.msra.mxu1 %v7425_v40  ;;  %v7517_v39 = vld [vmem:[%s11106_s1 + $0x4e8] ss:$16 sps:$4 sm:$0xff]   ;;  %v7522_v40 = vld [vmem:[%s11106_s1 + $0x504] ss:$16 sps:$4 sm:$0xff]  }
  0x64   :  { %4910 = vmatprep.subr.bf16.mxu0 %v7430_v41  ;;  %5443 = vmatprep.subr.bf16.mxu1 %v7433_v42  ;;  %v7525_v41 = vld [vmem:[%s11106_s1 + $0x50c] ss:$16 sps:$4 sm:$0xff]   ;;  %v7520_v42 = vld [vmem:[%s11106_s1 + $0x500] ss:$16 sps:$4 sm:$0xff]  }
  0x67   :  { %4911 = vmatpush1.bf16.msra.mxu0 %v7428_v43  ;;  %5444 = vmatpush1.bf16.msra.mxu1 %v7431_v44  ;;  %v7523_v43 = vld [vmem:[%s11106_s1 + $0x508] ss:$16 sps:$4 sm:$0xff]   ;;  %v7528_v44 = vld [vmem:[%s11106_s1 + $0x524] ss:$16 sps:$4 sm:$0xff]  }
  0x68   :  { %4912 = vmatprep.subr.bf16.mxu0 %v7436_v45  ;;  %5445 = vmatprep.subr.bf16.mxu1 %v7439_v46  ;;  %v7531_v45 = vld [vmem:[%s11106_s1 + $0x52c] ss:$16 sps:$4 sm:$0xff]   ;;  %v7526_v46 = vld [vmem:[%s11106_s1 + $0x520] ss:$16 sps:$4 sm:$0xff]  }
  0x6b   :  { %4913 = vmatpush1.bf16.msra.mxu0 %v7434_v47  ;;  %5446 = vmatpush1.bf16.msra.mxu1 %v7437_v48  ;;  %v7529_v47 = vld [vmem:[%s11106_s1 + $0x528] ss:$16 sps:$4 sm:$0xff]   ;;  %v7534_v48 = vld [vmem:[%s11106_s1 + $0x544] ss:$16 sps:$4 sm:$0xff]  }
  0x6c   :  { %4914 = vmatprep.subr.bf16.mxu0 %v7442_v49  ;;  %5447 = vmatprep.subr.bf16.mxu1 %v7445_v50  ;;  %v7537_v49 = vld [vmem:[%s11106_s1 + $0x54c] ss:$16 sps:$4 sm:$0xff]   ;;  %v7532_v50 = vld [vmem:[%s11106_s1 + $0x540] ss:$16 sps:$4 sm:$0xff]  }
  0x6f   :  { %4915 = vmatpush1.bf16.msra.mxu0 %v7440_v51  ;;  %5448 = vmatpush1.bf16.msra.mxu1 %v7443_v52  ;;  %v7535_v51 = vld [vmem:[%s11106_s1 + $0x548] ss:$16 sps:$4 sm:$0xff]   ;;  %v7540_v52 = vld [vmem:[%s11106_s1 + $0x564] ss:$16 sps:$4 sm:$0xff]  }
  0x70   :  { %4916 = vmatprep.subr.bf16.mxu0 %v7448_v53  ;;  %5449 = vmatprep.subr.bf16.mxu1 %v7451_v54  ;;  %v7543_v53 = vld [vmem:[%s11106_s1 + $0x56c] ss:$16 sps:$4 sm:$0xff]   ;;  %v7538_v54 = vld [vmem:[%s11106_s1 + $0x560] ss:$16 sps:$4 sm:$0xff]  }
  0x73   :  { %4917 = vmatpush1.bf16.msra.mxu0 %v7446_v55  ;;  %5450 = vmatpush1.bf16.msra.mxu1 %v7449_v56  ;;  %v7541_v55 = vld [vmem:[%s11106_s1 + $0x568] ss:$16 sps:$4 sm:$0xff]   ;;  %v7546_v56 = vld [vmem:[%s11106_s1 + $0x584] ss:$16 sps:$4 sm:$0xff]  }
  0x74   :  { %4918 = vmatprep.subr.bf16.mxu0 %v7454_v57  ;;  %5451 = vmatprep.subr.bf16.mxu1 %v7457_v58  ;;  %v7549_v57 = vld [vmem:[%s11106_s1 + $0x58c] ss:$16 sps:$4 sm:$0xff]   ;;  %v7544_v58 = vld [vmem:[%s11106_s1 + $0x580] ss:$16 sps:$4 sm:$0xff]  }
  0x77   :  { %4919 = vmatpush1.bf16.msra.mxu0 %v7452_v59  ;;  %5452 = vmatpush1.bf16.msra.mxu1 %v7455_v60  ;;  %v7547_v59 = vld [vmem:[%s11106_s1 + $0x588] ss:$16 sps:$4 sm:$0xff]   ;;  %v7552_v60 = vld [vmem:[%s11106_s1 + $0x5a4] ss:$16 sps:$4 sm:$0xff]  }
  0x78   :  { %4920 = vmatprep.subr.bf16.mxu0 %v7460_v61  ;;  %5453 = vmatprep.subr.bf16.mxu1 %v7463_v62  ;;  %v7555_v61 = vld [vmem:[%s11106_s1 + $0x5ac] ss:$16 sps:$4 sm:$0xff]   ;;  %v7550_v62 = vld [vmem:[%s11106_s1 + $0x5a0] ss:$16 sps:$4 sm:$0xff]  }
  0x7b   :  { %4921 = vmatpush1.bf16.msra.mxu0 %v7458_v63  ;;  %5454 = vmatpush1.bf16.msra.mxu1 %v7461_v0  ;;  %v7553_v63 = vld [vmem:[%s11106_s1 + $0x5a8] ss:$16 sps:$4 sm:$0xff]   ;;  %v7558_v0 = vld [vmem:[%s11106_s1 + $0x5c4] ss:$16 sps:$4 sm:$0xff]  }
  0x7c   :  { %4922 = vmatprep.subr.bf16.mxu0 %v7466_v1  ;;  %5455 = vmatprep.subr.bf16.mxu1 %v7469_v2  ;;  %v7561_v1 = vld [vmem:[%s11106_s1 + $0x5cc] ss:$16 sps:$4 sm:$0xff]   ;;  %v7556_v2 = vld [vmem:[%s11106_s1 + $0x5c0] ss:$16 sps:$4 sm:$0xff]  }
  0x7f   :  { %4923 = vmatpush1.bf16.msra.mxu0 %v7464_v3  ;;  %5456 = vmatpush1.bf16.msra.mxu1 %v7467_v4  ;;  %v7559_v3 = vld [vmem:[%s11106_s1 + $0x5c8] ss:$16 sps:$4 sm:$0xff]   ;;  %v7564_v4 = vld [vmem:[%s11106_s1 + $0x5e4] ss:$16 sps:$4 sm:$0xff]  }
  0x80   :  { %4933 = vmatprep.subr.bf16.mxu0 %v7474_v5  ;;  %5466 = vmatprep.subr.bf16.mxu1 %v7477_v6  ;;  %v7567_v5 = vld [vmem:[%s11106_s1 + $0x5ec] ss:$16 sps:$4 sm:$0xff]   ;;  %v7562_v6 = vld [vmem:[%s11106_s1 + $0x5e0] ss:$16 sps:$4 sm:$0xff]  }
  0x82   :  { %4925 = vmatmul.mubr.bf16.vlgmr.msra.gmra.mrb[0].mxu0 %v6289_v7  ;;  %5458 = vmatmul.mubr.bf16.vlgmr.msra.gmra.mrb[0].mxu1 %v6289_v7  ;;  %v7565_v7 = vld [vmem:[%s11106_s1 + $0x5e8] ss:$16 sps:$4 sm:$0xff]  }
  0x83   :  { %4934 = vmatpush1.bf16.msra.mxu0 %v7472_v8  ;;  %5467 = vmatpush1.bf16.msra.mxu1 %v7475_v9  ;;  %v7572_v8 = vld [vmem:[%s11106_s1 + $0x604] ss:$16 sps:$4 sm:$0xff]   ;;  %v7575_v9 = vld [vmem:[%s11106_s1 + $0x60c] ss:$16 sps:$4 sm:$0xff]  }
  0x84   :  { %4935 = vmatprep.subr.bf16.mxu0 %v7480_v10  ;;  %5468 = vmatprep.subr.bf16.mxu1 %v7483_v12  ;;  %v7570_v10 = vld [vmem:[%s11106_s1 + $0x600] ss:$16 sps:$4 sm:$0xff]   ;;  %v6291_v12 = vcombine.low %v8958_v11, %v8958_v11  ;;  %v7581_v11 = vld [vmem:[%s11106_s1 + $0x62c] ss:$16 sps:$4 sm:$0xff]  }
  0x85   :  { %4965 = vmatprep.mubr.bf16.mxu0 %v6292_v13  ;;  %5498 = vmatprep.mubr.bf16.mxu1 %v6292_v13  ;;  %v7573_v13 = vld [vmem:[%s11106_s1 + $0x608] ss:$16 sps:$4 sm:$0xff]  }
  0x87   :  { %4936 = vmatpush1.bf16.msra.mxu0 %v7478_v14  ;;  %5469 = vmatpush1.bf16.msra.mxu1 %v7481_v15  ;;  %v9156_v14 = vld [vmem:[%s11107_s0 + $0x18] sm:$0xff]  ;;  %v7578_v15 = vld [vmem:[%s11106_s1 + $0x624] ss:$16 sps:$4 sm:$0xff]  }
  0x88   :  { %4937 = vmatprep.subr.bf16.mxu0 %v7486_v16  ;;  %5470 = vmatprep.subr.bf16.mxu1 %v7489_v17  ;;  %v6294_v16 = vcombine.high %v9156_v14, %v9156_v14  ;;  %v7576_v17 = vld [vmem:[%s11106_s1 + $0x620] ss:$16 sps:$4 sm:$0xff]  }
  0x8b   :  { %4938 = vmatpush1.bf16.msra.mxu0 %v7484_v18  ;;  %5471 = vmatpush1.bf16.msra.mxu1 %v7487_v19  ;;  %v7579_v18 = vld [vmem:[%s11106_s1 + $0x628] ss:$16 sps:$4 sm:$0xff]   ;;  %v7584_v19 = vld [vmem:[%s11106_s1 + $0x644] ss:$16 sps:$4 sm:$0xff]  }
  0x8c   :  { %4939 = vmatprep.subr.bf16.mxu0 %v7492_v20  ;;  %5472 = vmatprep.subr.bf16.mxu1 %v7495_v21  ;;  %v7587_v20 = vld [vmem:[%s11106_s1 + $0x64c] ss:$16 sps:$4 sm:$0xff]   ;;  %v7582_v21 = vld [vmem:[%s11106_s1 + $0x640] ss:$16 sps:$4 sm:$0xff]  }
  0x8f   :  { %4940 = vmatpush1.bf16.msra.mxu0 %v7490_v22  ;;  %5473 = vmatpush1.bf16.msra.mxu1 %v7493_v23  ;;  %v7585_v22 = vld [vmem:[%s11106_s1 + $0x648] ss:$16 sps:$4 sm:$0xff]   ;;  %v7590_v23 = vld [vmem:[%s11106_s1 + $0x664] ss:$16 sps:$4 sm:$0xff]  }
  0x90   :  { %4941 = vmatprep.subr.bf16.mxu0 %v7498_v24  ;;  %5474 = vmatprep.subr.bf16.mxu1 %v7501_v25  ;;  %v7593_v24 = vld [vmem:[%s11106_s1 + $0x66c] ss:$16 sps:$4 sm:$0xff]   ;;  %v7588_v25 = vld [vmem:[%s11106_s1 + $0x660] ss:$16 sps:$4 sm:$0xff]  }
  0x93   :  { %4942 = vmatpush1.bf16.msra.mxu0 %v7496_v26  ;;  %5475 = vmatpush1.bf16.msra.mxu1 %v7499_v27  ;;  %v7591_v26 = vld [vmem:[%s11106_s1 + $0x668] ss:$16 sps:$4 sm:$0xff]   ;;  %v7596_v27 = vld [vmem:[%s11106_s1 + $0x684] ss:$16 sps:$4 sm:$0xff]  }
  0x94   :  { %4943 = vmatprep.subr.bf16.mxu0 %v7504_v28  ;;  %5476 = vmatprep.subr.bf16.mxu1 %v7507_v29  ;;  %v7599_v28 = vld [vmem:[%s11106_s1 + $0x68c] ss:$16 sps:$4 sm:$0xff]   ;;  %v7594_v29 = vld [vmem:[%s11106_s1 + $0x680] ss:$16 sps:$4 sm:$0xff]  }
  0x97   :  { %4944 = vmatpush1.bf16.msra.mxu0 %v7502_v30  ;;  %5477 = vmatpush1.bf16.msra.mxu1 %v7505_v31  ;;  %v7597_v30 = vld [vmem:[%s11106_s1 + $0x688] ss:$16 sps:$4 sm:$0xff]   ;;  %v7602_v31 = vld [vmem:[%s11106_s1 + $0x6a4] ss:$16 sps:$4 sm:$0xff]  }
  0x98   :  { %4945 = vmatprep.subr.bf16.mxu0 %v7510_v32  ;;  %5478 = vmatprep.subr.bf16.mxu1 %v7513_v33  ;;  %v7605_v32 = vld [vmem:[%s11106_s1 + $0x6ac] ss:$16 sps:$4 sm:$0xff]   ;;  %v7600_v33 = vld [vmem:[%s11106_s1 + $0x6a0] ss:$16 sps:$4 sm:$0xff]  }
  0x9b   :  { %4946 = vmatpush1.bf16.msra.mxu0 %v7508_v34  ;;  %5479 = vmatpush1.bf16.msra.mxu1 %v7511_v35  ;;  %v7603_v34 = vld [vmem:[%s11106_s1 + $0x6a8] ss:$16 sps:$4 sm:$0xff]   ;;  %v7608_v35 = vld [vmem:[%s11106_s1 + $0x6c4] ss:$16 sps:$4 sm:$0xff]  }
  0x9c   :  { %4947 = vmatprep.subr.bf16.mxu0 %v7516_v36  ;;  %5480 = vmatprep.subr.bf16.mxu1 %v7519_v37  ;;  %v7611_v36 = vld [vmem:[%s11106_s1 + $0x6cc] ss:$16 sps:$4 sm:$0xff]   ;;  %v7606_v37 = vld [vmem:[%s11106_s1 + $0x6c0] ss:$16 sps:$4 sm:$0xff]  }
  0x9f   :  { %4948 = vmatpush1.bf16.msra.mxu0 %v7514_v38  ;;  %5481 = vmatpush1.bf16.msra.mxu1 %v7517_v39  ;;  %v7609_v38 = vld [vmem:[%s11106_s1 + $0x6c8] ss:$16 sps:$4 sm:$0xff]   ;;  %v7614_v39 = vld [vmem:[%s11106_s1 + $0x6e4] ss:$16 sps:$4 sm:$0xff]  }
  0xa0   :  { %4949 = vmatprep.subr.bf16.mxu0 %v7522_v40  ;;  %5482 = vmatprep.subr.bf16.mxu1 %v7525_v41  ;;  %v7617_v40 = vld [vmem:[%s11106_s1 + $0x6ec] ss:$16 sps:$4 sm:$0xff]   ;;  %v7612_v41 = vld [vmem:[%s11106_s1 + $0x6e0] ss:$16 sps:$4 sm:$0xff]  }
  0xa3   :  { %4950 = vmatpush1.bf16.msra.mxu0 %v7520_v42  ;;  %5483 = vmatpush1.bf16.msra.mxu1 %v7523_v43  ;;  %v7615_v42 = vld [vmem:[%s11106_s1 + $0x6e8] ss:$16 sps:$4 sm:$0xff]   ;;  %v7620_v43 = vld [vmem:[%s11106_s1 + $0x704] ss:$16 sps:$4 sm:$0xff]  }
  0xa4   :  { %4951 = vmatprep.subr.bf16.mxu0 %v7528_v44  ;;  %5484 = vmatprep.subr.bf16.mxu1 %v7531_v45  ;;  %v7623_v44 = vld [vmem:[%s11106_s1 + $0x70c] ss:$16 sps:$4 sm:$0xff]   ;;  %v7618_v45 = vld [vmem:[%s11106_s1 + $0x700] ss:$16 sps:$4 sm:$0xff]  }
  0xa7   :  { %4952 = vmatpush1.bf16.msra.mxu0 %v7526_v46  ;;  %5485 = vmatpush1.bf16.msra.mxu1 %v7529_v47  ;;  %v7621_v46 = vld [vmem:[%s11106_s1 + $0x708] ss:$16 sps:$4 sm:$0xff]   ;;  %v7626_v47 = vld [vmem:[%s11106_s1 + $0x724] ss:$16 sps:$4 sm:$0xff]  }
  0xa8   :  { %4953 = vmatprep.subr.bf16.mxu0 %v7534_v48  ;;  %5486 = vmatprep.subr.bf16.mxu1 %v7537_v49  ;;  %v7629_v48 = vld [vmem:[%s11106_s1 + $0x72c] ss:$16 sps:$4 sm:$0xff]   ;;  %v7624_v49 = vld [vmem:[%s11106_s1 + $0x720] ss:$16 sps:$4 sm:$0xff]  }
  0xab   :  { %4954 = vmatpush1.bf16.msra.mxu0 %v7532_v50  ;;  %5487 = vmatpush1.bf16.msra.mxu1 %v7535_v51  ;;  %v7627_v50 = vld [vmem:[%s11106_s1 + $0x728] ss:$16 sps:$4 sm:$0xff]   ;;  %v7632_v51 = vld [vmem:[%s11106_s1 + $0x744] ss:$16 sps:$4 sm:$0xff]  }
  0xac   :  { %4955 = vmatprep.subr.bf16.mxu0 %v7540_v52  ;;  %5488 = vmatprep.subr.bf16.mxu1 %v7543_v53  ;;  %v7635_v52 = vld [vmem:[%s11106_s1 + $0x74c] ss:$16 sps:$4 sm:$0xff]   ;;  %v7630_v53 = vld [vmem:[%s11106_s1 + $0x740] ss:$16 sps:$4 sm:$0xff]  }
  0xaf   :  { %4956 = vmatpush1.bf16.msra.mxu0 %v7538_v54  ;;  %5489 = vmatpush1.bf16.msra.mxu1 %v7541_v55  ;;  %v7633_v54 = vld [vmem:[%s11106_s1 + $0x748] ss:$16 sps:$4 sm:$0xff]   ;;  %v7638_v55 = vld [vmem:[%s11106_s1 + $0x764] ss:$16 sps:$4 sm:$0xff]  }
  0xb0   :  { %4957 = vmatprep.subr.bf16.mxu0 %v7546_v56  ;;  %5490 = vmatprep.subr.bf16.mxu1 %v7549_v57  ;;  %v7641_v56 = vld [vmem:[%s11106_s1 + $0x76c] ss:$16 sps:$4 sm:$0xff]   ;;  %v7636_v57 = vld [vmem:[%s11106_s1 + $0x760] ss:$16 sps:$4 sm:$0xff]  }
  0xb3   :  { %4958 = vmatpush1.bf16.msra.mxu0 %v7544_v58  ;;  %5491 = vmatpush1.bf16.msra.mxu1 %v7547_v59  ;;  %v7639_v58 = vld [vmem:[%s11106_s1 + $0x768] ss:$16 sps:$4 sm:$0xff]   ;;  %v7644_v59 = vld [vmem:[%s11106_s1 + $0x784] ss:$16 sps:$4 sm:$0xff]  }
  0xb4   :  { %4959 = vmatprep.subr.bf16.mxu0 %v7552_v60  ;;  %5492 = vmatprep.subr.bf16.mxu1 %v7555_v61  ;;  %v7647_v60 = vld [vmem:[%s11106_s1 + $0x78c] ss:$16 sps:$4 sm:$0xff]   ;;  %v7642_v61 = vld [vmem:[%s11106_s1 + $0x780] ss:$16 sps:$4 sm:$0xff]  }
  0xb7   :  { %4960 = vmatpush1.bf16.msra.mxu0 %v7550_v62  ;;  %5493 = vmatpush1.bf16.msra.mxu1 %v7553_v63  ;;  %v7645_v62 = vld [vmem:[%s11106_s1 + $0x788] ss:$16 sps:$4 sm:$0xff]   ;;  %v7650_v63 = vld [vmem:[%s11106_s1 + $0x7a4] ss:$16 sps:$4 sm:$0xff]  }
  0xb8   :  { %4961 = vmatprep.subr.bf16.mxu0 %v7558_v0  ;;  %5494 = vmatprep.subr.bf16.mxu1 %v7561_v1  ;;  %v7653_v0 = vld [vmem:[%s11106_s1 + $0x7ac] ss:$16 sps:$4 sm:$0xff]   ;;  %v7648_v1 = vld [vmem:[%s11106_s1 + $0x7a0] ss:$16 sps:$4 sm:$0xff]  }
  0xbb   :  { %4962 = vmatpush1.bf16.msra.mxu0 %v7556_v2  ;;  %5495 = vmatpush1.bf16.msra.mxu1 %v7559_v3  ;;  %v7651_v2 = vld [vmem:[%s11106_s1 + $0x7a8] ss:$16 sps:$4 sm:$0xff]   ;;  %v7656_v3 = vld [vmem:[%s11106_s1 + $0x7c4] ss:$16 sps:$4 sm:$0xff]  }
  0xbc   :  { %4963 = vmatprep.subr.bf16.mxu0 %v7564_v4  ;;  %5496 = vmatprep.subr.bf16.mxu1 %v7567_v5  ;;  %v7659_v4 = vld [vmem:[%s11106_s1 + $0x7cc] ss:$16 sps:$4 sm:$0xff]   ;;  %v7654_v5 = vld [vmem:[%s11106_s1 + $0x7c0] ss:$16 sps:$4 sm:$0xff]  }
  0xbf   :  { %4964 = vmatpush1.bf16.msra.mxu0 %v7562_v6  ;;  %5497 = vmatpush1.bf16.msra.mxu1 %v7565_v7  ;;  %v7657_v6 = vld [vmem:[%s11106_s1 + $0x7c8] ss:$16 sps:$4 sm:$0xff]   ;;  %v7662_v7 = vld [vmem:[%s11106_s1 + $0x7e4] ss:$16 sps:$4 sm:$0xff]  }
  0xc0   :  { %4974 = vmatprep.subr.bf16.mxu0 %v7572_v8  ;;  %5507 = vmatprep.subr.bf16.mxu1 %v7575_v9  ;;  %v7665_v8 = vld [vmem:[%s11106_s1 + $0x7ec] ss:$16 sps:$4 sm:$0xff]   ;;  %v7660_v9 = vld [vmem:[%s11106_s1 + $0x7e0] ss:$16 sps:$4 sm:$0xff]  }
  0xc2   :  { %4966 = vmatmul.mubr.bf16.vlgmr.msra.gmra.mrb[0].mxu0 %v6291_v12  ;;  %5499 = vmatmul.mubr.bf16.vlgmr.msra.gmra.mrb[0].mxu1 %v6291_v12  ;;  %v7670_v12 = vld [vmem:[%s11106_s1 + $0x804] ss:$16 sps:$4 sm:$0xff]  }
  0xc3   :  { %4975 = vmatpush1.bf16.msra.mxu0 %v7570_v10  ;;  %5508 = vmatpush1.bf16.msra.mxu1 %v7573_v13  ;;  %v7663_v10 = vld [vmem:[%s11106_s1 + $0x7e8] ss:$16 sps:$4 sm:$0xff]   ;;  %v7673_v13 = vld [vmem:[%s11106_s1 + $0x80c] ss:$16 sps:$4 sm:$0xff]  }
  0xc4   :  { %4976 = vmatprep.subr.bf16.mxu0 %v7578_v15  ;;  %5509 = vmatprep.subr.bf16.mxu1 %v7581_v11  ;;  %v7668_v15 = vld [vmem:[%s11106_s1 + $0x800] ss:$16 sps:$4 sm:$0xff]   ;;  %v6293_v11 = vcombine.low %v9156_v14, %v9156_v14  ;;  %v7679_v14 = vld [vmem:[%s11106_s1 + $0x82c] ss:$16 sps:$4 sm:$0xff]  }
  0xc5   :  { %5006 = vmatprep.mubr.bf16.mxu0 %v6294_v16  ;;  %5539 = vmatprep.mubr.bf16.mxu1 %v6294_v16  ;;  %v9354_v16 = vld [vmem:[%s11107_s0 + $0x20] sm:$0xff] }
  0xc7   :  { %4977 = vmatpush1.bf16.msra.mxu0 %v7576_v17  ;;  %5510 = vmatpush1.bf16.msra.mxu1 %v7579_v18  ;;  %v7671_v17 = vld [vmem:[%s11106_s1 + $0x808] ss:$16 sps:$4 sm:$0xff]   ;;  %v7676_v18 = vld [vmem:[%s11106_s1 + $0x824] ss:$16 sps:$4 sm:$0xff]  }
  0xc8   :  { %4978 = vmatprep.subr.bf16.mxu0 %v7584_v19  ;;  %5511 = vmatprep.subr.bf16.mxu1 %v7587_v20  ;;  %v6296_v19 = vcombine.high %v9354_v16, %v9354_v16  ;;  %v7674_v20 = vld [vmem:[%s11106_s1 + $0x820] ss:$16 sps:$4 sm:$0xff]  }
  0xcb   :  { %4979 = vmatpush1.bf16.msra.mxu0 %v7582_v21  ;;  %5512 = vmatpush1.bf16.msra.mxu1 %v7585_v22  ;;  %v7677_v21 = vld [vmem:[%s11106_s1 + $0x828] ss:$16 sps:$4 sm:$0xff]   ;;  %v7682_v22 = vld [vmem:[%s11106_s1 + $0x844] ss:$16 sps:$4 sm:$0xff]  }
  0xcc   :  { %4980 = vmatprep.subr.bf16.mxu0 %v7590_v23  ;;  %5513 = vmatprep.subr.bf16.mxu1 %v7593_v24  ;;  %v7685_v23 = vld [vmem:[%s11106_s1 + $0x84c] ss:$16 sps:$4 sm:$0xff]   ;;  %v7680_v24 = vld [vmem:[%s11106_s1 + $0x840] ss:$16 sps:$4 sm:$0xff]  }
  0xcf   :  { %4981 = vmatpush1.bf16.msra.mxu0 %v7588_v25  ;;  %5514 = vmatpush1.bf16.msra.mxu1 %v7591_v26  ;;  %v7683_v25 = vld [vmem:[%s11106_s1 + $0x848] ss:$16 sps:$4 sm:$0xff]   ;;  %v7688_v26 = vld [vmem:[%s11106_s1 + $0x864] ss:$16 sps:$4 sm:$0xff]  }
  0xd0   :  { %4982 = vmatprep.subr.bf16.mxu0 %v7596_v27  ;;  %5515 = vmatprep.subr.bf16.mxu1 %v7599_v28  ;;  %v7691_v27 = vld [vmem:[%s11106_s1 + $0x86c] ss:$16 sps:$4 sm:$0xff]   ;;  %v7686_v28 = vld [vmem:[%s11106_s1 + $0x860] ss:$16 sps:$4 sm:$0xff]  }
  0xd3   :  { %4983 = vmatpush1.bf16.msra.mxu0 %v7594_v29  ;;  %5516 = vmatpush1.bf16.msra.mxu1 %v7597_v30  ;;  %v7689_v29 = vld [vmem:[%s11106_s1 + $0x868] ss:$16 sps:$4 sm:$0xff]   ;;  %v7694_v30 = vld [vmem:[%s11106_s1 + $0x884] ss:$16 sps:$4 sm:$0xff]  }
  0xd4   :  { %4984 = vmatprep.subr.bf16.mxu0 %v7602_v31  ;;  %5517 = vmatprep.subr.bf16.mxu1 %v7605_v32  ;;  %v7697_v31 = vld [vmem:[%s11106_s1 + $0x88c] ss:$16 sps:$4 sm:$0xff]   ;;  %v7692_v32 = vld [vmem:[%s11106_s1 + $0x880] ss:$16 sps:$4 sm:$0xff]  }
  0xd7   :  { %4985 = vmatpush1.bf16.msra.mxu0 %v7600_v33  ;;  %5518 = vmatpush1.bf16.msra.mxu1 %v7603_v34  ;;  %v7695_v33 = vld [vmem:[%s11106_s1 + $0x888] ss:$16 sps:$4 sm:$0xff]   ;;  %v7700_v34 = vld [vmem:[%s11106_s1 + $0x8a4] ss:$16 sps:$4 sm:$0xff]  }
  0xd8   :  { %4986 = vmatprep.subr.bf16.mxu0 %v7608_v35  ;;  %5519 = vmatprep.subr.bf16.mxu1 %v7611_v36  ;;  %v7703_v35 = vld [vmem:[%s11106_s1 + $0x8ac] ss:$16 sps:$4 sm:$0xff]   ;;  %v7698_v36 = vld [vmem:[%s11106_s1 + $0x8a0] ss:$16 sps:$4 sm:$0xff]  }
  0xdb   :  { %4987 = vmatpush1.bf16.msra.mxu0 %v7606_v37  ;;  %5520 = vmatpush1.bf16.msra.mxu1 %v7609_v38  ;;  %v7701_v37 = vld [vmem:[%s11106_s1 + $0x8a8] ss:$16 sps:$4 sm:$0xff]   ;;  %v7706_v38 = vld [vmem:[%s11106_s1 + $0x8c4] ss:$16 sps:$4 sm:$0xff]  }
  0xdc   :  { %4988 = vmatprep.subr.bf16.mxu0 %v7614_v39  ;;  %5521 = vmatprep.subr.bf16.mxu1 %v7617_v40  ;;  %v7709_v39 = vld [vmem:[%s11106_s1 + $0x8cc] ss:$16 sps:$4 sm:$0xff]   ;;  %v7704_v40 = vld [vmem:[%s11106_s1 + $0x8c0] ss:$16 sps:$4 sm:$0xff]  }
  0xdf   :  { %4989 = vmatpush1.bf16.msra.mxu0 %v7612_v41  ;;  %5522 = vmatpush1.bf16.msra.mxu1 %v7615_v42  ;;  %v7707_v41 = vld [vmem:[%s11106_s1 + $0x8c8] ss:$16 sps:$4 sm:$0xff]   ;;  %v7712_v42 = vld [vmem:[%s11106_s1 + $0x8e4] ss:$16 sps:$4 sm:$0xff]  }
  0xe0   :  { %4990 = vmatprep.subr.bf16.mxu0 %v7620_v43  ;;  %5523 = vmatprep.subr.bf16.mxu1 %v7623_v44  ;;  %v7715_v43 = vld [vmem:[%s11106_s1 + $0x8ec] ss:$16 sps:$4 sm:$0xff]   ;;  %v7710_v44 = vld [vmem:[%s11106_s1 + $0x8e0] ss:$16 sps:$4 sm:$0xff]  }
  0xe3   :  { %4991 = vmatpush1.bf16.msra.mxu0 %v7618_v45  ;;  %5524 = vmatpush1.bf16.msra.mxu1 %v7621_v46  ;;  %v7713_v45 = vld [vmem:[%s11106_s1 + $0x8e8] ss:$16 sps:$4 sm:$0xff]   ;;  %v7718_v46 = vld [vmem:[%s11106_s1 + $0x904] ss:$16 sps:$4 sm:$0xff]  }
  0xe4   :  { %4992 = vmatprep.subr.bf16.mxu0 %v7626_v47  ;;  %5525 = vmatprep.subr.bf16.mxu1 %v7629_v48  ;;  %v7721_v47 = vld [vmem:[%s11106_s1 + $0x90c] ss:$16 sps:$4 sm:$0xff]   ;;  %v7716_v48 = vld [vmem:[%s11106_s1 + $0x900] ss:$16 sps:$4 sm:$0xff]  }
  0xe7   :  { %4993 = vmatpush1.bf16.msra.mxu0 %v7624_v49  ;;  %5526 = vmatpush1.bf16.msra.mxu1 %v7627_v50  ;;  %v7719_v49 = vld [vmem:[%s11106_s1 + $0x908] ss:$16 sps:$4 sm:$0xff]   ;;  %v7724_v50 = vld [vmem:[%s11106_s1 + $0x924] ss:$16 sps:$4 sm:$0xff]  }
  0xe8   :  { %4994 = vmatprep.subr.bf16.mxu0 %v7632_v51  ;;  %5527 = vmatprep.subr.bf16.mxu1 %v7635_v52  ;;  %v7727_v51 = vld [vmem:[%s11106_s1 + $0x92c] ss:$16 sps:$4 sm:$0xff]   ;;  %v7722_v52 = vld [vmem:[%s11106_s1 + $0x920] ss:$16 sps:$4 sm:$0xff]  }
  0xeb   :  { %4995 = vmatpush1.bf16.msra.mxu0 %v7630_v53  ;;  %5528 = vmatpush1.bf16.msra.mxu1 %v7633_v54  ;;  %v7725_v53 = vld [vmem:[%s11106_s1 + $0x928] ss:$16 sps:$4 sm:$0xff]   ;;  %v7730_v54 = vld [vmem:[%s11106_s1 + $0x944] ss:$16 sps:$4 sm:$0xff]  }
  0xec   :  { %4996 = vmatprep.subr.bf16.mxu0 %v7638_v55  ;;  %5529 = vmatprep.subr.bf16.mxu1 %v7641_v56  ;;  %v7733_v55 = vld [vmem:[%s11106_s1 + $0x94c] ss:$16 sps:$4 sm:$0xff]   ;;  %v7728_v56 = vld [vmem:[%s11106_s1 + $0x940] ss:$16 sps:$4 sm:$0xff]  }
  0xef   :  { %4997 = vmatpush1.bf16.msra.mxu0 %v7636_v57  ;;  %5530 = vmatpush1.bf16.msra.mxu1 %v7639_v58  ;;  %v7731_v57 = vld [vmem:[%s11106_s1 + $0x948] ss:$16 sps:$4 sm:$0xff]   ;;  %v7736_v58 = vld [vmem:[%s11106_s1 + $0x964] ss:$16 sps:$4 sm:$0xff]  }
  0xf0   :  { %4998 = vmatprep.subr.bf16.mxu0 %v7644_v59  ;;  %5531 = vmatprep.subr.bf16.mxu1 %v7647_v60  ;;  %v7739_v59 = vld [vmem:[%s11106_s1 + $0x96c] ss:$16 sps:$4 sm:$0xff]   ;;  %v7734_v60 = vld [vmem:[%s11106_s1 + $0x960] ss:$16 sps:$4 sm:$0xff]  }
  0xf3   :  { %4999 = vmatpush1.bf16.msra.mxu0 %v7642_v61  ;;  %5532 = vmatpush1.bf16.msra.mxu1 %v7645_v62  ;;  %v7737_v61 = vld [vmem:[%s11106_s1 + $0x968] ss:$16 sps:$4 sm:$0xff]   ;;  %v7742_v62 = vld [vmem:[%s11106_s1 + $0x984] ss:$16 sps:$4 sm:$0xff]  }
  0xf4   :  { %5000 = vmatprep.subr.bf16.mxu0 %v7650_v63  ;;  %5533 = vmatprep.subr.bf16.mxu1 %v7653_v0  ;;  %v7745_v63 = vld [vmem:[%s11106_s1 + $0x98c] ss:$16 sps:$4 sm:$0xff]   ;;  %v7740_v0 = vld [vmem:[%s11106_s1 + $0x980] ss:$16 sps:$4 sm:$0xff]  }
  0xf7   :  { %5001 = vmatpush1.bf16.msra.mxu0 %v7648_v1  ;;  %5534 = vmatpush1.bf16.msra.mxu1 %v7651_v2  ;;  %v7743_v1 = vld [vmem:[%s11106_s1 + $0x988] ss:$16 sps:$4 sm:$0xff]   ;;  %v7748_v2 = vld [vmem:[%s11106_s1 + $0x9a4] ss:$16 sps:$4 sm:$0xff]  }
  0xf8   :  { %5002 = vmatprep.subr.bf16.mxu0 %v7656_v3  ;;  %5535 = vmatprep.subr.bf16.mxu1 %v7659_v4  ;;  %v7751_v3 = vld [vmem:[%s11106_s1 + $0x9ac] ss:$16 sps:$4 sm:$0xff]   ;;  %v7746_v4 = vld [vmem:[%s11106_s1 + $0x9a0] ss:$16 sps:$4 sm:$0xff]  }
  0xfb   :  { %5003 = vmatpush1.bf16.msra.mxu0 %v7654_v5  ;;  %5536 = vmatpush1.bf16.msra.mxu1 %v7657_v6  ;;  %v7749_v5 = vld [vmem:[%s11106_s1 + $0x9a8] ss:$16 sps:$4 sm:$0xff]   ;;  %v7754_v6 = vld [vmem:[%s11106_s1 + $0x9c4] ss:$16 sps:$4 sm:$0xff]  }
  0xfc   :  { %5004 = vmatprep.subr.bf16.mxu0 %v7662_v7  ;;  %5537 = vmatprep.subr.bf16.mxu1 %v7665_v8  ;;  %v7757_v7 = vld [vmem:[%s11106_s1 + $0x9cc] ss:$16 sps:$4 sm:$0xff]   ;;  %v7752_v8 = vld [vmem:[%s11106_s1 + $0x9c0] ss:$16 sps:$4 sm:$0xff]  }
  0xff   :  { %5005 = vmatpush1.bf16.msra.mxu0 %v7660_v9  ;;  %5538 = vmatpush1.bf16.msra.mxu1 %v7663_v10  ;;  %v7755_v9 = vld [vmem:[%s11106_s1 + $0x9c8] ss:$16 sps:$4 sm:$0xff]   ;;  %v7760_v10 = vld [vmem:[%s11106_s1 + $0x9e4] ss:$16 sps:$4 sm:$0xff]  }
 0x100   :  { %5015 = vmatprep.subr.bf16.mxu0 %v7670_v12  ;;  %5548 = vmatprep.subr.bf16.mxu1 %v7673_v13  ;;  %v7763_v12 = vld [vmem:[%s11106_s1 + $0x9ec] ss:$16 sps:$4 sm:$0xff]   ;;  %v7758_v13 = vld [vmem:[%s11106_s1 + $0x9e0] ss:$16 sps:$4 sm:$0xff]  }
 0x102   :  { %5007 = vmatmul.mubr.bf16.vlgmr.msra.gmra.mrb[0].mxu0 %v6293_v11  ;;  %5540 = vmatmul.mubr.bf16.vlgmr.msra.gmra.mrb[0].mxu1 %v6293_v11  ;;  %v7768_v11 = vld [vmem:[%s11106_s1 + $0xa04] ss:$16 sps:$4 sm:$0xff]  }
 0x103   :  { %5016 = vmatpush1.bf16.msra.mxu0 %v7668_v15  ;;  %5549 = vmatpush1.bf16.msra.mxu1 %v7671_v17  ;;  %v7761_v15 = vld [vmem:[%s11106_s1 + $0x9e8] ss:$16 sps:$4 sm:$0xff]   ;;  %v7771_v17 = vld [vmem:[%s11106_s1 + $0xa0c] ss:$16 sps:$4 sm:$0xff]  }
 0x104   :  { %5017 = vmatprep.subr.bf16.mxu0 %v7676_v18  ;;  %5550 = vmatprep.subr.bf16.mxu1 %v7679_v14  ;;  %v9550_v18 = vld [vmem:[%s11107_s0 + $0x28] sm:$0xff]  ;;  %v6295_v14 = vcombine.low %v9354_v16, %v9354_v16 }
 0x105   :  { %5047 = vmatprep.mubr.bf16.mxu0 %v6296_v19  ;;  %5580 = vmatprep.mubr.bf16.mxu1 %v6296_v19  ;;  %v7766_v19 = vld [vmem:[%s11106_s1 + $0xa00] ss:$16 sps:$4 sm:$0xff]   ;;  %v7777_v16 = vld [vmem:[%s11106_s1 + $0xa2c] ss:$16 sps:$4 sm:$0xff]  }
 0x107   :  { %5018 = vmatpush1.bf16.msra.mxu0 %v7674_v20  ;;  %5551 = vmatpush1.bf16.msra.mxu1 %v7677_v21  ;;  %v7769_v20 = vld [vmem:[%s11106_s1 + $0xa08] ss:$16 sps:$4 sm:$0xff]   ;;  %v7774_v21 = vld [vmem:[%s11106_s1 + $0xa24] ss:$16 sps:$4 sm:$0xff]  }
 0x108   :  { %5019 = vmatprep.subr.bf16.mxu0 %v7682_v22  ;;  %5552 = vmatprep.subr.bf16.mxu1 %v7685_v23  ;;  %v6298_v22 = vcombine.high %v9550_v18, %v9550_v18  ;;  %v7772_v23 = vld [vmem:[%s11106_s1 + $0xa20] ss:$16 sps:$4 sm:$0xff]  }
 0x10b   :  { %5020 = vmatpush1.bf16.msra.mxu0 %v7680_v24  ;;  %5553 = vmatpush1.bf16.msra.mxu1 %v7683_v25  ;;  %v7775_v24 = vld [vmem:[%s11106_s1 + $0xa28] ss:$16 sps:$4 sm:$0xff]   ;;  %v7780_v25 = vld [vmem:[%s11106_s1 + $0xa44] ss:$16 sps:$4 sm:$0xff]  }
 0x10c   :  { %5021 = vmatprep.subr.bf16.mxu0 %v7688_v26  ;;  %5554 = vmatprep.subr.bf16.mxu1 %v7691_v27  ;;  %v7783_v26 = vld [vmem:[%s11106_s1 + $0xa4c] ss:$16 sps:$4 sm:$0xff]   ;;  %v7778_v27 = vld [vmem:[%s11106_s1 + $0xa40] ss:$16 sps:$4 sm:$0xff]  }
 0x10f   :  { %5022 = vmatpush1.bf16.msra.mxu0 %v7686_v28  ;;  %5555 = vmatpush1.bf16.msra.mxu1 %v7689_v29  ;;  %v7781_v28 = vld [vmem:[%s11106_s1 + $0xa48] ss:$16 sps:$4 sm:$0xff]   ;;  %v7786_v29 = vld [vmem:[%s11106_s1 + $0xa64] ss:$16 sps:$4 sm:$0xff]  }
 0x110   :  { %5023 = vmatprep.subr.bf16.mxu0 %v7694_v30  ;;  %5556 = vmatprep.subr.bf16.mxu1 %v7697_v31  ;;  %v7789_v30 = vld [vmem:[%s11106_s1 + $0xa6c] ss:$16 sps:$4 sm:$0xff]   ;;  %v7784_v31 = vld [vmem:[%s11106_s1 + $0xa60] ss:$16 sps:$4 sm:$0xff]  }
 0x113   :  { %5024 = vmatpush1.bf16.msra.mxu0 %v7692_v32  ;;  %5557 = vmatpush1.bf16.msra.mxu1 %v7695_v33  ;;  %v7787_v32 = vld [vmem:[%s11106_s1 + $0xa68] ss:$16 sps:$4 sm:$0xff]   ;;  %v7792_v33 = vld [vmem:[%s11106_s1 + $0xa84] ss:$16 sps:$4 sm:$0xff]  }
 0x114   :  { %5025 = vmatprep.subr.bf16.mxu0 %v7700_v34  ;;  %5558 = vmatprep.subr.bf16.mxu1 %v7703_v35  ;;  %v7795_v34 = vld [vmem:[%s11106_s1 + $0xa8c] ss:$16 sps:$4 sm:$0xff]   ;;  %v7790_v35 = vld [vmem:[%s11106_s1 + $0xa80] ss:$16 sps:$4 sm:$0xff]  }
 0x117   :  { %5026 = vmatpush1.bf16.msra.mxu0 %v7698_v36  ;;  %5559 = vmatpush1.bf16.msra.mxu1 %v7701_v37  ;;  %v7793_v36 = vld [vmem:[%s11106_s1 + $0xa88] ss:$16 sps:$4 sm:$0xff]   ;;  %v7798_v37 = vld [vmem:[%s11106_s1 + $0xaa4] ss:$16 sps:$4 sm:$0xff]  }
 0x118   :  { %5027 = vmatprep.subr.bf16.mxu0 %v7706_v38  ;;  %5560 = vmatprep.subr.bf16.mxu1 %v7709_v39  ;;  %v7801_v38 = vld [vmem:[%s11106_s1 + $0xaac] ss:$16 sps:$4 sm:$0xff]   ;;  %v7796_v39 = vld [vmem:[%s11106_s1 + $0xaa0] ss:$16 sps:$4 sm:$0xff]  }
 0x11b   :  { %5028 = vmatpush1.bf16.msra.mxu0 %v7704_v40  ;;  %5561 = vmatpush1.bf16.msra.mxu1 %v7707_v41  ;;  %v7799_v40 = vld [vmem:[%s11106_s1 + $0xaa8] ss:$16 sps:$4 sm:$0xff]   ;;  %v7804_v41 = vld [vmem:[%s11106_s1 + $0xac4] ss:$16 sps:$4 sm:$0xff]  }
 0x11c   :  { %5029 = vmatprep.subr.bf16.mxu0 %v7712_v42  ;;  %5562 = vmatprep.subr.bf16.mxu1 %v7715_v43  ;;  %v7807_v42 = vld [vmem:[%s11106_s1 + $0xacc] ss:$16 sps:$4 sm:$0xff]   ;;  %v7802_v43 = vld [vmem:[%s11106_s1 + $0xac0] ss:$16 sps:$4 sm:$0xff]  }
 0x11f   :  { %5030 = vmatpush1.bf16.msra.mxu0 %v7710_v44  ;;  %5563 = vmatpush1.bf16.msra.mxu1 %v7713_v45  ;;  %v7805_v44 = vld [vmem:[%s11106_s1 + $0xac8] ss:$16 sps:$4 sm:$0xff]   ;;  %v7810_v45 = vld [vmem:[%s11106_s1 + $0xae4] ss:$16 sps:$4 sm:$0xff]  }
 0x120   :  { %5031 = vmatprep.subr.bf16.mxu0 %v7718_v46  ;;  %5564 = vmatprep.subr.bf16.mxu1 %v7721_v47  ;;  %v7813_v46 = vld [vmem:[%s11106_s1 + $0xaec] ss:$16 sps:$4 sm:$0xff]   ;;  %v7808_v47 = vld [vmem:[%s11106_s1 + $0xae0] ss:$16 sps:$4 sm:$0xff]  }
 0x123   :  { %5032 = vmatpush1.bf16.msra.mxu0 %v7716_v48  ;;  %5565 = vmatpush1.bf16.msra.mxu1 %v7719_v49  ;;  %v7811_v48 = vld [vmem:[%s11106_s1 + $0xae8] ss:$16 sps:$4 sm:$0xff]   ;;  %v7816_v49 = vld [vmem:[%s11106_s1 + $0xb04] ss:$16 sps:$4 sm:$0xff]  }
 0x124   :  { %5033 = vmatprep.subr.bf16.mxu0 %v7724_v50  ;;  %5566 = vmatprep.subr.bf16.mxu1 %v7727_v51  ;;  %v7819_v50 = vld [vmem:[%s11106_s1 + $0xb0c] ss:$16 sps:$4 sm:$0xff]   ;;  %v7814_v51 = vld [vmem:[%s11106_s1 + $0xb00] ss:$16 sps:$4 sm:$0xff]  }
 0x127   :  { %5034 = vmatpush1.bf16.msra.mxu0 %v7722_v52  ;;  %5567 = vmatpush1.bf16.msra.mxu1 %v7725_v53  ;;  %v7817_v52 = vld [vmem:[%s11106_s1 + $0xb08] ss:$16 sps:$4 sm:$0xff]   ;;  %v7822_v53 = vld [vmem:[%s11106_s1 + $0xb24] ss:$16 sps:$4 sm:$0xff]  }
 0x128   :  { %5035 = vmatprep.subr.bf16.mxu0 %v7730_v54  ;;  %5568 = vmatprep.subr.bf16.mxu1 %v7733_v55  ;;  %v7825_v54 = vld [vmem:[%s11106_s1 + $0xb2c] ss:$16 sps:$4 sm:$0xff]   ;;  %v7820_v55 = vld [vmem:[%s11106_s1 + $0xb20] ss:$16 sps:$4 sm:$0xff]  }
 0x12b   :  { %5036 = vmatpush1.bf16.msra.mxu0 %v7728_v56  ;;  %5569 = vmatpush1.bf16.msra.mxu1 %v7731_v57  ;;  %v7823_v56 = vld [vmem:[%s11106_s1 + $0xb28] ss:$16 sps:$4 sm:$0xff]   ;;  %v7828_v57 = vld [vmem:[%s11106_s1 + $0xb44] ss:$16 sps:$4 sm:$0xff]  }
 0x12c   :  { %5037 = vmatprep.subr.bf16.mxu0 %v7736_v58  ;;  %5570 = vmatprep.subr.bf16.mxu1 %v7739_v59  ;;  %v7831_v58 = vld [vmem:[%s11106_s1 + $0xb4c] ss:$16 sps:$4 sm:$0xff]   ;;  %v7826_v59 = vld [vmem:[%s11106_s1 + $0xb40] ss:$16 sps:$4 sm:$0xff]  }
 0x12f   :  { %5038 = vmatpush1.bf16.msra.mxu0 %v7734_v60  ;;  %5571 = vmatpush1.bf16.msra.mxu1 %v7737_v61  ;;  %v7829_v60 = vld [vmem:[%s11106_s1 + $0xb48] ss:$16 sps:$4 sm:$0xff]   ;;  %v7834_v61 = vld [vmem:[%s11106_s1 + $0xb64] ss:$16 sps:$4 sm:$0xff]  }
 0x130   :  { %5039 = vmatprep.subr.bf16.mxu0 %v7742_v62  ;;  %5572 = vmatprep.subr.bf16.mxu1 %v7745_v63  ;;  %v7837_v62 = vld [vmem:[%s11106_s1 + $0xb6c] ss:$16 sps:$4 sm:$0xff]   ;;  %v7832_v63 = vld [vmem:[%s11106_s1 + $0xb60] ss:$16 sps:$4 sm:$0xff]  }
 0x133   :  { %5040 = vmatpush1.bf16.msra.mxu0 %v7740_v0  ;;  %5573 = vmatpush1.bf16.msra.mxu1 %v7743_v1  ;;  %v7835_v0 = vld [vmem:[%s11106_s1 + $0xb68] ss:$16 sps:$4 sm:$0xff]   ;;  %v7840_v1 = vld [vmem:[%s11106_s1 + $0xb84] ss:$16 sps:$4 sm:$0xff]  }
 0x134   :  { %5041 = vmatprep.subr.bf16.mxu0 %v7748_v2  ;;  %5574 = vmatprep.subr.bf16.mxu1 %v7751_v3  ;;  %v7843_v2 = vld [vmem:[%s11106_s1 + $0xb8c] ss:$16 sps:$4 sm:$0xff]   ;;  %v7838_v3 = vld [vmem:[%s11106_s1 + $0xb80] ss:$16 sps:$4 sm:$0xff]  }
 0x137   :  { %5042 = vmatpush1.bf16.msra.mxu0 %v7746_v4  ;;  %5575 = vmatpush1.bf16.msra.mxu1 %v7749_v5  ;;  %v7841_v4 = vld [vmem:[%s11106_s1 + $0xb88] ss:$16 sps:$4 sm:$0xff]   ;;  %v7846_v5 = vld [vmem:[%s11106_s1 + $0xba4] ss:$16 sps:$4 sm:$0xff]  }
 0x138   :  { %5043 = vmatprep.subr.bf16.mxu0 %v7754_v6  ;;  %5576 = vmatprep.subr.bf16.mxu1 %v7757_v7  ;;  %v7849_v6 = vld [vmem:[%s11106_s1 + $0xbac] ss:$16 sps:$4 sm:$0xff]   ;;  %v7844_v7 = vld [vmem:[%s11106_s1 + $0xba0] ss:$16 sps:$4 sm:$0xff]  }
 0x13b   :  { %5044 = vmatpush1.bf16.msra.mxu0 %v7752_v8  ;;  %5577 = vmatpush1.bf16.msra.mxu1 %v7755_v9  ;;  %v7847_v8 = vld [vmem:[%s11106_s1 + $0xba8] ss:$16 sps:$4 sm:$0xff]   ;;  %v7852_v9 = vld [vmem:[%s11106_s1 + $0xbc4] ss:$16 sps:$4 sm:$0xff]  }
 0x13c   :  { %5045 = vmatprep.subr.bf16.mxu0 %v7760_v10  ;;  %5578 = vmatprep.subr.bf16.mxu1 %v7763_v12  ;;  %v7855_v10 = vld [vmem:[%s11106_s1 + $0xbcc] ss:$16 sps:$4 sm:$0xff]   ;;  %v7850_v12 = vld [vmem:[%s11106_s1 + $0xbc0] ss:$16 sps:$4 sm:$0xff]  }
 0x13f   :  { %5046 = vmatpush1.bf16.msra.mxu0 %v7758_v13  ;;  %5579 = vmatpush1.bf16.msra.mxu1 %v7761_v15  ;;  %v7853_v13 = vld [vmem:[%s11106_s1 + $0xbc8] ss:$16 sps:$4 sm:$0xff]   ;;  %v7858_v15 = vld [vmem:[%s11106_s1 + $0xbe4] ss:$16 sps:$4 sm:$0xff]  }
 0x140   :  { %5056 = vmatprep.subr.bf16.mxu0 %v7768_v11  ;;  %5589 = vmatprep.subr.bf16.mxu1 %v7771_v17  ;;  %v7861_v11 = vld [vmem:[%s11106_s1 + $0xbec] ss:$16 sps:$4 sm:$0xff]   ;;  %v7856_v17 = vld [vmem:[%s11106_s1 + $0xbe0] ss:$16 sps:$4 sm:$0xff]  }
 0x142   :  { %5048 = vmatmul.mubr.bf16.vlgmr.msra.gmra.mrb[0].mxu0 %v6295_v14  ;;  %5581 = vmatmul.mubr.bf16.vlgmr.msra.gmra.mrb[0].mxu1 %v6295_v14  ;;  %v7859_v14 = vld [vmem:[%s11106_s1 + $0xbe8] ss:$16 sps:$4 sm:$0xff]  }
 0x143   :  { %5057 = vmatpush1.bf16.msra.mxu0 %v7766_v19  ;;  %5590 = vmatpush1.bf16.msra.mxu1 %v7769_v20  ;;  %v7866_v19 = vld [vmem:[%s11106_s1 + $0xc04] ss:$16 sps:$4 sm:$0xff]   ;;  %v7869_v20 = vld [vmem:[%s11106_s1 + $0xc0c] ss:$16 sps:$4 sm:$0xff]  }
 0x144   :  { %5058 = vmatprep.subr.bf16.mxu0 %v7774_v21  ;;  %5591 = vmatprep.subr.bf16.mxu1 %v7777_v16  ;;  %v9751_v21 = vld [vmem:[%s11107_s0 + $0x30] sm:$0xff]  ;;  %v6297_v16 = vcombine.low %v9550_v18, %v9550_v18  ;;  %v7875_v18 = vld [vmem:[%s11106_s1 + $0xc2c] ss:$16 sps:$4 sm:$0xff]  }
 0x145   :  { %5088 = vmatprep.mubr.bf16.mxu0 %v6298_v22  ;;  %5621 = vmatprep.mubr.bf16.mxu1 %v6298_v22  ;;  %v7864_v22 = vld [vmem:[%s11106_s1 + $0xc00] ss:$16 sps:$4 sm:$0xff]  }
 0x147   :  { %5059 = vmatpush1.bf16.msra.mxu0 %v7772_v23  ;;  %5592 = vmatpush1.bf16.msra.mxu1 %v7775_v24  ;;  %v7867_v23 = vld [vmem:[%s11106_s1 + $0xc08] ss:$16 sps:$4 sm:$0xff]   ;;  %v7872_v24 = vld [vmem:[%s11106_s1 + $0xc24] ss:$16 sps:$4 sm:$0xff]  }
 0x148   :  { %5060 = vmatprep.subr.bf16.mxu0 %v7780_v25  ;;  %5593 = vmatprep.subr.bf16.mxu1 %v7783_v26  ;;  %v6300_v25 = vcombine.high %v9751_v21, %v9751_v21  ;;  %v7870_v26 = vld [vmem:[%s11106_s1 + $0xc20] ss:$16 sps:$4 sm:$0xff]  }
 0x14b   :  { %5061 = vmatpush1.bf16.msra.mxu0 %v7778_v27  ;;  %5594 = vmatpush1.bf16.msra.mxu1 %v7781_v28  ;;  %v7873_v27 = vld [vmem:[%s11106_s1 + $0xc28] ss:$16 sps:$4 sm:$0xff]   ;;  %v7878_v28 = vld [vmem:[%s11106_s1 + $0xc44] ss:$16 sps:$4 sm:$0xff]  }
 0x14c   :  { %5062 = vmatprep.subr.bf16.mxu0 %v7786_v29  ;;  %5595 = vmatprep.subr.bf16.mxu1 %v7789_v30  ;;  %v7881_v29 = vld [vmem:[%s11106_s1 + $0xc4c] ss:$16 sps:$4 sm:$0xff]   ;;  %v7876_v30 = vld [vmem:[%s11106_s1 + $0xc40] ss:$16 sps:$4 sm:$0xff]  }
 0x14f   :  { %5063 = vmatpush1.bf16.msra.mxu0 %v7784_v31  ;;  %5596 = vmatpush1.bf16.msra.mxu1 %v7787_v32  ;;  %v7879_v31 = vld [vmem:[%s11106_s1 + $0xc48] ss:$16 sps:$4 sm:$0xff]   ;;  %v7884_v32 = vld [vmem:[%s11106_s1 + $0xc64] ss:$16 sps:$4 sm:$0xff]  }
 0x150   :  { %5064 = vmatprep.subr.bf16.mxu0 %v7792_v33  ;;  %5597 = vmatprep.subr.bf16.mxu1 %v7795_v34  ;;  %v7887_v33 = vld [vmem:[%s11106_s1 + $0xc6c] ss:$16 sps:$4 sm:$0xff]   ;;  %v7882_v34 = vld [vmem:[%s11106_s1 + $0xc60] ss:$16 sps:$4 sm:$0xff]  }
 0x153   :  { %5065 = vmatpush1.bf16.msra.mxu0 %v7790_v35  ;;  %5598 = vmatpush1.bf16.msra.mxu1 %v7793_v36  ;;  %v7885_v35 = vld [vmem:[%s11106_s1 + $0xc68] ss:$16 sps:$4 sm:$0xff]   ;;  %v7890_v36 = vld [vmem:[%s11106_s1 + $0xc84] ss:$16 sps:$4 sm:$0xff]  }
 0x154   :  { %5066 = vmatprep.subr.bf16.mxu0 %v7798_v37  ;;  %5599 = vmatprep.subr.bf16.mxu1 %v7801_v38  ;;  %v7893_v37 = vld [vmem:[%s11106_s1 + $0xc8c] ss:$16 sps:$4 sm:$0xff]   ;;  %v7888_v38 = vld [vmem:[%s11106_s1 + $0xc80] ss:$16 sps:$4 sm:$0xff]  }
 0x157   :  { %5067 = vmatpush1.bf16.msra.mxu0 %v7796_v39  ;;  %5600 = vmatpush1.bf16.msra.mxu1 %v7799_v40  ;;  %v7891_v39 = vld [vmem:[%s11106_s1 + $0xc88] ss:$16 sps:$4 sm:$0xff]   ;;  %v7896_v40 = vld [vmem:[%s11106_s1 + $0xca4] ss:$16 sps:$4 sm:$0xff]  }
 0x158   :  { %5068 = vmatprep.subr.bf16.mxu0 %v7804_v41  ;;  %5601 = vmatprep.subr.bf16.mxu1 %v7807_v42  ;;  %v7899_v41 = vld [vmem:[%s11106_s1 + $0xcac] ss:$16 sps:$4 sm:$0xff]   ;;  %v7894_v42 = vld [vmem:[%s11106_s1 + $0xca0] ss:$16 sps:$4 sm:$0xff]  }
 0x15b   :  { %5069 = vmatpush1.bf16.msra.mxu0 %v7802_v43  ;;  %5602 = vmatpush1.bf16.msra.mxu1 %v7805_v44  ;;  %v7897_v43 = vld [vmem:[%s11106_s1 + $0xca8] ss:$16 sps:$4 sm:$0xff]   ;;  %v7902_v44 = vld [vmem:[%s11106_s1 + $0xcc4] ss:$16 sps:$4 sm:$0xff]  }
 0x15c   :  { %5070 = vmatprep.subr.bf16.mxu0 %v7810_v45  ;;  %5603 = vmatprep.subr.bf16.mxu1 %v7813_v46  ;;  %v7905_v45 = vld [vmem:[%s11106_s1 + $0xccc] ss:$16 sps:$4 sm:$0xff]   ;;  %v7900_v46 = vld [vmem:[%s11106_s1 + $0xcc0] ss:$16 sps:$4 sm:$0xff]  }
 0x15f   :  { %5071 = vmatpush1.bf16.msra.mxu0 %v7808_v47  ;;  %5604 = vmatpush1.bf16.msra.mxu1 %v7811_v48  ;;  %v7903_v47 = vld [vmem:[%s11106_s1 + $0xcc8] ss:$16 sps:$4 sm:$0xff]   ;;  %v7908_v48 = vld [vmem:[%s11106_s1 + $0xce4] ss:$16 sps:$4 sm:$0xff]  }
 0x160   :  { %5072 = vmatprep.subr.bf16.mxu0 %v7816_v49  ;;  %5605 = vmatprep.subr.bf16.mxu1 %v7819_v50  ;;  %v7911_v49 = vld [vmem:[%s11106_s1 + $0xcec] ss:$16 sps:$4 sm:$0xff]   ;;  %v7906_v50 = vld [vmem:[%s11106_s1 + $0xce0] ss:$16 sps:$4 sm:$0xff]  }
 0x163   :  { %5073 = vmatpush1.bf16.msra.mxu0 %v7814_v51  ;;  %5606 = vmatpush1.bf16.msra.mxu1 %v7817_v52  ;;  %v7909_v51 = vld [vmem:[%s11106_s1 + $0xce8] ss:$16 sps:$4 sm:$0xff]   ;;  %v7914_v52 = vld [vmem:[%s11106_s1 + $0xd04] ss:$16 sps:$4 sm:$0xff]  }
 0x164   :  { %5074 = vmatprep.subr.bf16.mxu0 %v7822_v53  ;;  %5607 = vmatprep.subr.bf16.mxu1 %v7825_v54  ;;  %v7917_v53 = vld [vmem:[%s11106_s1 + $0xd0c] ss:$16 sps:$4 sm:$0xff]   ;;  %v7912_v54 = vld [vmem:[%s11106_s1 + $0xd00] ss:$16 sps:$4 sm:$0xff]  }
 0x167   :  { %5075 = vmatpush1.bf16.msra.mxu0 %v7820_v55  ;;  %5608 = vmatpush1.bf16.msra.mxu1 %v7823_v56  ;;  %v7915_v55 = vld [vmem:[%s11106_s1 + $0xd08] ss:$16 sps:$4 sm:$0xff]   ;;  %v7920_v56 = vld [vmem:[%s11106_s1 + $0xd24] ss:$16 sps:$4 sm:$0xff]  }
 0x168   :  { %5076 = vmatprep.subr.bf16.mxu0 %v7828_v57  ;;  %5609 = vmatprep.subr.bf16.mxu1 %v7831_v58  ;;  %v7923_v57 = vld [vmem:[%s11106_s1 + $0xd2c] ss:$16 sps:$4 sm:$0xff]   ;;  %v7918_v58 = vld [vmem:[%s11106_s1 + $0xd20] ss:$16 sps:$4 sm:$0xff]  }
 0x16b   :  { %5077 = vmatpush1.bf16.msra.mxu0 %v7826_v59  ;;  %5610 = vmatpush1.bf16.msra.mxu1 %v7829_v60  ;;  %v7921_v59 = vld [vmem:[%s11106_s1 + $0xd28] ss:$16 sps:$4 sm:$0xff]   ;;  %v7926_v60 = vld [vmem:[%s11106_s1 + $0xd44] ss:$16 sps:$4 sm:$0xff]  }
 0x16c   :  { %5078 = vmatprep.subr.bf16.mxu0 %v7834_v61  ;;  %5611 = vmatprep.subr.bf16.mxu1 %v7837_v62  ;;  %v7929_v61 = vld [vmem:[%s11106_s1 + $0xd4c] ss:$16 sps:$4 sm:$0xff]   ;;  %v7924_v62 = vld [vmem:[%s11106_s1 + $0xd40] ss:$16 sps:$4 sm:$0xff]  }
 0x16f   :  { %5079 = vmatpush1.bf16.msra.mxu0 %v7832_v63  ;;  %5612 = vmatpush1.bf16.msra.mxu1 %v7835_v0  ;;  %v7927_v63 = vld [vmem:[%s11106_s1 + $0xd48] ss:$16 sps:$4 sm:$0xff]   ;;  %v7932_v0 = vld [vmem:[%s11106_s1 + $0xd64] ss:$16 sps:$4 sm:$0xff]  }
 0x170   :  { %5080 = vmatprep.subr.bf16.mxu0 %v7840_v1  ;;  %5613 = vmatprep.subr.bf16.mxu1 %v7843_v2  ;;  %v7935_v1 = vld [vmem:[%s11106_s1 + $0xd6c] ss:$16 sps:$4 sm:$0xff]   ;;  %v7930_v2 = vld [vmem:[%s11106_s1 + $0xd60] ss:$16 sps:$4 sm:$0xff]  }
 0x173   :  { %5081 = vmatpush1.bf16.msra.mxu0 %v7838_v3  ;;  %5614 = vmatpush1.bf16.msra.mxu1 %v7841_v4  ;;  %v7933_v3 = vld [vmem:[%s11106_s1 + $0xd68] ss:$16 sps:$4 sm:$0xff]   ;;  %v7938_v4 = vld [vmem:[%s11106_s1 + $0xd84] ss:$16 sps:$4 sm:$0xff]  }
 0x174   :  { %5082 = vmatprep.subr.bf16.mxu0 %v7846_v5  ;;  %5615 = vmatprep.subr.bf16.mxu1 %v7849_v6  ;;  %v7941_v5 = vld [vmem:[%s11106_s1 + $0xd8c] ss:$16 sps:$4 sm:$0xff]   ;;  %v7936_v6 = vld [vmem:[%s11106_s1 + $0xd80] ss:$16 sps:$4 sm:$0xff]  }
 0x177   :  { %5083 = vmatpush1.bf16.msra.mxu0 %v7844_v7  ;;  %5616 = vmatpush1.bf16.msra.mxu1 %v7847_v8  ;;  %v7939_v7 = vld [vmem:[%s11106_s1 + $0xd88] ss:$16 sps:$4 sm:$0xff]   ;;  %v7944_v8 = vld [vmem:[%s11106_s1 + $0xda4] ss:$16 sps:$4 sm:$0xff]  }
 0x178   :  { %5084 = vmatprep.subr.bf16.mxu0 %v7852_v9  ;;  %5617 = vmatprep.subr.bf16.mxu1 %v7855_v10  ;;  %v7947_v9 = vld [vmem:[%s11106_s1 + $0xdac] ss:$16 sps:$4 sm:$0xff]   ;;  %v7942_v10 = vld [vmem:[%s11106_s1 + $0xda0] ss:$16 sps:$4 sm:$0xff]  }
 0x17b   :  { %5085 = vmatpush1.bf16.msra.mxu0 %v7850_v12  ;;  %5618 = vmatpush1.bf16.msra.mxu1 %v7853_v13  ;;  %v7945_v12 = vld [vmem:[%s11106_s1 + $0xda8] ss:$16 sps:$4 sm:$0xff]   ;;  %v7950_v13 = vld [vmem:[%s11106_s1 + $0xdc4] ss:$16 sps:$4 sm:$0xff]  }
 0x17c   :  { %5086 = vmatprep.subr.bf16.mxu0 %v7858_v15  ;;  %5619 = vmatprep.subr.bf16.mxu1 %v7861_v11  ;;  %v7953_v15 = vld [vmem:[%s11106_s1 + $0xdcc] ss:$16 sps:$4 sm:$0xff]   ;;  %v7948_v11 = vld [vmem:[%s11106_s1 + $0xdc0] ss:$16 sps:$4 sm:$0xff]  }
 0x17f   :  { %5087 = vmatpush1.bf16.msra.mxu0 %v7856_v17  ;;  %5620 = vmatpush1.bf16.msra.mxu1 %v7859_v14  ;;  %v7951_v17 = vld [vmem:[%s11106_s1 + $0xdc8] ss:$16 sps:$4 sm:$0xff]   ;;  %v7956_v14 = vld [vmem:[%s11106_s1 + $0xde4] ss:$16 sps:$4 sm:$0xff]  }
 0x180   :  { %5097 = vmatprep.subr.bf16.mxu0 %v7866_v19  ;;  %5630 = vmatprep.subr.bf16.mxu1 %v7869_v20  ;;  %v7959_v19 = vld [vmem:[%s11106_s1 + $0xdec] ss:$16 sps:$4 sm:$0xff]   ;;  %v7954_v20 = vld [vmem:[%s11106_s1 + $0xde0] ss:$16 sps:$4 sm:$0xff]  }
 0x182   :  { %5089 = vmatmul.mubr.bf16.vlgmr.msra.gmra.mrb[0].mxu0 %v6297_v16  ;;  %5622 = vmatmul.mubr.bf16.vlgmr.msra.gmra.mrb[0].mxu1 %v6297_v16  ;;  %v7957_v16 = vld [vmem:[%s11106_s1 + $0xde8] ss:$16 sps:$4 sm:$0xff]  }
 0x183   :  { %5098 = vmatpush1.bf16.msra.mxu0 %v7864_v22  ;;  %5631 = vmatpush1.bf16.msra.mxu1 %v7867_v23  ;;  %v7964_v22 = vld [vmem:[%s11106_s1 + $0xe04] ss:$16 sps:$4 sm:$0xff]   ;;  %v7967_v23 = vld [vmem:[%s11106_s1 + $0xe0c] ss:$16 sps:$4 sm:$0xff]  }
 0x184   :  { %5099 = vmatprep.subr.bf16.mxu0 %v7872_v24  ;;  %5632 = vmatprep.subr.bf16.mxu1 %v7875_v18  ;;  %v9952_v24 = vld [vmem:[%s11107_s0 + $0x38] sm:$0xff]  ;;  %v6299_v18 = vcombine.low %v9751_v21, %v9751_v21 }
 0x185   :  { %5129 = vmatprep.mubr.bf16.mxu0 %v6300_v25  ;;  %5662 = vmatprep.mubr.bf16.mxu1 %v6300_v25  ;;  %v7962_v25 = vld [vmem:[%s11106_s1 + $0xe00] ss:$16 sps:$4 sm:$0xff]   ;;  %v7973_v21 = vld [vmem:[%s11106_s1 + $0xe2c] ss:$16 sps:$4 sm:$0xff]  }
 0x187   :  { %5100 = vmatpush1.bf16.msra.mxu0 %v7870_v26  ;;  %5633 = vmatpush1.bf16.msra.mxu1 %v7873_v27  ;;  %v7965_v26 = vld [vmem:[%s11106_s1 + $0xe08] ss:$16 sps:$4 sm:$0xff]   ;;  %v7970_v27 = vld [vmem:[%s11106_s1 + $0xe24] ss:$16 sps:$4 sm:$0xff]  }
 0x188   :  { %5101 = vmatprep.subr.bf16.mxu0 %v7878_v28  ;;  %5634 = vmatprep.subr.bf16.mxu1 %v7881_v29  ;;  %v6302_v28 = vcombine.high %v9952_v24, %v9952_v24  ;;  %v7968_v29 = vld [vmem:[%s11106_s1 + $0xe20] ss:$16 sps:$4 sm:$0xff]  }
 0x18b   :  { %5102 = vmatpush1.bf16.msra.mxu0 %v7876_v30  ;;  %5635 = vmatpush1.bf16.msra.mxu1 %v7879_v31  ;;  %v7971_v30 = vld [vmem:[%s11106_s1 + $0xe28] ss:$16 sps:$4 sm:$0xff]   ;;  %v7976_v31 = vld [vmem:[%s11106_s1 + $0xe44] ss:$16 sps:$4 sm:$0xff]  }
 0x18c   :  { %5103 = vmatprep.subr.bf16.mxu0 %v7884_v32  ;;  %5636 = vmatprep.subr.bf16.mxu1 %v7887_v33  ;;  %v7979_v32 = vld [vmem:[%s11106_s1 + $0xe4c] ss:$16 sps:$4 sm:$0xff]   ;;  %v7974_v33 = vld [vmem:[%s11106_s1 + $0xe40] ss:$16 sps:$4 sm:$0xff]  }
 0x18f   :  { %5104 = vmatpush1.bf16.msra.mxu0 %v7882_v34  ;;  %5637 = vmatpush1.bf16.msra.mxu1 %v7885_v35  ;;  %v7977_v34 = vld [vmem:[%s11106_s1 + $0xe48] ss:$16 sps:$4 sm:$0xff]   ;;  %v7982_v35 = vld [vmem:[%s11106_s1 + $0xe64] ss:$16 sps:$4 sm:$0xff]  }
 0x190   :  { %5105 = vmatprep.subr.bf16.mxu0 %v7890_v36  ;;  %5638 = vmatprep.subr.bf16.mxu1 %v7893_v37  ;;  %v7985_v36 = vld [vmem:[%s11106_s1 + $0xe6c] ss:$16 sps:$4 sm:$0xff]   ;;  %v7980_v37 = vld [vmem:[%s11106_s1 + $0xe60] ss:$16 sps:$4 sm:$0xff]  }
 0x193   :  { %5106 = vmatpush1.bf16.msra.mxu0 %v7888_v38  ;;  %5639 = vmatpush1.bf16.msra.mxu1 %v7891_v39  ;;  %v7983_v38 = vld [vmem:[%s11106_s1 + $0xe68] ss:$16 sps:$4 sm:$0xff]   ;;  %v7988_v39 = vld [vmem:[%s11106_s1 + $0xe84] ss:$16 sps:$4 sm:$0xff]  }
 0x194   :  { %5107 = vmatprep.subr.bf16.mxu0 %v7896_v40  ;;  %5640 = vmatprep.subr.bf16.mxu1 %v7899_v41  ;;  %v7991_v40 = vld [vmem:[%s11106_s1 + $0xe8c] ss:$16 sps:$4 sm:$0xff]   ;;  %v7986_v41 = vld [vmem:[%s11106_s1 + $0xe80] ss:$16 sps:$4 sm:$0xff]  }
 0x197   :  { %5108 = vmatpush1.bf16.msra.mxu0 %v7894_v42  ;;  %5641 = vmatpush1.bf16.msra.mxu1 %v7897_v43  ;;  %v7989_v42 = vld [vmem:[%s11106_s1 + $0xe88] ss:$16 sps:$4 sm:$0xff]   ;;  %v7994_v43 = vld [vmem:[%s11106_s1 + $0xea4] ss:$16 sps:$4 sm:$0xff]  }
 0x198   :  { %5109 = vmatprep.subr.bf16.mxu0 %v7902_v44  ;;  %5642 = vmatprep.subr.bf16.mxu1 %v7905_v45  ;;  %v7997_v44 = vld [vmem:[%s11106_s1 + $0xeac] ss:$16 sps:$4 sm:$0xff]   ;;  %v7992_v45 = vld [vmem:[%s11106_s1 + $0xea0] ss:$16 sps:$4 sm:$0xff]  }
 0x19b   :  { %5110 = vmatpush1.bf16.msra.mxu0 %v7900_v46  ;;  %5643 = vmatpush1.bf16.msra.mxu1 %v7903_v47  ;;  %v7995_v46 = vld [vmem:[%s11106_s1 + $0xea8] ss:$16 sps:$4 sm:$0xff]   ;;  %v8000_v47 = vld [vmem:[%s11106_s1 + $0xec4] ss:$16 sps:$4 sm:$0xff]  }
 0x19c   :  { %5111 = vmatprep.subr.bf16.mxu0 %v7908_v48  ;;  %5644 = vmatprep.subr.bf16.mxu1 %v7911_v49  ;;  %v8003_v48 = vld [vmem:[%s11106_s1 + $0xecc] ss:$16 sps:$4 sm:$0xff]   ;;  %v7998_v49 = vld [vmem:[%s11106_s1 + $0xec0] ss:$16 sps:$4 sm:$0xff]  }
 0x19f   :  { %5112 = vmatpush1.bf16.msra.mxu0 %v7906_v50  ;;  %5645 = vmatpush1.bf16.msra.mxu1 %v7909_v51  ;;  %v8001_v50 = vld [vmem:[%s11106_s1 + $0xec8] ss:$16 sps:$4 sm:$0xff]   ;;  %v8006_v51 = vld [vmem:[%s11106_s1 + $0xee4] ss:$16 sps:$4 sm:$0xff]  }
 0x1a0   :  { %5113 = vmatprep.subr.bf16.mxu0 %v7914_v52  ;;  %5646 = vmatprep.subr.bf16.mxu1 %v7917_v53  ;;  %v8009_v52 = vld [vmem:[%s11106_s1 + $0xeec] ss:$16 sps:$4 sm:$0xff]   ;;  %v8004_v53 = vld [vmem:[%s11106_s1 + $0xee0] ss:$16 sps:$4 sm:$0xff]  }
 0x1a3   :  { %5114 = vmatpush1.bf16.msra.mxu0 %v7912_v54  ;;  %5647 = vmatpush1.bf16.msra.mxu1 %v7915_v55  ;;  %v8007_v54 = vld [vmem:[%s11106_s1 + $0xee8] ss:$16 sps:$4 sm:$0xff]   ;;  %v8012_v55 = vld [vmem:[%s11106_s1 + $0xf04] ss:$16 sps:$4 sm:$0xff]  }
 0x1a4   :  { %5115 = vmatprep.subr.bf16.mxu0 %v7920_v56  ;;  %5648 = vmatprep.subr.bf16.mxu1 %v7923_v57  ;;  %v8015_v56 = vld [vmem:[%s11106_s1 + $0xf0c] ss:$16 sps:$4 sm:$0xff]   ;;  %v8010_v57 = vld [vmem:[%s11106_s1 + $0xf00] ss:$16 sps:$4 sm:$0xff]  }
 0x1a7   :  { %5116 = vmatpush1.bf16.msra.mxu0 %v7918_v58  ;;  %5649 = vmatpush1.bf16.msra.mxu1 %v7921_v59  ;;  %v8013_v58 = vld [vmem:[%s11106_s1 + $0xf08] ss:$16 sps:$4 sm:$0xff]   ;;  %v8018_v59 = vld [vmem:[%s11106_s1 + $0xf24] ss:$16 sps:$4 sm:$0xff]  }
 0x1a8   :  { %5117 = vmatprep.subr.bf16.mxu0 %v7926_v60  ;;  %5650 = vmatprep.subr.bf16.mxu1 %v7929_v61  ;;  %v8021_v60 = vld [vmem:[%s11106_s1 + $0xf2c] ss:$16 sps:$4 sm:$0xff]   ;;  %v8016_v61 = vld [vmem:[%s11106_s1 + $0xf20] ss:$16 sps:$4 sm:$0xff]  }
 0x1ab   :  { %5118 = vmatpush1.bf16.msra.mxu0 %v7924_v62  ;;  %5651 = vmatpush1.bf16.msra.mxu1 %v7927_v63  ;;  %v8019_v62 = vld [vmem:[%s11106_s1 + $0xf28] ss:$16 sps:$4 sm:$0xff]   ;;  %v8024_v63 = vld [vmem:[%s11106_s1 + $0xf44] ss:$16 sps:$4 sm:$0xff]  }
 0x1ac   :  { %5119 = vmatprep.subr.bf16.mxu0 %v7932_v0  ;;  %5652 = vmatprep.subr.bf16.mxu1 %v7935_v1  ;;  %v8027_v0 = vld [vmem:[%s11106_s1 + $0xf4c] ss:$16 sps:$4 sm:$0xff]   ;;  %v8022_v1 = vld [vmem:[%s11106_s1 + $0xf40] ss:$16 sps:$4 sm:$0xff]  }
 0x1af   :  { %5120 = vmatpush1.bf16.msra.mxu0 %v7930_v2  ;;  %5653 = vmatpush1.bf16.msra.mxu1 %v7933_v3  ;;  %v8025_v2 = vld [vmem:[%s11106_s1 + $0xf48] ss:$16 sps:$4 sm:$0xff]   ;;  %v8030_v3 = vld [vmem:[%s11106_s1 + $0xf64] ss:$16 sps:$4 sm:$0xff]  }
 0x1b0   :  { %5121 = vmatprep.subr.bf16.mxu0 %v7938_v4  ;;  %5654 = vmatprep.subr.bf16.mxu1 %v7941_v5  ;;  %v8033_v4 = vld [vmem:[%s11106_s1 + $0xf6c] ss:$16 sps:$4 sm:$0xff]   ;;  %v8028_v5 = vld [vmem:[%s11106_s1 + $0xf60] ss:$16 sps:$4 sm:$0xff]  }
 0x1b3   :  { %5122 = vmatpush1.bf16.msra.mxu0 %v7936_v6  ;;  %5655 = vmatpush1.bf16.msra.mxu1 %v7939_v7  ;;  %v8031_v6 = vld [vmem:[%s11106_s1 + $0xf68] ss:$16 sps:$4 sm:$0xff]   ;;  %v8036_v7 = vld [vmem:[%s11106_s1 + $0xf84] ss:$16 sps:$4 sm:$0xff]  }
 0x1b4   :  { %5123 = vmatprep.subr.bf16.mxu0 %v7944_v8  ;;  %5656 = vmatprep.subr.bf16.mxu1 %v7947_v9  ;;  %v8039_v8 = vld [vmem:[%s11106_s1 + $0xf8c] ss:$16 sps:$4 sm:$0xff]   ;;  %v8034_v9 = vld [vmem:[%s11106_s1 + $0xf80] ss:$16 sps:$4 sm:$0xff]  }
 0x1b7   :  { %5124 = vmatpush1.bf16.msra.mxu0 %v7942_v10  ;;  %5657 = vmatpush1.bf16.msra.mxu1 %v7945_v12  ;;  %v8037_v10 = vld [vmem:[%s11106_s1 + $0xf88] ss:$16 sps:$4 sm:$0xff]   ;;  %v8042_v12 = vld [vmem:[%s11106_s1 + $0xfa4] ss:$16 sps:$4 sm:$0xff]  }
 0x1b8   :  { %5125 = vmatprep.subr.bf16.mxu0 %v7950_v13  ;;  %5658 = vmatprep.subr.bf16.mxu1 %v7953_v15  ;;  %v8045_v13 = vld [vmem:[%s11106_s1 + $0xfac] ss:$16 sps:$4 sm:$0xff]   ;;  %v8040_v15 = vld [vmem:[%s11106_s1 + $0xfa0] ss:$16 sps:$4 sm:$0xff]  }
 0x1bb   :  { %5126 = vmatpush1.bf16.msra.mxu0 %v7948_v11  ;;  %5659 = vmatpush1.bf16.msra.mxu1 %v7951_v17  ;;  %v8043_v11 = vld [vmem:[%s11106_s1 + $0xfa8] ss:$16 sps:$4 sm:$0xff]   ;;  %v8048_v17 = vld [vmem:[%s11106_s1 + $0xfc4] ss:$16 sps:$4 sm:$0xff]  }
 0x1bc   :  { %5127 = vmatprep.subr.bf16.mxu0 %v7956_v14  ;;  %5660 = vmatprep.subr.bf16.mxu1 %v7959_v19  ;;  %v8051_v14 = vld [vmem:[%s11106_s1 + $0xfcc] ss:$16 sps:$4 sm:$0xff]   ;;  %v8046_v19 = vld [vmem:[%s11106_s1 + $0xfc0] ss:$16 sps:$4 sm:$0xff]  }
 0x1bf   :  { %5128 = vmatpush1.bf16.msra.mxu0 %v7954_v20  ;;  %5661 = vmatpush1.bf16.msra.mxu1 %v7957_v16  ;;  %v8049_v20 = vld [vmem:[%s11106_s1 + $0xfc8] ss:$16 sps:$4 sm:$0xff]   ;;  %v8054_v16 = vld [vmem:[%s11106_s1 + $0xfe4] ss:$16 sps:$4 sm:$0xff]  }
 0x1c0   :  { %5138 = vmatprep.subr.bf16.mxu0 %v7964_v22  ;;  %5671 = vmatprep.subr.bf16.mxu1 %v7967_v23  ;;  %v8057_v22 = vld [vmem:[%s11106_s1 + $0xfec] ss:$16 sps:$4 sm:$0xff]   ;;  %v8052_v23 = vld [vmem:[%s11106_s1 + $0xfe0] ss:$16 sps:$4 sm:$0xff]  }
 0x1c2   :  { %5130 = vmatmul.mubr.bf16.vlgmr.msra.gmra.mrb[0].mxu0 %v6299_v18  ;;  %5663 = vmatmul.mubr.bf16.vlgmr.msra.gmra.mrb[0].mxu1 %v6299_v18  ;;  %v8055_v18 = vld [vmem:[%s11106_s1 + $0xfe8] ss:$16 sps:$4 sm:$0xff]  }
 0x1c3   :  { %5139 = vmatpush1.bf16.msra.mxu0 %v7962_v25  ;;  %5672 = vmatpush1.bf16.msra.mxu1 %v7965_v26  ;;  %v8062_v25 = vld [vmem:[%s11106_s1 + $0x1004] ss:$16 sps:$4 sm:$0xff]   ;;  %v8065_v26 = vld [vmem:[%s11106_s1 + $0x100c] ss:$16 sps:$4 sm:$0xff]  }
 0x1c4   :  { %5140 = vmatprep.subr.bf16.mxu0 %v7970_v27  ;;  %5673 = vmatprep.subr.bf16.mxu1 %v7973_v21  ;;  %v6301_v27 = vcombine.low %v9952_v24, %v9952_v24  ;;  %v10155_v21 = vld [vmem:[%s11107_s0 + $0x40] sm:$0xff] }
 0x1c5   :  { %5170 = vmatprep.mubr.bf16.mxu0 %v6302_v28  ;;  %5703 = vmatprep.mubr.bf16.mxu1 %v6302_v28  ;;  %v8060_v28 = vld [vmem:[%s11106_s1 + $0x1000] ss:$16 sps:$4 sm:$0xff]   ;;  %v8068_v24 = vld [vmem:[%s11106_s1 + $0x1024] ss:$16 sps:$4 sm:$0xff]  }
 0x1c7   :  { %5141 = vmatpush1.bf16.msra.mxu0 %v7968_v29  ;;  %5674 = vmatpush1.bf16.msra.mxu1 %v7971_v30  ;;  %v8063_v29 = vld [vmem:[%s11106_s1 + $0x1008] ss:$16 sps:$4 sm:$0xff]   ;;  %v8071_v30 = vld [vmem:[%s11106_s1 + $0x102c] ss:$16 sps:$4 sm:$0xff]  }
 0x1c8   :  { %5142 = vmatprep.subr.bf16.mxu0 %v7976_v31  ;;  %5675 = vmatprep.subr.bf16.mxu1 %v7979_v32  ;;  %v6304_v31 = vcombine.high %v10155_v21, %v10155_v21  ;;  %v8066_v32 = vld [vmem:[%s11106_s1 + $0x1020] ss:$16 sps:$4 sm:$0xff]  }
 0x1cb   :  { %5143 = vmatpush1.bf16.msra.mxu0 %v7974_v33  ;;  %5676 = vmatpush1.bf16.msra.mxu1 %v7977_v34  ;;  %v8069_v33 = vld [vmem:[%s11106_s1 + $0x1028] ss:$16 sps:$4 sm:$0xff]   ;;  %v8074_v34 = vld [vmem:[%s11106_s1 + $0x1044] ss:$16 sps:$4 sm:$0xff]  }
 0x1cc   :  { %5144 = vmatprep.subr.bf16.mxu0 %v7982_v35  ;;  %5677 = vmatprep.subr.bf16.mxu1 %v7985_v36  ;;  %v8077_v35 = vld [vmem:[%s11106_s1 + $0x104c] ss:$16 sps:$4 sm:$0xff]   ;;  %v8072_v36 = vld [vmem:[%s11106_s1 + $0x1040] ss:$16 sps:$4 sm:$0xff]  }
 0x1cf   :  { %5145 = vmatpush1.bf16.msra.mxu0 %v7980_v37  ;;  %5678 = vmatpush1.bf16.msra.mxu1 %v7983_v38  ;;  %v8075_v37 = vld [vmem:[%s11106_s1 + $0x1048] ss:$16 sps:$4 sm:$0xff]   ;;  %v8080_v38 = vld [vmem:[%s11106_s1 + $0x1064] ss:$16 sps:$4 sm:$0xff]  }
 0x1d0   :  { %5146 = vmatprep.subr.bf16.mxu0 %v7988_v39  ;;  %5679 = vmatprep.subr.bf16.mxu1 %v7991_v40  ;;  %v8083_v39 = vld [vmem:[%s11106_s1 + $0x106c] ss:$16 sps:$4 sm:$0xff]   ;;  %v8078_v40 = vld [vmem:[%s11106_s1 + $0x1060] ss:$16 sps:$4 sm:$0xff]  }
 0x1d3   :  { %5147 = vmatpush1.bf16.msra.mxu0 %v7986_v41  ;;  %5680 = vmatpush1.bf16.msra.mxu1 %v7989_v42  ;;  %v8081_v41 = vld [vmem:[%s11106_s1 + $0x1068] ss:$16 sps:$4 sm:$0xff]   ;;  %v8086_v42 = vld [vmem:[%s11106_s1 + $0x1084] ss:$16 sps:$4 sm:$0xff]  }
 0x1d4   :  { %5148 = vmatprep.subr.bf16.mxu0 %v7994_v43  ;;  %5681 = vmatprep.subr.bf16.mxu1 %v7997_v44  ;;  %v8089_v43 = vld [vmem:[%s11106_s1 + $0x108c] ss:$16 sps:$4 sm:$0xff]   ;;  %v8084_v44 = vld [vmem:[%s11106_s1 + $0x1080] ss:$16 sps:$4 sm:$0xff]  }
 0x1d7   :  { %5149 = vmatpush1.bf16.msra.mxu0 %v7992_v45  ;;  %5682 = vmatpush1.bf16.msra.mxu1 %v7995_v46  ;;  %v8087_v45 = vld [vmem:[%s11106_s1 + $0x1088] ss:$16 sps:$4 sm:$0xff]   ;;  %v8092_v46 = vld [vmem:[%s11106_s1 + $0x10a4] ss:$16 sps:$4 sm:$0xff]  }
 0x1d8   :  { %5150 = vmatprep.subr.bf16.mxu0 %v8000_v47  ;;  %5683 = vmatprep.subr.bf16.mxu1 %v8003_v48  ;;  %v8095_v47 = vld [vmem:[%s11106_s1 + $0x10ac] ss:$16 sps:$4 sm:$0xff]   ;;  %v8090_v48 = vld [vmem:[%s11106_s1 + $0x10a0] ss:$16 sps:$4 sm:$0xff]  }
 0x1db   :  { %5151 = vmatpush1.bf16.msra.mxu0 %v7998_v49  ;;  %5684 = vmatpush1.bf16.msra.mxu1 %v8001_v50  ;;  %v8093_v49 = vld [vmem:[%s11106_s1 + $0x10a8] ss:$16 sps:$4 sm:$0xff]   ;;  %v8098_v50 = vld [vmem:[%s11106_s1 + $0x10c4] ss:$16 sps:$4 sm:$0xff]  }
 0x1dc   :  { %5152 = vmatprep.subr.bf16.mxu0 %v8006_v51  ;;  %5685 = vmatprep.subr.bf16.mxu1 %v8009_v52  ;;  %v8101_v51 = vld [vmem:[%s11106_s1 + $0x10cc] ss:$16 sps:$4 sm:$0xff]   ;;  %v8096_v52 = vld [vmem:[%s11106_s1 + $0x10c0] ss:$16 sps:$4 sm:$0xff]  }
 0x1df   :  { %5153 = vmatpush1.bf16.msra.mxu0 %v8004_v53  ;;  %5686 = vmatpush1.bf16.msra.mxu1 %v8007_v54  ;;  %v8099_v53 = vld [vmem:[%s11106_s1 + $0x10c8] ss:$16 sps:$4 sm:$0xff]   ;;  %v8104_v54 = vld [vmem:[%s11106_s1 + $0x10e4] ss:$16 sps:$4 sm:$0xff]  }
 0x1e0   :  { %5154 = vmatprep.subr.bf16.mxu0 %v8012_v55  ;;  %5687 = vmatprep.subr.bf16.mxu1 %v8015_v56  ;;  %v8107_v55 = vld [vmem:[%s11106_s1 + $0x10ec] ss:$16 sps:$4 sm:$0xff]   ;;  %v8102_v56 = vld [vmem:[%s11106_s1 + $0x10e0] ss:$16 sps:$4 sm:$0xff]  }
 0x1e3   :  { %5155 = vmatpush1.bf16.msra.mxu0 %v8010_v57  ;;  %5688 = vmatpush1.bf16.msra.mxu1 %v8013_v58  ;;  %v8105_v57 = vld [vmem:[%s11106_s1 + $0x10e8] ss:$16 sps:$4 sm:$0xff]   ;;  %v8110_v58 = vld [vmem:[%s11106_s1 + $0x1104] ss:$16 sps:$4 sm:$0xff]  }
 0x1e4   :  { %5156 = vmatprep.subr.bf16.mxu0 %v8018_v59  ;;  %5689 = vmatprep.subr.bf16.mxu1 %v8021_v60  ;;  %v8113_v59 = vld [vmem:[%s11106_s1 + $0x110c] ss:$16 sps:$4 sm:$0xff]   ;;  %v8108_v60 = vld [vmem:[%s11106_s1 + $0x1100] ss:$16 sps:$4 sm:$0xff]  }
 0x1e7   :  { %5157 = vmatpush1.bf16.msra.mxu0 %v8016_v61  ;;  %5690 = vmatpush1.bf16.msra.mxu1 %v8019_v62  ;;  %v8111_v61 = vld [vmem:[%s11106_s1 + $0x1108] ss:$16 sps:$4 sm:$0xff]   ;;  %v8116_v62 = vld [vmem:[%s11106_s1 + $0x1124] ss:$16 sps:$4 sm:$0xff]  }
 0x1e8   :  { %5158 = vmatprep.subr.bf16.mxu0 %v8024_v63  ;;  %5691 = vmatprep.subr.bf16.mxu1 %v8027_v0  ;;  %v8119_v63 = vld [vmem:[%s11106_s1 + $0x112c] ss:$16 sps:$4 sm:$0xff]   ;;  %v8114_v0 = vld [vmem:[%s11106_s1 + $0x1120] ss:$16 sps:$4 sm:$0xff]  }
 0x1eb   :  { %5159 = vmatpush1.bf16.msra.mxu0 %v8022_v1  ;;  %5692 = vmatpush1.bf16.msra.mxu1 %v8025_v2  ;;  %v8117_v1 = vld [vmem:[%s11106_s1 + $0x1128] ss:$16 sps:$4 sm:$0xff]   ;;  %v8122_v2 = vld [vmem:[%s11106_s1 + $0x1144] ss:$16 sps:$4 sm:$0xff]  }
 0x1ec   :  { %5160 = vmatprep.subr.bf16.mxu0 %v8030_v3  ;;  %5693 = vmatprep.subr.bf16.mxu1 %v8033_v4  ;;  %v8125_v3 = vld [vmem:[%s11106_s1 + $0x114c] ss:$16 sps:$4 sm:$0xff]   ;;  %v8120_v4 = vld [vmem:[%s11106_s1 + $0x1140] ss:$16 sps:$4 sm:$0xff]  }
 0x1ef   :  { %5161 = vmatpush1.bf16.msra.mxu0 %v8028_v5  ;;  %5694 = vmatpush1.bf16.msra.mxu1 %v8031_v6  ;;  %v8123_v5 = vld [vmem:[%s11106_s1 + $0x1148] ss:$16 sps:$4 sm:$0xff]   ;;  %v8128_v6 = vld [vmem:[%s11106_s1 + $0x1164] ss:$16 sps:$4 sm:$0xff]  }
 0x1f0   :  { %5162 = vmatprep.subr.bf16.mxu0 %v8036_v7  ;;  %5695 = vmatprep.subr.bf16.mxu1 %v8039_v8  ;;  %v8131_v7 = vld [vmem:[%s11106_s1 + $0x116c] ss:$16 sps:$4 sm:$0xff]   ;;  %v8126_v8 = vld [vmem:[%s11106_s1 + $0x1160] ss:$16 sps:$4 sm:$0xff]  }
 0x1f3   :  { %5163 = vmatpush1.bf16.msra.mxu0 %v8034_v9  ;;  %5696 = vmatpush1.bf16.msra.mxu1 %v8037_v10  ;;  %v8129_v9 = vld [vmem:[%s11106_s1 + $0x1168] ss:$16 sps:$4 sm:$0xff]   ;;  %v8134_v10 = vld [vmem:[%s11106_s1 + $0x1184] ss:$16 sps:$4 sm:$0xff]  }
 0x1f4   :  { %5164 = vmatprep.subr.bf16.mxu0 %v8042_v12  ;;  %5697 = vmatprep.subr.bf16.mxu1 %v8045_v13  ;;  %v8137_v12 = vld [vmem:[%s11106_s1 + $0x118c] ss:$16 sps:$4 sm:$0xff]   ;;  %v8132_v13 = vld [vmem:[%s11106_s1 + $0x1180] ss:$16 sps:$4 sm:$0xff]  }
 0x1f7   :  { %5165 = vmatpush1.bf16.msra.mxu0 %v8040_v15  ;;  %5698 = vmatpush1.bf16.msra.mxu1 %v8043_v11  ;;  %v8135_v15 = vld [vmem:[%s11106_s1 + $0x1188] ss:$16 sps:$4 sm:$0xff]   ;;  %v8140_v11 = vld [vmem:[%s11106_s1 + $0x11a4] ss:$16 sps:$4 sm:$0xff]  }
 0x1f8   :  { %5166 = vmatprep.subr.bf16.mxu0 %v8048_v17  ;;  %5699 = vmatprep.subr.bf16.mxu1 %v8051_v14  ;;  %v8143_v17 = vld [vmem:[%s11106_s1 + $0x11ac] ss:$16 sps:$4 sm:$0xff]   ;;  %v8138_v14 = vld [vmem:[%s11106_s1 + $0x11a0] ss:$16 sps:$4 sm:$0xff]  }
 0x1fb   :  { %5167 = vmatpush1.bf16.msra.mxu0 %v8046_v19  ;;  %5700 = vmatpush1.bf16.msra.mxu1 %v8049_v20  ;;  %v8141_v19 = vld [vmem:[%s11106_s1 + $0x11a8] ss:$16 sps:$4 sm:$0xff]   ;;  %v8146_v20 = vld [vmem:[%s11106_s1 + $0x11c4] ss:$16 sps:$4 sm:$0xff]  }
 0x1fc   :  { %5168 = vmatprep.subr.bf16.mxu0 %v8054_v16  ;;  %5701 = vmatprep.subr.bf16.mxu1 %v8057_v22  ;;  %v8149_v16 = vld [vmem:[%s11106_s1 + $0x11cc] ss:$16 sps:$4 sm:$0xff]   ;;  %v8144_v22 = vld [vmem:[%s11106_s1 + $0x11c0] ss:$16 sps:$4 sm:$0xff]  }
 0x1ff   :  { %5169 = vmatpush1.bf16.msra.mxu0 %v8052_v23  ;;  %5702 = vmatpush1.bf16.msra.mxu1 %v8055_v18  ;;  %v8147_v23 = vld [vmem:[%s11106_s1 + $0x11c8] ss:$16 sps:$4 sm:$0xff]   ;;  %v8152_v18 = vld [vmem:[%s11106_s1 + $0x11e4] ss:$16 sps:$4 sm:$0xff]  }
 0x200   :  { %5179 = vmatprep.subr.bf16.mxu0 %v8062_v25  ;;  %5712 = vmatprep.subr.bf16.mxu1 %v8065_v26  ;;  %v8155_v25 = vld [vmem:[%s11106_s1 + $0x11ec] ss:$16 sps:$4 sm:$0xff]   ;;  %v8150_v26 = vld [vmem:[%s11106_s1 + $0x11e0] ss:$16 sps:$4 sm:$0xff]  }
 0x202   :  { %5171 = vmatmul.mubr.bf16.vlgmr.msra.gmra.mrb[0].mxu0 %v6301_v27  ;;  %5704 = vmatmul.mubr.bf16.vlgmr.msra.gmra.mrb[0].mxu1 %v6301_v27  ;;  %v8153_v27 = vld [vmem:[%s11106_s1 + $0x11e8] ss:$16 sps:$4 sm:$0xff]  }
 0x203   :  { %5180 = vmatpush1.bf16.msra.mxu0 %v8060_v28  ;;  %5713 = vmatpush1.bf16.msra.mxu1 %v8063_v29  ;;  %v8160_v28 = vld [vmem:[%s11106_s1 + $0x1204] ss:$16 sps:$4 sm:$0xff]   ;;  %v8163_v29 = vld [vmem:[%s11106_s1 + $0x120c] ss:$16 sps:$4 sm:$0xff]  }
 0x204   :  { %5181 = vmatprep.subr.bf16.mxu0 %v8068_v24  ;;  %5714 = vmatprep.subr.bf16.mxu1 %v8071_v30  ;;  %v6303_v24 = vcombine.low %v10155_v21, %v10155_v21  ;;  %v10356_v30 = vld [vmem:[%s11107_s0 + $0x48] sm:$0xff]  ;;  %v8166_v21 = vld [vmem:[%s11106_s1 + $0x1224] ss:$16 sps:$4 sm:$0xff]  }
 0x205   :  { %5211 = vmatprep.mubr.bf16.mxu0 %v6304_v31  ;;  %5744 = vmatprep.mubr.bf16.mxu1 %v6304_v31  ;;  %v8158_v31 = vld [vmem:[%s11106_s1 + $0x1200] ss:$16 sps:$4 sm:$0xff]  }
 0x207   :  { %5182 = vmatpush1.bf16.msra.mxu0 %v8066_v32  ;;  %5715 = vmatpush1.bf16.msra.mxu1 %v8069_v33  ;;  %v8161_v32 = vld [vmem:[%s11106_s1 + $0x1208] ss:$16 sps:$4 sm:$0xff]   ;;  %v8169_v33 = vld [vmem:[%s11106_s1 + $0x122c] ss:$16 sps:$4 sm:$0xff]  }
 0x208   :  { %5183 = vmatprep.subr.bf16.mxu0 %v8074_v34  ;;  %5716 = vmatprep.subr.bf16.mxu1 %v8077_v35  ;;  %v6306_v34 = vcombine.high %v10356_v30, %v10356_v30  ;;  %v8164_v35 = vld [vmem:[%s11106_s1 + $0x1220] ss:$16 sps:$4 sm:$0xff]  }
 0x20b   :  { %5184 = vmatpush1.bf16.msra.mxu0 %v8072_v36  ;;  %5717 = vmatpush1.bf16.msra.mxu1 %v8075_v37  ;;  %v8167_v36 = vld [vmem:[%s11106_s1 + $0x1228] ss:$16 sps:$4 sm:$0xff]   ;;  %v8172_v37 = vld [vmem:[%s11106_s1 + $0x1244] ss:$16 sps:$4 sm:$0xff]  }
 0x20c   :  { %5185 = vmatprep.subr.bf16.mxu0 %v8080_v38  ;;  %5718 = vmatprep.subr.bf16.mxu1 %v8083_v39  ;;  %v8175_v38 = vld [vmem:[%s11106_s1 + $0x124c] ss:$16 sps:$4 sm:$0xff]   ;;  %v8170_v39 = vld [vmem:[%s11106_s1 + $0x1240] ss:$16 sps:$4 sm:$0xff]  }
 0x20f   :  { %5186 = vmatpush1.bf16.msra.mxu0 %v8078_v40  ;;  %5719 = vmatpush1.bf16.msra.mxu1 %v8081_v41  ;;  %v8173_v40 = vld [vmem:[%s11106_s1 + $0x1248] ss:$16 sps:$4 sm:$0xff]   ;;  %v8178_v41 = vld [vmem:[%s11106_s1 + $0x1264] ss:$16 sps:$4 sm:$0xff]  }
 0x210   :  { %5187 = vmatprep.subr.bf16.mxu0 %v8086_v42  ;;  %5720 = vmatprep.subr.bf16.mxu1 %v8089_v43  ;;  %v8181_v42 = vld [vmem:[%s11106_s1 + $0x126c] ss:$16 sps:$4 sm:$0xff]   ;;  %v8176_v43 = vld [vmem:[%s11106_s1 + $0x1260] ss:$16 sps:$4 sm:$0xff]  }
 0x213   :  { %5188 = vmatpush1.bf16.msra.mxu0 %v8084_v44  ;;  %5721 = vmatpush1.bf16.msra.mxu1 %v8087_v45  ;;  %v8179_v44 = vld [vmem:[%s11106_s1 + $0x1268] ss:$16 sps:$4 sm:$0xff]   ;;  %v8184_v45 = vld [vmem:[%s11106_s1 + $0x1284] ss:$16 sps:$4 sm:$0xff]  }
 0x214   :  { %5189 = vmatprep.subr.bf16.mxu0 %v8092_v46  ;;  %5722 = vmatprep.subr.bf16.mxu1 %v8095_v47  ;;  %v8187_v46 = vld [vmem:[%s11106_s1 + $0x128c] ss:$16 sps:$4 sm:$0xff]   ;;  %v8182_v47 = vld [vmem:[%s11106_s1 + $0x1280] ss:$16 sps:$4 sm:$0xff]  }
 0x217   :  { %5190 = vmatpush1.bf16.msra.mxu0 %v8090_v48  ;;  %5723 = vmatpush1.bf16.msra.mxu1 %v8093_v49  ;;  %v8185_v48 = vld [vmem:[%s11106_s1 + $0x1288] ss:$16 sps:$4 sm:$0xff]   ;;  %v8190_v49 = vld [vmem:[%s11106_s1 + $0x12a4] ss:$16 sps:$4 sm:$0xff]  }
 0x218   :  { %5191 = vmatprep.subr.bf16.mxu0 %v8098_v50  ;;  %5724 = vmatprep.subr.bf16.mxu1 %v8101_v51  ;;  %v8193_v50 = vld [vmem:[%s11106_s1 + $0x12ac] ss:$16 sps:$4 sm:$0xff]   ;;  %v8188_v51 = vld [vmem:[%s11106_s1 + $0x12a0] ss:$16 sps:$4 sm:$0xff]  }
 0x21b   :  { %5192 = vmatpush1.bf16.msra.mxu0 %v8096_v52  ;;  %5725 = vmatpush1.bf16.msra.mxu1 %v8099_v53  ;;  %v8191_v52 = vld [vmem:[%s11106_s1 + $0x12a8] ss:$16 sps:$4 sm:$0xff]   ;;  %v8196_v53 = vld [vmem:[%s11106_s1 + $0x12c4] ss:$16 sps:$4 sm:$0xff]  }
 0x21c   :  { %5193 = vmatprep.subr.bf16.mxu0 %v8104_v54  ;;  %5726 = vmatprep.subr.bf16.mxu1 %v8107_v55  ;;  %v8199_v54 = vld [vmem:[%s11106_s1 + $0x12cc] ss:$16 sps:$4 sm:$0xff]   ;;  %v8194_v55 = vld [vmem:[%s11106_s1 + $0x12c0] ss:$16 sps:$4 sm:$0xff]  }
 0x21f   :  { %5194 = vmatpush1.bf16.msra.mxu0 %v8102_v56  ;;  %5727 = vmatpush1.bf16.msra.mxu1 %v8105_v57  ;;  %v8197_v56 = vld [vmem:[%s11106_s1 + $0x12c8] ss:$16 sps:$4 sm:$0xff]   ;;  %v8202_v57 = vld [vmem:[%s11106_s1 + $0x12e4] ss:$16 sps:$4 sm:$0xff]  }
 0x220   :  { %5195 = vmatprep.subr.bf16.mxu0 %v8110_v58  ;;  %5728 = vmatprep.subr.bf16.mxu1 %v8113_v59  ;;  %v8205_v58 = vld [vmem:[%s11106_s1 + $0x12ec] ss:$16 sps:$4 sm:$0xff]   ;;  %v8200_v59 = vld [vmem:[%s11106_s1 + $0x12e0] ss:$16 sps:$4 sm:$0xff]  }
 0x223   :  { %5196 = vmatpush1.bf16.msra.mxu0 %v8108_v60  ;;  %5729 = vmatpush1.bf16.msra.mxu1 %v8111_v61  ;;  %v8203_v60 = vld [vmem:[%s11106_s1 + $0x12e8] ss:$16 sps:$4 sm:$0xff]   ;;  %v8208_v61 = vld [vmem:[%s11106_s1 + $0x1304] ss:$16 sps:$4 sm:$0xff]  }
 0x224   :  { %5197 = vmatprep.subr.bf16.mxu0 %v8116_v62  ;;  %5730 = vmatprep.subr.bf16.mxu1 %v8119_v63  ;;  %v8211_v62 = vld [vmem:[%s11106_s1 + $0x130c] ss:$16 sps:$4 sm:$0xff]   ;;  %v8206_v63 = vld [vmem:[%s11106_s1 + $0x1300] ss:$16 sps:$4 sm:$0xff]  }
 0x227   :  { %5198 = vmatpush1.bf16.msra.mxu0 %v8114_v0  ;;  %5731 = vmatpush1.bf16.msra.mxu1 %v8117_v1  ;;  %v8209_v0 = vld [vmem:[%s11106_s1 + $0x1308] ss:$16 sps:$4 sm:$0xff]   ;;  %v8214_v1 = vld [vmem:[%s11106_s1 + $0x1324] ss:$16 sps:$4 sm:$0xff]  }
 0x228   :  { %5199 = vmatprep.subr.bf16.mxu0 %v8122_v2  ;;  %5732 = vmatprep.subr.bf16.mxu1 %v8125_v3  ;;  %v8217_v2 = vld [vmem:[%s11106_s1 + $0x132c] ss:$16 sps:$4 sm:$0xff]   ;;  %v8212_v3 = vld [vmem:[%s11106_s1 + $0x1320] ss:$16 sps:$4 sm:$0xff]  }
 0x22b   :  { %5200 = vmatpush1.bf16.msra.mxu0 %v8120_v4  ;;  %5733 = vmatpush1.bf16.msra.mxu1 %v8123_v5  ;;  %v8215_v4 = vld [vmem:[%s11106_s1 + $0x1328] ss:$16 sps:$4 sm:$0xff]   ;;  %v8220_v5 = vld [vmem:[%s11106_s1 + $0x1344] ss:$16 sps:$4 sm:$0xff]  }
 0x22c   :  { %5201 = vmatprep.subr.bf16.mxu0 %v8128_v6  ;;  %5734 = vmatprep.subr.bf16.mxu1 %v8131_v7  ;;  %v8223_v6 = vld [vmem:[%s11106_s1 + $0x134c] ss:$16 sps:$4 sm:$0xff]   ;;  %v8218_v7 = vld [vmem:[%s11106_s1 + $0x1340] ss:$16 sps:$4 sm:$0xff]  }
 0x22f   :  { %5202 = vmatpush1.bf16.msra.mxu0 %v8126_v8  ;;  %5735 = vmatpush1.bf16.msra.mxu1 %v8129_v9  ;;  %v8221_v8 = vld [vmem:[%s11106_s1 + $0x1348] ss:$16 sps:$4 sm:$0xff]   ;;  %v8226_v9 = vld [vmem:[%s11106_s1 + $0x1364] ss:$16 sps:$4 sm:$0xff]  }
 0x230   :  { %5203 = vmatprep.subr.bf16.mxu0 %v8134_v10  ;;  %5736 = vmatprep.subr.bf16.mxu1 %v8137_v12  ;;  %v8229_v10 = vld [vmem:[%s11106_s1 + $0x136c] ss:$16 sps:$4 sm:$0xff]   ;;  %v8224_v12 = vld [vmem:[%s11106_s1 + $0x1360] ss:$16 sps:$4 sm:$0xff]  }
 0x233   :  { %5204 = vmatpush1.bf16.msra.mxu0 %v8132_v13  ;;  %5737 = vmatpush1.bf16.msra.mxu1 %v8135_v15  ;;  %v8227_v13 = vld [vmem:[%s11106_s1 + $0x1368] ss:$16 sps:$4 sm:$0xff]   ;;  %v8232_v15 = vld [vmem:[%s11106_s1 + $0x1384] ss:$16 sps:$4 sm:$0xff]  }
 0x234   :  { %5205 = vmatprep.subr.bf16.mxu0 %v8140_v11  ;;  %5738 = vmatprep.subr.bf16.mxu1 %v8143_v17  ;;  %v8235_v11 = vld [vmem:[%s11106_s1 + $0x138c] ss:$16 sps:$4 sm:$0xff]   ;;  %v8230_v17 = vld [vmem:[%s11106_s1 + $0x1380] ss:$16 sps:$4 sm:$0xff]  }
 0x237   :  { %5206 = vmatpush1.bf16.msra.mxu0 %v8138_v14  ;;  %5739 = vmatpush1.bf16.msra.mxu1 %v8141_v19  ;;  %v8233_v14 = vld [vmem:[%s11106_s1 + $0x1388] ss:$16 sps:$4 sm:$0xff]   ;;  %v8238_v19 = vld [vmem:[%s11106_s1 + $0x13a4] ss:$16 sps:$4 sm:$0xff]  }
 0x238   :  { %5207 = vmatprep.subr.bf16.mxu0 %v8146_v20  ;;  %5740 = vmatprep.subr.bf16.mxu1 %v8149_v16  ;;  %v8241_v20 = vld [vmem:[%s11106_s1 + $0x13ac] ss:$16 sps:$4 sm:$0xff]   ;;  %v8236_v16 = vld [vmem:[%s11106_s1 + $0x13a0] ss:$16 sps:$4 sm:$0xff]  }
 0x23b   :  { %5208 = vmatpush1.bf16.msra.mxu0 %v8144_v22  ;;  %5741 = vmatpush1.bf16.msra.mxu1 %v8147_v23  ;;  %v8239_v22 = vld [vmem:[%s11106_s1 + $0x13a8] ss:$16 sps:$4 sm:$0xff]   ;;  %v8244_v23 = vld [vmem:[%s11106_s1 + $0x13c4] ss:$16 sps:$4 sm:$0xff]  }
 0x23c   :  { %5209 = vmatprep.subr.bf16.mxu0 %v8152_v18  ;;  %5742 = vmatprep.subr.bf16.mxu1 %v8155_v25  ;;  %v8247_v18 = vld [vmem:[%s11106_s1 + $0x13cc] ss:$16 sps:$4 sm:$0xff]   ;;  %v8242_v25 = vld [vmem:[%s11106_s1 + $0x13c0] ss:$16 sps:$4 sm:$0xff]  }
 0x23f   :  { %5210 = vmatpush1.bf16.msra.mxu0 %v8150_v26  ;;  %5743 = vmatpush1.bf16.msra.mxu1 %v8153_v27  ;;  %v8245_v26 = vld [vmem:[%s11106_s1 + $0x13c8] ss:$16 sps:$4 sm:$0xff]   ;;  %v8250_v27 = vld [vmem:[%s11106_s1 + $0x13e4] ss:$16 sps:$4 sm:$0xff]  }
 0x240   :  { %5220 = vmatprep.subr.bf16.mxu0 %v8160_v28  ;;  %5753 = vmatprep.subr.bf16.mxu1 %v8163_v29  ;;  %v8253_v28 = vld [vmem:[%s11106_s1 + $0x13ec] ss:$16 sps:$4 sm:$0xff]   ;;  %v8248_v29 = vld [vmem:[%s11106_s1 + $0x13e0] ss:$16 sps:$4 sm:$0xff]  }
 0x242   :  { %5212 = vmatmul.mubr.bf16.vlgmr.msra.gmra.mrb[0].mxu0 %v6303_v24  ;;  %5745 = vmatmul.mubr.bf16.vlgmr.msra.gmra.mrb[0].mxu1 %v6303_v24  ;;  %v8251_v24 = vld [vmem:[%s11106_s1 + $0x13e8] ss:$16 sps:$4 sm:$0xff]  }
 0x243   :  { %5221 = vmatpush1.bf16.msra.mxu0 %v8158_v31  ;;  %5754 = vmatpush1.bf16.msra.mxu1 %v8161_v32  ;;  %v8258_v31 = vld [vmem:[%s11106_s1 + $0x1404] ss:$16 sps:$4 sm:$0xff]   ;;  %v8261_v32 = vld [vmem:[%s11106_s1 + $0x140c] ss:$16 sps:$4 sm:$0xff]  }
 0x244   :  { %5222 = vmatprep.subr.bf16.mxu0 %v8166_v21  ;;  %5755 = vmatprep.subr.bf16.mxu1 %v8169_v33  ;;  %v6305_v21 = vcombine.low %v10356_v30, %v10356_v30  ;;  %v10557_v33 = vld [vmem:[%s11107_s0 + $0x50] sm:$0xff] }
 0x245   :  { %5252 = vmatprep.mubr.bf16.mxu0 %v6306_v34  ;;  %5785 = vmatprep.mubr.bf16.mxu1 %v6306_v34  ;;  %v8256_v34 = vld [vmem:[%s11106_s1 + $0x1400] ss:$16 sps:$4 sm:$0xff]   ;;  %v8264_v30 = vld [vmem:[%s11106_s1 + $0x1424] ss:$16 sps:$4 sm:$0xff]  }
 0x247   :  { %5223 = vmatpush1.bf16.msra.mxu0 %v8164_v35  ;;  %5756 = vmatpush1.bf16.msra.mxu1 %v8167_v36  ;;  %v8259_v35 = vld [vmem:[%s11106_s1 + $0x1408] ss:$16 sps:$4 sm:$0xff]   ;;  %v8267_v36 = vld [vmem:[%s11106_s1 + $0x142c] ss:$16 sps:$4 sm:$0xff]  }
 0x248   :  { %5224 = vmatprep.subr.bf16.mxu0 %v8172_v37  ;;  %5757 = vmatprep.subr.bf16.mxu1 %v8175_v38  ;;  %v6308_v37 = vcombine.high %v10557_v33, %v10557_v33  ;;  %v8262_v38 = vld [vmem:[%s11106_s1 + $0x1420] ss:$16 sps:$4 sm:$0xff]  }
 0x24b   :  { %5225 = vmatpush1.bf16.msra.mxu0 %v8170_v39  ;;  %5758 = vmatpush1.bf16.msra.mxu1 %v8173_v40  ;;  %v8265_v39 = vld [vmem:[%s11106_s1 + $0x1428] ss:$16 sps:$4 sm:$0xff]   ;;  %v8270_v40 = vld [vmem:[%s11106_s1 + $0x1444] ss:$16 sps:$4 sm:$0xff]  }
 0x24c   :  { %5226 = vmatprep.subr.bf16.mxu0 %v8178_v41  ;;  %5759 = vmatprep.subr.bf16.mxu1 %v8181_v42  ;;  %v8273_v41 = vld [vmem:[%s11106_s1 + $0x144c] ss:$16 sps:$4 sm:$0xff]   ;;  %v8268_v42 = vld [vmem:[%s11106_s1 + $0x1440] ss:$16 sps:$4 sm:$0xff]  }
 0x24f   :  { %5227 = vmatpush1.bf16.msra.mxu0 %v8176_v43  ;;  %5760 = vmatpush1.bf16.msra.mxu1 %v8179_v44  ;;  %v8271_v43 = vld [vmem:[%s11106_s1 + $0x1448] ss:$16 sps:$4 sm:$0xff]   ;;  %v8276_v44 = vld [vmem:[%s11106_s1 + $0x1464] ss:$16 sps:$4 sm:$0xff]  }
 0x250   :  { %5228 = vmatprep.subr.bf16.mxu0 %v8184_v45  ;;  %5761 = vmatprep.subr.bf16.mxu1 %v8187_v46  ;;  %v8279_v45 = vld [vmem:[%s11106_s1 + $0x146c] ss:$16 sps:$4 sm:$0xff]   ;;  %v8274_v46 = vld [vmem:[%s11106_s1 + $0x1460] ss:$16 sps:$4 sm:$0xff]  }
 0x253   :  { %5229 = vmatpush1.bf16.msra.mxu0 %v8182_v47  ;;  %5762 = vmatpush1.bf16.msra.mxu1 %v8185_v48  ;;  %v8277_v47 = vld [vmem:[%s11106_s1 + $0x1468] ss:$16 sps:$4 sm:$0xff]   ;;  %v8282_v48 = vld [vmem:[%s11106_s1 + $0x1484] ss:$16 sps:$4 sm:$0xff]  }
 0x254   :  { %5230 = vmatprep.subr.bf16.mxu0 %v8190_v49  ;;  %5763 = vmatprep.subr.bf16.mxu1 %v8193_v50  ;;  %v8285_v49 = vld [vmem:[%s11106_s1 + $0x148c] ss:$16 sps:$4 sm:$0xff]   ;;  %v8280_v50 = vld [vmem:[%s11106_s1 + $0x1480] ss:$16 sps:$4 sm:$0xff]  }
 0x257   :  { %5231 = vmatpush1.bf16.msra.mxu0 %v8188_v51  ;;  %5764 = vmatpush1.bf16.msra.mxu1 %v8191_v52  ;;  %v8283_v51 = vld [vmem:[%s11106_s1 + $0x1488] ss:$16 sps:$4 sm:$0xff]   ;;  %v8288_v52 = vld [vmem:[%s11106_s1 + $0x14a4] ss:$16 sps:$4 sm:$0xff]  }
 0x258   :  { %5232 = vmatprep.subr.bf16.mxu0 %v8196_v53  ;;  %5765 = vmatprep.subr.bf16.mxu1 %v8199_v54  ;;  %v8291_v53 = vld [vmem:[%s11106_s1 + $0x14ac] ss:$16 sps:$4 sm:$0xff]   ;;  %v8286_v54 = vld [vmem:[%s11106_s1 + $0x14a0] ss:$16 sps:$4 sm:$0xff]  }
 0x25b   :  { %5233 = vmatpush1.bf16.msra.mxu0 %v8194_v55  ;;  %5766 = vmatpush1.bf16.msra.mxu1 %v8197_v56  ;;  %v8289_v55 = vld [vmem:[%s11106_s1 + $0x14a8] ss:$16 sps:$4 sm:$0xff]   ;;  %v8294_v56 = vld [vmem:[%s11106_s1 + $0x14c4] ss:$16 sps:$4 sm:$0xff]  }
 0x25c   :  { %5234 = vmatprep.subr.bf16.mxu0 %v8202_v57  ;;  %5767 = vmatprep.subr.bf16.mxu1 %v8205_v58  ;;  %v8297_v57 = vld [vmem:[%s11106_s1 + $0x14cc] ss:$16 sps:$4 sm:$0xff]   ;;  %v8292_v58 = vld [vmem:[%s11106_s1 + $0x14c0] ss:$16 sps:$4 sm:$0xff]  }
 0x25f   :  { %5235 = vmatpush1.bf16.msra.mxu0 %v8200_v59  ;;  %5768 = vmatpush1.bf16.msra.mxu1 %v8203_v60  ;;  %v8295_v59 = vld [vmem:[%s11106_s1 + $0x14c8] ss:$16 sps:$4 sm:$0xff]   ;;  %v8300_v60 = vld [vmem:[%s11106_s1 + $0x14e4] ss:$16 sps:$4 sm:$0xff]  }
 0x260   :  { %5236 = vmatprep.subr.bf16.mxu0 %v8208_v61  ;;  %5769 = vmatprep.subr.bf16.mxu1 %v8211_v62  ;;  %v8303_v61 = vld [vmem:[%s11106_s1 + $0x14ec] ss:$16 sps:$4 sm:$0xff]   ;;  %v8298_v62 = vld [vmem:[%s11106_s1 + $0x14e0] ss:$16 sps:$4 sm:$0xff]  }
 0x263   :  { %5237 = vmatpush1.bf16.msra.mxu0 %v8206_v63  ;;  %5770 = vmatpush1.bf16.msra.mxu1 %v8209_v0  ;;  %v8301_v63 = vld [vmem:[%s11106_s1 + $0x14e8] ss:$16 sps:$4 sm:$0xff]   ;;  %v8306_v0 = vld [vmem:[%s11106_s1 + $0x1504] ss:$16 sps:$4 sm:$0xff]  }
 0x264   :  { %5238 = vmatprep.subr.bf16.mxu0 %v8214_v1  ;;  %5771 = vmatprep.subr.bf16.mxu1 %v8217_v2  ;;  %v8309_v1 = vld [vmem:[%s11106_s1 + $0x150c] ss:$16 sps:$4 sm:$0xff]   ;;  %v8304_v2 = vld [vmem:[%s11106_s1 + $0x1500] ss:$16 sps:$4 sm:$0xff]  }
 0x267   :  { %5239 = vmatpush1.bf16.msra.mxu0 %v8212_v3  ;;  %5772 = vmatpush1.bf16.msra.mxu1 %v8215_v4  ;;  %v8307_v3 = vld [vmem:[%s11106_s1 + $0x1508] ss:$16 sps:$4 sm:$0xff]   ;;  %v8312_v4 = vld [vmem:[%s11106_s1 + $0x1524] ss:$16 sps:$4 sm:$0xff]  }
 0x268   :  { %5240 = vmatprep.subr.bf16.mxu0 %v8220_v5  ;;  %5773 = vmatprep.subr.bf16.mxu1 %v8223_v6  ;;  %v8315_v5 = vld [vmem:[%s11106_s1 + $0x152c] ss:$16 sps:$4 sm:$0xff]   ;;  %v8310_v6 = vld [vmem:[%s11106_s1 + $0x1520] ss:$16 sps:$4 sm:$0xff]  }
 0x26b   :  { %5241 = vmatpush1.bf16.msra.mxu0 %v8218_v7  ;;  %5774 = vmatpush1.bf16.msra.mxu1 %v8221_v8  ;;  %v8313_v7 = vld [vmem:[%s11106_s1 + $0x1528] ss:$16 sps:$4 sm:$0xff]   ;;  %v8318_v8 = vld [vmem:[%s11106_s1 + $0x1544] ss:$16 sps:$4 sm:$0xff]  }
 0x26c   :  { %5242 = vmatprep.subr.bf16.mxu0 %v8226_v9  ;;  %5775 = vmatprep.subr.bf16.mxu1 %v8229_v10  ;;  %v8321_v9 = vld [vmem:[%s11106_s1 + $0x154c] ss:$16 sps:$4 sm:$0xff]   ;;  %v8316_v10 = vld [vmem:[%s11106_s1 + $0x1540] ss:$16 sps:$4 sm:$0xff]  }
 0x26f   :  { %5243 = vmatpush1.bf16.msra.mxu0 %v8224_v12  ;;  %5776 = vmatpush1.bf16.msra.mxu1 %v8227_v13  ;;  %v8319_v12 = vld [vmem:[%s11106_s1 + $0x1548] ss:$16 sps:$4 sm:$0xff]   ;;  %v8324_v13 = vld [vmem:[%s11106_s1 + $0x1564] ss:$16 sps:$4 sm:$0xff]  }
 0x270   :  { %5244 = vmatprep.subr.bf16.mxu0 %v8232_v15  ;;  %5777 = vmatprep.subr.bf16.mxu1 %v8235_v11  ;;  %v8327_v15 = vld [vmem:[%s11106_s1 + $0x156c] ss:$16 sps:$4 sm:$0xff]   ;;  %v8322_v11 = vld [vmem:[%s11106_s1 + $0x1560] ss:$16 sps:$4 sm:$0xff]  }
 0x273   :  { %5245 = vmatpush1.bf16.msra.mxu0 %v8230_v17  ;;  %5778 = vmatpush1.bf16.msra.mxu1 %v8233_v14  ;;  %v8325_v17 = vld [vmem:[%s11106_s1 + $0x1568] ss:$16 sps:$4 sm:$0xff]   ;;  %v8330_v14 = vld [vmem:[%s11106_s1 + $0x1584] ss:$16 sps:$4 sm:$0xff]  }
 0x274   :  { %5246 = vmatprep.subr.bf16.mxu0 %v8238_v19  ;;  %5779 = vmatprep.subr.bf16.mxu1 %v8241_v20  ;;  %v8333_v19 = vld [vmem:[%s11106_s1 + $0x158c] ss:$16 sps:$4 sm:$0xff]   ;;  %v8328_v20 = vld [vmem:[%s11106_s1 + $0x1580] ss:$16 sps:$4 sm:$0xff]  }
 0x277   :  { %5247 = vmatpush1.bf16.msra.mxu0 %v8236_v16  ;;  %5780 = vmatpush1.bf16.msra.mxu1 %v8239_v22  ;;  %v8331_v16 = vld [vmem:[%s11106_s1 + $0x1588] ss:$16 sps:$4 sm:$0xff]   ;;  %v8336_v22 = vld [vmem:[%s11106_s1 + $0x15a4] ss:$16 sps:$4 sm:$0xff]  }
 0x278   :  { %5248 = vmatprep.subr.bf16.mxu0 %v8244_v23  ;;  %5781 = vmatprep.subr.bf16.mxu1 %v8247_v18  ;;  %v8339_v23 = vld [vmem:[%s11106_s1 + $0x15ac] ss:$16 sps:$4 sm:$0xff]   ;;  %v8334_v18 = vld [vmem:[%s11106_s1 + $0x15a0] ss:$16 sps:$4 sm:$0xff]  }
 0x27b   :  { %5249 = vmatpush1.bf16.msra.mxu0 %v8242_v25  ;;  %5782 = vmatpush1.bf16.msra.mxu1 %v8245_v26  ;;  %v8337_v25 = vld [vmem:[%s11106_s1 + $0x15a8] ss:$16 sps:$4 sm:$0xff]   ;;  %v8342_v26 = vld [vmem:[%s11106_s1 + $0x15c4] ss:$16 sps:$4 sm:$0xff]  }
 0x27c   :  { %5250 = vmatprep.subr.bf16.mxu0 %v8250_v27  ;;  %5783 = vmatprep.subr.bf16.mxu1 %v8253_v28  ;;  %v8345_v27 = vld [vmem:[%s11106_s1 + $0x15cc] ss:$16 sps:$4 sm:$0xff]   ;;  %v8340_v28 = vld [vmem:[%s11106_s1 + $0x15c0] ss:$16 sps:$4 sm:$0xff]  }
 0x27f   :  { %5251 = vmatpush1.bf16.msra.mxu0 %v8248_v29  ;;  %5784 = vmatpush1.bf16.msra.mxu1 %v8251_v24  ;;  %v8343_v29 = vld [vmem:[%s11106_s1 + $0x15c8] ss:$16 sps:$4 sm:$0xff]   ;;  %v8348_v24 = vld [vmem:[%s11106_s1 + $0x15e4] ss:$16 sps:$4 sm:$0xff]  }
 0x280   :  { %5261 = vmatprep.subr.bf16.mxu0 %v8258_v31  ;;  %5794 = vmatprep.subr.bf16.mxu1 %v8261_v32  ;;  %v8351_v31 = vld [vmem:[%s11106_s1 + $0x15ec] ss:$16 sps:$4 sm:$0xff]   ;;  %v8346_v32 = vld [vmem:[%s11106_s1 + $0x15e0] ss:$16 sps:$4 sm:$0xff]  }
 0x282   :  { %5253 = vmatmul.mubr.bf16.vlgmr.msra.gmra.mrb[0].mxu0 %v6305_v21  ;;  %5786 = vmatmul.mubr.bf16.vlgmr.msra.gmra.mrb[0].mxu1 %v6305_v21  ;;  %v8349_v21 = vld [vmem:[%s11106_s1 + $0x15e8] ss:$16 sps:$4 sm:$0xff]  }
 0x283   :  { %5262 = vmatpush1.bf16.msra.mxu0 %v8256_v34  ;;  %5795 = vmatpush1.bf16.msra.mxu1 %v8259_v35  ;;  %v8356_v34 = vld [vmem:[%s11106_s1 + $0x1604] ss:$16 sps:$4 sm:$0xff]   ;;  %v8359_v35 = vld [vmem:[%s11106_s1 + $0x160c] ss:$16 sps:$4 sm:$0xff]  }
 0x284   :  { %5263 = vmatprep.subr.bf16.mxu0 %v8264_v30  ;;  %5796 = vmatprep.subr.bf16.mxu1 %v8267_v36  ;;  %v6307_v30 = vcombine.low %v10557_v33, %v10557_v33  ;;  %v10758_v36 = vld [vmem:[%s11107_s0 + $0x58] sm:$0xff]  ;;  %v8362_v33 = vld [vmem:[%s11106_s1 + $0x1624] ss:$16 sps:$4 sm:$0xff]  }
 0x285   :  { %5293 = vmatprep.mubr.bf16.mxu0 %v6308_v37  ;;  %5826 = vmatprep.mubr.bf16.mxu1 %v6308_v37  ;;  %v8354_v37 = vld [vmem:[%s11106_s1 + $0x1600] ss:$16 sps:$4 sm:$0xff]  }
 0x287   :  { %5264 = vmatpush1.bf16.msra.mxu0 %v8262_v38  ;;  %5797 = vmatpush1.bf16.msra.mxu1 %v8265_v39  ;;  %v8357_v38 = vld [vmem:[%s11106_s1 + $0x1608] ss:$16 sps:$4 sm:$0xff]   ;;  %v8365_v39 = vld [vmem:[%s11106_s1 + $0x162c] ss:$16 sps:$4 sm:$0xff]  }
 0x288   :  { %5265 = vmatprep.subr.bf16.mxu0 %v8270_v40  ;;  %5798 = vmatprep.subr.bf16.mxu1 %v8273_v41  ;;  %v6310_v40 = vcombine.high %v10758_v36, %v10758_v36  ;;  %v8360_v41 = vld [vmem:[%s11106_s1 + $0x1620] ss:$16 sps:$4 sm:$0xff]  }
 0x28b   :  { %5266 = vmatpush1.bf16.msra.mxu0 %v8268_v42  ;;  %5799 = vmatpush1.bf16.msra.mxu1 %v8271_v43  ;;  %v8363_v42 = vld [vmem:[%s11106_s1 + $0x1628] ss:$16 sps:$4 sm:$0xff]   ;;  %v8368_v43 = vld [vmem:[%s11106_s1 + $0x1644] ss:$16 sps:$4 sm:$0xff]  }
 0x28c   :  { %5267 = vmatprep.subr.bf16.mxu0 %v8276_v44  ;;  %5800 = vmatprep.subr.bf16.mxu1 %v8279_v45  ;;  %v8371_v44 = vld [vmem:[%s11106_s1 + $0x164c] ss:$16 sps:$4 sm:$0xff]   ;;  %v8366_v45 = vld [vmem:[%s11106_s1 + $0x1640] ss:$16 sps:$4 sm:$0xff]  }
 0x28f   :  { %5268 = vmatpush1.bf16.msra.mxu0 %v8274_v46  ;;  %5801 = vmatpush1.bf16.msra.mxu1 %v8277_v47  ;;  %v8369_v46 = vld [vmem:[%s11106_s1 + $0x1648] ss:$16 sps:$4 sm:$0xff]   ;;  %v8374_v47 = vld [vmem:[%s11106_s1 + $0x1664] ss:$16 sps:$4 sm:$0xff]  }
 0x290   :  { %5269 = vmatprep.subr.bf16.mxu0 %v8282_v48  ;;  %5802 = vmatprep.subr.bf16.mxu1 %v8285_v49  ;;  %v8377_v48 = vld [vmem:[%s11106_s1 + $0x166c] ss:$16 sps:$4 sm:$0xff]   ;;  %v8372_v49 = vld [vmem:[%s11106_s1 + $0x1660] ss:$16 sps:$4 sm:$0xff]  }
 0x293   :  { %5270 = vmatpush1.bf16.msra.mxu0 %v8280_v50  ;;  %5803 = vmatpush1.bf16.msra.mxu1 %v8283_v51  ;;  %v8375_v50 = vld [vmem:[%s11106_s1 + $0x1668] ss:$16 sps:$4 sm:$0xff]   ;;  %v8380_v51 = vld [vmem:[%s11106_s1 + $0x1684] ss:$16 sps:$4 sm:$0xff]  }
 0x294   :  { %5271 = vmatprep.subr.bf16.mxu0 %v8288_v52  ;;  %5804 = vmatprep.subr.bf16.mxu1 %v8291_v53  ;;  %v8383_v52 = vld [vmem:[%s11106_s1 + $0x168c] ss:$16 sps:$4 sm:$0xff]   ;;  %v8378_v53 = vld [vmem:[%s11106_s1 + $0x1680] ss:$16 sps:$4 sm:$0xff]  }
 0x297   :  { %5272 = vmatpush1.bf16.msra.mxu0 %v8286_v54  ;;  %5805 = vmatpush1.bf16.msra.mxu1 %v8289_v55  ;;  %v8381_v54 = vld [vmem:[%s11106_s1 + $0x1688] ss:$16 sps:$4 sm:$0xff]   ;;  %v8386_v55 = vld [vmem:[%s11106_s1 + $0x16a4] ss:$16 sps:$4 sm:$0xff]  }
 0x298   :  { %5273 = vmatprep.subr.bf16.mxu0 %v8294_v56  ;;  %5806 = vmatprep.subr.bf16.mxu1 %v8297_v57  ;;  %v8389_v56 = vld [vmem:[%s11106_s1 + $0x16ac] ss:$16 sps:$4 sm:$0xff]   ;;  %v8384_v57 = vld [vmem:[%s11106_s1 + $0x16a0] ss:$16 sps:$4 sm:$0xff]  }
 0x29b   :  { %5274 = vmatpush1.bf16.msra.mxu0 %v8292_v58  ;;  %5807 = vmatpush1.bf16.msra.mxu1 %v8295_v59  ;;  %v8387_v58 = vld [vmem:[%s11106_s1 + $0x16a8] ss:$16 sps:$4 sm:$0xff]   ;;  %v8392_v59 = vld [vmem:[%s11106_s1 + $0x16c4] ss:$16 sps:$4 sm:$0xff]  }
 0x29c   :  { %5275 = vmatprep.subr.bf16.mxu0 %v8300_v60  ;;  %5808 = vmatprep.subr.bf16.mxu1 %v8303_v61  ;;  %v8395_v60 = vld [vmem:[%s11106_s1 + $0x16cc] ss:$16 sps:$4 sm:$0xff]   ;;  %v8390_v61 = vld [vmem:[%s11106_s1 + $0x16c0] ss:$16 sps:$4 sm:$0xff]  }
 0x29f   :  { %5276 = vmatpush1.bf16.msra.mxu0 %v8298_v62  ;;  %5809 = vmatpush1.bf16.msra.mxu1 %v8301_v63  ;;  %v8393_v62 = vld [vmem:[%s11106_s1 + $0x16c8] ss:$16 sps:$4 sm:$0xff]   ;;  %v8398_v63 = vld [vmem:[%s11106_s1 + $0x16e4] ss:$16 sps:$4 sm:$0xff]  }
 0x2a0   :  { %5277 = vmatprep.subr.bf16.mxu0 %v8306_v0  ;;  %5810 = vmatprep.subr.bf16.mxu1 %v8309_v1  ;;  %v8401_v0 = vld [vmem:[%s11106_s1 + $0x16ec] ss:$16 sps:$4 sm:$0xff]   ;;  %v8396_v1 = vld [vmem:[%s11106_s1 + $0x16e0] ss:$16 sps:$4 sm:$0xff]  }
 0x2a3   :  { %5278 = vmatpush1.bf16.msra.mxu0 %v8304_v2  ;;  %5811 = vmatpush1.bf16.msra.mxu1 %v8307_v3  ;;  %v8399_v2 = vld [vmem:[%s11106_s1 + $0x16e8] ss:$16 sps:$4 sm:$0xff]   ;;  %v8404_v3 = vld [vmem:[%s11106_s1 + $0x1704] ss:$16 sps:$4 sm:$0xff]  }
 0x2a4   :  { %5279 = vmatprep.subr.bf16.mxu0 %v8312_v4  ;;  %5812 = vmatprep.subr.bf16.mxu1 %v8315_v5  ;;  %v8407_v4 = vld [vmem:[%s11106_s1 + $0x170c] ss:$16 sps:$4 sm:$0xff]   ;;  %v8402_v5 = vld [vmem:[%s11106_s1 + $0x1700] ss:$16 sps:$4 sm:$0xff]  }
 0x2a7   :  { %5280 = vmatpush1.bf16.msra.mxu0 %v8310_v6  ;;  %5813 = vmatpush1.bf16.msra.mxu1 %v8313_v7  ;;  %v8405_v6 = vld [vmem:[%s11106_s1 + $0x1708] ss:$16 sps:$4 sm:$0xff]   ;;  %v8410_v7 = vld [vmem:[%s11106_s1 + $0x1724] ss:$16 sps:$4 sm:$0xff]  }
 0x2a8   :  { %5281 = vmatprep.subr.bf16.mxu0 %v8318_v8  ;;  %5814 = vmatprep.subr.bf16.mxu1 %v8321_v9  ;;  %v8413_v8 = vld [vmem:[%s11106_s1 + $0x172c] ss:$16 sps:$4 sm:$0xff]   ;;  %v8408_v9 = vld [vmem:[%s11106_s1 + $0x1720] ss:$16 sps:$4 sm:$0xff]  }
 0x2ab   :  { %5282 = vmatpush1.bf16.msra.mxu0 %v8316_v10  ;;  %5815 = vmatpush1.bf16.msra.mxu1 %v8319_v12  ;;  %v8411_v10 = vld [vmem:[%s11106_s1 + $0x1728] ss:$16 sps:$4 sm:$0xff]   ;;  %v8416_v12 = vld [vmem:[%s11106_s1 + $0x1744] ss:$16 sps:$4 sm:$0xff]  }
 0x2ac   :  { %5283 = vmatprep.subr.bf16.mxu0 %v8324_v13  ;;  %5816 = vmatprep.subr.bf16.mxu1 %v8327_v15  ;;  %v8419_v13 = vld [vmem:[%s11106_s1 + $0x174c] ss:$16 sps:$4 sm:$0xff]   ;;  %v8414_v15 = vld [vmem:[%s11106_s1 + $0x1740] ss:$16 sps:$4 sm:$0xff]  }
 0x2af   :  { %5284 = vmatpush1.bf16.msra.mxu0 %v8322_v11  ;;  %5817 = vmatpush1.bf16.msra.mxu1 %v8325_v17  ;;  %v8417_v11 = vld [vmem:[%s11106_s1 + $0x1748] ss:$16 sps:$4 sm:$0xff]   ;;  %v8422_v17 = vld [vmem:[%s11106_s1 + $0x1764] ss:$16 sps:$4 sm:$0xff]  }
 0x2b0   :  { %5285 = vmatprep.subr.bf16.mxu0 %v8330_v14  ;;  %5818 = vmatprep.subr.bf16.mxu1 %v8333_v19  ;;  %v8425_v14 = vld [vmem:[%s11106_s1 + $0x176c] ss:$16 sps:$4 sm:$0xff]   ;;  %v8420_v19 = vld [vmem:[%s11106_s1 + $0x1760] ss:$16 sps:$4 sm:$0xff]  }
 0x2b3   :  { %5286 = vmatpush1.bf16.msra.mxu0 %v8328_v20  ;;  %5819 = vmatpush1.bf16.msra.mxu1 %v8331_v16  ;;  %v8423_v20 = vld [vmem:[%s11106_s1 + $0x1768] ss:$16 sps:$4 sm:$0xff]   ;;  %v8428_v16 = vld [vmem:[%s11106_s1 + $0x1784] ss:$16 sps:$4 sm:$0xff]  }
 0x2b4   :  { %5287 = vmatprep.subr.bf16.mxu0 %v8336_v22  ;;  %5820 = vmatprep.subr.bf16.mxu1 %v8339_v23  ;;  %v8431_v22 = vld [vmem:[%s11106_s1 + $0x178c] ss:$16 sps:$4 sm:$0xff]   ;;  %v8426_v23 = vld [vmem:[%s11106_s1 + $0x1780] ss:$16 sps:$4 sm:$0xff]  }
 0x2b7   :  { %5288 = vmatpush1.bf16.msra.mxu0 %v8334_v18  ;;  %5821 = vmatpush1.bf16.msra.mxu1 %v8337_v25  ;;  %v8429_v18 = vld [vmem:[%s11106_s1 + $0x1788] ss:$16 sps:$4 sm:$0xff]   ;;  %v8434_v25 = vld [vmem:[%s11106_s1 + $0x17a4] ss:$16 sps:$4 sm:$0xff]  }
 0x2b8   :  { %5289 = vmatprep.subr.bf16.mxu0 %v8342_v26  ;;  %5822 = vmatprep.subr.bf16.mxu1 %v8345_v27  ;;  %v8437_v26 = vld [vmem:[%s11106_s1 + $0x17ac] ss:$16 sps:$4 sm:$0xff]   ;;  %v8432_v27 = vld [vmem:[%s11106_s1 + $0x17a0] ss:$16 sps:$4 sm:$0xff]  }
 0x2bb   :  { %5290 = vmatpush1.bf16.msra.mxu0 %v8340_v28  ;;  %5823 = vmatpush1.bf16.msra.mxu1 %v8343_v29  ;;  %v8435_v28 = vld [vmem:[%s11106_s1 + $0x17a8] ss:$16 sps:$4 sm:$0xff]   ;;  %v8440_v29 = vld [vmem:[%s11106_s1 + $0x17c4] ss:$16 sps:$4 sm:$0xff]  }
 0x2bc   :  { %5291 = vmatprep.subr.bf16.mxu0 %v8348_v24  ;;  %5824 = vmatprep.subr.bf16.mxu1 %v8351_v31  ;;  %v8443_v24 = vld [vmem:[%s11106_s1 + $0x17cc] ss:$16 sps:$4 sm:$0xff]   ;;  %v8438_v31 = vld [vmem:[%s11106_s1 + $0x17c0] ss:$16 sps:$4 sm:$0xff]  }
 0x2bf   :  { %5292 = vmatpush1.bf16.msra.mxu0 %v8346_v32  ;;  %5825 = vmatpush1.bf16.msra.mxu1 %v8349_v21  ;;  %v8441_v32 = vld [vmem:[%s11106_s1 + $0x17c8] ss:$16 sps:$4 sm:$0xff]   ;;  %v8446_v21 = vld [vmem:[%s11106_s1 + $0x17e4] ss:$16 sps:$4 sm:$0xff]  }
 0x2c0   :  { %5302 = vmatprep.subr.bf16.mxu0 %v8356_v34  ;;  %5835 = vmatprep.subr.bf16.mxu1 %v8359_v35  ;;  %v8449_v34 = vld [vmem:[%s11106_s1 + $0x17ec] ss:$16 sps:$4 sm:$0xff]   ;;  %v8444_v35 = vld [vmem:[%s11106_s1 + $0x17e0] ss:$16 sps:$4 sm:$0xff]  }
 0x2c2   :  { %5294 = vmatmul.mubr.bf16.vlgmr.msra.gmra.mrb[0].mxu0 %v6307_v30  ;;  %5827 = vmatmul.mubr.bf16.vlgmr.msra.gmra.mrb[0].mxu1 %v6307_v30  ;;  %v8447_v30 = vld [vmem:[%s11106_s1 + $0x17e8] ss:$16 sps:$4 sm:$0xff]  }
 0x2c3   :  { %5303 = vmatpush1.bf16.msra.mxu0 %v8354_v37  ;;  %5836 = vmatpush1.bf16.msra.mxu1 %v8357_v38  ;;  %v8454_v37 = vld [vmem:[%s11106_s1 + $0x1804] ss:$16 sps:$4 sm:$0xff]   ;;  %v8457_v38 = vld [vmem:[%s11106_s1 + $0x180c] ss:$16 sps:$4 sm:$0xff]  }
 0x2c4   :  { %5304 = vmatprep.subr.bf16.mxu0 %v8362_v33  ;;  %5837 = vmatprep.subr.bf16.mxu1 %v8365_v39  ;;  %v6309_v33 = vcombine.low %v10758_v36, %v10758_v36  ;;  %v8452_v39 = vld [vmem:[%s11106_s1 + $0x1800] ss:$16 sps:$4 sm:$0xff]   ;;  %v8463_v36 = vld [vmem:[%s11106_s1 + $0x182c] ss:$16 sps:$4 sm:$0xff]  }
 0x2c5   :  { %5334 = vmatprep.mubr.bf16.mxu0 %v6310_v40  ;;  %5867 = vmatprep.mubr.bf16.mxu1 %v6310_v40  ;;  %v8455_v40 = vld [vmem:[%s11106_s1 + $0x1808] ss:$16 sps:$4 sm:$0xff]  }
 0x2c7   :  { %5305 = vmatpush1.bf16.msra.mxu0 %v8360_v41  ;;  %5838 = vmatpush1.bf16.msra.mxu1 %v8363_v42  ;;  %v8460_v41 = vld [vmem:[%s11106_s1 + $0x1824] ss:$16 sps:$4 sm:$0xff]   ;;  %v8458_v42 = vld [vmem:[%s11106_s1 + $0x1820] ss:$16 sps:$4 sm:$0xff]  }
 0x2c8   :  { %5306 = vmatprep.subr.bf16.mxu0 %v8368_v43  ;;  %5839 = vmatprep.subr.bf16.mxu1 %v8371_v44  ;;  %v8461_v43 = vld [vmem:[%s11106_s1 + $0x1828] ss:$16 sps:$4 sm:$0xff]   ;;  %v8466_v44 = vld [vmem:[%s11106_s1 + $0x1844] ss:$16 sps:$4 sm:$0xff]  }
 0x2cb   :  { %5307 = vmatpush1.bf16.msra.mxu0 %v8366_v45  ;;  %5840 = vmatpush1.bf16.msra.mxu1 %v8369_v46  ;;  %v8469_v45 = vld [vmem:[%s11106_s1 + $0x184c] ss:$16 sps:$4 sm:$0xff]   ;;  %v8513_v46 = vmov 0  }
 0x2cc   :  { %5308 = vmatprep.subr.bf16.mxu0 %v8374_v47  ;;  %5841 = vmatprep.subr.bf16.mxu1 %v8377_v48  ;;  %v8464_v47 = vld [vmem:[%s11106_s1 + $0x1840] ss:$16 sps:$4 sm:$0xff]   ;;  %v8467_v48 = vld [vmem:[%s11106_s1 + $0x1848] ss:$16 sps:$4 sm:$0xff]  }
 0x2cf   :  { %5309 = vmatpush1.bf16.msra.mxu0 %v8372_v49  ;;  %5842 = vmatpush1.bf16.msra.mxu1 %v8375_v50  ;;  %v8472_v49 = vld [vmem:[%s11106_s1 + $0x1864] ss:$16 sps:$4 sm:$0xff]   ;;  %v8475_v50 = vld [vmem:[%s11106_s1 + $0x186c] ss:$16 sps:$4 sm:$0xff]  }
 0x2d0   :  { %5310 = vmatprep.subr.bf16.mxu0 %v8380_v51  ;;  %5843 = vmatprep.subr.bf16.mxu1 %v8383_v52  ;;  %v8470_v51 = vld [vmem:[%s11106_s1 + $0x1860] ss:$16 sps:$4 sm:$0xff]   ;;  %v8473_v52 = vld [vmem:[%s11106_s1 + $0x1868] ss:$16 sps:$4 sm:$0xff]  }
 0x2d3   :  { %5311 = vmatpush1.bf16.msra.mxu0 %v8378_v53  ;;  %5844 = vmatpush1.bf16.msra.mxu1 %v8381_v54  ;;  %v8477_v53 = vld [vmem:[%s11108_s3 + $0x40] sm:$0xff]  }
 0x2d4   :  { %5312 = vmatprep.subr.bf16.mxu0 %v8386_v55  ;;  %5845 = vmatprep.subr.bf16.mxu1 %v8389_v56  ;;  %v8478_v54 = vld [vmem:[%s11108_s3 + $0xc0] sm:$0xff]  }
 0x2d5   :  { %v8476_v55 = vld [vmem:[%s11107_s0 + $0x60] ss:$0 sps:$4 sm:$0xff]  }
 0x2d6   :  { %v8479_v56 = vld [vmem:[%s11108_s3] sm:$0xff]  }
 0x2d7   :  { %5313 = vmatpush1.bf16.msra.mxu0 %v8384_v57  ;;  %5846 = vmatpush1.bf16.msra.mxu1 %v8387_v58  ;;  %v8480_v57 = vld [vmem:[%s11108_s3 + $0x80] sm:$0xff]   ;;  %v8481_v58 = vld [vmem:[%s11108_s3 + $0x48] sm:$0xff]  }
 0x2d8   :  { %5314 = vmatprep.subr.bf16.mxu0 %v8392_v59  ;;  %5847 = vmatprep.subr.bf16.mxu1 %v8395_v60  ;;  %v8482_v59 = vld [vmem:[%s11108_s3 + $0xc8] sm:$0xff]  }
 0x2d9   :  { %v8483_v60 = vld [vmem:[%s11108_s3 + $0x8] sm:$0xff]  }
 0x2db   :  { %5315 = vmatpush1.bf16.msra.mxu0 %v8390_v61  ;;  %5848 = vmatpush1.bf16.msra.mxu1 %v8393_v62  ;;  %v8484_v61 = vld [vmem:[%s11108_s3 + $0x88] sm:$0xff]   ;;  %v8485_v62 = vld [vmem:[%s11108_s3 + $0x50] sm:$0xff]  }
 0x2dc   :  { %5316 = vmatprep.subr.bf16.mxu0 %v8398_v63  ;;  %5849 = vmatprep.subr.bf16.mxu1 %v8401_v0  ;;  %v8486_v63 = vld [vmem:[%s11108_s3 + $0xd0] sm:$0xff]  }
 0x2dd   :  { %v8487_v0 = vld [vmem:[%s11108_s3 + $0x10] sm:$0xff]  }
 0x2df   :  { %5317 = vmatpush1.bf16.msra.mxu0 %v8396_v1  ;;  %5850 = vmatpush1.bf16.msra.mxu1 %v8399_v2  ;;  %v8488_v1 = vld [vmem:[%s11108_s3 + $0x90] sm:$0xff]   ;;  %v8489_v2 = vld [vmem:[%s11108_s3 + $0x58] sm:$0xff]  }
 0x2e0   :  { %5318 = vmatprep.subr.bf16.mxu0 %v8404_v3  ;;  %5851 = vmatprep.subr.bf16.mxu1 %v8407_v4  ;;  %v8490_v3 = vld [vmem:[%s11108_s3 + $0xd8] sm:$0xff]  }
 0x2e1   :  { %v8491_v4 = vld [vmem:[%s11108_s3 + $0x18] sm:$0xff]  }
 0x2e3   :  { %5319 = vmatpush1.bf16.msra.mxu0 %v8402_v5  ;;  %5852 = vmatpush1.bf16.msra.mxu1 %v8405_v6  ;;  %v8492_v5 = vld [vmem:[%s11108_s3 + $0x98] sm:$0xff]   ;;  %v8493_v6 = vld [vmem:[%s11108_s3 + $0x60] sm:$0xff]  }
 0x2e4   :  { %5320 = vmatprep.subr.bf16.mxu0 %v8410_v7  ;;  %5853 = vmatprep.subr.bf16.mxu1 %v8413_v8  ;;  %v8494_v7 = vld [vmem:[%s11108_s3 + $0xe0] sm:$0xff]  }
 0x2e5   :  { %v8495_v8 = vld [vmem:[%s11108_s3 + $0x20] sm:$0xff]  }
 0x2e7   :  { %5321 = vmatpush1.bf16.msra.mxu0 %v8408_v9  ;;  %5854 = vmatpush1.bf16.msra.mxu1 %v8411_v10  ;;  %v8496_v9 = vld [vmem:[%s11108_s3 + $0xa0] sm:$0xff]   ;;  %v8497_v10 = vld [vmem:[%s11108_s3 + $0x68] sm:$0xff]  }
 0x2e8   :  { %5322 = vmatprep.subr.bf16.mxu0 %v8416_v12  ;;  %5855 = vmatprep.subr.bf16.mxu1 %v8419_v13  ;;  %v8498_v12 = vld [vmem:[%s11108_s3 + $0xe8] sm:$0xff]  }
 0x2e9   :  { %v8499_v13 = vld [vmem:[%s11108_s3 + $0x28] sm:$0xff]  }
 0x2eb   :  { %5323 = vmatpush1.bf16.msra.mxu0 %v8414_v15  ;;  %5856 = vmatpush1.bf16.msra.mxu1 %v8417_v11  ;;  %v8500_v15 = vld [vmem:[%s11108_s3 + $0xa8] sm:$0xff]   ;;  %v8501_v11 = vld [vmem:[%s11108_s3 + $0x70] sm:$0xff]  }
 0x2ec   :  { %5324 = vmatprep.subr.bf16.mxu0 %v8422_v17  ;;  %5857 = vmatprep.subr.bf16.mxu1 %v8425_v14  ;;  %v8502_v17 = vld [vmem:[%s11108_s3 + $0xf0] sm:$0xff]  }
 0x2ed   :  { %v8503_v14 = vld [vmem:[%s11108_s3 + $0x30] sm:$0xff]  }
 0x2ef   :  { %5325 = vmatpush1.bf16.msra.mxu0 %v8420_v19  ;;  %5858 = vmatpush1.bf16.msra.mxu1 %v8423_v20  ;;  %v8504_v19 = vld [vmem:[%s11108_s3 + $0xb0] sm:$0xff]   ;;  %v8505_v20 = vld [vmem:[%s11108_s3 + $0x78] sm:$0xff]  }
 0x2f0   :  { %5326 = vmatprep.subr.bf16.mxu0 %v8428_v16  ;;  %5859 = vmatprep.subr.bf16.mxu1 %v8431_v22  ;;  %v8506_v16 = vld [vmem:[%s11108_s3 + $0xf8] sm:$0xff]  }
 0x2f1   :  { %v8507_v22 = vld [vmem:[%s11108_s3 + $0x38] sm:$0xff]  }
 0x2f3   :  { %5327 = vmatpush1.bf16.msra.mxu0 %v8426_v23  ;;  %5860 = vmatpush1.bf16.msra.mxu1 %v8429_v18  ;;  %v8508_v23 = vld [vmem:[%s11108_s3 + $0xb8] sm:$0xff]   ;;  %v820_v18 = vlaneseq }
 0x2f4   :  { %5328 = vmatprep.subr.bf16.mxu0 %v8434_v25  ;;  %5861 = vmatprep.subr.bf16.mxu1 %v8437_v26 }
 0x2f5   :  { %v821_v25 = vshrl.u32 %v820_v18, 7 }
 0x2f7   :  { %5329 = vmatpush1.bf16.msra.mxu0 %v8432_v27  ;;  %5862 = vmatpush1.bf16.msra.mxu1 %v8435_v28  ;;  %v822_v26 = vsub.s32 0, %v821_v25  ;;  %v830_v27 = vsub.s32 2, %v821_v25  ;;  %v818_v28 = vld [vmem:[%s11109_s2] sm:$0xf] }
 0x2f8   :  { %5330 = vmatprep.subr.bf16.mxu0 %v8440_v29  ;;  %5863 = vmatprep.subr.bf16.mxu1 %v8443_v24  ;;  %v826_v29 = vsub.s32 1, %v821_v25  ;;  %v834_v24 = vsub.s32 3, %v821_v25 }
 0x2fb   :  { %5331 = vmatpush1.bf16.msra.mxu0 %v8438_v31  ;;  %5864 = vmatpush1.bf16.msra.mxu1 %v8441_v32  ;;  %v823_v31 = vrot.slane %v818_v28, %v822_v26  ;;  %v831_v32 = vrot.slane %v818_v28, %v830_v27 }
 0x2fc   :  { %5332 = vmatprep.subr.bf16.mxu0 %v8446_v21  ;;  %5865 = vmatprep.subr.bf16.mxu1 %v8449_v34  ;;  %v827_v21 = vrot.slane %v818_v28, %v826_v29  ;;  %v835_v34 = vrot.slane %v818_v28, %v834_v24 }
 0x2ff   :  { %5333 = vmatpush1.bf16.msra.mxu0 %v8444_v35  ;;  %5866 = vmatpush1.bf16.msra.mxu1 %v8447_v30 }
 0x300   :  { %5343 = vmatprep.subr.bf16.mxu0 %v8454_v37  ;;  %5876 = vmatprep.subr.bf16.mxu1 %v8457_v38 }
 0x302   :  { %5335 = vmatmul.mubr.bf16.vlgmr.msra.gmra.mrb[0].mxu0 %v6309_v33  ;;  %5868 = vmatmul.mubr.bf16.vlgmr.msra.gmra.mrb[0].mxu1 %v6309_v33 }
 0x303   :  { %5344 = vmatpush1.bf16.msra.mxu0 %v8452_v39  ;;  %5877 = vmatpush1.bf16.msra.mxu1 %v8455_v40 }
 0x304   :  { %5345 = vmatprep.subr.bf16.mxu0 %v8460_v41  ;;  %5878 = vmatprep.subr.bf16.mxu1 %v8463_v36 }
 0x305   :  { %5375 = vmatprep.mubr.bf16.mxu0 %v8513_v46  ;;  %5908 = vmatprep.mubr.bf16.mxu1 %v8513_v46 }
 0x307   :  { %5346 = vmatpush1.bf16.msra.mxu0 %v8458_v42  ;;  %5879 = vmatpush1.bf16.msra.mxu1 %v8461_v43 }
 0x308   :  { %5347 = vmatprep.subr.bf16.mxu0 %v8466_v44  ;;  %5880 = vmatprep.subr.bf16.mxu1 %v8469_v45 }
 0x30b   :  { %5348 = vmatpush1.bf16.msra.mxu0 %v8464_v47  ;;  %5881 = vmatpush1.bf16.msra.mxu1 %v8467_v48 }
 0x30c   :  { %5349 = vmatprep.subr.bf16.mxu0 %v8472_v49  ;;  %5882 = vmatprep.subr.bf16.mxu1 %v8475_v50 }
 0x30f   :  { %5350 = vmatpush1.bf16.msra.mxu0 %v8470_v51  ;;  %5883 = vmatpush1.bf16.msra.mxu1 %v8473_v52 }
 0x310   :  { %7131 = vmatprep.subr.bf16.mxu0 %v8477_v53  ;;  %7153 = vmatprep.subr.bf16.mxu1 %v8478_v54 }
 0x312   :  { %7096 = vmatmul.mubr.msk.bf16.vlgmr.msra.gmra.mrb[0].mxu0 %vm4847_vm0, %v8476_v55  ;;  %7097 = vmatmul.mubr.msk.bf16.vlgmr.msra.gmra.mrb[0].mxu1 %vm4847_vm0, %v8476_v55  ;;  %v7098_v55 = vld [vmem:[%s11110_s4] ss:$0 sm:$0xff] }
 0x313   :  { %7132 = vmatpush3.bf16.msra.mxu0 %v8479_v56  ;;  %7154 = vmatpush3.bf16.msra.mxu1 %v8480_v57 }
 0x314   :  { %7133 = vmatprep.subr.bf16.mxu0 %v8481_v58  ;;  %7155 = vmatprep.subr.bf16.mxu1 %v8482_v59  ;;  %v6269_v58 = vand.u32 127, %v820_v18 }
 0x316   :  { %vm6270_vm1 = vcmp.lt.s32.totalorder %v6269_v58, 6 }
 0x317   :  { %7134 = vmatpush3.bf16.msra.mxu0 %v8483_v60  ;;  %7156 = vmatpush3.bf16.msra.mxu1 %v8484_v61 }
 0x318   :  { %7135 = vmatprep.subr.bf16.mxu0 %v8485_v62  ;;  %7157 = vmatprep.subr.bf16.mxu1 %v8486_v63 }
 0x31b   :  { %7136 = vmatpush3.bf16.msra.mxu0 %v8487_v0  ;;  %7158 = vmatpush3.bf16.msra.mxu1 %v8488_v1 }
 0x31c   :  { %7137 = vmatprep.subr.bf16.mxu0 %v8489_v2  ;;  %7159 = vmatprep.subr.bf16.mxu1 %v8490_v3 }
 0x31f   :  { %7138 = vmatpush3.bf16.msra.mxu0 %v8491_v4  ;;  %7160 = vmatpush3.bf16.msra.mxu1 %v8492_v5 }
 0x320   :  { %7139 = vmatprep.subr.bf16.mxu0 %v8493_v6  ;;  %7161 = vmatprep.subr.bf16.mxu1 %v8494_v7 }
 0x323   :  { %7140 = vmatpush3.bf16.msra.mxu0 %v8495_v8  ;;  %7162 = vmatpush3.bf16.msra.mxu1 %v8496_v9 }
 0x324   :  { %7141 = vmatprep.subr.bf16.mxu0 %v8497_v10  ;;  %7163 = vmatprep.subr.bf16.mxu1 %v8498_v12 }
 0x327   :  { %7142 = vmatpush3.bf16.msra.mxu0 %v8499_v13  ;;  %7164 = vmatpush3.bf16.msra.mxu1 %v8500_v15 }
 0x328   :  { %7143 = vmatprep.subr.bf16.mxu0 %v8501_v11  ;;  %7165 = vmatprep.subr.bf16.mxu1 %v8502_v17 }
 0x32b   :  { %7144 = vmatpush3.bf16.msra.mxu0 %v8503_v14  ;;  %7166 = vmatpush3.bf16.msra.mxu1 %v8504_v19 }
 0x32c   :  { %7145 = vmatprep.subr.bf16.mxu0 %v8505_v20  ;;  %7167 = vmatprep.subr.bf16.mxu1 %v8506_v16 }
 0x32f   :  { %7146 = vmatpush3.bf16.msra.mxu0 %v8507_v22  ;;  %7168 = vmatpush3.bf16.msra.mxu1 %v8508_v23 }
 0x3e5   :  { %v5377_v35 = vpop.f32.mrb[0].mxu0  ;;  %v5910_v30 = vpop.f32.mrb[0].mxu1 }
 0x3e6   :  { %v7175_v37 = vadd.f32 %v5377_v35, %v823_v31  ;;  %v7177_v38 = vadd.f32 %v5910_v30, %v831_v32  ;;  %v5379_v33 = vpop.f32.mrb[1].mxu0  ;;  %v5912_v39 = vpop.f32.mrb[1].mxu1 }
 0x3e7   :  { %v7176_v40 = vadd.f32 %v5379_v33, %v827_v21  ;;  %v7178_v41 = vadd.f32 %v5912_v39, %v835_v34  ;;  %v5381_v36 = vpop.f32.mrb[2].mxu0  ;;  %v5914_v42 = vpop.f32.mrb[2].mxu1 }
 0x3e8   :  { %v5917_v43 = vmax.f32 %v7175_v37, 0.0  ;;  %v5919_v44 = vmax.f32 %v7177_v38, 0.0  ;;  %v5382_v45 = vpop.f32.mrb[3].mxu0  ;;  %v5915_v46 = vpop.f32.mrb[3].mxu1 }
 0x3e9   :  { %v5918_v47 = vmax.f32 %v7176_v40, 0.0  ;;  %v5920_v48 = vmax.f32 %v7178_v41, 0.0 }
 0x3ea   :  { %v5921_v51 = vpack.c.bf16 %v5917_v43, %v5917_v43  ;;  %v5923_v52 = vpack.c.bf16 %v5919_v44, %v5919_v44 }
 0x3eb   :  { %v5922_v49 = vpack.c.bf16 %v5918_v47, %v5918_v47  ;;  %v5924_v50 = vpack.c.bf16 %v5920_v48, %v5920_v48 }
 0x3ed   :  { %6220 = vmatprep.mubr.bf16.mxu0 %v5922_v49  ;;  %6260 = vmatprep.mubr.bf16.mxu1 %v5924_v50 }
 0x3ee   :  { %6221 = vmatmul.mubr.bf16.vlgmr.msra.gmra.mrb[4].mxu0 %v5921_v51  ;;  %6261 = vmatmul.mubr.bf16.vlgmr.msra.gmra.mrb[4].mxu1 %v5923_v52 }
 0x4c1   :  { %v7147_v53 = vpop.f32.mrb[4].mxu0  ;;  %v7169_v54 = vpop.f32.mrb[4].mxu1 }
 0x4c2   :  { %v7148_v56 = vpop.f32.mrb[5].mxu0  ;;  %v7170_v57 = vpop.f32.mrb[5].mxu1 }
 0x4c3   :  { %v7149_v59 = vadd.f32 %v7148_v56, %v7147_v53  ;;  %v7171_v60 = vadd.f32 %v7170_v57, %v7169_v54  ;;  %v7150_v61 = vpop.f32.mrb[6].mxu0  ;;  %v7172_v62 = vpop.f32.mrb[6].mxu1 }
 0x4c4   :  { %v7151_v63 = vpop.f32.mrb[7].mxu0  ;;  %v7173_v0 = vpop.f32.mrb[7].mxu1 }
 0x4c5   :  { %v6223_v1 = vadd.f32 %v7149_v59, %v7098_v55 }
 0x4c7   :  { %v6263_v2 = vadd.f32 %v7171_v60, %v6223_v1 }
 0x4c9   :  { %v6271_v3 = vsel %vm6270_vm1, %v6263_v2, -inf }
 0x4ca   :  { %6272 = vmax.xlane.f32.xlu0 %v6271_v3 }
 0x557   :  { %v6273_v4 = vpop.xlane.xlu0 %6272 }
 0x558   :  { %v6274_v5 = vsub.f32 %v6271_v3, %v6273_v4 }
 0x55a   :  { %v6275_v6 = vmul.f32 1.442695, %v6274_v5 }
 0x55c   :  { %8509 = vpow2.f32 %v6275_v6 }
 0x566   :  { %v8510_v7 = vpop.eup %8509 }
 0x567   :  { %v6277_v8 = vsel %vm6270_vm1, %v8510_v7, 0.0 }
 0x568   :  { %6278 = vadd.xlane.f32.xlu0 %v6277_v8 }
 0x5f5   :  { %v6279_v9 = vpop.xlane.xlu0 %6278 }
 0x5f6   :  { %8511 = vrcp.f32 %v6279_v9 }
 0x600   :  { %v8512_v10 = vpop.eup %8511 }
 0x601   :  { %v6281_v12 = vmul.f32 %v8512_v10, %v6277_v8 }
 0x603   :  { %6282 = vst [vmem:[%s11111_s5] sm:$0xff] %v6281_v12 }

</bundles_post_ra>
